<compile_context>
chip_gen: v7x
topology: tpu7x:2x2x1
jax: 0.10.0
libtpu: 0.0.40
codegen_flags: <defaults>
</compile_context>

<pallas_src>
import functools

import jax
import jax.numpy as jnp
from jax.experimental import pallas as pl
from jax.experimental.pallas import tpu as pltpu  # noqa: F401  (TPU backend)


# ----------------------------------------------------------------------------
# Fused forward kernel.
#
# Row orderings (chosen so pooling == max over leading row blocks and conv2 /
# fc1 only ever need contiguous static slices inside the kernel):
#   cols1 rows : (a, b, s, t, P, Q, n)  with conv1 output coords
#                y1 = 4P + 2s + a,  x1 = 4Q + 2t + b
#                (a, b) = pool1 phase, (s, t) = parity of pooled coords
#                (needed by conv2's taps), (P, Q) in [0, 6).
#   p1         : [s, t, P, Q, n, c] == pooled conv1 output at (2P+s, 2Q+t)
#   conv2 / p2 : rows (r, s2, n) with r = pooled row, s2 = pooled col in [0,4)
# ----------------------------------------------------------------------------
def _lenet_kernel(cols1_ref, w1_ref, b1_ref, w2_ref, b2_ref,
                  wf1_ref, bf1_ref, wf2_ref, bf2_ref, wf3_ref, bf3_ref,
                  o_ref, *, n):
    f32 = jnp.float32

    # ---- conv1 (5x5, 1->6) as one im2col matmul, fused relu ----------------
    h1 = jnp.dot(cols1_ref[...], w1_ref[...], preferred_element_type=f32)
    h1 = jnp.maximum(h1 + b1_ref[...], 0.0)                 # (16*36*n, 6)

    # ---- pool1: max over the 4 leading (a, b) phase blocks -----------------
    h1 = h1.reshape(4, 4 * 36 * n, 6)
    p1 = jnp.maximum(jnp.maximum(h1[0], h1[1]), jnp.maximum(h1[2], h1[3]))
    p1 = p1.reshape(2, 2, 6, 6, n, 6)                       # [s, t, P, Q, n, c]

    # ---- conv2 (5x5, 6->12) + relu + pool2, all in VMEM --------------------
    # Per pool2 phase (a2, b2), accumulate the 25 taps as small dots
    # (sum-of-dots avoids any lane-dim concatenation inside the kernel; at
    # these shapes the matmul is padding-dominated anyway).
    phase_out = []
    for a2 in range(2):
        for b2 in range(2):
            acc = jnp.zeros((16 * n, 12), f32)
            for i in range(5):
                for j in range(5):
                    u, v = a2 + i, b2 + j
                    tap = p1[u % 2, v % 2,
                             u // 2:u // 2 + 4, v // 2:v // 2 + 4]  # (4,4,n,6)
                    acc = acc + jnp.dot(tap.reshape(16 * n, 6),
                                        w2_ref[i * 5 + j],
                                        preferred_element_type=f32)
            phase_out.append(jnp.maximum(acc + b2_ref[...], 0.0))
    p2 = jnp.maximum(jnp.maximum(phase_out[0], phase_out[1]),
                     jnp.maximum(phase_out[2], phase_out[3]))   # (16n, 12)
    p2 = p2.reshape(16, n, 12)                                  # [h*4+w, n, c]

    # ---- fc1 (192->120) as 16 partial dots ---------------------------------
    # PyTorch's NCHW flatten permutation is folded into wf1's packing at init.
    acc = jnp.zeros((n, 120), f32)
    for hw in range(16):
        acc = acc + jnp.dot(p2[hw], wf1_ref[hw], preferred_element_type=f32)
    t = jnp.maximum(acc + bf1_ref[...], 0.0)                    # (n, 120)

    # ---- fc2 (120->60) + relu, fc3 (60->10) --------------------------------
    t = jnp.maximum(jnp.dot(t, wf2_ref[...], preferred_element_type=f32)
                    + bf2_ref[...], 0.0)                        # (n, 60)
    o_ref[...] = (jnp.dot(t, wf3_ref[...], preferred_element_type=f32)
                  + bf3_ref[...]).astype(o_ref.dtype)           # (n, 10)


def _full_vmem_spec(shape):
    # Whole-array block (legal for any shape), single grid point.
    return pl.BlockSpec(shape, lambda *_: (0,) * len(shape))


# ----------------------------------------------------------------------------
# Wrapper: conv1 im2col on the raw input + one fused pallas_call.
# ----------------------------------------------------------------------------
def forward(prepped, x_nchw):
    n = x_nchw.shape[0]
    x = x_nchw.reshape(n, 28, 28).astype(jnp.float32)   # C_in = 1

    # conv1 im2col on the tiny raw input, rows ordered (a, b, s, t, P, Q, n)
    # so that pool1 / conv2 / pool2 / fc1 inside the kernel only need
    # contiguous slices and leading-axis maxes.
    taps = jnp.stack([x[:, i:i + 24, j:j + 24]
                      for i in range(5) for j in range(5)], axis=-1)  # (n,24,24,25)
    t8 = taps.reshape(n, 6, 2, 2, 6, 2, 2, 25)        # [n, P, s, a, Q, t, b, k]
    cols1 = jnp.transpose(t8, (3, 6, 2, 5, 1, 4, 0, 7)).reshape(16 * 36 * n, 25)

    args = (cols1,
            prepped["w1"], prepped["b1"], prepped["w2"], prepped["b2"],
            prepped["wf1"], prepped["bf1"], prepped["wf2"], prepped["bf2"],
            prepped["wf3"], prepped["bf3"])
    return pl.pallas_call(
        functools.partial(_lenet_kernel, n=n),
        out_shape=jax.ShapeDtypeStruct((n, 10), jnp.float32),
        in_specs=[_full_vmem_spec(a.shape) for a in args],
        out_specs=_full_vmem_spec((n, 10)),
    )(*args)


# ----------------------------------------------------------------------------
# Parameters: deterministic synthetic init (PyTorch-style), packed once.
# ----------------------------------------------------------------------------
def init_params(key):
    ks = jax.random.split(key, 10)

    def u(k, shape, fan_in):
        bound = 1.0 / jnp.sqrt(jnp.float32(fan_in))
        return jax.random.uniform(k, shape, jnp.float32, -bound, bound)

    return {
        "conv1_w": u(ks[0], (6, 1, 5, 5), 1 * 5 * 5),
        "conv1_b": u(ks[1], (6,), 1 * 5 * 5),
        "conv2_w": u(ks[2], (12, 6, 5, 5), 6 * 5 * 5),
        "conv2_b": u(ks[3], (12,), 6 * 5 * 5),
        "fc1_w": u(ks[4], (120, 12 * 4 * 4), 12 * 4 * 4),
        "fc1_b": u(ks[5], (120,), 12 * 4 * 4),
        "fc2_w": u(ks[6], (60, 120), 120),
        "fc2_b": u(ks[7], (60,), 120),
        "fc3_w": u(ks[8], (10, 60), 60),
        "fc3_b": u(ks[9], (10,), 60),
    }


def prepare_params(p):
    """One-time weight packing / transposition (kept out of the hot path)."""
    return {
        # conv1: (6,1,5,5) -> (25, 6); row k = i*5 + j
        "w1": p["conv1_w"].reshape(6, 25).T,
        "b1": p["conv1_b"].reshape(1, 6),
        # conv2: (12,6,5,5) -> (25, 6, 12); w2[i*5+j, c, d] = conv2_w[d, c, i, j]
        "w2": jnp.transpose(p["conv2_w"], (2, 3, 1, 0)).reshape(25, 6, 12),
        "b2": p["conv2_b"].reshape(1, 12),
        # fc1: fold PyTorch's NCHW flatten (idx = d*16 + h*4 + w) into packing:
        # wf1[h*4+w, d, f] = fc1_w[f, d*16 + h*4 + w]
        "wf1": jnp.transpose(p["fc1_w"].reshape(120, 12, 16), (2, 1, 0)),
        "bf1": p["fc1_b"].reshape(1, 120),
        "wf2": p["fc2_w"].T,
        "bf2": p["fc2_b"].reshape(1, 60),
        "wf3": p["fc3_w"].T,
        "bf3": p["fc3_b"].reshape(1, 10),
    }


# ----------------------------------------------------------------------------
# Pure-JAX reference (mirrors Network.forward) for a numerical sanity check.
# ----------------------------------------------------------------------------
def reference_forward(params, x_nchw):
    def conv(x, w, b):
        y = jax.lax.conv_general_dilated(
            x, w, window_strides=(1, 1), padding="VALID",
            dimension_numbers=("NCHW", "OIHW", "NCHW"))
        return y + b.reshape(1, -1, 1, 1)

    def pool(x):
        return jnp.maximum(
            jnp.maximum(x[:, :, 0::2, 0::2], x[:, :, 0::2, 1::2]),
            jnp.maximum(x[:, :, 1::2, 0::2], x[:, :, 1::2, 1::2]))

    t = x_nchw.astype(jnp.float32)
    t = pool(jnp.maximum(conv(t, params["conv1_w"], params["conv1_b"]), 0.0))
    t = pool(jnp.maximum(conv(t, params["conv2_w"], params["conv2_b"]), 0.0))
    t = t.reshape(t.shape[0], 12 * 4 * 4)
    t = jnp.maximum(t @ params["fc1_w"].T + params["fc1_b"], 0.0)
    t = jnp.maximum(t @ params["fc2_w"].T + params["fc2_b"], 0.0)
    return t @ params["fc3_w"].T + params["fc3_b"]


if __name__ == "__main__":
    key = jax.random.PRNGKey(0)
    k_in, k_par = jax.random.split(key)
    params = init_params(k_par)
    prepped = prepare_params(params)

    # (N, C, H, W) = (2, 1, 28, 28): smallest shape consistent with
    # fc1.in_features = 12 * 4 * 4 (MNIST-sized input).
    x = jax.random.normal(k_in, (2, 1, 28, 28), jnp.float32)

    out = jax.jit(forward)(prepped, x)
    out = jax.block_until_ready(out)
    assert out.shape == (2, 10), out.shape

    ref = jax.block_until_ready(reference_forward(params, x))
    assert jnp.allclose(out, ref, rtol=1e-3, atol=1e-3), (
        float(jnp.max(jnp.abs(out - ref))))

    print("KERNEL_OK")
</pallas_src>

<mosaic_0001>
module attributes {stable_mosaic.version = 11 : i64} {
  func.func @_lenet_kernel(%arg0: memref<1152x25xf32, #tpu.memory_space<vmem>>, %arg1: memref<25x6xf32, #tpu.memory_space<vmem>>, %arg2: memref<1x6xf32, #tpu.memory_space<vmem>>, %arg3: memref<25x6x12xf32, #tpu.memory_space<vmem>>, %arg4: memref<1x12xf32, #tpu.memory_space<vmem>>, %arg5: memref<16x12x120xf32, #tpu.memory_space<vmem>>, %arg6: memref<1x120xf32, #tpu.memory_space<vmem>>, %arg7: memref<120x60xf32, #tpu.memory_space<vmem>>, %arg8: memref<1x60xf32, #tpu.memory_space<vmem>>, %arg9: memref<60x10xf32, #tpu.memory_space<vmem>>, %arg10: memref<1x10xf32, #tpu.memory_space<vmem>>, %arg11: memref<2x10xf32, #tpu.memory_space<vmem>>) attributes {dimension_semantics = [], scalar_prefetch = 0 : i64, scratch_operands = 0 : i64, tpu.core_type = #tpu.core_type<tc>} {
    %c0 = arith.constant 0 : index
    %c0_0 = arith.constant 0 : index
    %0 = vector.load %arg0[%c0, %c0_0] : memref<1152x25xf32, #tpu.memory_space<vmem>>, vector<1152x25xf32>
    %c0_1 = arith.constant 0 : index
    %c0_2 = arith.constant 0 : index
    %1 = vector.load %arg1[%c0_1, %c0_2] : memref<25x6xf32, #tpu.memory_space<vmem>>, vector<25x6xf32>
    %cst = arith.constant dense<0.000000e+00> : vector<1152x6xf32>
    %2 = tpu.matmul %0, %1, %cst {dimension_numbers = #tpu.dot_dimension_numbers<[1], [0], [0], [1], [0, 0, 1, 1], [], []>} : vector<1152x25xf32>, vector<25x6xf32>, vector<1152x6xf32> -> vector<1152x6xf32>
    %c0_3 = arith.constant 0 : index
    %c0_4 = arith.constant 0 : index
    %3 = vector.load %arg2[%c0_3, %c0_4] : memref<1x6xf32, #tpu.memory_space<vmem>>, vector<1x6xf32>
    %4 = vector.broadcast %3 : vector<1x6xf32> to vector<1152x6xf32>
    %5 = arith.addf %2, %4 : vector<1152x6xf32>
    %cst_5 = arith.constant 0.000000e+00 : f32
    %6 = vector.broadcast %cst_5 : f32 to vector<1152x6xf32>
    %7 = arith.maximumf %5, %6 : vector<1152x6xf32>
    %8 = vector.shape_cast %7 : vector<1152x6xf32> to vector<4x288x6xf32>
    %9 = vector.extract_strided_slice %8 {offsets = [0, 0, 0], sizes = [1, 288, 6], strides = [1, 1, 1]} : vector<4x288x6xf32> to vector<1x288x6xf32>
    %10 = vector.shape_cast %9 : vector<1x288x6xf32> to vector<288x6xf32>
    %11 = vector.extract_strided_slice %8 {offsets = [1, 0, 0], sizes = [1, 288, 6], strides = [1, 1, 1]} : vector<4x288x6xf32> to vector<1x288x6xf32>
    %12 = vector.shape_cast %11 : vector<1x288x6xf32> to vector<288x6xf32>
    %13 = arith.maximumf %10, %12 : vector<288x6xf32>
    %14 = vector.extract_strided_slice %8 {offsets = [2, 0, 0], sizes = [1, 288, 6], strides = [1, 1, 1]} : vector<4x288x6xf32> to vector<1x288x6xf32>
    %15 = vector.shape_cast %14 : vector<1x288x6xf32> to vector<288x6xf32>
    %16 = vector.extract_strided_slice %8 {offsets = [3, 0, 0], sizes = [1, 288, 6], strides = [1, 1, 1]} : vector<4x288x6xf32> to vector<1x288x6xf32>
    %17 = vector.shape_cast %16 : vector<1x288x6xf32> to vector<288x6xf32>
    %18 = arith.maximumf %15, %17 : vector<288x6xf32>
    %19 = arith.maximumf %13, %18 : vector<288x6xf32>
    %20 = vector.shape_cast %19 : vector<288x6xf32> to vector<2x2x6x6x2x6xf32>
    %cst_6 = arith.constant 0.000000e+00 : f32
    %21 = vector.broadcast %cst_6 : f32 to vector<32x12xf32>
    %22 = vector.extract_strided_slice %20 {offsets = [0, 0, 0, 0, 0, 0], sizes = [1, 1, 4, 4, 2, 6], strides = [1, 1, 1, 1, 1, 1]} : vector<2x2x6x6x2x6xf32> to vector<1x1x4x4x2x6xf32>
    %23 = vector.shape_cast %22 : vector<1x1x4x4x2x6xf32> to vector<4x4x2x6xf32>
    %24 = vector.shape_cast %23 : vector<4x4x2x6xf32> to vector<32x6xf32>
    %c0_7 = arith.constant 0 : index
    %c0_8 = arith.constant 0 : index
    %c0_9 = arith.constant 0 : index
    %25 = vector.load %arg3[%c0_7, %c0_8, %c0_9] : memref<25x6x12xf32, #tpu.memory_space<vmem>>, vector<1x6x12xf32>
    %26 = vector.shape_cast %25 : vector<1x6x12xf32> to vector<6x12xf32>
    %cst_10 = arith.constant dense<0.000000e+00> : vector<32x12xf32>
    %27 = tpu.matmul %24, %26, %cst_10 {dimension_numbers = #tpu.dot_dimension_numbers<[1], [0], [0], [1], [0, 0, 1, 1], [], []>} : vector<32x6xf32>, vector<6x12xf32>, vector<32x12xf32> -> vector<32x12xf32>
    %28 = arith.addf %21, %27 : vector<32x12xf32>
    %29 = vector.extract_strided_slice %20 {offsets = [0, 1, 0, 0, 0, 0], sizes = [1, 1, 4, 4, 2, 6], strides = [1, 1, 1, 1, 1, 1]} : vector<2x2x6x6x2x6xf32> to vector<1x1x4x4x2x6xf32>
    %30 = vector.shape_cast %29 : vector<1x1x4x4x2x6xf32> to vector<4x4x2x6xf32>
    %31 = vector.shape_cast %30 : vector<4x4x2x6xf32> to vector<32x6xf32>
    %c1 = arith.constant 1 : index
    %c0_11 = arith.constant 0 : index
    %c0_12 = arith.constant 0 : index
    %32 = vector.load %arg3[%c1, %c0_11, %c0_12] : memref<25x6x12xf32, #tpu.memory_space<vmem>>, vector<1x6x12xf32>
    %33 = vector.shape_cast %32 : vector<1x6x12xf32> to vector<6x12xf32>
    %cst_13 = arith.constant dense<0.000000e+00> : vector<32x12xf32>
    %34 = tpu.matmul %31, %33, %cst_13 {dimension_numbers = #tpu.dot_dimension_numbers<[1], [0], [0], [1], [0, 0, 1, 1], [], []>} : vector<32x6xf32>, vector<6x12xf32>, vector<32x12xf32> -> vector<32x12xf32>
    %35 = arith.addf %28, %34 : vector<32x12xf32>
    %36 = vector.extract_strided_slice %20 {offsets = [0, 0, 0, 1, 0, 0], sizes = [1, 1, 4, 4, 2, 6], strides = [1, 1, 1, 1, 1, 1]} : vector<2x2x6x6x2x6xf32> to vector<1x1x4x4x2x6xf32>
    %37 = vector.shape_cast %36 : vector<1x1x4x4x2x6xf32> to vector<4x4x2x6xf32>
    %38 = vector.shape_cast %37 : vector<4x4x2x6xf32> to vector<32x6xf32>
    %c2 = arith.constant 2 : index
    %c0_14 = arith.constant 0 : index
    %c0_15 = arith.constant 0 : index
    %39 = vector.load %arg3[%c2, %c0_14, %c0_15] : memref<25x6x12xf32, #tpu.memory_space<vmem>>, vector<1x6x12xf32>
    %40 = vector.shape_cast %39 : vector<1x6x12xf32> to vector<6x12xf32>
    %cst_16 = arith.constant dense<0.000000e+00> : vector<32x12xf32>
    %41 = tpu.matmul %38, %40, %cst_16 {dimension_numbers = #tpu.dot_dimension_numbers<[1], [0], [0], [1], [0, 0, 1, 1], [], []>} : vector<32x6xf32>, vector<6x12xf32>, vector<32x12xf32> -> vector<32x12xf32>
    %42 = arith.addf %35, %41 : vector<32x12xf32>
    %43 = vector.extract_strided_slice %20 {offsets = [0, 1, 0, 1, 0, 0], sizes = [1, 1, 4, 4, 2, 6], strides = [1, 1, 1, 1, 1, 1]} : vector<2x2x6x6x2x6xf32> to vector<1x1x4x4x2x6xf32>
    %44 = vector.shape_cast %43 : vector<1x1x4x4x2x6xf32> to vector<4x4x2x6xf32>
    %45 = vector.shape_cast %44 : vector<4x4x2x6xf32> to vector<32x6xf32>
    %c3 = arith.constant 3 : index
    %c0_17 = arith.constant 0 : index
    %c0_18 = arith.constant 0 : index
    %46 = vector.load %arg3[%c3, %c0_17, %c0_18] : memref<25x6x12xf32, #tpu.memory_space<vmem>>, vector<1x6x12xf32>
    %47 = vector.shape_cast %46 : vector<1x6x12xf32> to vector<6x12xf32>
    %cst_19 = arith.constant dense<0.000000e+00> : vector<32x12xf32>
    %48 = tpu.matmul %45, %47, %cst_19 {dimension_numbers = #tpu.dot_dimension_numbers<[1], [0], [0], [1], [0, 0, 1, 1], [], []>} : vector<32x6xf32>, vector<6x12xf32>, vector<32x12xf32> -> vector<32x12xf32>
    %49 = arith.addf %42, %48 : vector<32x12xf32>
    %50 = vector.extract_strided_slice %20 {offsets = [0, 0, 0, 2, 0, 0], sizes = [1, 1, 4, 4, 2, 6], strides = [1, 1, 1, 1, 1, 1]} : vector<2x2x6x6x2x6xf32> to vector<1x1x4x4x2x6xf32>
    %51 = vector.shape_cast %50 : vector<1x1x4x4x2x6xf32> to vector<4x4x2x6xf32>
    %52 = vector.shape_cast %51 : vector<4x4x2x6xf32> to vector<32x6xf32>
    %c4 = arith.constant 4 : index
    %c0_20 = arith.constant 0 : index
    %c0_21 = arith.constant 0 : index
    %53 = vector.load %arg3[%c4, %c0_20, %c0_21] : memref<25x6x12xf32, #tpu.memory_space<vmem>>, vector<1x6x12xf32>
    %54 = vector.shape_cast %53 : vector<1x6x12xf32> to vector<6x12xf32>
    %cst_22 = arith.constant dense<0.000000e+00> : vector<32x12xf32>
    %55 = tpu.matmul %52, %54, %cst_22 {dimension_numbers = #tpu.dot_dimension_numbers<[1], [0], [0], [1], [0, 0, 1, 1], [], []>} : vector<32x6xf32>, vector<6x12xf32>, vector<32x12xf32> -> vector<32x12xf32>
    %56 = arith.addf %49, %55 : vector<32x12xf32>
    %57 = vector.extract_strided_slice %20 {offsets = [1, 0, 0, 0, 0, 0], sizes = [1, 1, 4, 4, 2, 6], strides = [1, 1, 1, 1, 1, 1]} : vector<2x2x6x6x2x6xf32> to vector<1x1x4x4x2x6xf32>
    %58 = vector.shape_cast %57 : vector<1x1x4x4x2x6xf32> to vector<4x4x2x6xf32>
    %59 = vector.shape_cast %58 : vector<4x4x2x6xf32> to vector<32x6xf32>
    %c5 = arith.constant 5 : index
    %c0_23 = arith.constant 0 : index
    %c0_24 = arith.constant 0 : index
    %60 = vector.load %arg3[%c5, %c0_23, %c0_24] : memref<25x6x12xf32, #tpu.memory_space<vmem>>, vector<1x6x12xf32>
    %61 = vector.shape_cast %60 : vector<1x6x12xf32> to vector<6x12xf32>
    %cst_25 = arith.constant dense<0.000000e+00> : vector<32x12xf32>
    %62 = tpu.matmul %59, %61, %cst_25 {dimension_numbers = #tpu.dot_dimension_numbers<[1], [0], [0], [1], [0, 0, 1, 1], [], []>} : vector<32x6xf32>, vector<6x12xf32>, vector<32x12xf32> -> vector<32x12xf32>
    %63 = arith.addf %56, %62 : vector<32x12xf32>
    %64 = vector.extract_strided_slice %20 {offsets = [1, 1, 0, 0, 0, 0], sizes = [1, 1, 4, 4, 2, 6], strides = [1, 1, 1, 1, 1, 1]} : vector<2x2x6x6x2x6xf32> to vector<1x1x4x4x2x6xf32>
    %65 = vector.shape_cast %64 : vector<1x1x4x4x2x6xf32> to vector<4x4x2x6xf32>
    %66 = vector.shape_cast %65 : vector<4x4x2x6xf32> to vector<32x6xf32>
    %c6 = arith.constant 6 : index
    %c0_26 = arith.constant 0 : index
    %c0_27 = arith.constant 0 : index
    %67 = vector.load %arg3[%c6, %c0_26, %c0_27] : memref<25x6x12xf32, #tpu.memory_space<vmem>>, vector<1x6x12xf32>
    %68 = vector.shape_cast %67 : vector<1x6x12xf32> to vector<6x12xf32>
    %cst_28 = arith.constant dense<0.000000e+00> : vector<32x12xf32>
    %69 = tpu.matmul %66, %68, %cst_28 {dimension_numbers = #tpu.dot_dimension_numbers<[1], [0], [0], [1], [0, 0, 1, 1], [], []>} : vector<32x6xf32>, vector<6x12xf32>, vector<32x12xf32> -> vector<32x12xf32>
    %70 = arith.addf %63, %69 : vector<32x12xf32>
    %71 = vector.extract_strided_slice %20 {offsets = [1, 0, 0, 1, 0, 0], sizes = [1, 1, 4, 4, 2, 6], strides = [1, 1, 1, 1, 1, 1]} : vector<2x2x6x6x2x6xf32> to vector<1x1x4x4x2x6xf32>
    %72 = vector.shape_cast %71 : vector<1x1x4x4x2x6xf32> to vector<4x4x2x6xf32>
    %73 = vector.shape_cast %72 : vector<4x4x2x6xf32> to vector<32x6xf32>
    %c7 = arith.constant 7 : index
    %c0_29 = arith.constant 0 : index
    %c0_30 = arith.constant 0 : index
    %74 = vector.load %arg3[%c7, %c0_29, %c0_30] : memref<25x6x12xf32, #tpu.memory_space<vmem>>, vector<1x6x12xf32>
    %75 = vector.shape_cast %74 : vector<1x6x12xf32> to vector<6x12xf32>
    %cst_31 = arith.constant dense<0.000000e+00> : vector<32x12xf32>
    %76 = tpu.matmul %73, %75, %cst_31 {dimension_numbers = #tpu.dot_dimension_numbers<[1], [0], [0], [1], [0, 0, 1, 1], [], []>} : vector<32x6xf32>, vector<6x12xf32>, vector<32x12xf32> -> vector<32x12xf32>
    %77 = arith.addf %70, %76 : vector<32x12xf32>
    %78 = vector.extract_strided_slice %20 {offsets = [1, 1, 0, 1, 0, 0], sizes = [1, 1, 4, 4, 2, 6], strides = [1, 1, 1, 1, 1, 1]} : vector<2x2x6x6x2x6xf32> to vector<1x1x4x4x2x6xf32>
    %79 = vector.shape_cast %78 : vector<1x1x4x4x2x6xf32> to vector<4x4x2x6xf32>
    %80 = vector.shape_cast %79 : vector<4x4x2x6xf32> to vector<32x6xf32>
    %c8 = arith.constant 8 : index
    %c0_32 = arith.constant 0 : index
    %c0_33 = arith.constant 0 : index
    %81 = vector.load %arg3[%c8, %c0_32, %c0_33] : memref<25x6x12xf32, #tpu.memory_space<vmem>>, vector<1x6x12xf32>
    %82 = vector.shape_cast %81 : vector<1x6x12xf32> to vector<6x12xf32>
    %cst_34 = arith.constant dense<0.000000e+00> : vector<32x12xf32>
    %83 = tpu.matmul %80, %82, %cst_34 {dimension_numbers = #tpu.dot_dimension_numbers<[1], [0], [0], [1], [0, 0, 1, 1], [], []>} : vector<32x6xf32>, vector<6x12xf32>, vector<32x12xf32> -> vector<32x12xf32>
    %84 = arith.addf %77, %83 : vector<32x12xf32>
    %85 = vector.extract_strided_slice %20 {offsets = [1, 0, 0, 2, 0, 0], sizes = [1, 1, 4, 4, 2, 6], strides = [1, 1, 1, 1, 1, 1]} : vector<2x2x6x6x2x6xf32> to vector<1x1x4x4x2x6xf32>
    %86 = vector.shape_cast %85 : vector<1x1x4x4x2x6xf32> to vector<4x4x2x6xf32>
    %87 = vector.shape_cast %86 : vector<4x4x2x6xf32> to vector<32x6xf32>
    %c9 = arith.constant 9 : index
    %c0_35 = arith.constant 0 : index
    %c0_36 = arith.constant 0 : index
    %88 = vector.load %arg3[%c9, %c0_35, %c0_36] : memref<25x6x12xf32, #tpu.memory_space<vmem>>, vector<1x6x12xf32>
    %89 = vector.shape_cast %88 : vector<1x6x12xf32> to vector<6x12xf32>
    %cst_37 = arith.constant dense<0.000000e+00> : vector<32x12xf32>
    %90 = tpu.matmul %87, %89, %cst_37 {dimension_numbers = #tpu.dot_dimension_numbers<[1], [0], [0], [1], [0, 0, 1, 1], [], []>} : vector<32x6xf32>, vector<6x12xf32>, vector<32x12xf32> -> vector<32x12xf32>
    %91 = arith.addf %84, %90 : vector<32x12xf32>
    %92 = vector.extract_strided_slice %20 {offsets = [0, 0, 1, 0, 0, 0], sizes = [1, 1, 4, 4, 2, 6], strides = [1, 1, 1, 1, 1, 1]} : vector<2x2x6x6x2x6xf32> to vector<1x1x4x4x2x6xf32>
    %93 = vector.shape_cast %92 : vector<1x1x4x4x2x6xf32> to vector<4x4x2x6xf32>
    %94 = vector.shape_cast %93 : vector<4x4x2x6xf32> to vector<32x6xf32>
    %c10 = arith.constant 10 : index
    %c0_38 = arith.constant 0 : index
    %c0_39 = arith.constant 0 : index
    %95 = vector.load %arg3[%c10, %c0_38, %c0_39] : memref<25x6x12xf32, #tpu.memory_space<vmem>>, vector<1x6x12xf32>
    %96 = vector.shape_cast %95 : vector<1x6x12xf32> to vector<6x12xf32>
    %cst_40 = arith.constant dense<0.000000e+00> : vector<32x12xf32>
    %97 = tpu.matmul %94, %96, %cst_40 {dimension_numbers = #tpu.dot_dimension_numbers<[1], [0], [0], [1], [0, 0, 1, 1], [], []>} : vector<32x6xf32>, vector<6x12xf32>, vector<32x12xf32> -> vector<32x12xf32>
    %98 = arith.addf %91, %97 : vector<32x12xf32>
    %99 = vector.extract_strided_slice %20 {offsets = [0, 1, 1, 0, 0, 0], sizes = [1, 1, 4, 4, 2, 6], strides = [1, 1, 1, 1, 1, 1]} : vector<2x2x6x6x2x6xf32> to vector<1x1x4x4x2x6xf32>
    %100 = vector.shape_cast %99 : vector<1x1x4x4x2x6xf32> to vector<4x4x2x6xf32>
    %101 = vector.shape_cast %100 : vector<4x4x2x6xf32> to vector<32x6xf32>
    %c11 = arith.constant 11 : index
    %c0_41 = arith.constant 0 : index
    %c0_42 = arith.constant 0 : index
    %102 = vector.load %arg3[%c11, %c0_41, %c0_42] : memref<25x6x12xf32, #tpu.memory_space<vmem>>, vector<1x6x12xf32>
    %103 = vector.shape_cast %102 : vector<1x6x12xf32> to vector<6x12xf32>
    %cst_43 = arith.constant dense<0.000000e+00> : vector<32x12xf32>
    %104 = tpu.matmul %101, %103, %cst_43 {dimension_numbers = #tpu.dot_dimension_numbers<[1], [0], [0], [1], [0, 0, 1, 1], [], []>} : vector<32x6xf32>, vector<6x12xf32>, vector<32x12xf32> -> vector<32x12xf32>
    %105 = arith.addf %98, %104 : vector<32x12xf32>
    %106 = vector.extract_strided_slice %20 {offsets = [0, 0, 1, 1, 0, 0], sizes = [1, 1, 4, 4, 2, 6], strides = [1, 1, 1, 1, 1, 1]} : vector<2x2x6x6x2x6xf32> to vector<1x1x4x4x2x6xf32>
    %107 = vector.shape_cast %106 : vector<1x1x4x4x2x6xf32> to vector<4x4x2x6xf32>
    %108 = vector.shape_cast %107 : vector<4x4x2x6xf32> to vector<32x6xf32>
    %c12 = arith.constant 12 : index
    %c0_44 = arith.constant 0 : index
    %c0_45 = arith.constant 0 : index
    %109 = vector.load %arg3[%c12, %c0_44, %c0_45] : memref<25x6x12xf32, #tpu.memory_space<vmem>>, vector<1x6x12xf32>
    %110 = vector.shape_cast %109 : vector<1x6x12xf32> to vector<6x12xf32>
    %cst_46 = arith.constant dense<0.000000e+00> : vector<32x12xf32>
    %111 = tpu.matmul %108, %110, %cst_46 {dimension_numbers = #tpu.dot_dimension_numbers<[1], [0], [0], [1], [0, 0, 1, 1], [], []>} : vector<32x6xf32>, vector<6x12xf32>, vector<32x12xf32> -> vector<32x12xf32>
    %112 = arith.addf %105, %111 : vector<32x12xf32>
    %113 = vector.extract_strided_slice %20 {offsets = [0, 1, 1, 1, 0, 0], sizes = [1, 1, 4, 4, 2, 6], strides = [1, 1, 1, 1, 1, 1]} : vector<2x2x6x6x2x6xf32> to vector<1x1x4x4x2x6xf32>
    %114 = vector.shape_cast %113 : vector<1x1x4x4x2x6xf32> to vector<4x4x2x6xf32>
    %115 = vector.shape_cast %114 : vector<4x4x2x6xf32> to vector<32x6xf32>
    %c13 = arith.constant 13 : index
    %c0_47 = arith.constant 0 : index
    %c0_48 = arith.constant 0 : index
    %116 = vector.load %arg3[%c13, %c0_47, %c0_48] : memref<25x6x12xf32, #tpu.memory_space<vmem>>, vector<1x6x12xf32>
    %117 = vector.shape_cast %116 : vector<1x6x12xf32> to vector<6x12xf32>
    %cst_49 = arith.constant dense<0.000000e+00> : vector<32x12xf32>
    %118 = tpu.matmul %115, %117, %cst_49 {dimension_numbers = #tpu.dot_dimension_numbers<[1], [0], [0], [1], [0, 0, 1, 1], [], []>} : vector<32x6xf32>, vector<6x12xf32>, vector<32x12xf32> -> vector<32x12xf32>
    %119 = arith.addf %112, %118 : vector<32x12xf32>
    %120 = vector.extract_strided_slice %20 {offsets = [0, 0, 1, 2, 0, 0], sizes = [1, 1, 4, 4, 2, 6], strides = [1, 1, 1, 1, 1, 1]} : vector<2x2x6x6x2x6xf32> to vector<1x1x4x4x2x6xf32>
    %121 = vector.shape_cast %120 : vector<1x1x4x4x2x6xf32> to vector<4x4x2x6xf32>
    %122 = vector.shape_cast %121 : vector<4x4x2x6xf32> to vector<32x6xf32>
    %c14 = arith.constant 14 : index
    %c0_50 = arith.constant 0 : index
    %c0_51 = arith.constant 0 : index
    %123 = vector.load %arg3[%c14, %c0_50, %c0_51] : memref<25x6x12xf32, #tpu.memory_space<vmem>>, vector<1x6x12xf32>
    %124 = vector.shape_cast %123 : vector<1x6x12xf32> to vector<6x12xf32>
    %cst_52 = arith.constant dense<0.000000e+00> : vector<32x12xf32>
    %125 = tpu.matmul %122, %124, %cst_52 {dimension_numbers = #tpu.dot_dimension_numbers<[1], [0], [0], [1], [0, 0, 1, 1], [], []>} : vector<32x6xf32>, vector<6x12xf32>, vector<32x12xf32> -> vector<32x12xf32>
    %126 = arith.addf %119, %125 : vector<32x12xf32>
    %127 = vector.extract_strided_slice %20 {offsets = [1, 0, 1, 0, 0, 0], sizes = [1, 1, 4, 4, 2, 6], strides = [1, 1, 1, 1, 1, 1]} : vector<2x2x6x6x2x6xf32> to vector<1x1x4x4x2x6xf32>
    %128 = vector.shape_cast %127 : vector<1x1x4x4x2x6xf32> to vector<4x4x2x6xf32>
    %129 = vector.shape_cast %128 : vector<4x4x2x6xf32> to vector<32x6xf32>
    %c15 = arith.constant 15 : index
    %c0_53 = arith.constant 0 : index
    %c0_54 = arith.constant 0 : index
    %130 = vector.load %arg3[%c15, %c0_53, %c0_54] : memref<25x6x12xf32, #tpu.memory_space<vmem>>, vector<1x6x12xf32>
    %131 = vector.shape_cast %130 : vector<1x6x12xf32> to vector<6x12xf32>
    %cst_55 = arith.constant dense<0.000000e+00> : vector<32x12xf32>
    %132 = tpu.matmul %129, %131, %cst_55 {dimension_numbers = #tpu.dot_dimension_numbers<[1], [0], [0], [1], [0, 0, 1, 1], [], []>} : vector<32x6xf32>, vector<6x12xf32>, vector<32x12xf32> -> vector<32x12xf32>
    %133 = arith.addf %126, %132 : vector<32x12xf32>
    %134 = vector.extract_strided_slice %20 {offsets = [1, 1, 1, 0, 0, 0], sizes = [1, 1, 4, 4, 2, 6], strides = [1, 1, 1, 1, 1, 1]} : vector<2x2x6x6x2x6xf32> to vector<1x1x4x4x2x6xf32>
    %135 = vector.shape_cast %134 : vector<1x1x4x4x2x6xf32> to vector<4x4x2x6xf32>
    %136 = vector.shape_cast %135 : vector<4x4x2x6xf32> to vector<32x6xf32>
    %c16 = arith.constant 16 : index
    %c0_56 = arith.constant 0 : index
    %c0_57 = arith.constant 0 : index
    %137 = vector.load %arg3[%c16, %c0_56, %c0_57] : memref<25x6x12xf32, #tpu.memory_space<vmem>>, vector<1x6x12xf32>
    %138 = vector.shape_cast %137 : vector<1x6x12xf32> to vector<6x12xf32>
    %cst_58 = arith.constant dense<0.000000e+00> : vector<32x12xf32>
    %139 = tpu.matmul %136, %138, %cst_58 {dimension_numbers = #tpu.dot_dimension_numbers<[1], [0], [0], [1], [0, 0, 1, 1], [], []>} : vector<32x6xf32>, vector<6x12xf32>, vector<32x12xf32> -> vector<32x12xf32>
    %140 = arith.addf %133, %139 : vector<32x12xf32>
    %141 = vector.extract_strided_slice %20 {offsets = [1, 0, 1, 1, 0, 0], sizes = [1, 1, 4, 4, 2, 6], strides = [1, 1, 1, 1, 1, 1]} : vector<2x2x6x6x2x6xf32> to vector<1x1x4x4x2x6xf32>
    %142 = vector.shape_cast %141 : vector<1x1x4x4x2x6xf32> to vector<4x4x2x6xf32>
    %143 = vector.shape_cast %142 : vector<4x4x2x6xf32> to vector<32x6xf32>
    %c17 = arith.constant 17 : index
    %c0_59 = arith.constant 0 : index
    %c0_60 = arith.constant 0 : index
    %144 = vector.load %arg3[%c17, %c0_59, %c0_60] : memref<25x6x12xf32, #tpu.memory_space<vmem>>, vector<1x6x12xf32>
    %145 = vector.shape_cast %144 : vector<1x6x12xf32> to vector<6x12xf32>
    %cst_61 = arith.constant dense<0.000000e+00> : vector<32x12xf32>
    %146 = tpu.matmul %143, %145, %cst_61 {dimension_numbers = #tpu.dot_dimension_numbers<[1], [0], [0], [1], [0, 0, 1, 1], [], []>} : vector<32x6xf32>, vector<6x12xf32>, vector<32x12xf32> -> vector<32x12xf32>
    %147 = arith.addf %140, %146 : vector<32x12xf32>
    %148 = vector.extract_strided_slice %20 {offsets = [1, 1, 1, 1, 0, 0], sizes = [1, 1, 4, 4, 2, 6], strides = [1, 1, 1, 1, 1, 1]} : vector<2x2x6x6x2x6xf32> to vector<1x1x4x4x2x6xf32>
    %149 = vector.shape_cast %148 : vector<1x1x4x4x2x6xf32> to vector<4x4x2x6xf32>
    %150 = vector.shape_cast %149 : vector<4x4x2x6xf32> to vector<32x6xf32>
    %c18 = arith.constant 18 : index
    %c0_62 = arith.constant 0 : index
    %c0_63 = arith.constant 0 : index
    %151 = vector.load %arg3[%c18, %c0_62, %c0_63] : memref<25x6x12xf32, #tpu.memory_space<vmem>>, vector<1x6x12xf32>
    %152 = vector.shape_cast %151 : vector<1x6x12xf32> to vector<6x12xf32>
    %cst_64 = arith.constant dense<0.000000e+00> : vector<32x12xf32>
    %153 = tpu.matmul %150, %152, %cst_64 {dimension_numbers = #tpu.dot_dimension_numbers<[1], [0], [0], [1], [0, 0, 1, 1], [], []>} : vector<32x6xf32>, vector<6x12xf32>, vector<32x12xf32> -> vector<32x12xf32>
    %154 = arith.addf %147, %153 : vector<32x12xf32>
    %155 = vector.extract_strided_slice %20 {offsets = [1, 0, 1, 2, 0, 0], sizes = [1, 1, 4, 4, 2, 6], strides = [1, 1, 1, 1, 1, 1]} : vector<2x2x6x6x2x6xf32> to vector<1x1x4x4x2x6xf32>
    %156 = vector.shape_cast %155 : vector<1x1x4x4x2x6xf32> to vector<4x4x2x6xf32>
    %157 = vector.shape_cast %156 : vector<4x4x2x6xf32> to vector<32x6xf32>
    %c19 = arith.constant 19 : index
    %c0_65 = arith.constant 0 : index
    %c0_66 = arith.constant 0 : index
    %158 = vector.load %arg3[%c19, %c0_65, %c0_66] : memref<25x6x12xf32, #tpu.memory_space<vmem>>, vector<1x6x12xf32>
    %159 = vector.shape_cast %158 : vector<1x6x12xf32> to vector<6x12xf32>
    %cst_67 = arith.constant dense<0.000000e+00> : vector<32x12xf32>
    %160 = tpu.matmul %157, %159, %cst_67 {dimension_numbers = #tpu.dot_dimension_numbers<[1], [0], [0], [1], [0, 0, 1, 1], [], []>} : vector<32x6xf32>, vector<6x12xf32>, vector<32x12xf32> -> vector<32x12xf32>
    %161 = arith.addf %154, %160 : vector<32x12xf32>
    %162 = vector.extract_strided_slice %20 {offsets = [0, 0, 2, 0, 0, 0], sizes = [1, 1, 4, 4, 2, 6], strides = [1, 1, 1, 1, 1, 1]} : vector<2x2x6x6x2x6xf32> to vector<1x1x4x4x2x6xf32>
    %163 = vector.shape_cast %162 : vector<1x1x4x4x2x6xf32> to vector<4x4x2x6xf32>
    %164 = vector.shape_cast %163 : vector<4x4x2x6xf32> to vector<32x6xf32>
    %c20 = arith.constant 20 : index
    %c0_68 = arith.constant 0 : index
    %c0_69 = arith.constant 0 : index
    %165 = vector.load %arg3[%c20, %c0_68, %c0_69] : memref<25x6x12xf32, #tpu.memory_space<vmem>>, vector<1x6x12xf32>
    %166 = vector.shape_cast %165 : vector<1x6x12xf32> to vector<6x12xf32>
    %cst_70 = arith.constant dense<0.000000e+00> : vector<32x12xf32>
    %167 = tpu.matmul %164, %166, %cst_70 {dimension_numbers = #tpu.dot_dimension_numbers<[1], [0], [0], [1], [0, 0, 1, 1], [], []>} : vector<32x6xf32>, vector<6x12xf32>, vector<32x12xf32> -> vector<32x12xf32>
    %168 = arith.addf %161, %167 : vector<32x12xf32>
    %169 = vector.extract_strided_slice %20 {offsets = [0, 1, 2, 0, 0, 0], sizes = [1, 1, 4, 4, 2, 6], strides = [1, 1, 1, 1, 1, 1]} : vector<2x2x6x6x2x6xf32> to vector<1x1x4x4x2x6xf32>
    %170 = vector.shape_cast %169 : vector<1x1x4x4x2x6xf32> to vector<4x4x2x6xf32>
    %171 = vector.shape_cast %170 : vector<4x4x2x6xf32> to vector<32x6xf32>
    %c21 = arith.constant 21 : index
    %c0_71 = arith.constant 0 : index
    %c0_72 = arith.constant 0 : index
    %172 = vector.load %arg3[%c21, %c0_71, %c0_72] : memref<25x6x12xf32, #tpu.memory_space<vmem>>, vector<1x6x12xf32>
    %173 = vector.shape_cast %172 : vector<1x6x12xf32> to vector<6x12xf32>
    %cst_73 = arith.constant dense<0.000000e+00> : vector<32x12xf32>
    %174 = tpu.matmul %171, %173, %cst_73 {dimension_numbers = #tpu.dot_dimension_numbers<[1], [0], [0], [1], [0, 0, 1, 1], [], []>} : vector<32x6xf32>, vector<6x12xf32>, vector<32x12xf32> -> vector<32x12xf32>
    %175 = arith.addf %168, %174 : vector<32x12xf32>
    %176 = vector.extract_strided_slice %20 {offsets = [0, 0, 2, 1, 0, 0], sizes = [1, 1, 4, 4, 2, 6], strides = [1, 1, 1, 1, 1, 1]} : vector<2x2x6x6x2x6xf32> to vector<1x1x4x4x2x6xf32>
    %177 = vector.shape_cast %176 : vector<1x1x4x4x2x6xf32> to vector<4x4x2x6xf32>
    %178 = vector.shape_cast %177 : vector<4x4x2x6xf32> to vector<32x6xf32>
    %c22 = arith.constant 22 : index
    %c0_74 = arith.constant 0 : index
    %c0_75 = arith.constant 0 : index
    %179 = vector.load %arg3[%c22, %c0_74, %c0_75] : memref<25x6x12xf32, #tpu.memory_space<vmem>>, vector<1x6x12xf32>
    %180 = vector.shape_cast %179 : vector<1x6x12xf32> to vector<6x12xf32>
    %cst_76 = arith.constant dense<0.000000e+00> : vector<32x12xf32>
    %181 = tpu.matmul %178, %180, %cst_76 {dimension_numbers = #tpu.dot_dimension_numbers<[1], [0], [0], [1], [0, 0, 1, 1], [], []>} : vector<32x6xf32>, vector<6x12xf32>, vector<32x12xf32> -> vector<32x12xf32>
    %182 = arith.addf %175, %181 : vector<32x12xf32>
    %183 = vector.extract_strided_slice %20 {offsets = [0, 1, 2, 1, 0, 0], sizes = [1, 1, 4, 4, 2, 6], strides = [1, 1, 1, 1, 1, 1]} : vector<2x2x6x6x2x6xf32> to vector<1x1x4x4x2x6xf32>
    %184 = vector.shape_cast %183 : vector<1x1x4x4x2x6xf32> to vector<4x4x2x6xf32>
    %185 = vector.shape_cast %184 : vector<4x4x2x6xf32> to vector<32x6xf32>
    %c23 = arith.constant 23 : index
    %c0_77 = arith.constant 0 : index
    %c0_78 = arith.constant 0 : index
    %186 = vector.load %arg3[%c23, %c0_77, %c0_78] : memref<25x6x12xf32, #tpu.memory_space<vmem>>, vector<1x6x12xf32>
    %187 = vector.shape_cast %186 : vector<1x6x12xf32> to vector<6x12xf32>
    %cst_79 = arith.constant dense<0.000000e+00> : vector<32x12xf32>
    %188 = tpu.matmul %185, %187, %cst_79 {dimension_numbers = #tpu.dot_dimension_numbers<[1], [0], [0], [1], [0, 0, 1, 1], [], []>} : vector<32x6xf32>, vector<6x12xf32>, vector<32x12xf32> -> vector<32x12xf32>
    %189 = arith.addf %182, %188 : vector<32x12xf32>
    %190 = vector.extract_strided_slice %20 {offsets = [0, 0, 2, 2, 0, 0], sizes = [1, 1, 4, 4, 2, 6], strides = [1, 1, 1, 1, 1, 1]} : vector<2x2x6x6x2x6xf32> to vector<1x1x4x4x2x6xf32>
    %191 = vector.shape_cast %190 : vector<1x1x4x4x2x6xf32> to vector<4x4x2x6xf32>
    %192 = vector.shape_cast %191 : vector<4x4x2x6xf32> to vector<32x6xf32>
    %c24 = arith.constant 24 : index
    %c0_80 = arith.constant 0 : index
    %c0_81 = arith.constant 0 : index
    %193 = vector.load %arg3[%c24, %c0_80, %c0_81] : memref<25x6x12xf32, #tpu.memory_space<vmem>>, vector<1x6x12xf32>
    %194 = vector.shape_cast %193 : vector<1x6x12xf32> to vector<6x12xf32>
    %cst_82 = arith.constant dense<0.000000e+00> : vector<32x12xf32>
    %195 = tpu.matmul %192, %194, %cst_82 {dimension_numbers = #tpu.dot_dimension_numbers<[1], [0], [0], [1], [0, 0, 1, 1], [], []>} : vector<32x6xf32>, vector<6x12xf32>, vector<32x12xf32> -> vector<32x12xf32>
    %196 = arith.addf %189, %195 : vector<32x12xf32>
    %c0_83 = arith.constant 0 : index
    %c0_84 = arith.constant 0 : index
    %197 = vector.load %arg4[%c0_83, %c0_84] : memref<1x12xf32, #tpu.memory_space<vmem>>, vector<1x12xf32>
    %198 = vector.broadcast %197 : vector<1x12xf32> to vector<32x12xf32>
    %199 = arith.addf %196, %198 : vector<32x12xf32>
    %cst_85 = arith.constant 0.000000e+00 : f32
    %200 = vector.broadcast %cst_85 : f32 to vector<32x12xf32>
    %201 = arith.maximumf %199, %200 : vector<32x12xf32>
    %cst_86 = arith.constant 0.000000e+00 : f32
    %202 = vector.broadcast %cst_86 : f32 to vector<32x12xf32>
    %203 = vector.extract_strided_slice %20 {offsets = [0, 1, 0, 0, 0, 0], sizes = [1, 1, 4, 4, 2, 6], strides = [1, 1, 1, 1, 1, 1]} : vector<2x2x6x6x2x6xf32> to vector<1x1x4x4x2x6xf32>
    %204 = vector.shape_cast %203 : vector<1x1x4x4x2x6xf32> to vector<4x4x2x6xf32>
    %205 = vector.shape_cast %204 : vector<4x4x2x6xf32> to vector<32x6xf32>
    %c0_87 = arith.constant 0 : index
    %c0_88 = arith.constant 0 : index
    %c0_89 = arith.constant 0 : index
    %206 = vector.load %arg3[%c0_87, %c0_88, %c0_89] : memref<25x6x12xf32, #tpu.memory_space<vmem>>, vector<1x6x12xf32>
    %207 = vector.shape_cast %206 : vector<1x6x12xf32> to vector<6x12xf32>
    %cst_90 = arith.constant dense<0.000000e+00> : vector<32x12xf32>
    %208 = tpu.matmul %205, %207, %cst_90 {dimension_numbers = #tpu.dot_dimension_numbers<[1], [0], [0], [1], [0, 0, 1, 1], [], []>} : vector<32x6xf32>, vector<6x12xf32>, vector<32x12xf32> -> vector<32x12xf32>
    %209 = arith.addf %202, %208 : vector<32x12xf32>
    %210 = vector.extract_strided_slice %20 {offsets = [0, 0, 0, 1, 0, 0], sizes = [1, 1, 4, 4, 2, 6], strides = [1, 1, 1, 1, 1, 1]} : vector<2x2x6x6x2x6xf32> to vector<1x1x4x4x2x6xf32>
    %211 = vector.shape_cast %210 : vector<1x1x4x4x2x6xf32> to vector<4x4x2x6xf32>
    %212 = vector.shape_cast %211 : vector<4x4x2x6xf32> to vector<32x6xf32>
    %c1_91 = arith.constant 1 : index
    %c0_92 = arith.constant 0 : index
    %c0_93 = arith.constant 0 : index
    %213 = vector.load %arg3[%c1_91, %c0_92, %c0_93] : memref<25x6x12xf32, #tpu.memory_space<vmem>>, vector<1x6x12xf32>
    %214 = vector.shape_cast %213 : vector<1x6x12xf32> to vector<6x12xf32>
    %cst_94 = arith.constant dense<0.000000e+00> : vector<32x12xf32>
    %215 = tpu.matmul %212, %214, %cst_94 {dimension_numbers = #tpu.dot_dimension_numbers<[1], [0], [0], [1], [0, 0, 1, 1], [], []>} : vector<32x6xf32>, vector<6x12xf32>, vector<32x12xf32> -> vector<32x12xf32>
    %216 = arith.addf %209, %215 : vector<32x12xf32>
    %217 = vector.extract_strided_slice %20 {offsets = [0, 1, 0, 1, 0, 0], sizes = [1, 1, 4, 4, 2, 6], strides = [1, 1, 1, 1, 1, 1]} : vector<2x2x6x6x2x6xf32> to vector<1x1x4x4x2x6xf32>
    %218 = vector.shape_cast %217 : vector<1x1x4x4x2x6xf32> to vector<4x4x2x6xf32>
    %219 = vector.shape_cast %218 : vector<4x4x2x6xf32> to vector<32x6xf32>
    %c2_95 = arith.constant 2 : index
    %c0_96 = arith.constant 0 : index
    %c0_97 = arith.constant 0 : index
    %220 = vector.load %arg3[%c2_95, %c0_96, %c0_97] : memref<25x6x12xf32, #tpu.memory_space<vmem>>, vector<1x6x12xf32>
    %221 = vector.shape_cast %220 : vector<1x6x12xf32> to vector<6x12xf32>
    %cst_98 = arith.constant dense<0.000000e+00> : vector<32x12xf32>
    %222 = tpu.matmul %219, %221, %cst_98 {dimension_numbers = #tpu.dot_dimension_numbers<[1], [0], [0], [1], [0, 0, 1, 1], [], []>} : vector<32x6xf32>, vector<6x12xf32>, vector<32x12xf32> -> vector<32x12xf32>
    %223 = arith.addf %216, %222 : vector<32x12xf32>
    %224 = vector.extract_strided_slice %20 {offsets = [0, 0, 0, 2, 0, 0], sizes = [1, 1, 4, 4, 2, 6], strides = [1, 1, 1, 1, 1, 1]} : vector<2x2x6x6x2x6xf32> to vector<1x1x4x4x2x6xf32>
    %225 = vector.shape_cast %224 : vector<1x1x4x4x2x6xf32> to vector<4x4x2x6xf32>
    %226 = vector.shape_cast %225 : vector<4x4x2x6xf32> to vector<32x6xf32>
    %c3_99 = arith.constant 3 : index
    %c0_100 = arith.constant 0 : index
    %c0_101 = arith.constant 0 : index
    %227 = vector.load %arg3[%c3_99, %c0_100, %c0_101] : memref<25x6x12xf32, #tpu.memory_space<vmem>>, vector<1x6x12xf32>
    %228 = vector.shape_cast %227 : vector<1x6x12xf32> to vector<6x12xf32>
    %cst_102 = arith.constant dense<0.000000e+00> : vector<32x12xf32>
    %229 = tpu.matmul %226, %228, %cst_102 {dimension_numbers = #tpu.dot_dimension_numbers<[1], [0], [0], [1], [0, 0, 1, 1], [], []>} : vector<32x6xf32>, vector<6x12xf32>, vector<32x12xf32> -> vector<32x12xf32>
    %230 = arith.addf %223, %229 : vector<32x12xf32>
    %231 = vector.extract_strided_slice %20 {offsets = [0, 1, 0, 2, 0, 0], sizes = [1, 1, 4, 4, 2, 6], strides = [1, 1, 1, 1, 1, 1]} : vector<2x2x6x6x2x6xf32> to vector<1x1x4x4x2x6xf32>
    %232 = vector.shape_cast %231 : vector<1x1x4x4x2x6xf32> to vector<4x4x2x6xf32>
    %233 = vector.shape_cast %232 : vector<4x4x2x6xf32> to vector<32x6xf32>
    %c4_103 = arith.constant 4 : index
    %c0_104 = arith.constant 0 : index
    %c0_105 = arith.constant 0 : index
    %234 = vector.load %arg3[%c4_103, %c0_104, %c0_105] : memref<25x6x12xf32, #tpu.memory_space<vmem>>, vector<1x6x12xf32>
    %235 = vector.shape_cast %234 : vector<1x6x12xf32> to vector<6x12xf32>
    %cst_106 = arith.constant dense<0.000000e+00> : vector<32x12xf32>
    %236 = tpu.matmul %233, %235, %cst_106 {dimension_numbers = #tpu.dot_dimension_numbers<[1], [0], [0], [1], [0, 0, 1, 1], [], []>} : vector<32x6xf32>, vector<6x12xf32>, vector<32x12xf32> -> vector<32x12xf32>
    %237 = arith.addf %230, %236 : vector<32x12xf32>
    %238 = vector.extract_strided_slice %20 {offsets = [1, 1, 0, 0, 0, 0], sizes = [1, 1, 4, 4, 2, 6], strides = [1, 1, 1, 1, 1, 1]} : vector<2x2x6x6x2x6xf32> to vector<1x1x4x4x2x6xf32>
    %239 = vector.shape_cast %238 : vector<1x1x4x4x2x6xf32> to vector<4x4x2x6xf32>
    %240 = vector.shape_cast %239 : vector<4x4x2x6xf32> to vector<32x6xf32>
    %c5_107 = arith.constant 5 : index
    %c0_108 = arith.constant 0 : index
    %c0_109 = arith.constant 0 : index
    %241 = vector.load %arg3[%c5_107, %c0_108, %c0_109] : memref<25x6x12xf32, #tpu.memory_space<vmem>>, vector<1x6x12xf32>
    %242 = vector.shape_cast %241 : vector<1x6x12xf32> to vector<6x12xf32>
    %cst_110 = arith.constant dense<0.000000e+00> : vector<32x12xf32>
    %243 = tpu.matmul %240, %242, %cst_110 {dimension_numbers = #tpu.dot_dimension_numbers<[1], [0], [0], [1], [0, 0, 1, 1], [], []>} : vector<32x6xf32>, vector<6x12xf32>, vector<32x12xf32> -> vector<32x12xf32>
    %244 = arith.addf %237, %243 : vector<32x12xf32>
    %245 = vector.extract_strided_slice %20 {offsets = [1, 0, 0, 1, 0, 0], sizes = [1, 1, 4, 4, 2, 6], strides = [1, 1, 1, 1, 1, 1]} : vector<2x2x6x6x2x6xf32> to vector<1x1x4x4x2x6xf32>
    %246 = vector.shape_cast %245 : vector<1x1x4x4x2x6xf32> to vector<4x4x2x6xf32>
    %247 = vector.shape_cast %246 : vector<4x4x2x6xf32> to vector<32x6xf32>
    %c6_111 = arith.constant 6 : index
    %c0_112 = arith.constant 0 : index
    %c0_113 = arith.constant 0 : index
    %248 = vector.load %arg3[%c6_111, %c0_112, %c0_113] : memref<25x6x12xf32, #tpu.memory_space<vmem>>, vector<1x6x12xf32>
    %249 = vector.shape_cast %248 : vector<1x6x12xf32> to vector<6x12xf32>
    %cst_114 = arith.constant dense<0.000000e+00> : vector<32x12xf32>
    %250 = tpu.matmul %247, %249, %cst_114 {dimension_numbers = #tpu.dot_dimension_numbers<[1], [0], [0], [1], [0, 0, 1, 1], [], []>} : vector<32x6xf32>, vector<6x12xf32>, vector<32x12xf32> -> vector<32x12xf32>
    %251 = arith.addf %244, %250 : vector<32x12xf32>
    %252 = vector.extract_strided_slice %20 {offsets = [1, 1, 0, 1, 0, 0], sizes = [1, 1, 4, 4, 2, 6], strides = [1, 1, 1, 1, 1, 1]} : vector<2x2x6x6x2x6xf32> to vector<1x1x4x4x2x6xf32>
    %253 = vector.shape_cast %252 : vector<1x1x4x4x2x6xf32> to vector<4x4x2x6xf32>
    %254 = vector.shape_cast %253 : vector<4x4x2x6xf32> to vector<32x6xf32>
    %c7_115 = arith.constant 7 : index
    %c0_116 = arith.constant 0 : index
    %c0_117 = arith.constant 0 : index
    %255 = vector.load %arg3[%c7_115, %c0_116, %c0_117] : memref<25x6x12xf32, #tpu.memory_space<vmem>>, vector<1x6x12xf32>
    %256 = vector.shape_cast %255 : vector<1x6x12xf32> to vector<6x12xf32>
    %cst_118 = arith.constant dense<0.000000e+00> : vector<32x12xf32>
    %257 = tpu.matmul %254, %256, %cst_118 {dimension_numbers = #tpu.dot_dimension_numbers<[1], [0], [0], [1], [0, 0, 1, 1], [], []>} : vector<32x6xf32>, vector<6x12xf32>, vector<32x12xf32> -> vector<32x12xf32>
    %258 = arith.addf %251, %257 : vector<32x12xf32>
    %259 = vector.extract_strided_slice %20 {offsets = [1, 0, 0, 2, 0, 0], sizes = [1, 1, 4, 4, 2, 6], strides = [1, 1, 1, 1, 1, 1]} : vector<2x2x6x6x2x6xf32> to vector<1x1x4x4x2x6xf32>
    %260 = vector.shape_cast %259 : vector<1x1x4x4x2x6xf32> to vector<4x4x2x6xf32>
    %261 = vector.shape_cast %260 : vector<4x4x2x6xf32> to vector<32x6xf32>
    %c8_119 = arith.constant 8 : index
    %c0_120 = arith.constant 0 : index
    %c0_121 = arith.constant 0 : index
    %262 = vector.load %arg3[%c8_119, %c0_120, %c0_121] : memref<25x6x12xf32, #tpu.memory_space<vmem>>, vector<1x6x12xf32>
    %263 = vector.shape_cast %262 : vector<1x6x12xf32> to vector<6x12xf32>
    %cst_122 = arith.constant dense<0.000000e+00> : vector<32x12xf32>
    %264 = tpu.matmul %261, %263, %cst_122 {dimension_numbers = #tpu.dot_dimension_numbers<[1], [0], [0], [1], [0, 0, 1, 1], [], []>} : vector<32x6xf32>, vector<6x12xf32>, vector<32x12xf32> -> vector<32x12xf32>
    %265 = arith.addf %258, %264 : vector<32x12xf32>
    %266 = vector.extract_strided_slice %20 {offsets = [1, 1, 0, 2, 0, 0], sizes = [1, 1, 4, 4, 2, 6], strides = [1, 1, 1, 1, 1, 1]} : vector<2x2x6x6x2x6xf32> to vector<1x1x4x4x2x6xf32>
    %267 = vector.shape_cast %266 : vector<1x1x4x4x2x6xf32> to vector<4x4x2x6xf32>
    %268 = vector.shape_cast %267 : vector<4x4x2x6xf32> to vector<32x6xf32>
    %c9_123 = arith.constant 9 : index
    %c0_124 = arith.constant 0 : index
    %c0_125 = arith.constant 0 : index
    %269 = vector.load %arg3[%c9_123, %c0_124, %c0_125] : memref<25x6x12xf32, #tpu.memory_space<vmem>>, vector<1x6x12xf32>
    %270 = vector.shape_cast %269 : vector<1x6x12xf32> to vector<6x12xf32>
    %cst_126 = arith.constant dense<0.000000e+00> : vector<32x12xf32>
    %271 = tpu.matmul %268, %270, %cst_126 {dimension_numbers = #tpu.dot_dimension_numbers<[1], [0], [0], [1], [0, 0, 1, 1], [], []>} : vector<32x6xf32>, vector<6x12xf32>, vector<32x12xf32> -> vector<32x12xf32>
    %272 = arith.addf %265, %271 : vector<32x12xf32>
    %273 = vector.extract_strided_slice %20 {offsets = [0, 1, 1, 0, 0, 0], sizes = [1, 1, 4, 4, 2, 6], strides = [1, 1, 1, 1, 1, 1]} : vector<2x2x6x6x2x6xf32> to vector<1x1x4x4x2x6xf32>
    %274 = vector.shape_cast %273 : vector<1x1x4x4x2x6xf32> to vector<4x4x2x6xf32>
    %275 = vector.shape_cast %274 : vector<4x4x2x6xf32> to vector<32x6xf32>
    %c10_127 = arith.constant 10 : index
    %c0_128 = arith.constant 0 : index
    %c0_129 = arith.constant 0 : index
    %276 = vector.load %arg3[%c10_127, %c0_128, %c0_129] : memref<25x6x12xf32, #tpu.memory_space<vmem>>, vector<1x6x12xf32>
    %277 = vector.shape_cast %276 : vector<1x6x12xf32> to vector<6x12xf32>
    %cst_130 = arith.constant dense<0.000000e+00> : vector<32x12xf32>
    %278 = tpu.matmul %275, %277, %cst_130 {dimension_numbers = #tpu.dot_dimension_numbers<[1], [0], [0], [1], [0, 0, 1, 1], [], []>} : vector<32x6xf32>, vector<6x12xf32>, vector<32x12xf32> -> vector<32x12xf32>
    %279 = arith.addf %272, %278 : vector<32x12xf32>
    %280 = vector.extract_strided_slice %20 {offsets = [0, 0, 1, 1, 0, 0], sizes = [1, 1, 4, 4, 2, 6], strides = [1, 1, 1, 1, 1, 1]} : vector<2x2x6x6x2x6xf32> to vector<1x1x4x4x2x6xf32>
    %281 = vector.shape_cast %280 : vector<1x1x4x4x2x6xf32> to vector<4x4x2x6xf32>
    %282 = vector.shape_cast %281 : vector<4x4x2x6xf32> to vector<32x6xf32>
    %c11_131 = arith.constant 11 : index
    %c0_132 = arith.constant 0 : index
    %c0_133 = arith.constant 0 : index
    %283 = vector.load %arg3[%c11_131, %c0_132, %c0_133] : memref<25x6x12xf32, #tpu.memory_space<vmem>>, vector<1x6x12xf32>
    %284 = vector.shape_cast %283 : vector<1x6x12xf32> to vector<6x12xf32>
    %cst_134 = arith.constant dense<0.000000e+00> : vector<32x12xf32>
    %285 = tpu.matmul %282, %284, %cst_134 {dimension_numbers = #tpu.dot_dimension_numbers<[1], [0], [0], [1], [0, 0, 1, 1], [], []>} : vector<32x6xf32>, vector<6x12xf32>, vector<32x12xf32> -> vector<32x12xf32>
    %286 = arith.addf %279, %285 : vector<32x12xf32>
    %287 = vector.extract_strided_slice %20 {offsets = [0, 1, 1, 1, 0, 0], sizes = [1, 1, 4, 4, 2, 6], strides = [1, 1, 1, 1, 1, 1]} : vector<2x2x6x6x2x6xf32> to vector<1x1x4x4x2x6xf32>
    %288 = vector.shape_cast %287 : vector<1x1x4x4x2x6xf32> to vector<4x4x2x6xf32>
    %289 = vector.shape_cast %288 : vector<4x4x2x6xf32> to vector<32x6xf32>
    %c12_135 = arith.constant 12 : index
    %c0_136 = arith.constant 0 : index
    %c0_137 = arith.constant 0 : index
    %290 = vector.load %arg3[%c12_135, %c0_136, %c0_137] : memref<25x6x12xf32, #tpu.memory_space<vmem>>, vector<1x6x12xf32>
    %291 = vector.shape_cast %290 : vector<1x6x12xf32> to vector<6x12xf32>
    %cst_138 = arith.constant dense<0.000000e+00> : vector<32x12xf32>
    %292 = tpu.matmul %289, %291, %cst_138 {dimension_numbers = #tpu.dot_dimension_numbers<[1], [0], [0], [1], [0, 0, 1, 1], [], []>} : vector<32x6xf32>, vector<6x12xf32>, vector<32x12xf32> -> vector<32x12xf32>
    %293 = arith.addf %286, %292 : vector<32x12xf32>
    %294 = vector.extract_strided_slice %20 {offsets = [0, 0, 1, 2, 0, 0], sizes = [1, 1, 4, 4, 2, 6], strides = [1, 1, 1, 1, 1, 1]} : vector<2x2x6x6x2x6xf32> to vector<1x1x4x4x2x6xf32>
    %295 = vector.shape_cast %294 : vector<1x1x4x4x2x6xf32> to vector<4x4x2x6xf32>
    %296 = vector.shape_cast %295 : vector<4x4x2x6xf32> to vector<32x6xf32>
    %c13_139 = arith.constant 13 : index
    %c0_140 = arith.constant 0 : index
    %c0_141 = arith.constant 0 : index
    %297 = vector.load %arg3[%c13_139, %c0_140, %c0_141] : memref<25x6x12xf32, #tpu.memory_space<vmem>>, vector<1x6x12xf32>
    %298 = vector.shape_cast %297 : vector<1x6x12xf32> to vector<6x12xf32>
    %cst_142 = arith.constant dense<0.000000e+00> : vector<32x12xf32>
    %299 = tpu.matmul %296, %298, %cst_142 {dimension_numbers = #tpu.dot_dimension_numbers<[1], [0], [0], [1], [0, 0, 1, 1], [], []>} : vector<32x6xf32>, vector<6x12xf32>, vector<32x12xf32> -> vector<32x12xf32>
    %300 = arith.addf %293, %299 : vector<32x12xf32>
    %301 = vector.extract_strided_slice %20 {offsets = [0, 1, 1, 2, 0, 0], sizes = [1, 1, 4, 4, 2, 6], strides = [1, 1, 1, 1, 1, 1]} : vector<2x2x6x6x2x6xf32> to vector<1x1x4x4x2x6xf32>
    %302 = vector.shape_cast %301 : vector<1x1x4x4x2x6xf32> to vector<4x4x2x6xf32>
    %303 = vector.shape_cast %302 : vector<4x4x2x6xf32> to vector<32x6xf32>
    %c14_143 = arith.constant 14 : index
    %c0_144 = arith.constant 0 : index
    %c0_145 = arith.constant 0 : index
    %304 = vector.load %arg3[%c14_143, %c0_144, %c0_145] : memref<25x6x12xf32, #tpu.memory_space<vmem>>, vector<1x6x12xf32>
    %305 = vector.shape_cast %304 : vector<1x6x12xf32> to vector<6x12xf32>
    %cst_146 = arith.constant dense<0.000000e+00> : vector<32x12xf32>
    %306 = tpu.matmul %303, %305, %cst_146 {dimension_numbers = #tpu.dot_dimension_numbers<[1], [0], [0], [1], [0, 0, 1, 1], [], []>} : vector<32x6xf32>, vector<6x12xf32>, vector<32x12xf32> -> vector<32x12xf32>
    %307 = arith.addf %300, %306 : vector<32x12xf32>
    %308 = vector.extract_strided_slice %20 {offsets = [1, 1, 1, 0, 0, 0], sizes = [1, 1, 4, 4, 2, 6], strides = [1, 1, 1, 1, 1, 1]} : vector<2x2x6x6x2x6xf32> to vector<1x1x4x4x2x6xf32>
    %309 = vector.shape_cast %308 : vector<1x1x4x4x2x6xf32> to vector<4x4x2x6xf32>
    %310 = vector.shape_cast %309 : vector<4x4x2x6xf32> to vector<32x6xf32>
    %c15_147 = arith.constant 15 : index
    %c0_148 = arith.constant 0 : index
    %c0_149 = arith.constant 0 : index
    %311 = vector.load %arg3[%c15_147, %c0_148, %c0_149] : memref<25x6x12xf32, #tpu.memory_space<vmem>>, vector<1x6x12xf32>
    %312 = vector.shape_cast %311 : vector<1x6x12xf32> to vector<6x12xf32>
    %cst_150 = arith.constant dense<0.000000e+00> : vector<32x12xf32>
    %313 = tpu.matmul %310, %312, %cst_150 {dimension_numbers = #tpu.dot_dimension_numbers<[1], [0], [0], [1], [0, 0, 1, 1], [], []>} : vector<32x6xf32>, vector<6x12xf32>, vector<32x12xf32> -> vector<32x12xf32>
    %314 = arith.addf %307, %313 : vector<32x12xf32>
    %315 = vector.extract_strided_slice %20 {offsets = [1, 0, 1, 1, 0, 0], sizes = [1, 1, 4, 4, 2, 6], strides = [1, 1, 1, 1, 1, 1]} : vector<2x2x6x6x2x6xf32> to vector<1x1x4x4x2x6xf32>
    %316 = vector.shape_cast %315 : vector<1x1x4x4x2x6xf32> to vector<4x4x2x6xf32>
    %317 = vector.shape_cast %316 : vector<4x4x2x6xf32> to vector<32x6xf32>
    %c16_151 = arith.constant 16 : index
    %c0_152 = arith.constant 0 : index
    %c0_153 = arith.constant 0 : index
    %318 = vector.load %arg3[%c16_151, %c0_152, %c0_153] : memref<25x6x12xf32, #tpu.memory_space<vmem>>, vector<1x6x12xf32>
    %319 = vector.shape_cast %318 : vector<1x6x12xf32> to vector<6x12xf32>
    %cst_154 = arith.constant dense<0.000000e+00> : vector<32x12xf32>
    %320 = tpu.matmul %317, %319, %cst_154 {dimension_numbers = #tpu.dot_dimension_numbers<[1], [0], [0], [1], [0, 0, 1, 1], [], []>} : vector<32x6xf32>, vector<6x12xf32>, vector<32x12xf32> -> vector<32x12xf32>
    %321 = arith.addf %314, %320 : vector<32x12xf32>
    %322 = vector.extract_strided_slice %20 {offsets = [1, 1, 1, 1, 0, 0], sizes = [1, 1, 4, 4, 2, 6], strides = [1, 1, 1, 1, 1, 1]} : vector<2x2x6x6x2x6xf32> to vector<1x1x4x4x2x6xf32>
    %323 = vector.shape_cast %322 : vector<1x1x4x4x2x6xf32> to vector<4x4x2x6xf32>
    %324 = vector.shape_cast %323 : vector<4x4x2x6xf32> to vector<32x6xf32>
    %c17_155 = arith.constant 17 : index
    %c0_156 = arith.constant 0 : index
    %c0_157 = arith.constant 0 : index
    %325 = vector.load %arg3[%c17_155, %c0_156, %c0_157] : memref<25x6x12xf32, #tpu.memory_space<vmem>>, vector<1x6x12xf32>
    %326 = vector.shape_cast %325 : vector<1x6x12xf32> to vector<6x12xf32>
    %cst_158 = arith.constant dense<0.000000e+00> : vector<32x12xf32>
    %327 = tpu.matmul %324, %326, %cst_158 {dimension_numbers = #tpu.dot_dimension_numbers<[1], [0], [0], [1], [0, 0, 1, 1], [], []>} : vector<32x6xf32>, vector<6x12xf32>, vector<32x12xf32> -> vector<32x12xf32>
    %328 = arith.addf %321, %327 : vector<32x12xf32>
    %329 = vector.extract_strided_slice %20 {offsets = [1, 0, 1, 2, 0, 0], sizes = [1, 1, 4, 4, 2, 6], strides = [1, 1, 1, 1, 1, 1]} : vector<2x2x6x6x2x6xf32> to vector<1x1x4x4x2x6xf32>
    %330 = vector.shape_cast %329 : vector<1x1x4x4x2x6xf32> to vector<4x4x2x6xf32>
    %331 = vector.shape_cast %330 : vector<4x4x2x6xf32> to vector<32x6xf32>
    %c18_159 = arith.constant 18 : index
    %c0_160 = arith.constant 0 : index
    %c0_161 = arith.constant 0 : index
    %332 = vector.load %arg3[%c18_159, %c0_160, %c0_161] : memref<25x6x12xf32, #tpu.memory_space<vmem>>, vector<1x6x12xf32>
    %333 = vector.shape_cast %332 : vector<1x6x12xf32> to vector<6x12xf32>
    %cst_162 = arith.constant dense<0.000000e+00> : vector<32x12xf32>
    %334 = tpu.matmul %331, %333, %cst_162 {dimension_numbers = #tpu.dot_dimension_numbers<[1], [0], [0], [1], [0, 0, 1, 1], [], []>} : vector<32x6xf32>, vector<6x12xf32>, vector<32x12xf32> -> vector<32x12xf32>
    %335 = arith.addf %328, %334 : vector<32x12xf32>
    %336 = vector.extract_strided_slice %20 {offsets = [1, 1, 1, 2, 0, 0], sizes = [1, 1, 4, 4, 2, 6], strides = [1, 1, 1, 1, 1, 1]} : vector<2x2x6x6x2x6xf32> to vector<1x1x4x4x2x6xf32>
    %337 = vector.shape_cast %336 : vector<1x1x4x4x2x6xf32> to vector<4x4x2x6xf32>
    %338 = vector.shape_cast %337 : vector<4x4x2x6xf32> to vector<32x6xf32>
    %c19_163 = arith.constant 19 : index
    %c0_164 = arith.constant 0 : index
    %c0_165 = arith.constant 0 : index
    %339 = vector.load %arg3[%c19_163, %c0_164, %c0_165] : memref<25x6x12xf32, #tpu.memory_space<vmem>>, vector<1x6x12xf32>
    %340 = vector.shape_cast %339 : vector<1x6x12xf32> to vector<6x12xf32>
    %cst_166 = arith.constant dense<0.000000e+00> : vector<32x12xf32>
    %341 = tpu.matmul %338, %340, %cst_166 {dimension_numbers = #tpu.dot_dimension_numbers<[1], [0], [0], [1], [0, 0, 1, 1], [], []>} : vector<32x6xf32>, vector<6x12xf32>, vector<32x12xf32> -> vector<32x12xf32>
    %342 = arith.addf %335, %341 : vector<32x12xf32>
    %343 = vector.extract_strided_slice %20 {offsets = [0, 1, 2, 0, 0, 0], sizes = [1, 1, 4, 4, 2, 6], strides = [1, 1, 1, 1, 1, 1]} : vector<2x2x6x6x2x6xf32> to vector<1x1x4x4x2x6xf32>
    %344 = vector.shape_cast %343 : vector<1x1x4x4x2x6xf32> to vector<4x4x2x6xf32>
    %345 = vector.shape_cast %344 : vector<4x4x2x6xf32> to vector<32x6xf32>
    %c20_167 = arith.constant 20 : index
    %c0_168 = arith.constant 0 : index
    %c0_169 = arith.constant 0 : index
    %346 = vector.load %arg3[%c20_167, %c0_168, %c0_169] : memref<25x6x12xf32, #tpu.memory_space<vmem>>, vector<1x6x12xf32>
    %347 = vector.shape_cast %346 : vector<1x6x12xf32> to vector<6x12xf32>
    %cst_170 = arith.constant dense<0.000000e+00> : vector<32x12xf32>
    %348 = tpu.matmul %345, %347, %cst_170 {dimension_numbers = #tpu.dot_dimension_numbers<[1], [0], [0], [1], [0, 0, 1, 1], [], []>} : vector<32x6xf32>, vector<6x12xf32>, vector<32x12xf32> -> vector<32x12xf32>
    %349 = arith.addf %342, %348 : vector<32x12xf32>
    %350 = vector.extract_strided_slice %20 {offsets = [0, 0, 2, 1, 0, 0], sizes = [1, 1, 4, 4, 2, 6], strides = [1, 1, 1, 1, 1, 1]} : vector<2x2x6x6x2x6xf32> to vector<1x1x4x4x2x6xf32>
    %351 = vector.shape_cast %350 : vector<1x1x4x4x2x6xf32> to vector<4x4x2x6xf32>
    %352 = vector.shape_cast %351 : vector<4x4x2x6xf32> to vector<32x6xf32>
    %c21_171 = arith.constant 21 : index
    %c0_172 = arith.constant 0 : index
    %c0_173 = arith.constant 0 : index
    %353 = vector.load %arg3[%c21_171, %c0_172, %c0_173] : memref<25x6x12xf32, #tpu.memory_space<vmem>>, vector<1x6x12xf32>
    %354 = vector.shape_cast %353 : vector<1x6x12xf32> to vector<6x12xf32>
    %cst_174 = arith.constant dense<0.000000e+00> : vector<32x12xf32>
    %355 = tpu.matmul %352, %354, %cst_174 {dimension_numbers = #tpu.dot_dimension_numbers<[1], [0], [0], [1], [0, 0, 1, 1], [], []>} : vector<32x6xf32>, vector<6x12xf32>, vector<32x12xf32> -> vector<32x12xf32>
    %356 = arith.addf %349, %355 : vector<32x12xf32>
    %357 = vector.extract_strided_slice %20 {offsets = [0, 1, 2, 1, 0, 0], sizes = [1, 1, 4, 4, 2, 6], strides = [1, 1, 1, 1, 1, 1]} : vector<2x2x6x6x2x6xf32> to vector<1x1x4x4x2x6xf32>
    %358 = vector.shape_cast %357 : vector<1x1x4x4x2x6xf32> to vector<4x4x2x6xf32>
    %359 = vector.shape_cast %358 : vector<4x4x2x6xf32> to vector<32x6xf32>
    %c22_175 = arith.constant 22 : index
    %c0_176 = arith.constant 0 : index
    %c0_177 = arith.constant 0 : index
    %360 = vector.load %arg3[%c22_175, %c0_176, %c0_177] : memref<25x6x12xf32, #tpu.memory_space<vmem>>, vector<1x6x12xf32>
    %361 = vector.shape_cast %360 : vector<1x6x12xf32> to vector<6x12xf32>
    %cst_178 = arith.constant dense<0.000000e+00> : vector<32x12xf32>
    %362 = tpu.matmul %359, %361, %cst_178 {dimension_numbers = #tpu.dot_dimension_numbers<[1], [0], [0], [1], [0, 0, 1, 1], [], []>} : vector<32x6xf32>, vector<6x12xf32>, vector<32x12xf32> -> vector<32x12xf32>
    %363 = arith.addf %356, %362 : vector<32x12xf32>
    %364 = vector.extract_strided_slice %20 {offsets = [0, 0, 2, 2, 0, 0], sizes = [1, 1, 4, 4, 2, 6], strides = [1, 1, 1, 1, 1, 1]} : vector<2x2x6x6x2x6xf32> to vector<1x1x4x4x2x6xf32>
    %365 = vector.shape_cast %364 : vector<1x1x4x4x2x6xf32> to vector<4x4x2x6xf32>
    %366 = vector.shape_cast %365 : vector<4x4x2x6xf32> to vector<32x6xf32>
    %c23_179 = arith.constant 23 : index
    %c0_180 = arith.constant 0 : index
    %c0_181 = arith.constant 0 : index
    %367 = vector.load %arg3[%c23_179, %c0_180, %c0_181] : memref<25x6x12xf32, #tpu.memory_space<vmem>>, vector<1x6x12xf32>
    %368 = vector.shape_cast %367 : vector<1x6x12xf32> to vector<6x12xf32>
    %cst_182 = arith.constant dense<0.000000e+00> : vector<32x12xf32>
    %369 = tpu.matmul %366, %368, %cst_182 {dimension_numbers = #tpu.dot_dimension_numbers<[1], [0], [0], [1], [0, 0, 1, 1], [], []>} : vector<32x6xf32>, vector<6x12xf32>, vector<32x12xf32> -> vector<32x12xf32>
    %370 = arith.addf %363, %369 : vector<32x12xf32>
    %371 = vector.extract_strided_slice %20 {offsets = [0, 1, 2, 2, 0, 0], sizes = [1, 1, 4, 4, 2, 6], strides = [1, 1, 1, 1, 1, 1]} : vector<2x2x6x6x2x6xf32> to vector<1x1x4x4x2x6xf32>
    %372 = vector.shape_cast %371 : vector<1x1x4x4x2x6xf32> to vector<4x4x2x6xf32>
    %373 = vector.shape_cast %372 : vector<4x4x2x6xf32> to vector<32x6xf32>
    %c24_183 = arith.constant 24 : index
    %c0_184 = arith.constant 0 : index
    %c0_185 = arith.constant 0 : index
    %374 = vector.load %arg3[%c24_183, %c0_184, %c0_185] : memref<25x6x12xf32, #tpu.memory_space<vmem>>, vector<1x6x12xf32>
    %375 = vector.shape_cast %374 : vector<1x6x12xf32> to vector<6x12xf32>
    %cst_186 = arith.constant dense<0.000000e+00> : vector<32x12xf32>
    %376 = tpu.matmul %373, %375, %cst_186 {dimension_numbers = #tpu.dot_dimension_numbers<[1], [0], [0], [1], [0, 0, 1, 1], [], []>} : vector<32x6xf32>, vector<6x12xf32>, vector<32x12xf32> -> vector<32x12xf32>
    %377 = arith.addf %370, %376 : vector<32x12xf32>
    %c0_187 = arith.constant 0 : index
    %c0_188 = arith.constant 0 : index
    %378 = vector.load %arg4[%c0_187, %c0_188] : memref<1x12xf32, #tpu.memory_space<vmem>>, vector<1x12xf32>
    %379 = vector.broadcast %378 : vector<1x12xf32> to vector<32x12xf32>
    %380 = arith.addf %377, %379 : vector<32x12xf32>
    %cst_189 = arith.constant 0.000000e+00 : f32
    %381 = vector.broadcast %cst_189 : f32 to vector<32x12xf32>
    %382 = arith.maximumf %380, %381 : vector<32x12xf32>
    %cst_190 = arith.constant 0.000000e+00 : f32
    %383 = vector.broadcast %cst_190 : f32 to vector<32x12xf32>
    %384 = vector.extract_strided_slice %20 {offsets = [1, 0, 0, 0, 0, 0], sizes = [1, 1, 4, 4, 2, 6], strides = [1, 1, 1, 1, 1, 1]} : vector<2x2x6x6x2x6xf32> to vector<1x1x4x4x2x6xf32>
    %385 = vector.shape_cast %384 : vector<1x1x4x4x2x6xf32> to vector<4x4x2x6xf32>
    %386 = vector.shape_cast %385 : vector<4x4x2x6xf32> to vector<32x6xf32>
    %c0_191 = arith.constant 0 : index
    %c0_192 = arith.constant 0 : index
    %c0_193 = arith.constant 0 : index
    %387 = vector.load %arg3[%c0_191, %c0_192, %c0_193] : memref<25x6x12xf32, #tpu.memory_space<vmem>>, vector<1x6x12xf32>
    %388 = vector.shape_cast %387 : vector<1x6x12xf32> to vector<6x12xf32>
    %cst_194 = arith.constant dense<0.000000e+00> : vector<32x12xf32>
    %389 = tpu.matmul %386, %388, %cst_194 {dimension_numbers = #tpu.dot_dimension_numbers<[1], [0], [0], [1], [0, 0, 1, 1], [], []>} : vector<32x6xf32>, vector<6x12xf32>, vector<32x12xf32> -> vector<32x12xf32>
    %390 = arith.addf %383, %389 : vector<32x12xf32>
    %391 = vector.extract_strided_slice %20 {offsets = [1, 1, 0, 0, 0, 0], sizes = [1, 1, 4, 4, 2, 6], strides = [1, 1, 1, 1, 1, 1]} : vector<2x2x6x6x2x6xf32> to vector<1x1x4x4x2x6xf32>
    %392 = vector.shape_cast %391 : vector<1x1x4x4x2x6xf32> to vector<4x4x2x6xf32>
    %393 = vector.shape_cast %392 : vector<4x4x2x6xf32> to vector<32x6xf32>
    %c1_195 = arith.constant 1 : index
    %c0_196 = arith.constant 0 : index
    %c0_197 = arith.constant 0 : index
    %394 = vector.load %arg3[%c1_195, %c0_196, %c0_197] : memref<25x6x12xf32, #tpu.memory_space<vmem>>, vector<1x6x12xf32>
    %395 = vector.shape_cast %394 : vector<1x6x12xf32> to vector<6x12xf32>
    %cst_198 = arith.constant dense<0.000000e+00> : vector<32x12xf32>
    %396 = tpu.matmul %393, %395, %cst_198 {dimension_numbers = #tpu.dot_dimension_numbers<[1], [0], [0], [1], [0, 0, 1, 1], [], []>} : vector<32x6xf32>, vector<6x12xf32>, vector<32x12xf32> -> vector<32x12xf32>
    %397 = arith.addf %390, %396 : vector<32x12xf32>
    %398 = vector.extract_strided_slice %20 {offsets = [1, 0, 0, 1, 0, 0], sizes = [1, 1, 4, 4, 2, 6], strides = [1, 1, 1, 1, 1, 1]} : vector<2x2x6x6x2x6xf32> to vector<1x1x4x4x2x6xf32>
    %399 = vector.shape_cast %398 : vector<1x1x4x4x2x6xf32> to vector<4x4x2x6xf32>
    %400 = vector.shape_cast %399 : vector<4x4x2x6xf32> to vector<32x6xf32>
    %c2_199 = arith.constant 2 : index
    %c0_200 = arith.constant 0 : index
    %c0_201 = arith.constant 0 : index
    %401 = vector.load %arg3[%c2_199, %c0_200, %c0_201] : memref<25x6x12xf32, #tpu.memory_space<vmem>>, vector<1x6x12xf32>
    %402 = vector.shape_cast %401 : vector<1x6x12xf32> to vector<6x12xf32>
    %cst_202 = arith.constant dense<0.000000e+00> : vector<32x12xf32>
    %403 = tpu.matmul %400, %402, %cst_202 {dimension_numbers = #tpu.dot_dimension_numbers<[1], [0], [0], [1], [0, 0, 1, 1], [], []>} : vector<32x6xf32>, vector<6x12xf32>, vector<32x12xf32> -> vector<32x12xf32>
    %404 = arith.addf %397, %403 : vector<32x12xf32>
    %405 = vector.extract_strided_slice %20 {offsets = [1, 1, 0, 1, 0, 0], sizes = [1, 1, 4, 4, 2, 6], strides = [1, 1, 1, 1, 1, 1]} : vector<2x2x6x6x2x6xf32> to vector<1x1x4x4x2x6xf32>
    %406 = vector.shape_cast %405 : vector<1x1x4x4x2x6xf32> to vector<4x4x2x6xf32>
    %407 = vector.shape_cast %406 : vector<4x4x2x6xf32> to vector<32x6xf32>
    %c3_203 = arith.constant 3 : index
    %c0_204 = arith.constant 0 : index
    %c0_205 = arith.constant 0 : index
    %408 = vector.load %arg3[%c3_203, %c0_204, %c0_205] : memref<25x6x12xf32, #tpu.memory_space<vmem>>, vector<1x6x12xf32>
    %409 = vector.shape_cast %408 : vector<1x6x12xf32> to vector<6x12xf32>
    %cst_206 = arith.constant dense<0.000000e+00> : vector<32x12xf32>
    %410 = tpu.matmul %407, %409, %cst_206 {dimension_numbers = #tpu.dot_dimension_numbers<[1], [0], [0], [1], [0, 0, 1, 1], [], []>} : vector<32x6xf32>, vector<6x12xf32>, vector<32x12xf32> -> vector<32x12xf32>
    %411 = arith.addf %404, %410 : vector<32x12xf32>
    %412 = vector.extract_strided_slice %20 {offsets = [1, 0, 0, 2, 0, 0], sizes = [1, 1, 4, 4, 2, 6], strides = [1, 1, 1, 1, 1, 1]} : vector<2x2x6x6x2x6xf32> to vector<1x1x4x4x2x6xf32>
    %413 = vector.shape_cast %412 : vector<1x1x4x4x2x6xf32> to vector<4x4x2x6xf32>
    %414 = vector.shape_cast %413 : vector<4x4x2x6xf32> to vector<32x6xf32>
    %c4_207 = arith.constant 4 : index
    %c0_208 = arith.constant 0 : index
    %c0_209 = arith.constant 0 : index
    %415 = vector.load %arg3[%c4_207, %c0_208, %c0_209] : memref<25x6x12xf32, #tpu.memory_space<vmem>>, vector<1x6x12xf32>
    %416 = vector.shape_cast %415 : vector<1x6x12xf32> to vector<6x12xf32>
    %cst_210 = arith.constant dense<0.000000e+00> : vector<32x12xf32>
    %417 = tpu.matmul %414, %416, %cst_210 {dimension_numbers = #tpu.dot_dimension_numbers<[1], [0], [0], [1], [0, 0, 1, 1], [], []>} : vector<32x6xf32>, vector<6x12xf32>, vector<32x12xf32> -> vector<32x12xf32>
    %418 = arith.addf %411, %417 : vector<32x12xf32>
    %419 = vector.extract_strided_slice %20 {offsets = [0, 0, 1, 0, 0, 0], sizes = [1, 1, 4, 4, 2, 6], strides = [1, 1, 1, 1, 1, 1]} : vector<2x2x6x6x2x6xf32> to vector<1x1x4x4x2x6xf32>
    %420 = vector.shape_cast %419 : vector<1x1x4x4x2x6xf32> to vector<4x4x2x6xf32>
    %421 = vector.shape_cast %420 : vector<4x4x2x6xf32> to vector<32x6xf32>
    %c5_211 = arith.constant 5 : index
    %c0_212 = arith.constant 0 : index
    %c0_213 = arith.constant 0 : index
    %422 = vector.load %arg3[%c5_211, %c0_212, %c0_213] : memref<25x6x12xf32, #tpu.memory_space<vmem>>, vector<1x6x12xf32>
    %423 = vector.shape_cast %422 : vector<1x6x12xf32> to vector<6x12xf32>
    %cst_214 = arith.constant dense<0.000000e+00> : vector<32x12xf32>
    %424 = tpu.matmul %421, %423, %cst_214 {dimension_numbers = #tpu.dot_dimension_numbers<[1], [0], [0], [1], [0, 0, 1, 1], [], []>} : vector<32x6xf32>, vector<6x12xf32>, vector<32x12xf32> -> vector<32x12xf32>
    %425 = arith.addf %418, %424 : vector<32x12xf32>
    %426 = vector.extract_strided_slice %20 {offsets = [0, 1, 1, 0, 0, 0], sizes = [1, 1, 4, 4, 2, 6], strides = [1, 1, 1, 1, 1, 1]} : vector<2x2x6x6x2x6xf32> to vector<1x1x4x4x2x6xf32>
    %427 = vector.shape_cast %426 : vector<1x1x4x4x2x6xf32> to vector<4x4x2x6xf32>
    %428 = vector.shape_cast %427 : vector<4x4x2x6xf32> to vector<32x6xf32>
    %c6_215 = arith.constant 6 : index
    %c0_216 = arith.constant 0 : index
    %c0_217 = arith.constant 0 : index
    %429 = vector.load %arg3[%c6_215, %c0_216, %c0_217] : memref<25x6x12xf32, #tpu.memory_space<vmem>>, vector<1x6x12xf32>
    %430 = vector.shape_cast %429 : vector<1x6x12xf32> to vector<6x12xf32>
    %cst_218 = arith.constant dense<0.000000e+00> : vector<32x12xf32>
    %431 = tpu.matmul %428, %430, %cst_218 {dimension_numbers = #tpu.dot_dimension_numbers<[1], [0], [0], [1], [0, 0, 1, 1], [], []>} : vector<32x6xf32>, vector<6x12xf32>, vector<32x12xf32> -> vector<32x12xf32>
    %432 = arith.addf %425, %431 : vector<32x12xf32>
    %433 = vector.extract_strided_slice %20 {offsets = [0, 0, 1, 1, 0, 0], sizes = [1, 1, 4, 4, 2, 6], strides = [1, 1, 1, 1, 1, 1]} : vector<2x2x6x6x2x6xf32> to vector<1x1x4x4x2x6xf32>
    %434 = vector.shape_cast %433 : vector<1x1x4x4x2x6xf32> to vector<4x4x2x6xf32>
    %435 = vector.shape_cast %434 : vector<4x4x2x6xf32> to vector<32x6xf32>
    %c7_219 = arith.constant 7 : index
    %c0_220 = arith.constant 0 : index
    %c0_221 = arith.constant 0 : index
    %436 = vector.load %arg3[%c7_219, %c0_220, %c0_221] : memref<25x6x12xf32, #tpu.memory_space<vmem>>, vector<1x6x12xf32>
    %437 = vector.shape_cast %436 : vector<1x6x12xf32> to vector<6x12xf32>
    %cst_222 = arith.constant dense<0.000000e+00> : vector<32x12xf32>
    %438 = tpu.matmul %435, %437, %cst_222 {dimension_numbers = #tpu.dot_dimension_numbers<[1], [0], [0], [1], [0, 0, 1, 1], [], []>} : vector<32x6xf32>, vector<6x12xf32>, vector<32x12xf32> -> vector<32x12xf32>
    %439 = arith.addf %432, %438 : vector<32x12xf32>
    %440 = vector.extract_strided_slice %20 {offsets = [0, 1, 1, 1, 0, 0], sizes = [1, 1, 4, 4, 2, 6], strides = [1, 1, 1, 1, 1, 1]} : vector<2x2x6x6x2x6xf32> to vector<1x1x4x4x2x6xf32>
    %441 = vector.shape_cast %440 : vector<1x1x4x4x2x6xf32> to vector<4x4x2x6xf32>
    %442 = vector.shape_cast %441 : vector<4x4x2x6xf32> to vector<32x6xf32>
    %c8_223 = arith.constant 8 : index
    %c0_224 = arith.constant 0 : index
    %c0_225 = arith.constant 0 : index
    %443 = vector.load %arg3[%c8_223, %c0_224, %c0_225] : memref<25x6x12xf32, #tpu.memory_space<vmem>>, vector<1x6x12xf32>
    %444 = vector.shape_cast %443 : vector<1x6x12xf32> to vector<6x12xf32>
    %cst_226 = arith.constant dense<0.000000e+00> : vector<32x12xf32>
    %445 = tpu.matmul %442, %444, %cst_226 {dimension_numbers = #tpu.dot_dimension_numbers<[1], [0], [0], [1], [0, 0, 1, 1], [], []>} : vector<32x6xf32>, vector<6x12xf32>, vector<32x12xf32> -> vector<32x12xf32>
    %446 = arith.addf %439, %445 : vector<32x12xf32>
    %447 = vector.extract_strided_slice %20 {offsets = [0, 0, 1, 2, 0, 0], sizes = [1, 1, 4, 4, 2, 6], strides = [1, 1, 1, 1, 1, 1]} : vector<2x2x6x6x2x6xf32> to vector<1x1x4x4x2x6xf32>
    %448 = vector.shape_cast %447 : vector<1x1x4x4x2x6xf32> to vector<4x4x2x6xf32>
    %449 = vector.shape_cast %448 : vector<4x4x2x6xf32> to vector<32x6xf32>
    %c9_227 = arith.constant 9 : index
    %c0_228 = arith.constant 0 : index
    %c0_229 = arith.constant 0 : index
    %450 = vector.load %arg3[%c9_227, %c0_228, %c0_229] : memref<25x6x12xf32, #tpu.memory_space<vmem>>, vector<1x6x12xf32>
    %451 = vector.shape_cast %450 : vector<1x6x12xf32> to vector<6x12xf32>
    %cst_230 = arith.constant dense<0.000000e+00> : vector<32x12xf32>
    %452 = tpu.matmul %449, %451, %cst_230 {dimension_numbers = #tpu.dot_dimension_numbers<[1], [0], [0], [1], [0, 0, 1, 1], [], []>} : vector<32x6xf32>, vector<6x12xf32>, vector<32x12xf32> -> vector<32x12xf32>
    %453 = arith.addf %446, %452 : vector<32x12xf32>
    %454 = vector.extract_strided_slice %20 {offsets = [1, 0, 1, 0, 0, 0], sizes = [1, 1, 4, 4, 2, 6], strides = [1, 1, 1, 1, 1, 1]} : vector<2x2x6x6x2x6xf32> to vector<1x1x4x4x2x6xf32>
    %455 = vector.shape_cast %454 : vector<1x1x4x4x2x6xf32> to vector<4x4x2x6xf32>
    %456 = vector.shape_cast %455 : vector<4x4x2x6xf32> to vector<32x6xf32>
    %c10_231 = arith.constant 10 : index
    %c0_232 = arith.constant 0 : index
    %c0_233 = arith.constant 0 : index
    %457 = vector.load %arg3[%c10_231, %c0_232, %c0_233] : memref<25x6x12xf32, #tpu.memory_space<vmem>>, vector<1x6x12xf32>
    %458 = vector.shape_cast %457 : vector<1x6x12xf32> to vector<6x12xf32>
    %cst_234 = arith.constant dense<0.000000e+00> : vector<32x12xf32>
    %459 = tpu.matmul %456, %458, %cst_234 {dimension_numbers = #tpu.dot_dimension_numbers<[1], [0], [0], [1], [0, 0, 1, 1], [], []>} : vector<32x6xf32>, vector<6x12xf32>, vector<32x12xf32> -> vector<32x12xf32>
    %460 = arith.addf %453, %459 : vector<32x12xf32>
    %461 = vector.extract_strided_slice %20 {offsets = [1, 1, 1, 0, 0, 0], sizes = [1, 1, 4, 4, 2, 6], strides = [1, 1, 1, 1, 1, 1]} : vector<2x2x6x6x2x6xf32> to vector<1x1x4x4x2x6xf32>
    %462 = vector.shape_cast %461 : vector<1x1x4x4x2x6xf32> to vector<4x4x2x6xf32>
    %463 = vector.shape_cast %462 : vector<4x4x2x6xf32> to vector<32x6xf32>
    %c11_235 = arith.constant 11 : index
    %c0_236 = arith.constant 0 : index
    %c0_237 = arith.constant 0 : index
    %464 = vector.load %arg3[%c11_235, %c0_236, %c0_237] : memref<25x6x12xf32, #tpu.memory_space<vmem>>, vector<1x6x12xf32>
    %465 = vector.shape_cast %464 : vector<1x6x12xf32> to vector<6x12xf32>
    %cst_238 = arith.constant dense<0.000000e+00> : vector<32x12xf32>
    %466 = tpu.matmul %463, %465, %cst_238 {dimension_numbers = #tpu.dot_dimension_numbers<[1], [0], [0], [1], [0, 0, 1, 1], [], []>} : vector<32x6xf32>, vector<6x12xf32>, vector<32x12xf32> -> vector<32x12xf32>
    %467 = arith.addf %460, %466 : vector<32x12xf32>
    %468 = vector.extract_strided_slice %20 {offsets = [1, 0, 1, 1, 0, 0], sizes = [1, 1, 4, 4, 2, 6], strides = [1, 1, 1, 1, 1, 1]} : vector<2x2x6x6x2x6xf32> to vector<1x1x4x4x2x6xf32>
    %469 = vector.shape_cast %468 : vector<1x1x4x4x2x6xf32> to vector<4x4x2x6xf32>
    %470 = vector.shape_cast %469 : vector<4x4x2x6xf32> to vector<32x6xf32>
    %c12_239 = arith.constant 12 : index
    %c0_240 = arith.constant 0 : index
    %c0_241 = arith.constant 0 : index
    %471 = vector.load %arg3[%c12_239, %c0_240, %c0_241] : memref<25x6x12xf32, #tpu.memory_space<vmem>>, vector<1x6x12xf32>
    %472 = vector.shape_cast %471 : vector<1x6x12xf32> to vector<6x12xf32>
    %cst_242 = arith.constant dense<0.000000e+00> : vector<32x12xf32>
    %473 = tpu.matmul %470, %472, %cst_242 {dimension_numbers = #tpu.dot_dimension_numbers<[1], [0], [0], [1], [0, 0, 1, 1], [], []>} : vector<32x6xf32>, vector<6x12xf32>, vector<32x12xf32> -> vector<32x12xf32>
    %474 = arith.addf %467, %473 : vector<32x12xf32>
    %475 = vector.extract_strided_slice %20 {offsets = [1, 1, 1, 1, 0, 0], sizes = [1, 1, 4, 4, 2, 6], strides = [1, 1, 1, 1, 1, 1]} : vector<2x2x6x6x2x6xf32> to vector<1x1x4x4x2x6xf32>
    %476 = vector.shape_cast %475 : vector<1x1x4x4x2x6xf32> to vector<4x4x2x6xf32>
    %477 = vector.shape_cast %476 : vector<4x4x2x6xf32> to vector<32x6xf32>
    %c13_243 = arith.constant 13 : index
    %c0_244 = arith.constant 0 : index
    %c0_245 = arith.constant 0 : index
    %478 = vector.load %arg3[%c13_243, %c0_244, %c0_245] : memref<25x6x12xf32, #tpu.memory_space<vmem>>, vector<1x6x12xf32>
    %479 = vector.shape_cast %478 : vector<1x6x12xf32> to vector<6x12xf32>
    %cst_246 = arith.constant dense<0.000000e+00> : vector<32x12xf32>
    %480 = tpu.matmul %477, %479, %cst_246 {dimension_numbers = #tpu.dot_dimension_numbers<[1], [0], [0], [1], [0, 0, 1, 1], [], []>} : vector<32x6xf32>, vector<6x12xf32>, vector<32x12xf32> -> vector<32x12xf32>
    %481 = arith.addf %474, %480 : vector<32x12xf32>
    %482 = vector.extract_strided_slice %20 {offsets = [1, 0, 1, 2, 0, 0], sizes = [1, 1, 4, 4, 2, 6], strides = [1, 1, 1, 1, 1, 1]} : vector<2x2x6x6x2x6xf32> to vector<1x1x4x4x2x6xf32>
    %483 = vector.shape_cast %482 : vector<1x1x4x4x2x6xf32> to vector<4x4x2x6xf32>
    %484 = vector.shape_cast %483 : vector<4x4x2x6xf32> to vector<32x6xf32>
    %c14_247 = arith.constant 14 : index
    %c0_248 = arith.constant 0 : index
    %c0_249 = arith.constant 0 : index
    %485 = vector.load %arg3[%c14_247, %c0_248, %c0_249] : memref<25x6x12xf32, #tpu.memory_space<vmem>>, vector<1x6x12xf32>
    %486 = vector.shape_cast %485 : vector<1x6x12xf32> to vector<6x12xf32>
    %cst_250 = arith.constant dense<0.000000e+00> : vector<32x12xf32>
    %487 = tpu.matmul %484, %486, %cst_250 {dimension_numbers = #tpu.dot_dimension_numbers<[1], [0], [0], [1], [0, 0, 1, 1], [], []>} : vector<32x6xf32>, vector<6x12xf32>, vector<32x12xf32> -> vector<32x12xf32>
    %488 = arith.addf %481, %487 : vector<32x12xf32>
    %489 = vector.extract_strided_slice %20 {offsets = [0, 0, 2, 0, 0, 0], sizes = [1, 1, 4, 4, 2, 6], strides = [1, 1, 1, 1, 1, 1]} : vector<2x2x6x6x2x6xf32> to vector<1x1x4x4x2x6xf32>
    %490 = vector.shape_cast %489 : vector<1x1x4x4x2x6xf32> to vector<4x4x2x6xf32>
    %491 = vector.shape_cast %490 : vector<4x4x2x6xf32> to vector<32x6xf32>
    %c15_251 = arith.constant 15 : index
    %c0_252 = arith.constant 0 : index
    %c0_253 = arith.constant 0 : index
    %492 = vector.load %arg3[%c15_251, %c0_252, %c0_253] : memref<25x6x12xf32, #tpu.memory_space<vmem>>, vector<1x6x12xf32>
    %493 = vector.shape_cast %492 : vector<1x6x12xf32> to vector<6x12xf32>
    %cst_254 = arith.constant dense<0.000000e+00> : vector<32x12xf32>
    %494 = tpu.matmul %491, %493, %cst_254 {dimension_numbers = #tpu.dot_dimension_numbers<[1], [0], [0], [1], [0, 0, 1, 1], [], []>} : vector<32x6xf32>, vector<6x12xf32>, vector<32x12xf32> -> vector<32x12xf32>
    %495 = arith.addf %488, %494 : vector<32x12xf32>
    %496 = vector.extract_strided_slice %20 {offsets = [0, 1, 2, 0, 0, 0], sizes = [1, 1, 4, 4, 2, 6], strides = [1, 1, 1, 1, 1, 1]} : vector<2x2x6x6x2x6xf32> to vector<1x1x4x4x2x6xf32>
    %497 = vector.shape_cast %496 : vector<1x1x4x4x2x6xf32> to vector<4x4x2x6xf32>
    %498 = vector.shape_cast %497 : vector<4x4x2x6xf32> to vector<32x6xf32>
    %c16_255 = arith.constant 16 : index
    %c0_256 = arith.constant 0 : index
    %c0_257 = arith.constant 0 : index
    %499 = vector.load %arg3[%c16_255, %c0_256, %c0_257] : memref<25x6x12xf32, #tpu.memory_space<vmem>>, vector<1x6x12xf32>
    %500 = vector.shape_cast %499 : vector<1x6x12xf32> to vector<6x12xf32>
    %cst_258 = arith.constant dense<0.000000e+00> : vector<32x12xf32>
    %501 = tpu.matmul %498, %500, %cst_258 {dimension_numbers = #tpu.dot_dimension_numbers<[1], [0], [0], [1], [0, 0, 1, 1], [], []>} : vector<32x6xf32>, vector<6x12xf32>, vector<32x12xf32> -> vector<32x12xf32>
    %502 = arith.addf %495, %501 : vector<32x12xf32>
    %503 = vector.extract_strided_slice %20 {offsets = [0, 0, 2, 1, 0, 0], sizes = [1, 1, 4, 4, 2, 6], strides = [1, 1, 1, 1, 1, 1]} : vector<2x2x6x6x2x6xf32> to vector<1x1x4x4x2x6xf32>
    %504 = vector.shape_cast %503 : vector<1x1x4x4x2x6xf32> to vector<4x4x2x6xf32>
    %505 = vector.shape_cast %504 : vector<4x4x2x6xf32> to vector<32x6xf32>
    %c17_259 = arith.constant 17 : index
    %c0_260 = arith.constant 0 : index
    %c0_261 = arith.constant 0 : index
    %506 = vector.load %arg3[%c17_259, %c0_260, %c0_261] : memref<25x6x12xf32, #tpu.memory_space<vmem>>, vector<1x6x12xf32>
    %507 = vector.shape_cast %506 : vector<1x6x12xf32> to vector<6x12xf32>
    %cst_262 = arith.constant dense<0.000000e+00> : vector<32x12xf32>
    %508 = tpu.matmul %505, %507, %cst_262 {dimension_numbers = #tpu.dot_dimension_numbers<[1], [0], [0], [1], [0, 0, 1, 1], [], []>} : vector<32x6xf32>, vector<6x12xf32>, vector<32x12xf32> -> vector<32x12xf32>
    %509 = arith.addf %502, %508 : vector<32x12xf32>
    %510 = vector.extract_strided_slice %20 {offsets = [0, 1, 2, 1, 0, 0], sizes = [1, 1, 4, 4, 2, 6], strides = [1, 1, 1, 1, 1, 1]} : vector<2x2x6x6x2x6xf32> to vector<1x1x4x4x2x6xf32>
    %511 = vector.shape_cast %510 : vector<1x1x4x4x2x6xf32> to vector<4x4x2x6xf32>
    %512 = vector.shape_cast %511 : vector<4x4x2x6xf32> to vector<32x6xf32>
    %c18_263 = arith.constant 18 : index
    %c0_264 = arith.constant 0 : index
    %c0_265 = arith.constant 0 : index
    %513 = vector.load %arg3[%c18_263, %c0_264, %c0_265] : memref<25x6x12xf32, #tpu.memory_space<vmem>>, vector<1x6x12xf32>
    %514 = vector.shape_cast %513 : vector<1x6x12xf32> to vector<6x12xf32>
    %cst_266 = arith.constant dense<0.000000e+00> : vector<32x12xf32>
    %515 = tpu.matmul %512, %514, %cst_266 {dimension_numbers = #tpu.dot_dimension_numbers<[1], [0], [0], [1], [0, 0, 1, 1], [], []>} : vector<32x6xf32>, vector<6x12xf32>, vector<32x12xf32> -> vector<32x12xf32>
    %516 = arith.addf %509, %515 : vector<32x12xf32>
    %517 = vector.extract_strided_slice %20 {offsets = [0, 0, 2, 2, 0, 0], sizes = [1, 1, 4, 4, 2, 6], strides = [1, 1, 1, 1, 1, 1]} : vector<2x2x6x6x2x6xf32> to vector<1x1x4x4x2x6xf32>
    %518 = vector.shape_cast %517 : vector<1x1x4x4x2x6xf32> to vector<4x4x2x6xf32>
    %519 = vector.shape_cast %518 : vector<4x4x2x6xf32> to vector<32x6xf32>
    %c19_267 = arith.constant 19 : index
    %c0_268 = arith.constant 0 : index
    %c0_269 = arith.constant 0 : index
    %520 = vector.load %arg3[%c19_267, %c0_268, %c0_269] : memref<25x6x12xf32, #tpu.memory_space<vmem>>, vector<1x6x12xf32>
    %521 = vector.shape_cast %520 : vector<1x6x12xf32> to vector<6x12xf32>
    %cst_270 = arith.constant dense<0.000000e+00> : vector<32x12xf32>
    %522 = tpu.matmul %519, %521, %cst_270 {dimension_numbers = #tpu.dot_dimension_numbers<[1], [0], [0], [1], [0, 0, 1, 1], [], []>} : vector<32x6xf32>, vector<6x12xf32>, vector<32x12xf32> -> vector<32x12xf32>
    %523 = arith.addf %516, %522 : vector<32x12xf32>
    %524 = vector.extract_strided_slice %20 {offsets = [1, 0, 2, 0, 0, 0], sizes = [1, 1, 4, 4, 2, 6], strides = [1, 1, 1, 1, 1, 1]} : vector<2x2x6x6x2x6xf32> to vector<1x1x4x4x2x6xf32>
    %525 = vector.shape_cast %524 : vector<1x1x4x4x2x6xf32> to vector<4x4x2x6xf32>
    %526 = vector.shape_cast %525 : vector<4x4x2x6xf32> to vector<32x6xf32>
    %c20_271 = arith.constant 20 : index
    %c0_272 = arith.constant 0 : index
    %c0_273 = arith.constant 0 : index
    %527 = vector.load %arg3[%c20_271, %c0_272, %c0_273] : memref<25x6x12xf32, #tpu.memory_space<vmem>>, vector<1x6x12xf32>
    %528 = vector.shape_cast %527 : vector<1x6x12xf32> to vector<6x12xf32>
    %cst_274 = arith.constant dense<0.000000e+00> : vector<32x12xf32>
    %529 = tpu.matmul %526, %528, %cst_274 {dimension_numbers = #tpu.dot_dimension_numbers<[1], [0], [0], [1], [0, 0, 1, 1], [], []>} : vector<32x6xf32>, vector<6x12xf32>, vector<32x12xf32> -> vector<32x12xf32>
    %530 = arith.addf %523, %529 : vector<32x12xf32>
    %531 = vector.extract_strided_slice %20 {offsets = [1, 1, 2, 0, 0, 0], sizes = [1, 1, 4, 4, 2, 6], strides = [1, 1, 1, 1, 1, 1]} : vector<2x2x6x6x2x6xf32> to vector<1x1x4x4x2x6xf32>
    %532 = vector.shape_cast %531 : vector<1x1x4x4x2x6xf32> to vector<4x4x2x6xf32>
    %533 = vector.shape_cast %532 : vector<4x4x2x6xf32> to vector<32x6xf32>
    %c21_275 = arith.constant 21 : index
    %c0_276 = arith.constant 0 : index
    %c0_277 = arith.constant 0 : index
    %534 = vector.load %arg3[%c21_275, %c0_276, %c0_277] : memref<25x6x12xf32, #tpu.memory_space<vmem>>, vector<1x6x12xf32>
    %535 = vector.shape_cast %534 : vector<1x6x12xf32> to vector<6x12xf32>
    %cst_278 = arith.constant dense<0.000000e+00> : vector<32x12xf32>
    %536 = tpu.matmul %533, %535, %cst_278 {dimension_numbers = #tpu.dot_dimension_numbers<[1], [0], [0], [1], [0, 0, 1, 1], [], []>} : vector<32x6xf32>, vector<6x12xf32>, vector<32x12xf32> -> vector<32x12xf32>
    %537 = arith.addf %530, %536 : vector<32x12xf32>
    %538 = vector.extract_strided_slice %20 {offsets = [1, 0, 2, 1, 0, 0], sizes = [1, 1, 4, 4, 2, 6], strides = [1, 1, 1, 1, 1, 1]} : vector<2x2x6x6x2x6xf32> to vector<1x1x4x4x2x6xf32>
    %539 = vector.shape_cast %538 : vector<1x1x4x4x2x6xf32> to vector<4x4x2x6xf32>
    %540 = vector.shape_cast %539 : vector<4x4x2x6xf32> to vector<32x6xf32>
    %c22_279 = arith.constant 22 : index
    %c0_280 = arith.constant 0 : index
    %c0_281 = arith.constant 0 : index
    %541 = vector.load %arg3[%c22_279, %c0_280, %c0_281] : memref<25x6x12xf32, #tpu.memory_space<vmem>>, vector<1x6x12xf32>
    %542 = vector.shape_cast %541 : vector<1x6x12xf32> to vector<6x12xf32>
    %cst_282 = arith.constant dense<0.000000e+00> : vector<32x12xf32>
    %543 = tpu.matmul %540, %542, %cst_282 {dimension_numbers = #tpu.dot_dimension_numbers<[1], [0], [0], [1], [0, 0, 1, 1], [], []>} : vector<32x6xf32>, vector<6x12xf32>, vector<32x12xf32> -> vector<32x12xf32>
    %544 = arith.addf %537, %543 : vector<32x12xf32>
    %545 = vector.extract_strided_slice %20 {offsets = [1, 1, 2, 1, 0, 0], sizes = [1, 1, 4, 4, 2, 6], strides = [1, 1, 1, 1, 1, 1]} : vector<2x2x6x6x2x6xf32> to vector<1x1x4x4x2x6xf32>
    %546 = vector.shape_cast %545 : vector<1x1x4x4x2x6xf32> to vector<4x4x2x6xf32>
    %547 = vector.shape_cast %546 : vector<4x4x2x6xf32> to vector<32x6xf32>
    %c23_283 = arith.constant 23 : index
    %c0_284 = arith.constant 0 : index
    %c0_285 = arith.constant 0 : index
    %548 = vector.load %arg3[%c23_283, %c0_284, %c0_285] : memref<25x6x12xf32, #tpu.memory_space<vmem>>, vector<1x6x12xf32>
    %549 = vector.shape_cast %548 : vector<1x6x12xf32> to vector<6x12xf32>
    %cst_286 = arith.constant dense<0.000000e+00> : vector<32x12xf32>
    %550 = tpu.matmul %547, %549, %cst_286 {dimension_numbers = #tpu.dot_dimension_numbers<[1], [0], [0], [1], [0, 0, 1, 1], [], []>} : vector<32x6xf32>, vector<6x12xf32>, vector<32x12xf32> -> vector<32x12xf32>
    %551 = arith.addf %544, %550 : vector<32x12xf32>
    %552 = vector.extract_strided_slice %20 {offsets = [1, 0, 2, 2, 0, 0], sizes = [1, 1, 4, 4, 2, 6], strides = [1, 1, 1, 1, 1, 1]} : vector<2x2x6x6x2x6xf32> to vector<1x1x4x4x2x6xf32>
    %553 = vector.shape_cast %552 : vector<1x1x4x4x2x6xf32> to vector<4x4x2x6xf32>
    %554 = vector.shape_cast %553 : vector<4x4x2x6xf32> to vector<32x6xf32>
    %c24_287 = arith.constant 24 : index
    %c0_288 = arith.constant 0 : index
    %c0_289 = arith.constant 0 : index
    %555 = vector.load %arg3[%c24_287, %c0_288, %c0_289] : memref<25x6x12xf32, #tpu.memory_space<vmem>>, vector<1x6x12xf32>
    %556 = vector.shape_cast %555 : vector<1x6x12xf32> to vector<6x12xf32>
    %cst_290 = arith.constant dense<0.000000e+00> : vector<32x12xf32>
    %557 = tpu.matmul %554, %556, %cst_290 {dimension_numbers = #tpu.dot_dimension_numbers<[1], [0], [0], [1], [0, 0, 1, 1], [], []>} : vector<32x6xf32>, vector<6x12xf32>, vector<32x12xf32> -> vector<32x12xf32>
    %558 = arith.addf %551, %557 : vector<32x12xf32>
    %c0_291 = arith.constant 0 : index
    %c0_292 = arith.constant 0 : index
    %559 = vector.load %arg4[%c0_291, %c0_292] : memref<1x12xf32, #tpu.memory_space<vmem>>, vector<1x12xf32>
    %560 = vector.broadcast %559 : vector<1x12xf32> to vector<32x12xf32>
    %561 = arith.addf %558, %560 : vector<32x12xf32>
    %cst_293 = arith.constant 0.000000e+00 : f32
    %562 = vector.broadcast %cst_293 : f32 to vector<32x12xf32>
    %563 = arith.maximumf %561, %562 : vector<32x12xf32>
    %cst_294 = arith.constant 0.000000e+00 : f32
    %564 = vector.broadcast %cst_294 : f32 to vector<32x12xf32>
    %565 = vector.extract_strided_slice %20 {offsets = [1, 1, 0, 0, 0, 0], sizes = [1, 1, 4, 4, 2, 6], strides = [1, 1, 1, 1, 1, 1]} : vector<2x2x6x6x2x6xf32> to vector<1x1x4x4x2x6xf32>
    %566 = vector.shape_cast %565 : vector<1x1x4x4x2x6xf32> to vector<4x4x2x6xf32>
    %567 = vector.shape_cast %566 : vector<4x4x2x6xf32> to vector<32x6xf32>
    %c0_295 = arith.constant 0 : index
    %c0_296 = arith.constant 0 : index
    %c0_297 = arith.constant 0 : index
    %568 = vector.load %arg3[%c0_295, %c0_296, %c0_297] : memref<25x6x12xf32, #tpu.memory_space<vmem>>, vector<1x6x12xf32>
    %569 = vector.shape_cast %568 : vector<1x6x12xf32> to vector<6x12xf32>
    %cst_298 = arith.constant dense<0.000000e+00> : vector<32x12xf32>
    %570 = tpu.matmul %567, %569, %cst_298 {dimension_numbers = #tpu.dot_dimension_numbers<[1], [0], [0], [1], [0, 0, 1, 1], [], []>} : vector<32x6xf32>, vector<6x12xf32>, vector<32x12xf32> -> vector<32x12xf32>
    %571 = arith.addf %564, %570 : vector<32x12xf32>
    %572 = vector.extract_strided_slice %20 {offsets = [1, 0, 0, 1, 0, 0], sizes = [1, 1, 4, 4, 2, 6], strides = [1, 1, 1, 1, 1, 1]} : vector<2x2x6x6x2x6xf32> to vector<1x1x4x4x2x6xf32>
    %573 = vector.shape_cast %572 : vector<1x1x4x4x2x6xf32> to vector<4x4x2x6xf32>
    %574 = vector.shape_cast %573 : vector<4x4x2x6xf32> to vector<32x6xf32>
    %c1_299 = arith.constant 1 : index
    %c0_300 = arith.constant 0 : index
    %c0_301 = arith.constant 0 : index
    %575 = vector.load %arg3[%c1_299, %c0_300, %c0_301] : memref<25x6x12xf32, #tpu.memory_space<vmem>>, vector<1x6x12xf32>
    %576 = vector.shape_cast %575 : vector<1x6x12xf32> to vector<6x12xf32>
    %cst_302 = arith.constant dense<0.000000e+00> : vector<32x12xf32>
    %577 = tpu.matmul %574, %576, %cst_302 {dimension_numbers = #tpu.dot_dimension_numbers<[1], [0], [0], [1], [0, 0, 1, 1], [], []>} : vector<32x6xf32>, vector<6x12xf32>, vector<32x12xf32> -> vector<32x12xf32>
    %578 = arith.addf %571, %577 : vector<32x12xf32>
    %579 = vector.extract_strided_slice %20 {offsets = [1, 1, 0, 1, 0, 0], sizes = [1, 1, 4, 4, 2, 6], strides = [1, 1, 1, 1, 1, 1]} : vector<2x2x6x6x2x6xf32> to vector<1x1x4x4x2x6xf32>
    %580 = vector.shape_cast %579 : vector<1x1x4x4x2x6xf32> to vector<4x4x2x6xf32>
    %581 = vector.shape_cast %580 : vector<4x4x2x6xf32> to vector<32x6xf32>
    %c2_303 = arith.constant 2 : index
    %c0_304 = arith.constant 0 : index
    %c0_305 = arith.constant 0 : index
    %582 = vector.load %arg3[%c2_303, %c0_304, %c0_305] : memref<25x6x12xf32, #tpu.memory_space<vmem>>, vector<1x6x12xf32>
    %583 = vector.shape_cast %582 : vector<1x6x12xf32> to vector<6x12xf32>
    %cst_306 = arith.constant dense<0.000000e+00> : vector<32x12xf32>
    %584 = tpu.matmul %581, %583, %cst_306 {dimension_numbers = #tpu.dot_dimension_numbers<[1], [0], [0], [1], [0, 0, 1, 1], [], []>} : vector<32x6xf32>, vector<6x12xf32>, vector<32x12xf32> -> vector<32x12xf32>
    %585 = arith.addf %578, %584 : vector<32x12xf32>
    %586 = vector.extract_strided_slice %20 {offsets = [1, 0, 0, 2, 0, 0], sizes = [1, 1, 4, 4, 2, 6], strides = [1, 1, 1, 1, 1, 1]} : vector<2x2x6x6x2x6xf32> to vector<1x1x4x4x2x6xf32>
    %587 = vector.shape_cast %586 : vector<1x1x4x4x2x6xf32> to vector<4x4x2x6xf32>
    %588 = vector.shape_cast %587 : vector<4x4x2x6xf32> to vector<32x6xf32>
    %c3_307 = arith.constant 3 : index
    %c0_308 = arith.constant 0 : index
    %c0_309 = arith.constant 0 : index
    %589 = vector.load %arg3[%c3_307, %c0_308, %c0_309] : memref<25x6x12xf32, #tpu.memory_space<vmem>>, vector<1x6x12xf32>
    %590 = vector.shape_cast %589 : vector<1x6x12xf32> to vector<6x12xf32>
    %cst_310 = arith.constant dense<0.000000e+00> : vector<32x12xf32>
    %591 = tpu.matmul %588, %590, %cst_310 {dimension_numbers = #tpu.dot_dimension_numbers<[1], [0], [0], [1], [0, 0, 1, 1], [], []>} : vector<32x6xf32>, vector<6x12xf32>, vector<32x12xf32> -> vector<32x12xf32>
    %592 = arith.addf %585, %591 : vector<32x12xf32>
    %593 = vector.extract_strided_slice %20 {offsets = [1, 1, 0, 2, 0, 0], sizes = [1, 1, 4, 4, 2, 6], strides = [1, 1, 1, 1, 1, 1]} : vector<2x2x6x6x2x6xf32> to vector<1x1x4x4x2x6xf32>
    %594 = vector.shape_cast %593 : vector<1x1x4x4x2x6xf32> to vector<4x4x2x6xf32>
    %595 = vector.shape_cast %594 : vector<4x4x2x6xf32> to vector<32x6xf32>
    %c4_311 = arith.constant 4 : index
    %c0_312 = arith.constant 0 : index
    %c0_313 = arith.constant 0 : index
    %596 = vector.load %arg3[%c4_311, %c0_312, %c0_313] : memref<25x6x12xf32, #tpu.memory_space<vmem>>, vector<1x6x12xf32>
    %597 = vector.shape_cast %596 : vector<1x6x12xf32> to vector<6x12xf32>
    %cst_314 = arith.constant dense<0.000000e+00> : vector<32x12xf32>
    %598 = tpu.matmul %595, %597, %cst_314 {dimension_numbers = #tpu.dot_dimension_numbers<[1], [0], [0], [1], [0, 0, 1, 1], [], []>} : vector<32x6xf32>, vector<6x12xf32>, vector<32x12xf32> -> vector<32x12xf32>
    %599 = arith.addf %592, %598 : vector<32x12xf32>
    %600 = vector.extract_strided_slice %20 {offsets = [0, 1, 1, 0, 0, 0], sizes = [1, 1, 4, 4, 2, 6], strides = [1, 1, 1, 1, 1, 1]} : vector<2x2x6x6x2x6xf32> to vector<1x1x4x4x2x6xf32>
    %601 = vector.shape_cast %600 : vector<1x1x4x4x2x6xf32> to vector<4x4x2x6xf32>
    %602 = vector.shape_cast %601 : vector<4x4x2x6xf32> to vector<32x6xf32>
    %c5_315 = arith.constant 5 : index
    %c0_316 = arith.constant 0 : index
    %c0_317 = arith.constant 0 : index
    %603 = vector.load %arg3[%c5_315, %c0_316, %c0_317] : memref<25x6x12xf32, #tpu.memory_space<vmem>>, vector<1x6x12xf32>
    %604 = vector.shape_cast %603 : vector<1x6x12xf32> to vector<6x12xf32>
    %cst_318 = arith.constant dense<0.000000e+00> : vector<32x12xf32>
    %605 = tpu.matmul %602, %604, %cst_318 {dimension_numbers = #tpu.dot_dimension_numbers<[1], [0], [0], [1], [0, 0, 1, 1], [], []>} : vector<32x6xf32>, vector<6x12xf32>, vector<32x12xf32> -> vector<32x12xf32>
    %606 = arith.addf %599, %605 : vector<32x12xf32>
    %607 = vector.extract_strided_slice %20 {offsets = [0, 0, 1, 1, 0, 0], sizes = [1, 1, 4, 4, 2, 6], strides = [1, 1, 1, 1, 1, 1]} : vector<2x2x6x6x2x6xf32> to vector<1x1x4x4x2x6xf32>
    %608 = vector.shape_cast %607 : vector<1x1x4x4x2x6xf32> to vector<4x4x2x6xf32>
    %609 = vector.shape_cast %608 : vector<4x4x2x6xf32> to vector<32x6xf32>
    %c6_319 = arith.constant 6 : index
    %c0_320 = arith.constant 0 : index
    %c0_321 = arith.constant 0 : index
    %610 = vector.load %arg3[%c6_319, %c0_320, %c0_321] : memref<25x6x12xf32, #tpu.memory_space<vmem>>, vector<1x6x12xf32>
    %611 = vector.shape_cast %610 : vector<1x6x12xf32> to vector<6x12xf32>
    %cst_322 = arith.constant dense<0.000000e+00> : vector<32x12xf32>
    %612 = tpu.matmul %609, %611, %cst_322 {dimension_numbers = #tpu.dot_dimension_numbers<[1], [0], [0], [1], [0, 0, 1, 1], [], []>} : vector<32x6xf32>, vector<6x12xf32>, vector<32x12xf32> -> vector<32x12xf32>
    %613 = arith.addf %606, %612 : vector<32x12xf32>
    %614 = vector.extract_strided_slice %20 {offsets = [0, 1, 1, 1, 0, 0], sizes = [1, 1, 4, 4, 2, 6], strides = [1, 1, 1, 1, 1, 1]} : vector<2x2x6x6x2x6xf32> to vector<1x1x4x4x2x6xf32>
    %615 = vector.shape_cast %614 : vector<1x1x4x4x2x6xf32> to vector<4x4x2x6xf32>
    %616 = vector.shape_cast %615 : vector<4x4x2x6xf32> to vector<32x6xf32>
    %c7_323 = arith.constant 7 : index
    %c0_324 = arith.constant 0 : index
    %c0_325 = arith.constant 0 : index
    %617 = vector.load %arg3[%c7_323, %c0_324, %c0_325] : memref<25x6x12xf32, #tpu.memory_space<vmem>>, vector<1x6x12xf32>
    %618 = vector.shape_cast %617 : vector<1x6x12xf32> to vector<6x12xf32>
    %cst_326 = arith.constant dense<0.000000e+00> : vector<32x12xf32>
    %619 = tpu.matmul %616, %618, %cst_326 {dimension_numbers = #tpu.dot_dimension_numbers<[1], [0], [0], [1], [0, 0, 1, 1], [], []>} : vector<32x6xf32>, vector<6x12xf32>, vector<32x12xf32> -> vector<32x12xf32>
    %620 = arith.addf %613, %619 : vector<32x12xf32>
    %621 = vector.extract_strided_slice %20 {offsets = [0, 0, 1, 2, 0, 0], sizes = [1, 1, 4, 4, 2, 6], strides = [1, 1, 1, 1, 1, 1]} : vector<2x2x6x6x2x6xf32> to vector<1x1x4x4x2x6xf32>
    %622 = vector.shape_cast %621 : vector<1x1x4x4x2x6xf32> to vector<4x4x2x6xf32>
    %623 = vector.shape_cast %622 : vector<4x4x2x6xf32> to vector<32x6xf32>
    %c8_327 = arith.constant 8 : index
    %c0_328 = arith.constant 0 : index
    %c0_329 = arith.constant 0 : index
    %624 = vector.load %arg3[%c8_327, %c0_328, %c0_329] : memref<25x6x12xf32, #tpu.memory_space<vmem>>, vector<1x6x12xf32>
    %625 = vector.shape_cast %624 : vector<1x6x12xf32> to vector<6x12xf32>
    %cst_330 = arith.constant dense<0.000000e+00> : vector<32x12xf32>
    %626 = tpu.matmul %623, %625, %cst_330 {dimension_numbers = #tpu.dot_dimension_numbers<[1], [0], [0], [1], [0, 0, 1, 1], [], []>} : vector<32x6xf32>, vector<6x12xf32>, vector<32x12xf32> -> vector<32x12xf32>
    %627 = arith.addf %620, %626 : vector<32x12xf32>
    %628 = vector.extract_strided_slice %20 {offsets = [0, 1, 1, 2, 0, 0], sizes = [1, 1, 4, 4, 2, 6], strides = [1, 1, 1, 1, 1, 1]} : vector<2x2x6x6x2x6xf32> to vector<1x1x4x4x2x6xf32>
    %629 = vector.shape_cast %628 : vector<1x1x4x4x2x6xf32> to vector<4x4x2x6xf32>
    %630 = vector.shape_cast %629 : vector<4x4x2x6xf32> to vector<32x6xf32>
    %c9_331 = arith.constant 9 : index
    %c0_332 = arith.constant 0 : index
    %c0_333 = arith.constant 0 : index
    %631 = vector.load %arg3[%c9_331, %c0_332, %c0_333] : memref<25x6x12xf32, #tpu.memory_space<vmem>>, vector<1x6x12xf32>
    %632 = vector.shape_cast %631 : vector<1x6x12xf32> to vector<6x12xf32>
    %cst_334 = arith.constant dense<0.000000e+00> : vector<32x12xf32>
    %633 = tpu.matmul %630, %632, %cst_334 {dimension_numbers = #tpu.dot_dimension_numbers<[1], [0], [0], [1], [0, 0, 1, 1], [], []>} : vector<32x6xf32>, vector<6x12xf32>, vector<32x12xf32> -> vector<32x12xf32>
    %634 = arith.addf %627, %633 : vector<32x12xf32>
    %635 = vector.extract_strided_slice %20 {offsets = [1, 1, 1, 0, 0, 0], sizes = [1, 1, 4, 4, 2, 6], strides = [1, 1, 1, 1, 1, 1]} : vector<2x2x6x6x2x6xf32> to vector<1x1x4x4x2x6xf32>
    %636 = vector.shape_cast %635 : vector<1x1x4x4x2x6xf32> to vector<4x4x2x6xf32>
    %637 = vector.shape_cast %636 : vector<4x4x2x6xf32> to vector<32x6xf32>
    %c10_335 = arith.constant 10 : index
    %c0_336 = arith.constant 0 : index
    %c0_337 = arith.constant 0 : index
    %638 = vector.load %arg3[%c10_335, %c0_336, %c0_337] : memref<25x6x12xf32, #tpu.memory_space<vmem>>, vector<1x6x12xf32>
    %639 = vector.shape_cast %638 : vector<1x6x12xf32> to vector<6x12xf32>
    %cst_338 = arith.constant dense<0.000000e+00> : vector<32x12xf32>
    %640 = tpu.matmul %637, %639, %cst_338 {dimension_numbers = #tpu.dot_dimension_numbers<[1], [0], [0], [1], [0, 0, 1, 1], [], []>} : vector<32x6xf32>, vector<6x12xf32>, vector<32x12xf32> -> vector<32x12xf32>
    %641 = arith.addf %634, %640 : vector<32x12xf32>
    %642 = vector.extract_strided_slice %20 {offsets = [1, 0, 1, 1, 0, 0], sizes = [1, 1, 4, 4, 2, 6], strides = [1, 1, 1, 1, 1, 1]} : vector<2x2x6x6x2x6xf32> to vector<1x1x4x4x2x6xf32>
    %643 = vector.shape_cast %642 : vector<1x1x4x4x2x6xf32> to vector<4x4x2x6xf32>
    %644 = vector.shape_cast %643 : vector<4x4x2x6xf32> to vector<32x6xf32>
    %c11_339 = arith.constant 11 : index
    %c0_340 = arith.constant 0 : index
    %c0_341 = arith.constant 0 : index
    %645 = vector.load %arg3[%c11_339, %c0_340, %c0_341] : memref<25x6x12xf32, #tpu.memory_space<vmem>>, vector<1x6x12xf32>
    %646 = vector.shape_cast %645 : vector<1x6x12xf32> to vector<6x12xf32>
    %cst_342 = arith.constant dense<0.000000e+00> : vector<32x12xf32>
    %647 = tpu.matmul %644, %646, %cst_342 {dimension_numbers = #tpu.dot_dimension_numbers<[1], [0], [0], [1], [0, 0, 1, 1], [], []>} : vector<32x6xf32>, vector<6x12xf32>, vector<32x12xf32> -> vector<32x12xf32>
    %648 = arith.addf %641, %647 : vector<32x12xf32>
    %649 = vector.extract_strided_slice %20 {offsets = [1, 1, 1, 1, 0, 0], sizes = [1, 1, 4, 4, 2, 6], strides = [1, 1, 1, 1, 1, 1]} : vector<2x2x6x6x2x6xf32> to vector<1x1x4x4x2x6xf32>
    %650 = vector.shape_cast %649 : vector<1x1x4x4x2x6xf32> to vector<4x4x2x6xf32>
    %651 = vector.shape_cast %650 : vector<4x4x2x6xf32> to vector<32x6xf32>
    %c12_343 = arith.constant 12 : index
    %c0_344 = arith.constant 0 : index
    %c0_345 = arith.constant 0 : index
    %652 = vector.load %arg3[%c12_343, %c0_344, %c0_345] : memref<25x6x12xf32, #tpu.memory_space<vmem>>, vector<1x6x12xf32>
    %653 = vector.shape_cast %652 : vector<1x6x12xf32> to vector<6x12xf32>
    %cst_346 = arith.constant dense<0.000000e+00> : vector<32x12xf32>
    %654 = tpu.matmul %651, %653, %cst_346 {dimension_numbers = #tpu.dot_dimension_numbers<[1], [0], [0], [1], [0, 0, 1, 1], [], []>} : vector<32x6xf32>, vector<6x12xf32>, vector<32x12xf32> -> vector<32x12xf32>
    %655 = arith.addf %648, %654 : vector<32x12xf32>
    %656 = vector.extract_strided_slice %20 {offsets = [1, 0, 1, 2, 0, 0], sizes = [1, 1, 4, 4, 2, 6], strides = [1, 1, 1, 1, 1, 1]} : vector<2x2x6x6x2x6xf32> to vector<1x1x4x4x2x6xf32>
    %657 = vector.shape_cast %656 : vector<1x1x4x4x2x6xf32> to vector<4x4x2x6xf32>
    %658 = vector.shape_cast %657 : vector<4x4x2x6xf32> to vector<32x6xf32>
    %c13_347 = arith.constant 13 : index
    %c0_348 = arith.constant 0 : index
    %c0_349 = arith.constant 0 : index
    %659 = vector.load %arg3[%c13_347, %c0_348, %c0_349] : memref<25x6x12xf32, #tpu.memory_space<vmem>>, vector<1x6x12xf32>
    %660 = vector.shape_cast %659 : vector<1x6x12xf32> to vector<6x12xf32>
    %cst_350 = arith.constant dense<0.000000e+00> : vector<32x12xf32>
    %661 = tpu.matmul %658, %660, %cst_350 {dimension_numbers = #tpu.dot_dimension_numbers<[1], [0], [0], [1], [0, 0, 1, 1], [], []>} : vector<32x6xf32>, vector<6x12xf32>, vector<32x12xf32> -> vector<32x12xf32>
    %662 = arith.addf %655, %661 : vector<32x12xf32>
    %663 = vector.extract_strided_slice %20 {offsets = [1, 1, 1, 2, 0, 0], sizes = [1, 1, 4, 4, 2, 6], strides = [1, 1, 1, 1, 1, 1]} : vector<2x2x6x6x2x6xf32> to vector<1x1x4x4x2x6xf32>
    %664 = vector.shape_cast %663 : vector<1x1x4x4x2x6xf32> to vector<4x4x2x6xf32>
    %665 = vector.shape_cast %664 : vector<4x4x2x6xf32> to vector<32x6xf32>
    %c14_351 = arith.constant 14 : index
    %c0_352 = arith.constant 0 : index
    %c0_353 = arith.constant 0 : index
    %666 = vector.load %arg3[%c14_351, %c0_352, %c0_353] : memref<25x6x12xf32, #tpu.memory_space<vmem>>, vector<1x6x12xf32>
    %667 = vector.shape_cast %666 : vector<1x6x12xf32> to vector<6x12xf32>
    %cst_354 = arith.constant dense<0.000000e+00> : vector<32x12xf32>
    %668 = tpu.matmul %665, %667, %cst_354 {dimension_numbers = #tpu.dot_dimension_numbers<[1], [0], [0], [1], [0, 0, 1, 1], [], []>} : vector<32x6xf32>, vector<6x12xf32>, vector<32x12xf32> -> vector<32x12xf32>
    %669 = arith.addf %662, %668 : vector<32x12xf32>
    %670 = vector.extract_strided_slice %20 {offsets = [0, 1, 2, 0, 0, 0], sizes = [1, 1, 4, 4, 2, 6], strides = [1, 1, 1, 1, 1, 1]} : vector<2x2x6x6x2x6xf32> to vector<1x1x4x4x2x6xf32>
    %671 = vector.shape_cast %670 : vector<1x1x4x4x2x6xf32> to vector<4x4x2x6xf32>
    %672 = vector.shape_cast %671 : vector<4x4x2x6xf32> to vector<32x6xf32>
    %c15_355 = arith.constant 15 : index
    %c0_356 = arith.constant 0 : index
    %c0_357 = arith.constant 0 : index
    %673 = vector.load %arg3[%c15_355, %c0_356, %c0_357] : memref<25x6x12xf32, #tpu.memory_space<vmem>>, vector<1x6x12xf32>
    %674 = vector.shape_cast %673 : vector<1x6x12xf32> to vector<6x12xf32>
    %cst_358 = arith.constant dense<0.000000e+00> : vector<32x12xf32>
    %675 = tpu.matmul %672, %674, %cst_358 {dimension_numbers = #tpu.dot_dimension_numbers<[1], [0], [0], [1], [0, 0, 1, 1], [], []>} : vector<32x6xf32>, vector<6x12xf32>, vector<32x12xf32> -> vector<32x12xf32>
    %676 = arith.addf %669, %675 : vector<32x12xf32>
    %677 = vector.extract_strided_slice %20 {offsets = [0, 0, 2, 1, 0, 0], sizes = [1, 1, 4, 4, 2, 6], strides = [1, 1, 1, 1, 1, 1]} : vector<2x2x6x6x2x6xf32> to vector<1x1x4x4x2x6xf32>
    %678 = vector.shape_cast %677 : vector<1x1x4x4x2x6xf32> to vector<4x4x2x6xf32>
    %679 = vector.shape_cast %678 : vector<4x4x2x6xf32> to vector<32x6xf32>
    %c16_359 = arith.constant 16 : index
    %c0_360 = arith.constant 0 : index
    %c0_361 = arith.constant 0 : index
    %680 = vector.load %arg3[%c16_359, %c0_360, %c0_361] : memref<25x6x12xf32, #tpu.memory_space<vmem>>, vector<1x6x12xf32>
    %681 = vector.shape_cast %680 : vector<1x6x12xf32> to vector<6x12xf32>
    %cst_362 = arith.constant dense<0.000000e+00> : vector<32x12xf32>
    %682 = tpu.matmul %679, %681, %cst_362 {dimension_numbers = #tpu.dot_dimension_numbers<[1], [0], [0], [1], [0, 0, 1, 1], [], []>} : vector<32x6xf32>, vector<6x12xf32>, vector<32x12xf32> -> vector<32x12xf32>
    %683 = arith.addf %676, %682 : vector<32x12xf32>
    %684 = vector.extract_strided_slice %20 {offsets = [0, 1, 2, 1, 0, 0], sizes = [1, 1, 4, 4, 2, 6], strides = [1, 1, 1, 1, 1, 1]} : vector<2x2x6x6x2x6xf32> to vector<1x1x4x4x2x6xf32>
    %685 = vector.shape_cast %684 : vector<1x1x4x4x2x6xf32> to vector<4x4x2x6xf32>
    %686 = vector.shape_cast %685 : vector<4x4x2x6xf32> to vector<32x6xf32>
    %c17_363 = arith.constant 17 : index
    %c0_364 = arith.constant 0 : index
    %c0_365 = arith.constant 0 : index
    %687 = vector.load %arg3[%c17_363, %c0_364, %c0_365] : memref<25x6x12xf32, #tpu.memory_space<vmem>>, vector<1x6x12xf32>
    %688 = vector.shape_cast %687 : vector<1x6x12xf32> to vector<6x12xf32>
    %cst_366 = arith.constant dense<0.000000e+00> : vector<32x12xf32>
    %689 = tpu.matmul %686, %688, %cst_366 {dimension_numbers = #tpu.dot_dimension_numbers<[1], [0], [0], [1], [0, 0, 1, 1], [], []>} : vector<32x6xf32>, vector<6x12xf32>, vector<32x12xf32> -> vector<32x12xf32>
    %690 = arith.addf %683, %689 : vector<32x12xf32>
    %691 = vector.extract_strided_slice %20 {offsets = [0, 0, 2, 2, 0, 0], sizes = [1, 1, 4, 4, 2, 6], strides = [1, 1, 1, 1, 1, 1]} : vector<2x2x6x6x2x6xf32> to vector<1x1x4x4x2x6xf32>
    %692 = vector.shape_cast %691 : vector<1x1x4x4x2x6xf32> to vector<4x4x2x6xf32>
    %693 = vector.shape_cast %692 : vector<4x4x2x6xf32> to vector<32x6xf32>
    %c18_367 = arith.constant 18 : index
    %c0_368 = arith.constant 0 : index
    %c0_369 = arith.constant 0 : index
    %694 = vector.load %arg3[%c18_367, %c0_368, %c0_369] : memref<25x6x12xf32, #tpu.memory_space<vmem>>, vector<1x6x12xf32>
    %695 = vector.shape_cast %694 : vector<1x6x12xf32> to vector<6x12xf32>
    %cst_370 = arith.constant dense<0.000000e+00> : vector<32x12xf32>
    %696 = tpu.matmul %693, %695, %cst_370 {dimension_numbers = #tpu.dot_dimension_numbers<[1], [0], [0], [1], [0, 0, 1, 1], [], []>} : vector<32x6xf32>, vector<6x12xf32>, vector<32x12xf32> -> vector<32x12xf32>
    %697 = arith.addf %690, %696 : vector<32x12xf32>
    %698 = vector.extract_strided_slice %20 {offsets = [0, 1, 2, 2, 0, 0], sizes = [1, 1, 4, 4, 2, 6], strides = [1, 1, 1, 1, 1, 1]} : vector<2x2x6x6x2x6xf32> to vector<1x1x4x4x2x6xf32>
    %699 = vector.shape_cast %698 : vector<1x1x4x4x2x6xf32> to vector<4x4x2x6xf32>
    %700 = vector.shape_cast %699 : vector<4x4x2x6xf32> to vector<32x6xf32>
    %c19_371 = arith.constant 19 : index
    %c0_372 = arith.constant 0 : index
    %c0_373 = arith.constant 0 : index
    %701 = vector.load %arg3[%c19_371, %c0_372, %c0_373] : memref<25x6x12xf32, #tpu.memory_space<vmem>>, vector<1x6x12xf32>
    %702 = vector.shape_cast %701 : vector<1x6x12xf32> to vector<6x12xf32>
    %cst_374 = arith.constant dense<0.000000e+00> : vector<32x12xf32>
    %703 = tpu.matmul %700, %702, %cst_374 {dimension_numbers = #tpu.dot_dimension_numbers<[1], [0], [0], [1], [0, 0, 1, 1], [], []>} : vector<32x6xf32>, vector<6x12xf32>, vector<32x12xf32> -> vector<32x12xf32>
    %704 = arith.addf %697, %703 : vector<32x12xf32>
    %705 = vector.extract_strided_slice %20 {offsets = [1, 1, 2, 0, 0, 0], sizes = [1, 1, 4, 4, 2, 6], strides = [1, 1, 1, 1, 1, 1]} : vector<2x2x6x6x2x6xf32> to vector<1x1x4x4x2x6xf32>
    %706 = vector.shape_cast %705 : vector<1x1x4x4x2x6xf32> to vector<4x4x2x6xf32>
    %707 = vector.shape_cast %706 : vector<4x4x2x6xf32> to vector<32x6xf32>
    %c20_375 = arith.constant 20 : index
    %c0_376 = arith.constant 0 : index
    %c0_377 = arith.constant 0 : index
    %708 = vector.load %arg3[%c20_375, %c0_376, %c0_377] : memref<25x6x12xf32, #tpu.memory_space<vmem>>, vector<1x6x12xf32>
    %709 = vector.shape_cast %708 : vector<1x6x12xf32> to vector<6x12xf32>
    %cst_378 = arith.constant dense<0.000000e+00> : vector<32x12xf32>
    %710 = tpu.matmul %707, %709, %cst_378 {dimension_numbers = #tpu.dot_dimension_numbers<[1], [0], [0], [1], [0, 0, 1, 1], [], []>} : vector<32x6xf32>, vector<6x12xf32>, vector<32x12xf32> -> vector<32x12xf32>
    %711 = arith.addf %704, %710 : vector<32x12xf32>
    %712 = vector.extract_strided_slice %20 {offsets = [1, 0, 2, 1, 0, 0], sizes = [1, 1, 4, 4, 2, 6], strides = [1, 1, 1, 1, 1, 1]} : vector<2x2x6x6x2x6xf32> to vector<1x1x4x4x2x6xf32>
    %713 = vector.shape_cast %712 : vector<1x1x4x4x2x6xf32> to vector<4x4x2x6xf32>
    %714 = vector.shape_cast %713 : vector<4x4x2x6xf32> to vector<32x6xf32>
    %c21_379 = arith.constant 21 : index
    %c0_380 = arith.constant 0 : index
    %c0_381 = arith.constant 0 : index
    %715 = vector.load %arg3[%c21_379, %c0_380, %c0_381] : memref<25x6x12xf32, #tpu.memory_space<vmem>>, vector<1x6x12xf32>
    %716 = vector.shape_cast %715 : vector<1x6x12xf32> to vector<6x12xf32>
    %cst_382 = arith.constant dense<0.000000e+00> : vector<32x12xf32>
    %717 = tpu.matmul %714, %716, %cst_382 {dimension_numbers = #tpu.dot_dimension_numbers<[1], [0], [0], [1], [0, 0, 1, 1], [], []>} : vector<32x6xf32>, vector<6x12xf32>, vector<32x12xf32> -> vector<32x12xf32>
    %718 = arith.addf %711, %717 : vector<32x12xf32>
    %719 = vector.extract_strided_slice %20 {offsets = [1, 1, 2, 1, 0, 0], sizes = [1, 1, 4, 4, 2, 6], strides = [1, 1, 1, 1, 1, 1]} : vector<2x2x6x6x2x6xf32> to vector<1x1x4x4x2x6xf32>
    %720 = vector.shape_cast %719 : vector<1x1x4x4x2x6xf32> to vector<4x4x2x6xf32>
    %721 = vector.shape_cast %720 : vector<4x4x2x6xf32> to vector<32x6xf32>
    %c22_383 = arith.constant 22 : index
    %c0_384 = arith.constant 0 : index
    %c0_385 = arith.constant 0 : index
    %722 = vector.load %arg3[%c22_383, %c0_384, %c0_385] : memref<25x6x12xf32, #tpu.memory_space<vmem>>, vector<1x6x12xf32>
    %723 = vector.shape_cast %722 : vector<1x6x12xf32> to vector<6x12xf32>
    %cst_386 = arith.constant dense<0.000000e+00> : vector<32x12xf32>
    %724 = tpu.matmul %721, %723, %cst_386 {dimension_numbers = #tpu.dot_dimension_numbers<[1], [0], [0], [1], [0, 0, 1, 1], [], []>} : vector<32x6xf32>, vector<6x12xf32>, vector<32x12xf32> -> vector<32x12xf32>
    %725 = arith.addf %718, %724 : vector<32x12xf32>
    %726 = vector.extract_strided_slice %20 {offsets = [1, 0, 2, 2, 0, 0], sizes = [1, 1, 4, 4, 2, 6], strides = [1, 1, 1, 1, 1, 1]} : vector<2x2x6x6x2x6xf32> to vector<1x1x4x4x2x6xf32>
    %727 = vector.shape_cast %726 : vector<1x1x4x4x2x6xf32> to vector<4x4x2x6xf32>
    %728 = vector.shape_cast %727 : vector<4x4x2x6xf32> to vector<32x6xf32>
    %c23_387 = arith.constant 23 : index
    %c0_388 = arith.constant 0 : index
    %c0_389 = arith.constant 0 : index
    %729 = vector.load %arg3[%c23_387, %c0_388, %c0_389] : memref<25x6x12xf32, #tpu.memory_space<vmem>>, vector<1x6x12xf32>
    %730 = vector.shape_cast %729 : vector<1x6x12xf32> to vector<6x12xf32>
    %cst_390 = arith.constant dense<0.000000e+00> : vector<32x12xf32>
    %731 = tpu.matmul %728, %730, %cst_390 {dimension_numbers = #tpu.dot_dimension_numbers<[1], [0], [0], [1], [0, 0, 1, 1], [], []>} : vector<32x6xf32>, vector<6x12xf32>, vector<32x12xf32> -> vector<32x12xf32>
    %732 = arith.addf %725, %731 : vector<32x12xf32>
    %733 = vector.extract_strided_slice %20 {offsets = [1, 1, 2, 2, 0, 0], sizes = [1, 1, 4, 4, 2, 6], strides = [1, 1, 1, 1, 1, 1]} : vector<2x2x6x6x2x6xf32> to vector<1x1x4x4x2x6xf32>
    %734 = vector.shape_cast %733 : vector<1x1x4x4x2x6xf32> to vector<4x4x2x6xf32>
    %735 = vector.shape_cast %734 : vector<4x4x2x6xf32> to vector<32x6xf32>
    %c24_391 = arith.constant 24 : index
    %c0_392 = arith.constant 0 : index
    %c0_393 = arith.constant 0 : index
    %736 = vector.load %arg3[%c24_391, %c0_392, %c0_393] : memref<25x6x12xf32, #tpu.memory_space<vmem>>, vector<1x6x12xf32>
    %737 = vector.shape_cast %736 : vector<1x6x12xf32> to vector<6x12xf32>
    %cst_394 = arith.constant dense<0.000000e+00> : vector<32x12xf32>
    %738 = tpu.matmul %735, %737, %cst_394 {dimension_numbers = #tpu.dot_dimension_numbers<[1], [0], [0], [1], [0, 0, 1, 1], [], []>} : vector<32x6xf32>, vector<6x12xf32>, vector<32x12xf32> -> vector<32x12xf32>
    %739 = arith.addf %732, %738 : vector<32x12xf32>
    %c0_395 = arith.constant 0 : index
    %c0_396 = arith.constant 0 : index
    %740 = vector.load %arg4[%c0_395, %c0_396] : memref<1x12xf32, #tpu.memory_space<vmem>>, vector<1x12xf32>
    %741 = vector.broadcast %740 : vector<1x12xf32> to vector<32x12xf32>
    %742 = arith.addf %739, %741 : vector<32x12xf32>
    %cst_397 = arith.constant 0.000000e+00 : f32
    %743 = vector.broadcast %cst_397 : f32 to vector<32x12xf32>
    %744 = arith.maximumf %742, %743 : vector<32x12xf32>
    %745 = arith.maximumf %201, %382 : vector<32x12xf32>
    %746 = arith.maximumf %563, %744 : vector<32x12xf32>
    %747 = arith.maximumf %745, %746 : vector<32x12xf32>
    %748 = vector.shape_cast %747 : vector<32x12xf32> to vector<16x2x12xf32>
    %cst_398 = arith.constant 0.000000e+00 : f32
    %749 = vector.broadcast %cst_398 : f32 to vector<2x120xf32>
    %750 = vector.extract_strided_slice %748 {offsets = [0, 0, 0], sizes = [1, 2, 12], strides = [1, 1, 1]} : vector<16x2x12xf32> to vector<1x2x12xf32>
    %751 = vector.shape_cast %750 : vector<1x2x12xf32> to vector<2x12xf32>
    %c0_399 = arith.constant 0 : index
    %c0_400 = arith.constant 0 : index
    %c0_401 = arith.constant 0 : index
    %752 = vector.load %arg5[%c0_399, %c0_400, %c0_401] : memref<16x12x120xf32, #tpu.memory_space<vmem>>, vector<1x12x120xf32>
    %753 = vector.shape_cast %752 : vector<1x12x120xf32> to vector<12x120xf32>
    %cst_402 = arith.constant dense<0.000000e+00> : vector<2x120xf32>
    %754 = tpu.matmul %751, %753, %cst_402 {dimension_numbers = #tpu.dot_dimension_numbers<[1], [0], [0], [1], [0, 0, 1, 1], [], []>} : vector<2x12xf32>, vector<12x120xf32>, vector<2x120xf32> -> vector<2x120xf32>
    %755 = arith.addf %749, %754 : vector<2x120xf32>
    %756 = vector.extract_strided_slice %748 {offsets = [1, 0, 0], sizes = [1, 2, 12], strides = [1, 1, 1]} : vector<16x2x12xf32> to vector<1x2x12xf32>
    %757 = vector.shape_cast %756 : vector<1x2x12xf32> to vector<2x12xf32>
    %c1_403 = arith.constant 1 : index
    %c0_404 = arith.constant 0 : index
    %c0_405 = arith.constant 0 : index
    %758 = vector.load %arg5[%c1_403, %c0_404, %c0_405] : memref<16x12x120xf32, #tpu.memory_space<vmem>>, vector<1x12x120xf32>
    %759 = vector.shape_cast %758 : vector<1x12x120xf32> to vector<12x120xf32>
    %cst_406 = arith.constant dense<0.000000e+00> : vector<2x120xf32>
    %760 = tpu.matmul %757, %759, %cst_406 {dimension_numbers = #tpu.dot_dimension_numbers<[1], [0], [0], [1], [0, 0, 1, 1], [], []>} : vector<2x12xf32>, vector<12x120xf32>, vector<2x120xf32> -> vector<2x120xf32>
    %761 = arith.addf %755, %760 : vector<2x120xf32>
    %762 = vector.extract_strided_slice %748 {offsets = [2, 0, 0], sizes = [1, 2, 12], strides = [1, 1, 1]} : vector<16x2x12xf32> to vector<1x2x12xf32>
    %763 = vector.shape_cast %762 : vector<1x2x12xf32> to vector<2x12xf32>
    %c2_407 = arith.constant 2 : index
    %c0_408 = arith.constant 0 : index
    %c0_409 = arith.constant 0 : index
    %764 = vector.load %arg5[%c2_407, %c0_408, %c0_409] : memref<16x12x120xf32, #tpu.memory_space<vmem>>, vector<1x12x120xf32>
    %765 = vector.shape_cast %764 : vector<1x12x120xf32> to vector<12x120xf32>
    %cst_410 = arith.constant dense<0.000000e+00> : vector<2x120xf32>
    %766 = tpu.matmul %763, %765, %cst_410 {dimension_numbers = #tpu.dot_dimension_numbers<[1], [0], [0], [1], [0, 0, 1, 1], [], []>} : vector<2x12xf32>, vector<12x120xf32>, vector<2x120xf32> -> vector<2x120xf32>
    %767 = arith.addf %761, %766 : vector<2x120xf32>
    %768 = vector.extract_strided_slice %748 {offsets = [3, 0, 0], sizes = [1, 2, 12], strides = [1, 1, 1]} : vector<16x2x12xf32> to vector<1x2x12xf32>
    %769 = vector.shape_cast %768 : vector<1x2x12xf32> to vector<2x12xf32>
    %c3_411 = arith.constant 3 : index
    %c0_412 = arith.constant 0 : index
    %c0_413 = arith.constant 0 : index
    %770 = vector.load %arg5[%c3_411, %c0_412, %c0_413] : memref<16x12x120xf32, #tpu.memory_space<vmem>>, vector<1x12x120xf32>
    %771 = vector.shape_cast %770 : vector<1x12x120xf32> to vector<12x120xf32>
    %cst_414 = arith.constant dense<0.000000e+00> : vector<2x120xf32>
    %772 = tpu.matmul %769, %771, %cst_414 {dimension_numbers = #tpu.dot_dimension_numbers<[1], [0], [0], [1], [0, 0, 1, 1], [], []>} : vector<2x12xf32>, vector<12x120xf32>, vector<2x120xf32> -> vector<2x120xf32>
    %773 = arith.addf %767, %772 : vector<2x120xf32>
    %774 = vector.extract_strided_slice %748 {offsets = [4, 0, 0], sizes = [1, 2, 12], strides = [1, 1, 1]} : vector<16x2x12xf32> to vector<1x2x12xf32>
    %775 = vector.shape_cast %774 : vector<1x2x12xf32> to vector<2x12xf32>
    %c4_415 = arith.constant 4 : index
    %c0_416 = arith.constant 0 : index
    %c0_417 = arith.constant 0 : index
    %776 = vector.load %arg5[%c4_415, %c0_416, %c0_417] : memref<16x12x120xf32, #tpu.memory_space<vmem>>, vector<1x12x120xf32>
    %777 = vector.shape_cast %776 : vector<1x12x120xf32> to vector<12x120xf32>
    %cst_418 = arith.constant dense<0.000000e+00> : vector<2x120xf32>
    %778 = tpu.matmul %775, %777, %cst_418 {dimension_numbers = #tpu.dot_dimension_numbers<[1], [0], [0], [1], [0, 0, 1, 1], [], []>} : vector<2x12xf32>, vector<12x120xf32>, vector<2x120xf32> -> vector<2x120xf32>
    %779 = arith.addf %773, %778 : vector<2x120xf32>
    %780 = vector.extract_strided_slice %748 {offsets = [5, 0, 0], sizes = [1, 2, 12], strides = [1, 1, 1]} : vector<16x2x12xf32> to vector<1x2x12xf32>
    %781 = vector.shape_cast %780 : vector<1x2x12xf32> to vector<2x12xf32>
    %c5_419 = arith.constant 5 : index
    %c0_420 = arith.constant 0 : index
    %c0_421 = arith.constant 0 : index
    %782 = vector.load %arg5[%c5_419, %c0_420, %c0_421] : memref<16x12x120xf32, #tpu.memory_space<vmem>>, vector<1x12x120xf32>
    %783 = vector.shape_cast %782 : vector<1x12x120xf32> to vector<12x120xf32>
    %cst_422 = arith.constant dense<0.000000e+00> : vector<2x120xf32>
    %784 = tpu.matmul %781, %783, %cst_422 {dimension_numbers = #tpu.dot_dimension_numbers<[1], [0], [0], [1], [0, 0, 1, 1], [], []>} : vector<2x12xf32>, vector<12x120xf32>, vector<2x120xf32> -> vector<2x120xf32>
    %785 = arith.addf %779, %784 : vector<2x120xf32>
    %786 = vector.extract_strided_slice %748 {offsets = [6, 0, 0], sizes = [1, 2, 12], strides = [1, 1, 1]} : vector<16x2x12xf32> to vector<1x2x12xf32>
    %787 = vector.shape_cast %786 : vector<1x2x12xf32> to vector<2x12xf32>
    %c6_423 = arith.constant 6 : index
    %c0_424 = arith.constant 0 : index
    %c0_425 = arith.constant 0 : index
    %788 = vector.load %arg5[%c6_423, %c0_424, %c0_425] : memref<16x12x120xf32, #tpu.memory_space<vmem>>, vector<1x12x120xf32>
    %789 = vector.shape_cast %788 : vector<1x12x120xf32> to vector<12x120xf32>
    %cst_426 = arith.constant dense<0.000000e+00> : vector<2x120xf32>
    %790 = tpu.matmul %787, %789, %cst_426 {dimension_numbers = #tpu.dot_dimension_numbers<[1], [0], [0], [1], [0, 0, 1, 1], [], []>} : vector<2x12xf32>, vector<12x120xf32>, vector<2x120xf32> -> vector<2x120xf32>
    %791 = arith.addf %785, %790 : vector<2x120xf32>
    %792 = vector.extract_strided_slice %748 {offsets = [7, 0, 0], sizes = [1, 2, 12], strides = [1, 1, 1]} : vector<16x2x12xf32> to vector<1x2x12xf32>
    %793 = vector.shape_cast %792 : vector<1x2x12xf32> to vector<2x12xf32>
    %c7_427 = arith.constant 7 : index
    %c0_428 = arith.constant 0 : index
    %c0_429 = arith.constant 0 : index
    %794 = vector.load %arg5[%c7_427, %c0_428, %c0_429] : memref<16x12x120xf32, #tpu.memory_space<vmem>>, vector<1x12x120xf32>
    %795 = vector.shape_cast %794 : vector<1x12x120xf32> to vector<12x120xf32>
    %cst_430 = arith.constant dense<0.000000e+00> : vector<2x120xf32>
    %796 = tpu.matmul %793, %795, %cst_430 {dimension_numbers = #tpu.dot_dimension_numbers<[1], [0], [0], [1], [0, 0, 1, 1], [], []>} : vector<2x12xf32>, vector<12x120xf32>, vector<2x120xf32> -> vector<2x120xf32>
    %797 = arith.addf %791, %796 : vector<2x120xf32>
    %798 = vector.extract_strided_slice %748 {offsets = [8, 0, 0], sizes = [1, 2, 12], strides = [1, 1, 1]} : vector<16x2x12xf32> to vector<1x2x12xf32>
    %799 = vector.shape_cast %798 : vector<1x2x12xf32> to vector<2x12xf32>
    %c8_431 = arith.constant 8 : index
    %c0_432 = arith.constant 0 : index
    %c0_433 = arith.constant 0 : index
    %800 = vector.load %arg5[%c8_431, %c0_432, %c0_433] : memref<16x12x120xf32, #tpu.memory_space<vmem>>, vector<1x12x120xf32>
    %801 = vector.shape_cast %800 : vector<1x12x120xf32> to vector<12x120xf32>
    %cst_434 = arith.constant dense<0.000000e+00> : vector<2x120xf32>
    %802 = tpu.matmul %799, %801, %cst_434 {dimension_numbers = #tpu.dot_dimension_numbers<[1], [0], [0], [1], [0, 0, 1, 1], [], []>} : vector<2x12xf32>, vector<12x120xf32>, vector<2x120xf32> -> vector<2x120xf32>
    %803 = arith.addf %797, %802 : vector<2x120xf32>
    %804 = vector.extract_strided_slice %748 {offsets = [9, 0, 0], sizes = [1, 2, 12], strides = [1, 1, 1]} : vector<16x2x12xf32> to vector<1x2x12xf32>
    %805 = vector.shape_cast %804 : vector<1x2x12xf32> to vector<2x12xf32>
    %c9_435 = arith.constant 9 : index
    %c0_436 = arith.constant 0 : index
    %c0_437 = arith.constant 0 : index
    %806 = vector.load %arg5[%c9_435, %c0_436, %c0_437] : memref<16x12x120xf32, #tpu.memory_space<vmem>>, vector<1x12x120xf32>
    %807 = vector.shape_cast %806 : vector<1x12x120xf32> to vector<12x120xf32>
    %cst_438 = arith.constant dense<0.000000e+00> : vector<2x120xf32>
    %808 = tpu.matmul %805, %807, %cst_438 {dimension_numbers = #tpu.dot_dimension_numbers<[1], [0], [0], [1], [0, 0, 1, 1], [], []>} : vector<2x12xf32>, vector<12x120xf32>, vector<2x120xf32> -> vector<2x120xf32>
    %809 = arith.addf %803, %808 : vector<2x120xf32>
    %810 = vector.extract_strided_slice %748 {offsets = [10, 0, 0], sizes = [1, 2, 12], strides = [1, 1, 1]} : vector<16x2x12xf32> to vector<1x2x12xf32>
    %811 = vector.shape_cast %810 : vector<1x2x12xf32> to vector<2x12xf32>
    %c10_439 = arith.constant 10 : index
    %c0_440 = arith.constant 0 : index
    %c0_441 = arith.constant 0 : index
    %812 = vector.load %arg5[%c10_439, %c0_440, %c0_441] : memref<16x12x120xf32, #tpu.memory_space<vmem>>, vector<1x12x120xf32>
    %813 = vector.shape_cast %812 : vector<1x12x120xf32> to vector<12x120xf32>
    %cst_442 = arith.constant dense<0.000000e+00> : vector<2x120xf32>
    %814 = tpu.matmul %811, %813, %cst_442 {dimension_numbers = #tpu.dot_dimension_numbers<[1], [0], [0], [1], [0, 0, 1, 1], [], []>} : vector<2x12xf32>, vector<12x120xf32>, vector<2x120xf32> -> vector<2x120xf32>
    %815 = arith.addf %809, %814 : vector<2x120xf32>
    %816 = vector.extract_strided_slice %748 {offsets = [11, 0, 0], sizes = [1, 2, 12], strides = [1, 1, 1]} : vector<16x2x12xf32> to vector<1x2x12xf32>
    %817 = vector.shape_cast %816 : vector<1x2x12xf32> to vector<2x12xf32>
    %c11_443 = arith.constant 11 : index
    %c0_444 = arith.constant 0 : index
    %c0_445 = arith.constant 0 : index
    %818 = vector.load %arg5[%c11_443, %c0_444, %c0_445] : memref<16x12x120xf32, #tpu.memory_space<vmem>>, vector<1x12x120xf32>
    %819 = vector.shape_cast %818 : vector<1x12x120xf32> to vector<12x120xf32>
    %cst_446 = arith.constant dense<0.000000e+00> : vector<2x120xf32>
    %820 = tpu.matmul %817, %819, %cst_446 {dimension_numbers = #tpu.dot_dimension_numbers<[1], [0], [0], [1], [0, 0, 1, 1], [], []>} : vector<2x12xf32>, vector<12x120xf32>, vector<2x120xf32> -> vector<2x120xf32>
    %821 = arith.addf %815, %820 : vector<2x120xf32>
    %822 = vector.extract_strided_slice %748 {offsets = [12, 0, 0], sizes = [1, 2, 12], strides = [1, 1, 1]} : vector<16x2x12xf32> to vector<1x2x12xf32>
    %823 = vector.shape_cast %822 : vector<1x2x12xf32> to vector<2x12xf32>
    %c12_447 = arith.constant 12 : index
    %c0_448 = arith.constant 0 : index
    %c0_449 = arith.constant 0 : index
    %824 = vector.load %arg5[%c12_447, %c0_448, %c0_449] : memref<16x12x120xf32, #tpu.memory_space<vmem>>, vector<1x12x120xf32>
    %825 = vector.shape_cast %824 : vector<1x12x120xf32> to vector<12x120xf32>
    %cst_450 = arith.constant dense<0.000000e+00> : vector<2x120xf32>
    %826 = tpu.matmul %823, %825, %cst_450 {dimension_numbers = #tpu.dot_dimension_numbers<[1], [0], [0], [1], [0, 0, 1, 1], [], []>} : vector<2x12xf32>, vector<12x120xf32>, vector<2x120xf32> -> vector<2x120xf32>
    %827 = arith.addf %821, %826 : vector<2x120xf32>
    %828 = vector.extract_strided_slice %748 {offsets = [13, 0, 0], sizes = [1, 2, 12], strides = [1, 1, 1]} : vector<16x2x12xf32> to vector<1x2x12xf32>
    %829 = vector.shape_cast %828 : vector<1x2x12xf32> to vector<2x12xf32>
    %c13_451 = arith.constant 13 : index
    %c0_452 = arith.constant 0 : index
    %c0_453 = arith.constant 0 : index
    %830 = vector.load %arg5[%c13_451, %c0_452, %c0_453] : memref<16x12x120xf32, #tpu.memory_space<vmem>>, vector<1x12x120xf32>
    %831 = vector.shape_cast %830 : vector<1x12x120xf32> to vector<12x120xf32>
    %cst_454 = arith.constant dense<0.000000e+00> : vector<2x120xf32>
    %832 = tpu.matmul %829, %831, %cst_454 {dimension_numbers = #tpu.dot_dimension_numbers<[1], [0], [0], [1], [0, 0, 1, 1], [], []>} : vector<2x12xf32>, vector<12x120xf32>, vector<2x120xf32> -> vector<2x120xf32>
    %833 = arith.addf %827, %832 : vector<2x120xf32>
    %834 = vector.extract_strided_slice %748 {offsets = [14, 0, 0], sizes = [1, 2, 12], strides = [1, 1, 1]} : vector<16x2x12xf32> to vector<1x2x12xf32>
    %835 = vector.shape_cast %834 : vector<1x2x12xf32> to vector<2x12xf32>
    %c14_455 = arith.constant 14 : index
    %c0_456 = arith.constant 0 : index
    %c0_457 = arith.constant 0 : index
    %836 = vector.load %arg5[%c14_455, %c0_456, %c0_457] : memref<16x12x120xf32, #tpu.memory_space<vmem>>, vector<1x12x120xf32>
    %837 = vector.shape_cast %836 : vector<1x12x120xf32> to vector<12x120xf32>
    %cst_458 = arith.constant dense<0.000000e+00> : vector<2x120xf32>
    %838 = tpu.matmul %835, %837, %cst_458 {dimension_numbers = #tpu.dot_dimension_numbers<[1], [0], [0], [1], [0, 0, 1, 1], [], []>} : vector<2x12xf32>, vector<12x120xf32>, vector<2x120xf32> -> vector<2x120xf32>
    %839 = arith.addf %833, %838 : vector<2x120xf32>
    %840 = vector.extract_strided_slice %748 {offsets = [15, 0, 0], sizes = [1, 2, 12], strides = [1, 1, 1]} : vector<16x2x12xf32> to vector<1x2x12xf32>
    %841 = vector.shape_cast %840 : vector<1x2x12xf32> to vector<2x12xf32>
    %c15_459 = arith.constant 15 : index
    %c0_460 = arith.constant 0 : index
    %c0_461 = arith.constant 0 : index
    %842 = vector.load %arg5[%c15_459, %c0_460, %c0_461] : memref<16x12x120xf32, #tpu.memory_space<vmem>>, vector<1x12x120xf32>
    %843 = vector.shape_cast %842 : vector<1x12x120xf32> to vector<12x120xf32>
    %cst_462 = arith.constant dense<0.000000e+00> : vector<2x120xf32>
    %844 = tpu.matmul %841, %843, %cst_462 {dimension_numbers = #tpu.dot_dimension_numbers<[1], [0], [0], [1], [0, 0, 1, 1], [], []>} : vector<2x12xf32>, vector<12x120xf32>, vector<2x120xf32> -> vector<2x120xf32>
    %845 = arith.addf %839, %844 : vector<2x120xf32>
    %c0_463 = arith.constant 0 : index
    %c0_464 = arith.constant 0 : index
    %846 = vector.load %arg6[%c0_463, %c0_464] : memref<1x120xf32, #tpu.memory_space<vmem>>, vector<1x120xf32>
    %847 = vector.broadcast %846 : vector<1x120xf32> to vector<2x120xf32>
    %848 = arith.addf %845, %847 : vector<2x120xf32>
    %cst_465 = arith.constant 0.000000e+00 : f32
    %849 = vector.broadcast %cst_465 : f32 to vector<2x120xf32>
    %850 = arith.maximumf %848, %849 : vector<2x120xf32>
    %c0_466 = arith.constant 0 : index
    %c0_467 = arith.constant 0 : index
    %851 = vector.load %arg7[%c0_466, %c0_467] : memref<120x60xf32, #tpu.memory_space<vmem>>, vector<120x60xf32>
    %cst_468 = arith.constant dense<0.000000e+00> : vector<2x60xf32>
    %852 = tpu.matmul %850, %851, %cst_468 {dimension_numbers = #tpu.dot_dimension_numbers<[1], [0], [0], [1], [0, 0, 1, 1], [], []>} : vector<2x120xf32>, vector<120x60xf32>, vector<2x60xf32> -> vector<2x60xf32>
    %c0_469 = arith.constant 0 : index
    %c0_470 = arith.constant 0 : index
    %853 = vector.load %arg8[%c0_469, %c0_470] : memref<1x60xf32, #tpu.memory_space<vmem>>, vector<1x60xf32>
    %854 = vector.broadcast %853 : vector<1x60xf32> to vector<2x60xf32>
    %855 = arith.addf %852, %854 : vector<2x60xf32>
    %cst_471 = arith.constant 0.000000e+00 : f32
    %856 = vector.broadcast %cst_471 : f32 to vector<2x60xf32>
    %857 = arith.maximumf %855, %856 : vector<2x60xf32>
    %c0_472 = arith.constant 0 : index
    %c0_473 = arith.constant 0 : index
    %858 = vector.load %arg9[%c0_472, %c0_473] : memref<60x10xf32, #tpu.memory_space<vmem>>, vector<60x10xf32>
    %cst_474 = arith.constant dense<0.000000e+00> : vector<2x10xf32>
    %859 = tpu.matmul %857, %858, %cst_474 {dimension_numbers = #tpu.dot_dimension_numbers<[1], [0], [0], [1], [0, 0, 1, 1], [], []>} : vector<2x60xf32>, vector<60x10xf32>, vector<2x10xf32> -> vector<2x10xf32>
    %c0_475 = arith.constant 0 : index
    %c0_476 = arith.constant 0 : index
    %860 = vector.load %arg10[%c0_475, %c0_476] : memref<1x10xf32, #tpu.memory_space<vmem>>, vector<1x10xf32>
    %861 = vector.broadcast %860 : vector<1x10xf32> to vector<2x10xf32>
    %862 = arith.addf %859, %861 : vector<2x10xf32>
    %c0_477 = arith.constant 0 : index
    %c0_478 = arith.constant 0 : index
    %863 = vector.load %arg11[%c0_477, %c0_478] : memref<2x10xf32, #tpu.memory_space<vmem>>, vector<2x10xf32>
    tpu.vector_store %arg11[%c0_477, %c0_478], %862 {strides = array<i32>} : memref<2x10xf32, #tpu.memory_space<vmem>>, vector<2x10xf32>,
    return
  }
}

</mosaic_0001>

<bundles_post_ra>
// kernel: forward.1
= control target key start
LH: loop header
LB: loop body
LE: loop exit
PB: predicated region body
PF: predicated region fallthrough
CT: control target
= control target key end

     0   :  { %vm627_vm0 = vcmask 1040384   ;;  %vm194_vm1 = vcmask 203776   ;;  %vm17268_vm2 = vmmov 1   ;;  %s21302_s0 = inlined_call_operand.vmem [shape: f32[1152,25], index: 0, kind: input, shape index: {}]   ;;  %s21303_s1 = inlined_call_operand.vmem [shape: f32[25,6], index: 1, kind: input, shape index: {}]   ;;  %s21304_s2 = inlined_call_operand.vmem [shape: f32[1,6], index: 2, kind: input, shape index: {}]   ;;  %s21305_s3 = inlined_call_operand.vmem [shape: f32[25,6,12], index: 3, kind: input, shape index: {}]   ;;  %s21306_s4 = inlined_call_operand.vmem [shape: f32[1,12], index: 4, kind: input, shape index: {}]   ;;  %s21307_s5 = inlined_call_operand.vmem [shape: f32[16,12,120], index: 5, kind: input, shape index: {}]   ;;  %s21308_s6 = inlined_call_operand.vmem [shape: f32[1,120], index: 6, kind: input, shape index: {}]   ;;  %s21309_s7 = inlined_call_operand.vmem [shape: f32[120,60], index: 7, kind: input, shape index: {}]   ;;  %s21310_s8 = inlined_call_operand.vmem [shape: f32[1,60], index: 8, kind: input, shape index: {}]   ;;  %s21311_s9 = inlined_call_operand.vmem [shape: f32[60,10], index: 9, kind: input, shape index: {}]   ;;  %s21312_s10 = inlined_call_operand.vmem [shape: f32[1,10], index: 10, kind: input, shape index: {}]   ;;  %s21313_s11 = inlined_call_operand.hbm [shape: f32[2,10], index: 11, kind: output, shape index: {}]  }
   0x1   :  { %v183_v0 = vld [vmem:[%s21303_s1] sm:$0xff]  ;;  %v184_v1 = vld [vmem:[%s21303_s1 + $0x8] sm:$0xff]  ;;  %v185_v2 = vld [vmem:[%s21303_s1 + $0x10] sm:$0xff] }
   0x2   :  { %v16734_v3 = vpack.c.bf16 %v184_v1, %v183_v0  ;;  %v186_v4 = vld [vmem:[%s21303_s1 + $0x18] sm:$0x1]  ;;  %v39_v5 = vld [vmem:[%s21302_s0] sm:$0xff]  ;;  %vm16739_vm3 = vmpackc.low %vm627_vm0, %vm17268_vm2 }
   0x3   :  { %v16738_v6 = vpack.c.bf16 %v186_v4, %v185_v2  ;;  %15554 = vmatprep.mubr.msk.f32.mxu0 %vm194_vm1, %v39_v5  ;;  %v40_v7 = vld [vmem:[%s21302_s0 + $0x8] sm:$0xff]  ;;  %v41_v8 = vld [vmem:[%s21302_s0 + $0x10] sm:$0xff]  ;;  %v42_v9 = vld [vmem:[%s21302_s0 + $0x18] sm:$0xff] }
   0x4   :  { %16735 = vmatprep.subr.bf16.mxu0 %v16734_v3  ;;  %v43_v10 = vld [vmem:[%s21302_s0 + $0x20] sm:$0xff]  ;;  %v44_v11 = vld [vmem:[%s21302_s0 + $0x28] sm:$0xff]  ;;  %v45_v12 = vld [vmem:[%s21302_s0 + $0x30] sm:$0xff] }
   0x5   :  { %16737 = vmatpush3.bf16.msra.mxu0 %v16734_v3  ;;  %v46_v13 = vld [vmem:[%s21302_s0 + $0x38] sm:$0xff]  ;;  %v47_v14 = vld [vmem:[%s21302_s0 + $0x40] sm:$0xff]  ;;  %v48_v15 = vld [vmem:[%s21302_s0 + $0x48] sm:$0xff] }
   0x6   :  { %16740 = vmatprep.subr.msk.bf16.mxu0 %vm16739_vm3, %v16738_v6  ;;  %v49_v16 = vld [vmem:[%s21302_s0 + $0x50] sm:$0xff] }
   0x9   :  { %16743 = vmatpush3.bf16.msk.msra.mxu0 %vm16739_vm3, %v16738_v6 }
   0xc   :  { %15555 = vmatmul.mubr.msk.f32.vlgmr.msra.gmra.mrb[0].mxu0 %vm194_vm1, %v40_v7 }
   0xd   :  { %15557 = vmatprep.mubr.msk.f32.mxu0 %vm194_vm1, %v41_v8 }
  0x10   :  { %15558 = vmatmul.mubr.msk.f32.gmra.mrb[2].mxu0 %vm194_vm1, %v42_v9 }
  0x11   :  { %15560 = vmatprep.mubr.msk.f32.mxu0 %vm194_vm1, %v43_v10 }
  0x14   :  { %15561 = vmatmul.mubr.msk.f32.gmra.mrb[4].mxu0 %vm194_vm1, %v44_v11 }
  0x15   :  { %15563 = vmatprep.mubr.msk.f32.mxu0 %vm194_vm1, %v45_v12 }
  0x18   :  { %15564 = vmatmul.mubr.msk.f32.gmra.mrb[6].mxu0 %vm194_vm1, %v46_v13 }
  0x19   :  { %15566 = vmatprep.mubr.msk.f32.mxu0 %vm194_vm1, %v47_v14 }
  0x1a   :  { %16 = vsyncpa [#allocation3], 0  ;;  %v50_v17 = vld [vmem:[%s21302_s0 + $0x58] sm:$0xff]  ;;  %v51_v18 = vld [vmem:[%s21302_s0 + $0x60] sm:$0xff]  ;;  %vm2396_vm4 = vcmask 1045504   ;;  %vm2387_vm5 = vcmask 48128  }
  0x1b   :  { %v52_v19 = vld [vmem:[%s21302_s0 + $0x68] sm:$0xff]  ;;  %v53_v20 = vld [vmem:[%s21302_s0 + $0x70] sm:$0xff]  ;;  %v54_v21 = vld [vmem:[%s21302_s0 + $0x78] sm:$0xff]  ;;  %vm12617_vm6 = vcmask 1043456   ;;  %vm17271_vm8 = vmmov 0   ;;  %vm12614_vm9 = vcmask 97280  }
  0x1c   :  { %15567 = vmatmul.mubr.msk.f32.gmra.mrb[8].mxu0 %vm194_vm1, %v48_v15  ;;  %v55_v22 = vld [vmem:[%s21302_s0 + $0x80] sm:$0xff]  ;;  %v56_v23 = vld [vmem:[%s21302_s0 + $0x88] sm:$0xff]  ;;  %v57_v24 = vld [vmem:[%s21302_s0 + $0x90] sm:$0xff]  ;;  %vm13903_vm10 = vcmask 982016   ;;  %vm13993_vm11 = vcmask 490496   ;;  %vm14070_vm12 = vcmask 74752  }
  0x1d   :  { %15569 = vmatprep.mubr.msk.f32.mxu0 %vm194_vm1, %v49_v16  ;;  %v58_v25 = vld [vmem:[%s21302_s0 + $0x98] sm:$0xff]  ;;  %v59_v26 = vld [vmem:[%s21302_s0 + $0xa0] sm:$0xff]  ;;  %v60_v27 = vld [vmem:[%s21302_s0 + $0xa8] sm:$0xff] }
  0x1e   :  { %v61_v28 = vld [vmem:[%s21302_s0 + $0xb0] sm:$0xff]  ;;  %v62_v29 = vld [vmem:[%s21302_s0 + $0xb8] sm:$0xff]  ;;  %v63_v30 = vld [vmem:[%s21302_s0 + $0xc0] sm:$0xff] }
  0x1f   :  { %v64_v31 = vld [vmem:[%s21302_s0 + $0xc8] sm:$0xff]  ;;  %v65_v32 = vld [vmem:[%s21302_s0 + $0xd0] sm:$0xff]  ;;  %v66_v33 = vld [vmem:[%s21302_s0 + $0xd8] sm:$0xff] }
  0x20   :  { %15570 = vmatmul.mubr.msk.f32.gmra.mrb[10].mxu0 %vm194_vm1, %v50_v17  ;;  %v67_v34 = vld [vmem:[%s21302_s0 + $0xe0] sm:$0xff]  ;;  %v68_v35 = vld [vmem:[%s21302_s0 + $0xe8] sm:$0xff]  ;;  %v69_v36 = vld [vmem:[%s21302_s0 + $0xf0] sm:$0xff] }
  0x21   :  { %15572 = vmatprep.mubr.msk.f32.mxu0 %vm194_vm1, %v51_v18  ;;  %v70_v37 = vld [vmem:[%s21302_s0 + $0xf8] sm:$0xff]  ;;  %v71_v38 = vld [vmem:[%s21302_s0 + $0x100] sm:$0xff]  ;;  %v72_v39 = vld [vmem:[%s21302_s0 + $0x108] sm:$0xff] }
  0x22   :  { %v73_v40 = vld [vmem:[%s21302_s0 + $0x110] sm:$0xff]  ;;  %v74_v41 = vld [vmem:[%s21302_s0 + $0x118] sm:$0xff]  ;;  %v75_v42 = vld [vmem:[%s21302_s0 + $0x120] sm:$0xff] }
  0x23   :  { %v76_v43 = vld [vmem:[%s21302_s0 + $0x128] sm:$0xff]  ;;  %v77_v44 = vld [vmem:[%s21302_s0 + $0x130] sm:$0xff]  ;;  %v78_v45 = vld [vmem:[%s21302_s0 + $0x138] sm:$0xff] }
  0x24   :  { %15573 = vmatmul.mubr.msk.f32.gmra.mrb[12].mxu0 %vm194_vm1, %v52_v19  ;;  %v79_v46 = vld [vmem:[%s21302_s0 + $0x140] sm:$0xff]  ;;  %v80_v47 = vld [vmem:[%s21302_s0 + $0x148] sm:$0xff]  ;;  %v81_v48 = vld [vmem:[%s21302_s0 + $0x150] sm:$0xff] }
  0x25   :  { %15575 = vmatprep.mubr.msk.f32.mxu0 %vm194_vm1, %v53_v20  ;;  %v82_v49 = vld [vmem:[%s21302_s0 + $0x158] sm:$0xff]  ;;  %v83_v50 = vld [vmem:[%s21302_s0 + $0x160] sm:$0xff]  ;;  %v84_v51 = vld [vmem:[%s21302_s0 + $0x168] sm:$0xff] }
  0x26   :  { %v85_v52 = vld [vmem:[%s21302_s0 + $0x170] sm:$0xff]  ;;  %v86_v53 = vld [vmem:[%s21302_s0 + $0x178] sm:$0xff]  ;;  %v87_v54 = vld [vmem:[%s21302_s0 + $0x180] sm:$0xff] }
  0x27   :  { %v88_v55 = vld [vmem:[%s21302_s0 + $0x188] sm:$0xff]  ;;  %v89_v56 = vld [vmem:[%s21302_s0 + $0x190] sm:$0xff]  ;;  %v90_v57 = vld [vmem:[%s21302_s0 + $0x198] sm:$0xff] }
  0x28   :  { %15576 = vmatmul.mubr.msk.f32.gmra.mrb[14].mxu0 %vm194_vm1, %v54_v21  ;;  %v91_v58 = vld [vmem:[%s21302_s0 + $0x1a0] sm:$0xff]  ;;  %v92_v59 = vld [vmem:[%s21302_s0 + $0x1a8] sm:$0xff]  ;;  %v93_v60 = vld [vmem:[%s21302_s0 + $0x1b0] sm:$0xff] }
  0x29   :  { %15578 = vmatprep.mubr.msk.f32.mxu0 %vm194_vm1, %v55_v22  ;;  %v94_v61 = vld [vmem:[%s21302_s0 + $0x1b8] sm:$0xff]  ;;  %v95_v62 = vld [vmem:[%s21302_s0 + $0x1c0] sm:$0xff]  ;;  %v96_v63 = vld [vmem:[%s21302_s0 + $0x1c8] sm:$0xff] }
  0x2a   :  { %v97_v0 = vld [vmem:[%s21302_s0 + $0x1d0] sm:$0xff]  ;;  %v98_v1 = vld [vmem:[%s21302_s0 + $0x1d8] sm:$0xff]  ;;  %v99_v2 = vld [vmem:[%s21302_s0 + $0x1e0] sm:$0xff] }
  0x2b   :  { %v100_v3 = vld [vmem:[%s21302_s0 + $0x1e8] sm:$0xff]  ;;  %v101_v4 = vld [vmem:[%s21302_s0 + $0x1f0] sm:$0xff]  ;;  %v102_v5 = vld [vmem:[%s21302_s0 + $0x1f8] sm:$0xff] }
  0x2c   :  { %15579 = vmatmul.mubr.msk.f32.gmra.mrb[16].mxu0 %vm194_vm1, %v56_v23  ;;  %v103_v6 = vld [vmem:[%s21302_s0 + $0x200] sm:$0xff]  ;;  %v104_v7 = vld [vmem:[%s21302_s0 + $0x208] sm:$0xff]  ;;  %v105_v8 = vld [vmem:[%s21302_s0 + $0x210] sm:$0xff] }
  0x2d   :  { %15581 = vmatprep.mubr.msk.f32.mxu0 %vm194_vm1, %v57_v24  ;;  %v106_v9 = vld [vmem:[%s21302_s0 + $0x218] sm:$0xff]  ;;  %v107_v10 = vld [vmem:[%s21302_s0 + $0x220] sm:$0xff]  ;;  %v108_v11 = vld [vmem:[%s21302_s0 + $0x228] sm:$0xff] }
  0x2e   :  { %v109_v12 = vld [vmem:[%s21302_s0 + $0x230] sm:$0xff]  ;;  %v110_v13 = vld [vmem:[%s21302_s0 + $0x238] sm:$0xff]  ;;  %v111_v14 = vld [vmem:[%s21302_s0 + $0x240] sm:$0xff] }
  0x2f   :  { %v112_v15 = vld [vmem:[%s21302_s0 + $0x248] sm:$0xff]  ;;  %v113_v16 = vld [vmem:[%s21302_s0 + $0x250] sm:$0xff]  ;;  %v114_v17 = vld [vmem:[%s21302_s0 + $0x258] sm:$0xff] }
  0x30   :  { %15582 = vmatmul.mubr.msk.f32.gmra.mrb[18].mxu0 %vm194_vm1, %v58_v25  ;;  %v115_v18 = vld [vmem:[%s21302_s0 + $0x260] sm:$0xff]  ;;  %v116_v19 = vld [vmem:[%s21302_s0 + $0x268] sm:$0xff]  ;;  %v117_v20 = vld [vmem:[%s21302_s0 + $0x270] sm:$0xff] }
  0x31   :  { %15584 = vmatprep.mubr.msk.f32.mxu0 %vm194_vm1, %v59_v26  ;;  %v118_v21 = vld [vmem:[%s21302_s0 + $0x278] sm:$0xff]  ;;  %v119_v22 = vld [vmem:[%s21302_s0 + $0x280] sm:$0xff]  ;;  %v120_v23 = vld [vmem:[%s21302_s0 + $0x288] sm:$0xff] }
  0x32   :  { %v121_v24 = vld [vmem:[%s21302_s0 + $0x290] sm:$0xff]  ;;  %v122_v25 = vld [vmem:[%s21302_s0 + $0x298] sm:$0xff]  ;;  %v123_v26 = vld [vmem:[%s21302_s0 + $0x2a0] sm:$0xff] }
  0x33   :  { %vm20971_vm7 = vmpackc.low %vm12617_vm6, %vm17268_vm2 }
  0x34   :  { %15585 = vmatmul.mubr.msk.f32.gmra.mrb[20].mxu0 %vm194_vm1, %v60_v27  ;;  %v124_v27 = vld [vmem:[%s21302_s0 + $0x2a8] sm:$0xff] }
  0x35   :  { %15587 = vmatprep.mubr.msk.f32.mxu0 %vm194_vm1, %v61_v28  ;;  %v125_v28 = vld [vmem:[%s21302_s0 + $0x2b0] sm:$0xff] }
  0x38   :  { %15588 = vmatmul.mubr.msk.f32.gmra.mrb[22].mxu0 %vm194_vm1, %v62_v29  ;;  %v126_v29 = vld [vmem:[%s21302_s0 + $0x2b8] sm:$0xff] }
  0x39   :  { %15590 = vmatprep.mubr.msk.f32.mxu0 %vm194_vm1, %v63_v30  ;;  %v127_v30 = vld [vmem:[%s21302_s0 + $0x2c0] sm:$0xff] }
  0x3c   :  { %15591 = vmatmul.mubr.msk.f32.gmra.mrb[24].mxu0 %vm194_vm1, %v64_v31  ;;  %v128_v31 = vld [vmem:[%s21302_s0 + $0x2c8] sm:$0xff] }
  0x3d   :  { %15593 = vmatprep.mubr.msk.f32.mxu0 %vm194_vm1, %v65_v32  ;;  %v129_v32 = vld [vmem:[%s21302_s0 + $0x2d0] sm:$0xff] }
  0x40   :  { %15594 = vmatmul.mubr.msk.f32.gmra.mrb[26].mxu0 %vm194_vm1, %v66_v33  ;;  %v130_v33 = vld [vmem:[%s21302_s0 + $0x2d8] sm:$0xff] }
  0x41   :  { %15596 = vmatprep.mubr.msk.f32.mxu0 %vm194_vm1, %v67_v34  ;;  %v131_v34 = vld [vmem:[%s21302_s0 + $0x2e0] sm:$0xff] }
  0x44   :  { %15597 = vmatmul.mubr.msk.f32.gmra.mrb[28].mxu0 %vm194_vm1, %v68_v35  ;;  %v132_v35 = vld [vmem:[%s21302_s0 + $0x2e8] sm:$0xff] }
  0x45   :  { %15599 = vmatprep.mubr.msk.f32.mxu0 %vm194_vm1, %v69_v36  ;;  %v133_v36 = vld [vmem:[%s21302_s0 + $0x2f0] sm:$0xff] }
  0x48   :  { %15600 = vmatmul.mubr.msk.f32.gmra.mrb[30].mxu0 %vm194_vm1, %v70_v37  ;;  %v134_v37 = vld [vmem:[%s21302_s0 + $0x2f8] sm:$0xff] }
  0x49   :  { %15602 = vmatprep.mubr.msk.f32.mxu0 %vm194_vm1, %v71_v38  ;;  %v135_v38 = vld [vmem:[%s21302_s0 + $0x300] sm:$0xff] }
  0x4c   :  { %15603 = vmatmul.mubr.msk.f32.gmra.mrb[32].mxu0 %vm194_vm1, %v72_v39  ;;  %v136_v39 = vld [vmem:[%s21302_s0 + $0x308] sm:$0xff] }
  0x4d   :  { %15605 = vmatprep.mubr.msk.f32.mxu0 %vm194_vm1, %v73_v40  ;;  %v137_v40 = vld [vmem:[%s21302_s0 + $0x310] sm:$0xff] }
  0x50   :  { %15606 = vmatmul.mubr.msk.f32.gmra.mrb[34].mxu0 %vm194_vm1, %v74_v41  ;;  %v138_v41 = vld [vmem:[%s21302_s0 + $0x318] sm:$0xff] }
  0x51   :  { %15608 = vmatprep.mubr.msk.f32.mxu0 %vm194_vm1, %v75_v42  ;;  %v139_v42 = vld [vmem:[%s21302_s0 + $0x320] sm:$0xff] }
  0x54   :  { %15609 = vmatmul.mubr.msk.f32.gmra.mrb[36].mxu0 %vm194_vm1, %v76_v43  ;;  %v140_v43 = vld [vmem:[%s21302_s0 + $0x328] sm:$0xff] }
  0x55   :  { %15611 = vmatprep.mubr.msk.f32.mxu0 %vm194_vm1, %v77_v44  ;;  %v141_v44 = vld [vmem:[%s21302_s0 + $0x330] sm:$0xff] }
  0x58   :  { %15612 = vmatmul.mubr.msk.f32.gmra.mrb[38].mxu0 %vm194_vm1, %v78_v45  ;;  %v142_v45 = vld [vmem:[%s21302_s0 + $0x338] sm:$0xff] }
  0x59   :  { %15614 = vmatprep.mubr.msk.f32.mxu0 %vm194_vm1, %v79_v46  ;;  %v143_v46 = vld [vmem:[%s21302_s0 + $0x340] sm:$0xff] }
  0x5c   :  { %15615 = vmatmul.mubr.msk.f32.gmra.mrb[40].mxu0 %vm194_vm1, %v80_v47  ;;  %v144_v47 = vld [vmem:[%s21302_s0 + $0x348] sm:$0xff] }
  0x5d   :  { %15617 = vmatprep.mubr.msk.f32.mxu0 %vm194_vm1, %v81_v48  ;;  %v145_v48 = vld [vmem:[%s21302_s0 + $0x350] sm:$0xff] }
  0x60   :  { %15618 = vmatmul.mubr.msk.f32.gmra.mrb[42].mxu0 %vm194_vm1, %v82_v49  ;;  %v146_v49 = vld [vmem:[%s21302_s0 + $0x358] sm:$0xff] }
  0x61   :  { %15620 = vmatprep.mubr.msk.f32.mxu0 %vm194_vm1, %v83_v50  ;;  %v147_v50 = vld [vmem:[%s21302_s0 + $0x360] sm:$0xff] }
  0x64   :  { %15621 = vmatmul.mubr.msk.f32.gmra.mrb[44].mxu0 %vm194_vm1, %v84_v51 }
  0x65   :  { %15623 = vmatprep.mubr.msk.f32.mxu0 %vm194_vm1, %v85_v52 }
  0x68   :  { %15624 = vmatmul.mubr.msk.f32.gmra.mrb[46].mxu0 %vm194_vm1, %v86_v53  ;;  %v148_v53 = vld [vmem:[%s21302_s0 + $0x368] sm:$0xff] }
  0x69   :  { %15626 = vmatprep.mubr.msk.f32.mxu0 %vm194_vm1, %v87_v54  ;;  %v149_v54 = vld [vmem:[%s21302_s0 + $0x370] sm:$0xff] }
  0x6c   :  { %15627 = vmatmul.mubr.msk.f32.gmra.mrb[48].mxu0 %vm194_vm1, %v88_v55 }
  0x6d   :  { %15629 = vmatprep.mubr.msk.f32.mxu0 %vm194_vm1, %v89_v56 }
  0x70   :  { %15630 = vmatmul.mubr.msk.f32.gmra.mrb[50].mxu0 %vm194_vm1, %v90_v57  ;;  %v150_v57 = vld [vmem:[%s21302_s0 + $0x378] sm:$0xff] }
  0x71   :  { %15632 = vmatprep.mubr.msk.f32.mxu0 %vm194_vm1, %v91_v58  ;;  %v151_v58 = vld [vmem:[%s21302_s0 + $0x380] sm:$0xff] }
  0x74   :  { %15633 = vmatmul.mubr.msk.f32.gmra.mrb[52].mxu0 %vm194_vm1, %v92_v59 }
  0x75   :  { %15635 = vmatprep.mubr.msk.f32.mxu0 %vm194_vm1, %v93_v60 }
  0x78   :  { %15636 = vmatmul.mubr.msk.f32.gmra.mrb[54].mxu0 %vm194_vm1, %v94_v61  ;;  %v152_v61 = vld [vmem:[%s21302_s0 + $0x388] sm:$0xff] }
  0x79   :  { %15638 = vmatprep.mubr.msk.f32.mxu0 %vm194_vm1, %v95_v62  ;;  %v153_v62 = vld [vmem:[%s21302_s0 + $0x390] sm:$0xff] }
  0x7c   :  { %15639 = vmatmul.mubr.msk.f32.gmra.mrb[56].mxu0 %vm194_vm1, %v96_v63 }
  0x7d   :  { %15641 = vmatprep.mubr.msk.f32.mxu0 %vm194_vm1, %v97_v0 }
  0x80   :  { %15642 = vmatmul.mubr.msk.f32.gmra.mrb[58].mxu0 %vm194_vm1, %v98_v1  ;;  %v154_v1 = vld [vmem:[%s21302_s0 + $0x398] sm:$0xff] }
  0x81   :  { %15644 = vmatprep.mubr.msk.f32.mxu0 %vm194_vm1, %v99_v2  ;;  %v155_v2 = vld [vmem:[%s21302_s0 + $0x3a0] sm:$0xff] }
  0x84   :  { %15645 = vmatmul.mubr.msk.f32.gmra.mrb[60].mxu0 %vm194_vm1, %v100_v3 }
  0x85   :  { %15647 = vmatprep.mubr.msk.f32.mxu0 %vm194_vm1, %v101_v4 }
  0x88   :  { %15648 = vmatmul.mubr.msk.f32.gmra.mrb[62].mxu0 %vm194_vm1, %v102_v5  ;;  %v156_v5 = vld [vmem:[%s21302_s0 + $0x3a8] sm:$0xff] }
  0x89   :  { %15650 = vmatprep.mubr.msk.f32.mxu0 %vm194_vm1, %v103_v6  ;;  %v157_v6 = vld [vmem:[%s21302_s0 + $0x3b0] sm:$0xff] }
  0x8c   :  { %15651 = vmatmul.mubr.msk.f32.gmra.mrb[64].mxu0 %vm194_vm1, %v104_v7 }
  0x8d   :  { %15653 = vmatprep.mubr.msk.f32.mxu0 %vm194_vm1, %v105_v8 }
  0x90   :  { %15654 = vmatmul.mubr.msk.f32.gmra.mrb[66].mxu0 %vm194_vm1, %v106_v9  ;;  %v158_v9 = vld [vmem:[%s21302_s0 + $0x3b8] sm:$0xff] }
  0x91   :  { %15656 = vmatprep.mubr.msk.f32.mxu0 %vm194_vm1, %v107_v10  ;;  %v159_v10 = vld [vmem:[%s21302_s0 + $0x3c0] sm:$0xff] }
  0x94   :  { %15657 = vmatmul.mubr.msk.f32.gmra.mrb[68].mxu0 %vm194_vm1, %v108_v11 }
  0x95   :  { %15659 = vmatprep.mubr.msk.f32.mxu0 %vm194_vm1, %v109_v12 }
  0x98   :  { %15660 = vmatmul.mubr.msk.f32.gmra.mrb[70].mxu0 %vm194_vm1, %v110_v13  ;;  %v160_v13 = vld [vmem:[%s21302_s0 + $0x3c8] sm:$0xff] }
  0x99   :  { %15662 = vmatprep.mubr.msk.f32.mxu0 %vm194_vm1, %v111_v14  ;;  %v161_v14 = vld [vmem:[%s21302_s0 + $0x3d0] sm:$0xff] }
  0x9c   :  { %15663 = vmatmul.mubr.msk.f32.gmra.mrb[72].mxu0 %vm194_vm1, %v112_v15 }
  0x9d   :  { %15665 = vmatprep.mubr.msk.f32.mxu0 %vm194_vm1, %v113_v16 }
  0xa0   :  { %15666 = vmatmul.mubr.msk.f32.gmra.mrb[74].mxu0 %vm194_vm1, %v114_v17  ;;  %v162_v17 = vld [vmem:[%s21302_s0 + $0x3d8] sm:$0xff] }
  0xa1   :  { %15668 = vmatprep.mubr.msk.f32.mxu0 %vm194_vm1, %v115_v18  ;;  %v163_v18 = vld [vmem:[%s21302_s0 + $0x3e0] sm:$0xff] }
  0xa4   :  { %15669 = vmatmul.mubr.msk.f32.gmra.mrb[76].mxu0 %vm194_vm1, %v116_v19 }
  0xa5   :  { %15671 = vmatprep.mubr.msk.f32.mxu0 %vm194_vm1, %v117_v20 }
  0xa8   :  { %15672 = vmatmul.mubr.msk.f32.gmra.mrb[78].mxu0 %vm194_vm1, %v118_v21  ;;  %v164_v21 = vld [vmem:[%s21302_s0 + $0x3e8] sm:$0xff] }
  0xa9   :  { %15674 = vmatprep.mubr.msk.f32.mxu0 %vm194_vm1, %v119_v22  ;;  %v165_v22 = vld [vmem:[%s21302_s0 + $0x3f0] sm:$0xff] }
  0xac   :  { %15675 = vmatmul.mubr.msk.f32.gmra.mrb[80].mxu0 %vm194_vm1, %v120_v23 }
  0xad   :  { %15677 = vmatprep.mubr.msk.f32.mxu0 %vm194_vm1, %v121_v24 }
  0xb0   :  { %15678 = vmatmul.mubr.msk.f32.gmra.mrb[82].mxu0 %vm194_vm1, %v122_v25  ;;  %v166_v25 = vld [vmem:[%s21302_s0 + $0x3f8] sm:$0xff] }
  0xb1   :  { %15680 = vmatprep.mubr.msk.f32.mxu0 %vm194_vm1, %v123_v26  ;;  %v167_v26 = vld [vmem:[%s21302_s0 + $0x400] sm:$0xff] }
  0xb4   :  { %15681 = vmatmul.mubr.msk.f32.gmra.mrb[84].mxu0 %vm194_vm1, %v124_v27 }
  0xb5   :  { %15683 = vmatprep.mubr.msk.f32.mxu0 %vm194_vm1, %v125_v28 }
  0xb8   :  { %15684 = vmatmul.mubr.msk.f32.gmra.mrb[86].mxu0 %vm194_vm1, %v126_v29  ;;  %v168_v29 = vld [vmem:[%s21302_s0 + $0x408] sm:$0xff] }
  0xb9   :  { %15686 = vmatprep.mubr.msk.f32.mxu0 %vm194_vm1, %v127_v30  ;;  %v169_v30 = vld [vmem:[%s21302_s0 + $0x410] sm:$0xff] }
  0xbc   :  { %15687 = vmatmul.mubr.msk.f32.gmra.mrb[88].mxu0 %vm194_vm1, %v128_v31 }
  0xbd   :  { %15689 = vmatprep.mubr.msk.f32.mxu0 %vm194_vm1, %v129_v32 }
  0xc0   :  { %15690 = vmatmul.mubr.msk.f32.gmra.mrb[90].mxu0 %vm194_vm1, %v130_v33  ;;  %v170_v33 = vld [vmem:[%s21302_s0 + $0x418] sm:$0xff] }
  0xc1   :  { %15692 = vmatprep.mubr.msk.f32.mxu0 %vm194_vm1, %v131_v34  ;;  %v171_v34 = vld [vmem:[%s21302_s0 + $0x420] sm:$0xff] }
  0xc4   :  { %15693 = vmatmul.mubr.msk.f32.gmra.mrb[92].mxu0 %vm194_vm1, %v132_v35 }
  0xc5   :  { %15695 = vmatprep.mubr.msk.f32.mxu0 %vm194_vm1, %v133_v36 }
  0xc8   :  { %15696 = vmatmul.mubr.msk.f32.gmra.mrb[94].mxu0 %vm194_vm1, %v134_v37  ;;  %v172_v37 = vld [vmem:[%s21302_s0 + $0x428] sm:$0xff] }
  0xc9   :  { %15698 = vmatprep.mubr.msk.f32.mxu0 %vm194_vm1, %v135_v38  ;;  %v173_v38 = vld [vmem:[%s21302_s0 + $0x430] sm:$0xff] }
  0xcc   :  { %15699 = vmatmul.mubr.msk.f32.gmra.mrb[96].mxu0 %vm194_vm1, %v136_v39 }
  0xcd   :  { %15701 = vmatprep.mubr.msk.f32.mxu0 %vm194_vm1, %v137_v40 }
  0xd0   :  { %15702 = vmatmul.mubr.msk.f32.gmra.mrb[98].mxu0 %vm194_vm1, %v138_v41  ;;  %v174_v41 = vld [vmem:[%s21302_s0 + $0x438] sm:$0xff] }
  0xd1   :  { %15704 = vmatprep.mubr.msk.f32.mxu0 %vm194_vm1, %v139_v42  ;;  %v175_v42 = vld [vmem:[%s21302_s0 + $0x440] sm:$0xff] }
  0xd4   :  { %15705 = vmatmul.mubr.msk.f32.gmra.mrb[100].mxu0 %vm194_vm1, %v140_v43 }
  0xd5   :  { %15707 = vmatprep.mubr.msk.f32.mxu0 %vm194_vm1, %v141_v44 }
  0xd8   :  { %15708 = vmatmul.mubr.msk.f32.gmra.mrb[102].mxu0 %vm194_vm1, %v142_v45  ;;  %v176_v45 = vld [vmem:[%s21302_s0 + $0x448] sm:$0xff] }
  0xd9   :  { %15710 = vmatprep.mubr.msk.f32.mxu0 %vm194_vm1, %v143_v46  ;;  %v177_v46 = vld [vmem:[%s21302_s0 + $0x450] sm:$0xff] }
  0xdc   :  { %15711 = vmatmul.mubr.msk.f32.gmra.mrb[104].mxu0 %vm194_vm1, %v144_v47 }
  0xdd   :  { %15713 = vmatprep.mubr.msk.f32.mxu0 %vm194_vm1, %v145_v48 }
  0xdf   :  { %v17781_v51 = vpop.f32.mrb[0].mxu0 }
  0xe0   :  { %v17783_v52 = vpop.f32.mrb[1].mxu0  ;;  %15714 = vmatmul.mubr.msk.f32.gmra.mrb[106].mxu0 %vm194_vm1, %v146_v49  ;;  %v178_v49 = vld [vmem:[%s21302_s0 + $0x458] sm:$0xff] }
  0xe1   :  { %15716 = vmatprep.mubr.msk.f32.mxu0 %vm194_vm1, %v147_v50  ;;  %v179_v50 = vld [vmem:[%s21302_s0 + $0x460] sm:$0xff] }
  0xe3   :  { %v17793_v55 = vpop.f32.mrb[2].mxu0 }
  0xe4   :  { %v17795_v56 = vpop.f32.mrb[3].mxu0  ;;  %15717 = vmatmul.mubr.msk.f32.gmra.mrb[108].mxu0 %vm194_vm1, %v148_v53 }
  0xe5   :  { %15719 = vmatprep.mubr.msk.f32.mxu0 %vm194_vm1, %v149_v54 }
  0xe7   :  { %v17805_v59 = vpop.f32.mrb[4].mxu0 }
  0xe8   :  { %v17807_v60 = vpop.f32.mrb[5].mxu0  ;;  %15720 = vmatmul.mubr.msk.f32.gmra.mrb[110].mxu0 %vm194_vm1, %v150_v57  ;;  %v180_v57 = vld [vmem:[%s21302_s0 + $0x468] sm:$0xff] }
  0xe9   :  { %15722 = vmatprep.mubr.msk.f32.mxu0 %vm194_vm1, %v151_v58  ;;  %v181_v58 = vld [vmem:[%s21302_s0 + $0x470] sm:$0xff] }
  0xeb   :  { %v17817_v63 = vpop.f32.mrb[6].mxu0 }
  0xec   :  { %v17819_v0 = vpop.f32.mrb[7].mxu0  ;;  %15723 = vmatmul.mubr.msk.f32.gmra.mrb[112].mxu0 %vm194_vm1, %v152_v61  ;;  %v17988_v61 = vld [vmem:[%s21304_s2] ss:$0 sm:$0xff] }
  0xed   :  { %15725 = vmatprep.mubr.msk.f32.mxu0 %vm194_vm1, %v153_v62 }
  0xef   :  { %v17829_v3 = vpop.f32.mrb[8].mxu0 }
  0xf0   :  { %v17831_v4 = vpop.f32.mrb[9].mxu0  ;;  %15726 = vmatmul.mubr.msk.f32.gmra.mrb[114].mxu0 %vm194_vm1, %v154_v1 }
  0xf1   :  { %15728 = vmatprep.mubr.msk.f32.mxu0 %vm194_vm1, %v155_v2  ;;  %v182_v2 = vld [vmem:[%s21302_s0 + $0x478] sm:$0xff] }
  0xf3   :  { %v17841_v7 = vpop.f32.mrb[10].mxu0 }
  0xf4   :  { %v17843_v8 = vpop.f32.mrb[11].mxu0  ;;  %15729 = vmatmul.mubr.msk.f32.gmra.mrb[116].mxu0 %vm194_vm1, %v156_v5  ;;  %v703_v5 = vadd.f32 %v17781_v51, %v17988_v61  ;;  %v708_v51 = vadd.f32 %v17988_v61, %v17795_v56  ;;  %v718_v56 = vadd.f32 %v17988_v61, %v17807_v60  ;;  %v728_v60 = vadd.f32 %v17988_v61, %v17819_v0 }
  0xf5   :  { %15731 = vmatprep.mubr.msk.f32.mxu0 %vm194_vm1, %v157_v6  ;;  %v698_v6 = vadd.f32 %v17988_v61, %v17783_v52  ;;  %v738_v0 = vadd.f32 %v17988_v61, %v17831_v4  ;;  %v748_v4 = vadd.f32 %v17988_v61, %v17843_v8 }
  0xf7   :  { %v17853_v11 = vpop.f32.mrb[12].mxu0 }
  0xf8   :  { %v17855_v12 = vpop.f32.mrb[13].mxu0  ;;  %15732 = vmatmul.mubr.msk.f32.gmra.mrb[118].mxu0 %vm194_vm1, %v158_v9 }
  0xf9   :  { %15734 = vmatprep.mubr.msk.f32.mxu0 %vm194_vm1, %v159_v10  ;;  %v758_v8 = vadd.f32 %v17988_v61, %v17855_v12 }
  0xfb   :  { %v17865_v15 = vpop.f32.mrb[14].mxu0 }
  0xfc   :  { %v17867_v16 = vpop.f32.mrb[15].mxu0  ;;  %15735 = vmatmul.mubr.msk.f32.gmra.mrb[120].mxu0 %vm194_vm1, %v160_v13 }
  0xfd   :  { %15737 = vmatprep.mubr.msk.f32.mxu0 %vm194_vm1, %v161_v14  ;;  %v768_v12 = vadd.f32 %v17988_v61, %v17867_v16 }
  0xff   :  { %v17877_v19 = vpop.f32.mrb[16].mxu0 }
 0x100   :  { %v17879_v20 = vpop.f32.mrb[17].mxu0  ;;  %15738 = vmatmul.mubr.msk.f32.gmra.mrb[122].mxu0 %vm194_vm1, %v162_v17  ;;  %v1417_v17 = vmax.f32 %v703_v5, 0.0 }
 0x101   :  { %15740 = vmatprep.mubr.msk.f32.mxu0 %vm194_vm1, %v163_v18  ;;  %v713_v18 = vadd.f32 %v17793_v55, %v17988_v61  ;;  %v723_v55 = vadd.f32 %v17805_v59, %v17988_v61  ;;  %v733_v59 = vadd.f32 %v17817_v63, %v17988_v61  ;;  %v743_v63 = vadd.f32 %v17829_v3, %v17988_v61 }
 0x102   :  { %v753_v3 = vadd.f32 %v17841_v7, %v17988_v61  ;;  %v763_v7 = vadd.f32 %v17853_v11, %v17988_v61  ;;  %v773_v11 = vadd.f32 %v17865_v15, %v17988_v61  ;;  %v783_v15 = vadd.f32 %v17877_v19, %v17988_v61 }
 0x103   :  { %v17889_v23 = vpop.f32.mrb[18].mxu0  ;;  %v778_v16 = vadd.f32 %v17988_v61, %v17879_v20 }
 0x104   :  { %v17891_v24 = vpop.f32.mrb[19].mxu0  ;;  %15741 = vmatmul.mubr.msk.f32.gmra.mrb[124].mxu0 %vm194_vm1, %v164_v21  ;;  %v793_v19 = vadd.f32 %v17889_v23, %v17988_v61 }
 0x105   :  { %15743 = vmatprep.mubr.msk.f32.mxu0 %vm194_vm1, %v165_v22  ;;  %v1416_v22 = vmax.f32 %v698_v6, 0.0  ;;  %v1420_v6 = vmax.f32 %v718_v56, 0.0  ;;  %v788_v20 = vadd.f32 %v17988_v61, %v17891_v24 }
 0x107   :  { %v17901_v27 = vpop.f32.mrb[20].mxu0 }
 0x108   :  { %v17903_v28 = vpop.f32.mrb[21].mxu0  ;;  %15744 = vmatmul.mubr.msk.f32.gmra.mrb[126].mxu0 %vm194_vm1, %v166_v25  ;;  %v803_v23 = vadd.f32 %v17901_v27, %v17988_v61 }
 0x109   :  { %15746 = vmatprep.mubr.msk.f32.mxu0 %vm194_vm1, %v167_v26  ;;  %v798_v24 = vadd.f32 %v17988_v61, %v17903_v28 }
 0x10b   :  { %v17913_v31 = vpop.f32.mrb[22].mxu0 }
 0x10c   :  { %v17915_v32 = vpop.f32.mrb[23].mxu0  ;;  %15747 = vmatmul.mubr.msk.f32.gmra.mrb[128].mxu0 %vm194_vm1, %v168_v29  ;;  %v813_v27 = vadd.f32 %v17913_v31, %v17988_v61 }
 0x10d   :  { %15749 = vmatprep.mubr.msk.f32.mxu0 %vm194_vm1, %v169_v30  ;;  %v808_v28 = vadd.f32 %v17988_v61, %v17915_v32 }
 0x10f   :  { %v17925_v35 = vpop.f32.mrb[24].mxu0 }
 0x110   :  { %v17927_v36 = vpop.f32.mrb[25].mxu0  ;;  %15750 = vmatmul.mubr.msk.f32.gmra.mrb[130].mxu0 %vm194_vm1, %v170_v33  ;;  %v823_v31 = vadd.f32 %v17925_v35, %v17988_v61 }
 0x111   :  { %15752 = vmatprep.mubr.msk.f32.mxu0 %vm194_vm1, %v171_v34  ;;  %v818_v32 = vadd.f32 %v17988_v61, %v17927_v36 }
 0x113   :  { %v17937_v39 = vpop.f32.mrb[26].mxu0 }
 0x114   :  { %v17939_v40 = vpop.f32.mrb[27].mxu0  ;;  %15753 = vmatmul.mubr.msk.f32.gmra.mrb[132].mxu0 %vm194_vm1, %v172_v37  ;;  %v1419_v37 = vmax.f32 %v713_v18, 0.0  ;;  %v833_v35 = vadd.f32 %v17937_v39, %v17988_v61 }
 0x115   :  { %15755 = vmatprep.mubr.msk.f32.mxu0 %vm194_vm1, %v173_v38  ;;  %v828_v36 = vadd.f32 %v17988_v61, %v17939_v40 }
 0x117   :  { %v17949_v43 = vpop.f32.mrb[28].mxu0 }
 0x118   :  { %v17951_v44 = vpop.f32.mrb[29].mxu0  ;;  %15756 = vmatmul.mubr.msk.f32.gmra.mrb[134].mxu0 %vm194_vm1, %v174_v41  ;;  %v1418_v41 = vmax.f32 %v708_v51, 0.0  ;;  %v843_v39 = vadd.f32 %v17949_v43, %v17988_v61 }
 0x119   :  { %15758 = vmatprep.mubr.msk.f32.mxu0 %vm194_vm1, %v175_v42  ;;  %v838_v40 = vadd.f32 %v17988_v61, %v17951_v44 }
 0x11b   :  { %v17961_v47 = vpop.f32.mrb[30].mxu0 }
 0x11c   :  { %v17963_v48 = vpop.f32.mrb[31].mxu0  ;;  %15759 = vmatmul.mubr.msk.f32.gmra.mrb[136].mxu0 %vm194_vm1, %v176_v45  ;;  %v853_v43 = vadd.f32 %v17961_v47, %v17988_v61 }
 0x11d   :  { %15761 = vmatprep.mubr.msk.f32.mxu0 %vm194_vm1, %v177_v46  ;;  %v848_v44 = vadd.f32 %v17988_v61, %v17963_v48 }
 0x11f   :  { %v17973_v53 = vpop.f32.mrb[32].mxu0 }
 0x120   :  { %v17975_v54 = vpop.f32.mrb[33].mxu0  ;;  %15762 = vmatmul.mubr.msk.f32.gmra.mrb[138].mxu0 %vm194_vm1, %v178_v49  ;;  %v863_v47 = vadd.f32 %v17973_v53, %v17988_v61 }
 0x121   :  { %15764 = vmatprep.mubr.msk.f32.mxu0 %vm194_vm1, %v179_v50  ;;  %v858_v48 = vadd.f32 %v17988_v61, %v17975_v54 }
 0x123   :  { %v17990_v62 = vpop.f32.mrb[34].mxu0 }
 0x124   :  { %v17992_v1 = vpop.f32.mrb[35].mxu0  ;;  %15765 = vmatmul.mubr.msk.f32.gmra.mrb[140].mxu0 %vm194_vm1, %v180_v57  ;;  %v873_v53 = vadd.f32 %v17990_v62, %v17988_v61 }
 0x125   :  { %15767 = vmatprep.mubr.msk.f32.mxu0 %vm194_vm1, %v181_v58  ;;  %v868_v54 = vadd.f32 %v17988_v61, %v17992_v1 }
 0x127   :  { %v15610_v9 = vpop.f32.mrb[36].mxu0 }
 0x128   :  { %v883_v10 = vadd.f32 %v15610_v9, %v17988_v61  ;;  %v877_v13 = vpop.f32.mrb[37].mxu0  ;;  %15768 = vmatmul.mubr.msk.f32.gmra.mrb[142].mxu0 %vm194_vm1, %v182_v2  ;;  %v1421_v2 = vmax.f32 %v723_v55, 0.0 }
 0x129   :  { %v878_v14 = vadd.f32 %v17988_v61, %v877_v13 }
 0x12a   :  { %v1453_v21 = vmax.f32 %v883_v10, 0.0 }
 0x12b   :  { %v1452_v25 = vmax.f32 %v878_v14, 0.0  ;;  %v15613_v26 = vpop.f32.mrb[38].mxu0 }
 0x12c   :  { %v18010_v52 = vmax.f32 %v1417_v17, %v1453_v21  ;;  %v893_v29 = vadd.f32 %v15613_v26, %v17988_v61  ;;  %v887_v30 = vpop.f32.mrb[39].mxu0 }
 0x12d   :  { %v18013_v33 = vmax.f32 %v1416_v22, %v1452_v25  ;;  %v888_v34 = vadd.f32 %v17988_v61, %v887_v30  ;;  %v1423_v22 = vmax.f32 %v733_v59, 0.0  ;;  %v1422_v25 = vmax.f32 %v728_v60, 0.0 }
 0x12e   :  { %v1455_v38 = vmax.f32 %v893_v29, 0.0 }
 0x12f   :  { %v1454_v42 = vmax.f32 %v888_v34, 0.0  ;;  %v15616_v45 = vpop.f32.mrb[40].mxu0 }
 0x130   :  { %v18020_v46 = vmax.f32 %v1419_v37, %v1455_v38  ;;  %v903_v49 = vadd.f32 %v15616_v45, %v17988_v61  ;;  %v897_v50 = vpop.f32.mrb[41].mxu0 }
 0x131   :  { %v18023_v57 = vmax.f32 %v1418_v41, %v1454_v42  ;;  %v898_v58 = vadd.f32 %v17988_v61, %v897_v50  ;;  %v1425_v41 = vmax.f32 %v743_v63, 0.0  ;;  %v1424_v42 = vmax.f32 %v738_v0, 0.0 }
 0x132   :  { %v1457_v5 = vmax.f32 %v903_v49, 0.0 }
 0x133   :  { %v1456_v9 = vmax.f32 %v898_v58, 0.0  ;;  %v15619_v10 = vpop.f32.mrb[42].mxu0 }
 0x134   :  { %v18030_v13 = vmax.f32 %v1421_v2, %v1457_v5  ;;  %v913_v14 = vadd.f32 %v15619_v10, %v17988_v61  ;;  %v907_v17 = vpop.f32.mrb[43].mxu0 }
 0x135   :  { %v18033_v18 = vmax.f32 %v1420_v6, %v1456_v9  ;;  %v908_v21 = vadd.f32 %v17988_v61, %v907_v17  ;;  %v1427_v6 = vmax.f32 %v753_v3, 0.0  ;;  %v1426_v9 = vmax.f32 %v748_v4, 0.0 }
 0x136   :  { %v1459_v51 = vmax.f32 %v913_v14, 0.0 }
 0x137   :  { %v1458_v26 = vmax.f32 %v908_v21, 0.0  ;;  %v15622_v29 = vpop.f32.mrb[44].mxu0 }
 0x138   :  { %v18040_v30 = vmax.f32 %v1423_v22, %v1459_v51  ;;  %v923_v34 = vadd.f32 %v15622_v29, %v17988_v61  ;;  %v917_v37 = vpop.f32.mrb[45].mxu0 }
 0x139   :  { %v18043_v55 = vmax.f32 %v1422_v25, %v1458_v26  ;;  %v918_v38 = vadd.f32 %v17988_v61, %v917_v37  ;;  %v1429_v25 = vmax.f32 %v763_v7, 0.0  ;;  %v1428_v26 = vmax.f32 %v758_v8, 0.0 }
 0x13a   :  { %v1461_v56 = vmax.f32 %v923_v34, 0.0 }
 0x13b   :  { %v1460_v45 = vmax.f32 %v918_v38, 0.0  ;;  %v15625_v49 = vpop.f32.mrb[46].mxu0 }
 0x13c   :  { %v18050_v50 = vmax.f32 %v1425_v41, %v1461_v56  ;;  %v933_v58 = vadd.f32 %v15625_v49, %v17988_v61  ;;  %v927_v2 = vpop.f32.mrb[47].mxu0 }
 0x13d   :  { %v18053_v59 = vmax.f32 %v1424_v42, %v1460_v45  ;;  %v928_v5 = vadd.f32 %v17988_v61, %v927_v2  ;;  %v1431_v42 = vmax.f32 %v773_v11, 0.0  ;;  %v1430_v45 = vmax.f32 %v768_v12, 0.0 }
 0x13e   :  { %v1463_v60 = vmax.f32 %v933_v58, 0.0 }
 0x13f   :  { %v1462_v10 = vmax.f32 %v928_v5, 0.0  ;;  %v15628_v14 = vpop.f32.mrb[48].mxu0 }
 0x140   :  { %v18060_v17 = vmax.f32 %v1427_v6, %v1463_v60  ;;  %v943_v21 = vadd.f32 %v15628_v14, %v17988_v61  ;;  %v937_v22 = vpop.f32.mrb[49].mxu0 }
 0x141   :  { %v18063_v63 = vmax.f32 %v1426_v9, %v1462_v10  ;;  %v938_v51 = vadd.f32 %v17988_v61, %v937_v22  ;;  %v1433_v9 = vmax.f32 %v783_v15, 0.0  ;;  %v1432_v10 = vmax.f32 %v778_v16, 0.0 }
 0x142   :  { %v1465_v0 = vmax.f32 %v943_v21, 0.0 }
 0x143   :  { %v1464_v29 = vmax.f32 %v938_v51, 0.0  ;;  %v15631_v34 = vpop.f32.mrb[50].mxu0 }
 0x144   :  { %v18070_v37 = vmax.f32 %v1429_v25, %v1465_v0  ;;  %v953_v38 = vadd.f32 %v15631_v34, %v17988_v61  ;;  %v947_v41 = vpop.f32.mrb[51].mxu0 }
 0x145   :  { %v18073_v3 = vmax.f32 %v1428_v26, %v1464_v29  ;;  %v948_v56 = vadd.f32 %v17988_v61, %v947_v41  ;;  %v1435_v26 = vmax.f32 %v793_v19, 0.0  ;;  %v1434_v29 = vmax.f32 %v788_v20, 0.0 }
 0x146   :  { %21459 = vst [vmem:[#allocation5_spill] sm:$0xff] %v18070_v37  ;;  %v1467_v4 = vmax.f32 %v953_v38, 0.0 }
 0x147   :  { %21460 = vst [vmem:[#allocation6_spill] sm:$0xff] %v18073_v3  ;;  %v1466_v49 = vmax.f32 %v948_v56, 0.0  ;;  %v15634_v58 = vpop.f32.mrb[52].mxu0 }
 0x148   :  { %v18080_v2 = vmax.f32 %v1431_v42, %v1467_v4  ;;  %v963_v5 = vadd.f32 %v15634_v58, %v17988_v61  ;;  %v957_v6 = vpop.f32.mrb[53].mxu0 }
 0x149   :  { %v18083_v7 = vmax.f32 %v1430_v45, %v1466_v49  ;;  %v958_v60 = vadd.f32 %v17988_v61, %v957_v6  ;;  %v1437_v45 = vmax.f32 %v803_v23, 0.0  ;;  %v1436_v49 = vmax.f32 %v798_v24, 0.0 }
 0x14a   :  { %21461 = vst [vmem:[#allocation7_spill] sm:$0xff] %v18080_v2  ;;  %v1469_v8 = vmax.f32 %v963_v5, 0.0 }
 0x14b   :  { %21462 = vst [vmem:[#allocation8_spill] sm:$0xff] %v18083_v7  ;;  %v1468_v14 = vmax.f32 %v958_v60, 0.0  ;;  %v15637_v21 = vpop.f32.mrb[54].mxu0 }
 0x14c   :  { %v18090_v22 = vmax.f32 %v1433_v9, %v1469_v8  ;;  %v973_v51 = vadd.f32 %v15637_v21, %v17988_v61  ;;  %v967_v25 = vpop.f32.mrb[55].mxu0 }
 0x14d   :  { %v18093_v11 = vmax.f32 %v1432_v10, %v1468_v14  ;;  %v968_v0 = vadd.f32 %v17988_v61, %v967_v25  ;;  %v1439_v10 = vmax.f32 %v813_v27, 0.0  ;;  %v1438_v14 = vmax.f32 %v808_v28, 0.0 }
 0x14e   :  { %21463 = vst [vmem:[#allocation9_spill] sm:$0xff] %v18090_v22  ;;  %v1471_v12 = vmax.f32 %v973_v51, 0.0 }
 0x14f   :  { %21464 = vst [vmem:[#allocation10_spill] sm:$0xff] %v18093_v11  ;;  %v1470_v34 = vmax.f32 %v968_v0, 0.0  ;;  %v15640_v38 = vpop.f32.mrb[56].mxu0 }
 0x150   :  { %v18100_v41 = vmax.f32 %v1435_v26, %v1471_v12  ;;  %v983_v56 = vadd.f32 %v15640_v38, %v17988_v61  ;;  %v977_v42 = vpop.f32.mrb[57].mxu0 }
 0x151   :  { %v18103_v15 = vmax.f32 %v1434_v29, %v1470_v34  ;;  %v978_v4 = vadd.f32 %v17988_v61, %v977_v42  ;;  %v1441_v29 = vmax.f32 %v823_v31, 0.0  ;;  %v1440_v34 = vmax.f32 %v818_v32, 0.0 }
 0x152   :  { %21465 = vst [vmem:[#allocation11_spill] sm:$0xff] %v18100_v41  ;;  %v1473_v16 = vmax.f32 %v983_v56, 0.0 }
 0x153   :  { %21466 = vst [vmem:[#allocation12_spill] sm:$0xff] %v18103_v15  ;;  %v1472_v58 = vmax.f32 %v978_v4, 0.0  ;;  %v15643_v5 = vpop.f32.mrb[58].mxu0 }
 0x154   :  { %v18110_v6 = vmax.f32 %v1437_v45, %v1473_v16  ;;  %v993_v60 = vadd.f32 %v15643_v5, %v17988_v61  ;;  %v987_v9 = vpop.f32.mrb[59].mxu0 }
 0x155   :  { %v18113_v19 = vmax.f32 %v1436_v49, %v1472_v58  ;;  %v988_v8 = vadd.f32 %v17988_v61, %v987_v9  ;;  %v1443_v49 = vmax.f32 %v833_v35, 0.0  ;;  %v1442_v58 = vmax.f32 %v828_v36, 0.0 }
 0x156   :  { %21467 = vst [vmem:[#allocation13_spill] sm:$0xff] %v18110_v6  ;;  %v1475_v20 = vmax.f32 %v993_v60, 0.0 }
 0x157   :  { %21468 = vst [vmem:[#allocation14_spill] sm:$0xff] %v18113_v19  ;;  %v1474_v21 = vmax.f32 %v988_v8, 0.0  ;;  %v15646_v51 = vpop.f32.mrb[60].mxu0 }
 0x158   :  { %v18120_v25 = vmax.f32 %v1439_v10, %v1475_v20  ;;  %v1003_v0 = vadd.f32 %v15646_v51, %v17988_v61  ;;  %v997_v26 = vpop.f32.mrb[61].mxu0 }
 0x159   :  { %v18123_v23 = vmax.f32 %v1438_v14, %v1474_v21  ;;  %v998_v12 = vadd.f32 %v17988_v61, %v997_v26  ;;  %v1445_v14 = vmax.f32 %v843_v39, 0.0  ;;  %v1444_v21 = vmax.f32 %v838_v40, 0.0 }
 0x15a   :  { %21469 = vst [vmem:[#allocation15_spill] sm:$0xff] %v18120_v25  ;;  %v1477_v24 = vmax.f32 %v1003_v0, 0.0 }
 0x15b   :  { %21470 = vst [vmem:[#allocation16_spill] sm:$0xff] %v18123_v23  ;;  %v1476_v38 = vmax.f32 %v998_v12, 0.0  ;;  %v15649_v56 = vpop.f32.mrb[62].mxu0 }
 0x15c   :  { %v18130_v42 = vmax.f32 %v1441_v29, %v1477_v24  ;;  %v1013_v4 = vadd.f32 %v15649_v56, %v17988_v61  ;;  %v1007_v45 = vpop.f32.mrb[63].mxu0 }
 0x15d   :  { %v18133_v27 = vmax.f32 %v1440_v34, %v1476_v38  ;;  %v1008_v16 = vadd.f32 %v17988_v61, %v1007_v45  ;;  %v1447_v34 = vmax.f32 %v853_v43, 0.0  ;;  %v1446_v38 = vmax.f32 %v848_v44, 0.0 }
 0x15e   :  { %21471 = vst [vmem:[#allocation17_spill] sm:$0xff] %v18130_v42  ;;  %v1479_v28 = vmax.f32 %v1013_v4, 0.0 }
 0x15f   :  { %21472 = vst [vmem:[#allocation18_spill] sm:$0xff] %v18133_v27  ;;  %v1478_v5 = vmax.f32 %v1008_v16, 0.0  ;;  %v15652_v60 = vpop.f32.mrb[64].mxu0 }
 0x160   :  { %v18140_v9 = vmax.f32 %v1443_v49, %v1479_v28  ;;  %v1023_v8 = vadd.f32 %v15652_v60, %v17988_v61  ;;  %v1017_v10 = vpop.f32.mrb[65].mxu0 }
 0x161   :  { %v18143_v31 = vmax.f32 %v1442_v58, %v1478_v5  ;;  %v1018_v20 = vadd.f32 %v17988_v61, %v1017_v10  ;;  %v1449_v58 = vmax.f32 %v863_v47, 0.0  ;;  %v1448_v5 = vmax.f32 %v858_v48, 0.0 }
 0x162   :  { %21473 = vst [vmem:[#allocation19_spill] sm:$0xff] %v18140_v9  ;;  %v1481_v32 = vmax.f32 %v1023_v8, 0.0  ;;  %v1708_v9 = vlaneseq }
 0x163   :  { %21474 = vst [vmem:[#allocation20_spill] sm:$0xff] %v18143_v31  ;;  %v1480_v51 = vmax.f32 %v1018_v20, 0.0  ;;  %v15655_v0 = vpop.f32.mrb[66].mxu0 }
 0x164   :  { %v18150_v26 = vmax.f32 %v1445_v14, %v1481_v32  ;;  %v1033_v12 = vadd.f32 %v15655_v0, %v17988_v61  ;;  %v1027_v29 = vpop.f32.mrb[67].mxu0  ;;  %v1709_v25 = vshrl.u32 %v1708_v9, 7 }
 0x165   :  { %v18153_v35 = vmax.f32 %v1444_v21, %v1480_v51  ;;  %v1028_v24 = vadd.f32 %v17988_v61, %v1027_v29  ;;  %v1451_v21 = vmax.f32 %v873_v53, 0.0  ;;  %v1450_v51 = vmax.f32 %v868_v54, 0.0  ;;  %v14232_v53 = vld [vmem:[%s21305_s3 + $0x8] sm:$0x3f] }
 0x166   :  { %21475 = vst [vmem:[#allocation21_spill] sm:$0xff] %v18150_v26  ;;  %v1483_v36 = vmax.f32 %v1033_v12, 0.0  ;;  %15770 = vmatprep.subr.msk.mxu1 %vm2396_vm4, %v14232_v53  ;;  %16170 = vmatprep.subr.msk.mxu0 %vm2396_vm4, %v14232_v53  ;;  %v17269_v26 = vmov 1983009808  }
 0x167   :  { %21476 = vst [vmem:[#allocation22_spill] sm:$0xff] %v18153_v35  ;;  %v1482_v56 = vmax.f32 %v1028_v24, 0.0  ;;  %v15658_v4 = vpop.f32.mrb[68].mxu0  ;;  %15771 = vmatpush3.msk.msra.mxu1 %vm2396_vm4, %v14232_v53  ;;  %16171 = vmatpush3.msk.msra.mxu0 %vm2396_vm4, %v14232_v53  ;;  %v1706_v31 = vunpack.c.l.s4 %v17269_v26 }
 0x168   :  { %v18160_v45 = vmax.f32 %v1447_v34, %v1483_v36  ;;  %v1043_v16 = vadd.f32 %v15658_v4, %v17988_v61  ;;  %v1037_v49 = vpop.f32.mrb[69].mxu0 }
 0x169   :  { %v18163_v39 = vmax.f32 %v1446_v38, %v1482_v56  ;;  %v1038_v28 = vadd.f32 %v17988_v61, %v1037_v49  ;;  %v1707_v23 = vunpack.c.0.s8 %v1706_v31 }
 0x16a   :  { %21477 = vst [vmem:[#allocation23_spill] sm:$0xff] %v18160_v45  ;;  %v1485_v40 = vmax.f32 %v1043_v16, 0.0 }
 0x16b   :  { %21478 = vst [vmem:[#allocation24_spill] sm:$0xff] %v18163_v39  ;;  %v1484_v60 = vmax.f32 %v1038_v28, 0.0  ;;  %v15661_v8 = vpop.f32.mrb[70].mxu0  ;;  %v18252_v7 = vsub.s32 %v1707_v23, %v1709_v25 }
 0x16c   :  { %v18170_v10 = vmax.f32 %v1449_v58, %v1485_v40  ;;  %v1053_v20 = vadd.f32 %v15661_v8, %v17988_v61  ;;  %v1047_v14 = vpop.f32.mrb[71].mxu0 }
 0x16d   :  { %v18173_v43 = vmax.f32 %v1448_v5, %v1484_v60  ;;  %v1048_v32 = vadd.f32 %v17988_v61, %v1047_v14  ;;  %v18206_v14 = vld [vmem:[%s21305_s3] sm:$0x3f]  ;;  %21484 = vst [vmem:[#allocation30_spill] sm:$0xff] %v18252_v7 }
 0x16e   :  { %21479 = vst [vmem:[#allocation25_spill] sm:$0xff] %v18170_v10  ;;  %v1487_v44 = vmax.f32 %v1053_v20, 0.0  ;;  %21483 = vst [vmem:[#allocation29_spill] sm:$0xff] %v18206_v14  ;;  %15778 = vmatprep.subr.msk.mxu1 %vm2396_vm4, %v18206_v14  ;;  %16178 = vmatprep.subr.msk.mxu0 %vm2396_vm4, %v18206_v14 }
 0x16f   :  { %21480 = vst [vmem:[#allocation26_spill] sm:$0xff] %v18173_v43  ;;  %v1486_v62 = vmax.f32 %v1048_v32, 0.0  ;;  %v15664_v0 = vpop.f32.mrb[72].mxu0 }
 0x170   :  { %v18176_v12 = vmax.f32 %v1451_v21, %v1487_v44  ;;  %v1057_v29 = vpop.f32.mrb[73].mxu0  ;;  %v1063_v19 = vadd.f32 %v15664_v0, %v17988_v61 }
 0x171   :  { %v18178_v1 = vmax.f32 %v1450_v51, %v1486_v62  ;;  %v1058_v6 = vadd.f32 %v17988_v61, %v1057_v29 }
 0x172   :  { %21481 = vst [vmem:[#allocation27_spill] sm:$0xff] %v18176_v12  ;;  %v1489_v31 = vmax.f32 %v1063_v19, 0.0 }
 0x173   :  { %21482 = vst [vmem:[#allocation28_spill] sm:$0xff] %v18178_v1  ;;  %v15667_v24 = vpop.f32.mrb[74].mxu0  ;;  %v1488_v9 = vmax.f32 %v1058_v6, 0.0 }
 0x174   :  { %v1067_v34 = vpop.f32.mrb[75].mxu0  ;;  %v1073_v15 = vadd.f32 %v15667_v24, %v17988_v61 }
 0x175   :  { %v1068_v41 = vadd.f32 %v17988_v61, %v1067_v34 }
 0x176   :  { %v1491_v3 = vmax.f32 %v1073_v15, 0.0 }
 0x177   :  { %v15670_v47 = vpop.f32.mrb[76].mxu0 }
 0x178   :  { %v1077_v36 = vpop.f32.mrb[77].mxu0  ;;  %v1083_v11 = vadd.f32 %v15670_v47, %v17988_v61 }
 0x179   :  { %v18250_v26 = vadd.f32 %v17988_v61, %v1077_v36  ;;  %v1490_v36 = vmax.f32 %v1068_v41, 0.0 }
 0x17a   :  { %v1493_v23 = vmax.f32 %v1083_v11, 0.0 }
 0x17b   :  { %v15673_v38 = vpop.f32.mrb[78].mxu0 }
 0x17c   :  { %v1087_v48 = vpop.f32.mrb[79].mxu0  ;;  %v18255_v0 = vadd.f32 %v15673_v38, %v17988_v61 }
 0x17d   :  { %v18259_v24 = vadd.f32 %v17988_v61, %v1087_v48 }
 0x17f   :  { %v15676_v56 = vpop.f32.mrb[80].mxu0 }
 0x180   :  { %v1097_v4 = vpop.f32.mrb[81].mxu0  ;;  %v18262_v34 = vadd.f32 %v15676_v56, %v17988_v61 }
 0x181   :  { %v18266_v25 = vadd.f32 %v17988_v61, %v1097_v4 }
 0x183   :  { %v15679_v16 = vpop.f32.mrb[82].mxu0 }
 0x184   :  { %v1107_v49 = vpop.f32.mrb[83].mxu0  ;;  %v18269_v6 = vadd.f32 %v15679_v16, %v17988_v61 }
 0x185   :  { %v18273_v15 = vadd.f32 %v17988_v61, %v1107_v49 }
 0x187   :  { %v18180_v28 = vpop.f32.mrb[84].mxu0 }
 0x188   :  { %v18182_v58 = vpop.f32.mrb[85].mxu0 }
 0x18b   :  { %v18187_v40 = vpop.f32.mrb[86].mxu0 }
 0x18c   :  { %v18191_v5 = vpop.f32.mrb[87].mxu0 }
 0x18f   :  { %v18195_v54 = vpop.f32.mrb[88].mxu0 }
 0x190   :  { %v18197_v60 = vpop.f32.mrb[89].mxu0 }
 0x193   :  { %v18199_v8 = vpop.f32.mrb[90].mxu0 }
 0x194   :  { %v18201_v20 = vpop.f32.mrb[91].mxu0 }
 0x197   :  { %v18212_v32 = vpop.f32.mrb[92].mxu0 }
 0x198   :  { %v18214_v21 = vpop.f32.mrb[93].mxu0 }
 0x19b   :  { %v18216_v44 = vpop.f32.mrb[94].mxu0 }
 0x19c   :  { %v18218_v51 = vpop.f32.mrb[95].mxu0 }
 0x19f   :  { %v18220_v62 = vpop.f32.mrb[96].mxu0 }
 0x1a0   :  { %v18222_v53 = vpop.f32.mrb[97].mxu0 }
 0x1a3   :  { %v18224_v1 = vpop.f32.mrb[98].mxu0 }
 0x1a4   :  { %v18226_v12 = vpop.f32.mrb[99].mxu0 }
 0x1a7   :  { %v18228_v43 = vpop.f32.mrb[100].mxu0 }
 0x1a8   :  { %v18230_v10 = vpop.f32.mrb[101].mxu0 }
 0x1ab   :  { %v18232_v39 = vpop.f32.mrb[102].mxu0 }
 0x1ac   :  { %v18234_v45 = vpop.f32.mrb[103].mxu0 }
 0x1af   :  { %v18236_v35 = vpop.f32.mrb[104].mxu0 }
 0x1b0   :  { %v18238_v27 = vpop.f32.mrb[105].mxu0 }
 0x1b3   :  { %v18240_v42 = vpop.f32.mrb[106].mxu0 }
 0x1b4   :  { %v18244_v14 = vpop.f32.mrb[107].mxu0 }
 0x1b7   :  { %v15718_v22 = vpop.f32.mrb[108].mxu0 }
 0x1b8   :  { %v1243_v29 = vadd.f32 %v15718_v22, %v17988_v61  ;;  %v1237_v2 = vpop.f32.mrb[109].mxu0  ;;  %v1492_v22 = vmax.f32 %v18250_v26, 0.0 }
 0x1b9   :  { %v1238_v47 = vadd.f32 %v17988_v61, %v1237_v2  ;;  %v18278_v2 = vadd.f32 %v18180_v28, %v17988_v61 }
 0x1ba   :  { %v1525_v19 = vmax.f32 %v1243_v29, 0.0 }
 0x1bb   :  { %v1524_v38 = vmax.f32 %v1238_v47, 0.0  ;;  %v15721_v48 = vpop.f32.mrb[110].mxu0 }
 0x1bc   :  { %v1597_v41 = vmax.f32 %v1489_v31, %v1525_v19  ;;  %v1253_v4 = vadd.f32 %v15721_v48, %v17988_v61  ;;  %v1247_v16 = vpop.f32.mrb[111].mxu0  ;;  %v18292_v19 = vadd.f32 %v17988_v61, %v18182_v58  ;;  %v18307_v58 = vadd.f32 %v17988_v61, %v18191_v5 }
 0x1bd   :  { %v1596_v26 = vmax.f32 %v1488_v9, %v1524_v38  ;;  %v1248_v49 = vadd.f32 %v17988_v61, %v1247_v16 }
 0x1be   :  { %v18287_v56 = vmax.f32 %v18010_v52, %v1597_v41  ;;  %v1527_v28 = vmax.f32 %v1253_v4, 0.0  ;;  %v18303_v4 = vadd.f32 %v18187_v40, %v17988_v61  ;;  %v18319_v40 = vadd.f32 %v17988_v61, %v18197_v60 }
 0x1bf   :  { %v18295_v48 = vmax.f32 %v18013_v33, %v1596_v26  ;;  %v1526_v9 = vmax.f32 %v1248_v49, 0.0  ;;  %v15724_v38 = vpop.f32.mrb[112].mxu0  ;;  %v18312_v49 = vadd.f32 %v18195_v54, %v17988_v61 }
 0x1c0   :  { %v1721_v37 = vcombine.high %v18287_v56, %v18287_v56  ;;  %v1599_v47 = vmax.f32 %v1491_v3, %v1527_v28  ;;  %v1263_v52 = vadd.f32 %v15724_v38, %v17988_v61  ;;  %v1257_v41 = vpop.f32.mrb[113].mxu0  ;;  %21485 = vst [vmem:[#allocation31_spill] sm:$0xff] %v18303_v4  ;;  %21487 = vst [vmem:[#allocation33_spill] sm:$0xff] %v18319_v40 }
 0x1c1   :  { %v1598_v33 = vmax.f32 %v1490_v36, %v1526_v9  ;;  %v1258_v26 = vadd.f32 %v17988_v61, %v1257_v41  ;;  %21486 = vst [vmem:[#allocation32_spill] sm:$0xff] %v18312_v49  ;;  %v18324_v41 = vadd.f32 %v18199_v8, %v17988_v61 }
 0x1c2   :  { %v1735_v3 = vrot.slane %v1721_v37, %v18252_v7  ;;  %v1635_v28 = vmax.f32 %v18020_v46, %v1599_v47  ;;  %v1529_v38 = vmax.f32 %v1263_v52, 0.0 }
 0x1c3   :  { %v1634_v5 = vmax.f32 %v18023_v57, %v1598_v33  ;;  %v1528_v36 = vmax.f32 %v1258_v26, 0.0  ;;  %v15727_v9 = vpop.f32.mrb[114].mxu0  ;;  %21488 = vst [vmem:[#allocation34_spill] sm:$0xff] %v18324_v41 }
 0x1c4   :  { %v1737_v54 = vcombine.high %v1735_v3, %v1735_v3  ;;  %v1755_v31 = vcombine.high %v1635_v28, %v1635_v28  ;;  %v1601_v37 = vmax.f32 %v1493_v23, %v1529_v38  ;;  %v1267_v11 = vpop.f32.mrb[115].mxu0  ;;  %v18328_v47 = vrot.slane %v1635_v28, %v18252_v7 }
 0x1c5   :  { %v1738_v52 = vcombine.high %v1634_v5, %v1634_v5  ;;  %v1745_v60 = vrot.slane %v1634_v5, %v18252_v7  ;;  %v1600_v29 = vmax.f32 %v1492_v22, %v1528_v36  ;;  %v18341_v5 = vadd.f32 %v17988_v61, %v18201_v20 }
 0x1c6   :  { %v2502_v26 = vcombine.low %v1735_v3, %v1737_v54  ;;  %v1637_v8 = vmax.f32 %v18030_v13, %v1601_v37  ;;  %v18344_v33 = vrot.slane %v1755_v31, %v18252_v7  ;;  %v18348_v13 = vadd.f32 %v18212_v32, %v17988_v61 }
 0x1c7   :  { %v18335_v16 = vrot.slane %v1738_v52, %v18252_v7  ;;  %v1753_v23 = vcombine.high %v1745_v60, %v1745_v60  ;;  %v2668_v38 = vcombine.low %v1737_v54, %v1745_v60  ;;  %v15730_v46 = vpop.f32.mrb[116].mxu0  ;;  %v18352_v22 = vcombine.high %v18328_v47, %v18328_v47 }
 0x1c8   :  { %v1277_v3 = vpop.f32.mrb[117].mxu0  ;;  %21489 = vst [vmem:[#allocation35_spill] sm:$0xff] %v18348_v13  ;;  %v18357_v37 = vadd.f32 %v17988_v61, %v18214_v21  ;;  %v18361_v20 = vadd.f32 %v18216_v44, %v17988_v61  ;;  %v2510_v31 = vrot.slane %v2502_v26, %v18252_v7  ;;  %v1789_v52 = vcombine.high %v1637_v8, %v1637_v8 }
 0x1c9   :  { %v2503_v36 = vcombine.low %v1745_v60, %v1753_v23  ;;  %v2669_v54 = vcombine.low %v1753_v23, %v18335_v16  ;;  %v2676_v4 = vrot.slane %v2668_v38, %v18252_v7  ;;  %v18370_v23 = vrot.slane %v1637_v8, %v18252_v7 }
 0x1ca   :  { %21490 = vst [vmem:[#allocation36_spill] sm:$0xff] %v18357_v37  ;;  %21491 = vst [vmem:[#allocation37_spill] sm:$0xff] %v18361_v20  ;;  %v18374_v21 = vcombine.high %v18344_v33, %v18344_v33  ;;  %v1636_v44 = vmax.f32 %v18033_v18, %v1600_v29  ;;  %v1273_v26 = vadd.f32 %v15727_v9, %v17988_v61 }
 0x1cb   :  { %v18365_v32 = vrot.slane %v2503_v36, %v18252_v7  ;;  %v2683_v60 = vrot.slane %v2669_v54, %v18252_v7  ;;  %v15733_v28 = vpop.f32.mrb[118].mxu0  ;;  %v1268_v57 = vadd.f32 %v17988_v61, %v1267_v11  ;;  %v2685_v38 = vcombine.low %v18352_v22, %v18344_v33 }
 0x1cc   :  { %v1287_v36 = vpop.f32.mrb[119].mxu0  ;;  %v18387_v41 = vrot.slane %v1789_v52, %v18252_v7  ;;  %v18391_v40 = vcombine.high %v18370_v23, %v18370_v23  ;;  %v1772_v18 = vcombine.high %v1636_v44, %v1636_v44  ;;  %v18394_v29 = vrot.slane %v1636_v44, %v18252_v7 }
 0x1cd   :  { %v18382_v54 = vcombine.low %v2510_v31, %v18365_v32  ;;  %v18384_v8 = vcombine.low %v2676_v4, %v2683_v60  ;;  %v1531_v11 = vmax.f32 %v1273_v26, 0.0  ;;  %v1530_v4 = vmax.f32 %v1268_v57, 0.0 }
 0x1ce   :  { %v18401_v52 = vadd.f32 %v17988_v61, %v18218_v51  ;;  %v18408_v44 = vrot.slane %v1772_v18, %v18252_v7  ;;  %v2686_v26 = vcombine.low %v18374_v21, %v18394_v29  ;;  %v18415_v57 = vadd.f32 %v17988_v61, %v18222_v53 }
 0x1cf   :  { %21492 = vst [vmem:[#allocation38_spill] sm:$0xff] %v18382_v54  ;;  %21493 = vst [vmem:[#allocation39_spill] sm:$0xff] %v18384_v8  ;;  %v15736_v60 = vpop.f32.mrb[120].mxu0  ;;  %v18405_v8 = vadd.f32 %v18220_v62, %v17988_v61  ;;  %v21495_v51 = vmax.f32 %v18255_v0, 0.0  ;;  %v21496_v54 = vmax.f32 %v18259_v24, 0.0  ;;  %v2693_v37 = vrot.slane %v2685_v38, %v18252_v7 }
 0x1d0   :  { %v1297_v9 = vpop.f32.mrb[121].mxu0  ;;  %21494 = vst [vmem:[#allocation40_spill] sm:$0xff] %v18415_v57  ;;  %v2703_v18 = vcombine.low %v18391_v40, %v18387_v41  ;;  %v18426_v13 = vcombine.high %v18408_v44, %v18408_v44  ;;  %v2700_v49 = vrot.slane %v2686_v26, %v18252_v7  ;;  %v1283_v24 = vadd.f32 %v15730_v46, %v17988_v61 }
 0x1d1   :  { %v1603_v31 = vmax.f32 %v21495_v51, %v1531_v11  ;;  %v1602_v62 = vmax.f32 %v21496_v54, %v1530_v4  ;;  %v1278_v54 = vadd.f32 %v17988_v61, %v1277_v3  ;;  %v18452_v46 = vadd.f32 %v17988_v61, %v18226_v12 }
 0x1d2   :  { %v18439_v51 = vcombine.low %v2693_v37, %v2700_v49  ;;  %v2702_v26 = vcombine.low %v18426_v13, %v18370_v23  ;;  %v18456_v3 = vadd.f32 %v18228_v43, %v17988_v61  ;;  %v18460_v49 = vadd.f32 %v17988_v61, %v18230_v10 }
 0x1d3   :  { %v18430_v53 = vmax.f32 %v18040_v30, %v1603_v31  ;;  %v18433_v0 = vmax.f32 %v18043_v55, %v1602_v62  ;;  %v15739_v38 = vpop.f32.mrb[122].mxu0  ;;  %v18448_v55 = vadd.f32 %v18224_v1, %v17988_v61  ;;  %21499 = vst [vmem:[#allocation43_spill] sm:$0xff] %v18452_v46  ;;  %v2717_v37 = vrot.slane %v2703_v18, %v18252_v7 }
 0x1d4   :  { %21497 = vst [vmem:[#allocation41_spill] sm:$0xff] %v18439_v51  ;;  %v18443_v20 = vpop.f32.mrb[123].mxu0  ;;  %21500 = vst [vmem:[#allocation44_spill] sm:$0xff] %v18456_v3  ;;  %v2710_v31 = vrot.slane %v2702_v26, %v18252_v7  ;;  %v1533_v62 = vmax.f32 %v1283_v24, 0.0  ;;  %v18466_v1 = vadd.f32 %v18232_v39, %v17988_v61  ;;  %v18470_v12 = vadd.f32 %v17988_v61, %v18234_v45 }
 0x1d5   :  { %21498 = vst [vmem:[#allocation42_spill] sm:$0xff] %v18448_v55  ;;  %21501 = vst [vmem:[#allocation45_spill] sm:$0xff] %v18460_v49  ;;  %v18474_v43 = vadd.f32 %v18236_v35, %v17988_v61  ;;  %v1532_v30 = vmax.f32 %v1278_v54, 0.0  ;;  %v18480_v18 = vadd.f32 %v17988_v61, %v18238_v27  ;;  %v21507_v39 = vmax.f32 %v18262_v34, 0.0  ;;  %v21520_v27 = vld [vmem:[#allocation7_spill] sm:$0xff] }
 0x1d6   :  { %21502 = vst [vmem:[#allocation46_spill] sm:$0xff] %v18466_v1  ;;  %21503 = vst [vmem:[#allocation47_spill] sm:$0xff] %v18470_v12  ;;  %v18482_v24 = vcombine.low %v2710_v31, %v2717_v37  ;;  %v1293_v4 = vadd.f32 %v15733_v28, %v17988_v61  ;;  %v21508_v54 = vmax.f32 %v18266_v25, 0.0  ;;  %v1288_v57 = vadd.f32 %v17988_v61, %v1287_v36 }
 0x1d7   :  { %21504 = vst [vmem:[#allocation48_spill] sm:$0xff] %v18474_v43  ;;  %v18476_v10 = vpop.f32.mrb[124].mxu0  ;;  %21505 = vst [vmem:[#allocation49_spill] sm:$0xff] %v18480_v18  ;;  %v1605_v26 = vmax.f32 %v21507_v39, %v1533_v62  ;;  %v1303_v35 = vadd.f32 %v15736_v60, %v17988_v61  ;;  %v18519_v60 = vadd.f32 %v17988_v61, %v18244_v14  ;;  %v21516_v28 = vmax.f32 %v18292_v19, 0.0 }
 0x1d8   :  { %21506 = vst [vmem:[#allocation50_spill] sm:$0xff] %v18482_v24  ;;  %v18487_v45 = vpop.f32.mrb[125].mxu0  ;;  %v1604_v51 = vmax.f32 %v21508_v54, %v1532_v30  ;;  %v1535_v31 = vmax.f32 %v1293_v4, 0.0  ;;  %v1534_v39 = vmax.f32 %v1288_v57, 0.0  ;;  %v21512_v57 = vmax.f32 %v18273_v15, 0.0 }
 0x1d9   :  { %v18497_v34 = vmax.f32 %v18050_v50, %v1605_v26  ;;  %v21509_v50 = vmax.f32 %v18269_v6, 0.0  ;;  %21511 = vst [vmem:[#allocation52_spill] sm:$0xff] %v18519_v60  ;;  %v1537_v36 = vmax.f32 %v1303_v35, 0.0  ;;  %v18525_v54 = vrot.slane %v18287_v56, %v18252_v7 }
 0x1da   :  { %v18501_v62 = vmax.f32 %v18053_v59, %v1604_v51  ;;  %v18515_v59 = vadd.f32 %v18240_v42, %v17988_v61  ;;  %v1606_v51 = vmax.f32 %v21512_v57, %v1534_v39  ;;  %v1704_v42 = vcombine.high %v18295_v48, %v18295_v48 }
 0x1db   :  { %v18504_v25 = vpop.f32.mrb[126].mxu0  ;;  %v1607_v26 = vmax.f32 %v21509_v50, %v1535_v31  ;;  %21513 = vst [vmem:[#allocation53_spill] sm:$0xff] %v18525_v54  ;;  %v1298_v31 = vadd.f32 %v17988_v61, %v1297_v9  ;;  %v1313_v50 = vadd.f32 %v15739_v38, %v17988_v61  ;;  %v18534_v14 = vrot.slane %v18295_v48, %v18252_v7 }
 0x1dc   :  { %v18511_v4 = vpop.f32.mrb[127].mxu0  ;;  %21510 = vst [vmem:[#allocation51_spill] sm:$0xff] %v18515_v59  ;;  %v18537_v15 = vmax.f32 %v18063_v63, %v1606_v51  ;;  %v21514_v35 = vmax.f32 %v18278_v2, 0.0  ;;  %v1754_v48 = vcombine.high %v18335_v16, %v18335_v16  ;;  %v21515_v51 = vld [vmem:[#allocation5_spill] sm:$0xff]  ;;  %v18561_v11 = vrot.slane %v1704_v42, %v18252_v7 }
 0x1dd   :  { %v1643_v6 = vmax.f32 %v18060_v17, %v1607_v26  ;;  %v1536_v26 = vmax.f32 %v1298_v31, 0.0  ;;  %v1539_v38 = vmax.f32 %v1313_v50, 0.0  ;;  %v21517_v31 = vld [vmem:[#allocation31_spill] sm:$0xff]  ;;  %v1308_v42 = vadd.f32 %v17988_v61, %v18443_v20 }
 0x1de   :  { %v1609_v56 = vmax.f32 %v21514_v35, %v1537_v36  ;;  %v1874_v63 = vcombine.high %v18537_v15, %v18537_v15  ;;  %v21518_v50 = vmax.f32 %v21517_v31, 0.0  ;;  %v1805_v60 = vcombine.high %v18387_v41, %v18387_v41 }
 0x1df   :  { %v18541_v39 = vpop.f32.mrb[128].mxu0  ;;  %v1891_v17 = vcombine.high %v1643_v6, %v1643_v6  ;;  %v1898_v9 = vrot.slane %v1643_v6, %v18252_v7  ;;  %v1608_v6 = vmax.f32 %v21516_v28, %v1536_v26  ;;  %v21519_v26 = vld [vmem:[#allocation6_spill] sm:$0xff]  ;;  %v2536_v46 = vcombine.low %v18408_v44, %v18426_v13 }
 0x1e0   :  { %v18544_v57 = vpop.f32.mrb[129].mxu0  ;;  %v1645_v2 = vmax.f32 %v21515_v51, %v1609_v56  ;;  %v1611_v37 = vmax.f32 %v21518_v50, %v1539_v38  ;;  %v1888_v59 = vrot.slane %v1874_v63, %v18252_v7  ;;  %v18579_v63 = vcombine.low %v18335_v16, %v1754_v48 }
 0x1e1   :  { %v1905_v36 = vrot.slane %v1891_v17, %v18252_v7  ;;  %v1906_v35 = vcombine.high %v1898_v9, %v1898_v9  ;;  %v18568_v17 = vcombine.high %v18534_v14, %v18534_v14  ;;  %v1644_v38 = vmax.f32 %v21519_v26, %v1608_v6 }
 0x1e2   :  { %v1890_v50 = vcombine.high %v1888_v59, %v1888_v59  ;;  %v18574_v30 = vmax.f32 %v21520_v27, %v1611_v37  ;;  %v2537_v6 = vcombine.low %v18370_v23, %v18391_v40  ;;  %v1925_v43 = vcombine.high %v1645_v2, %v1645_v2 }
 0x1e3   :  { %v18564_v56 = vpop.f32.mrb[130].mxu0  ;;  %v1907_v19 = vcombine.high %v1905_v36, %v1905_v36  ;;  %v2337_v28 = vcombine.low %v1898_v9, %v1906_v35  ;;  %v2839_v31 = vcombine.low %v1906_v35, %v1905_v36  ;;  %v1908_v24 = vcombine.high %v1644_v38, %v1644_v38 }
 0x1e4   :  { %v18571_v51 = vpop.f32.mrb[131].mxu0  ;;  %21521 = vst [vmem:[#allocation5_spill] sm:$0xff] %v18574_v30  ;;  %v2336_v26 = vcombine.low %v1888_v59, %v1890_v50  ;;  %v2838_v35 = vcombine.low %v1890_v50, %v1898_v9  ;;  %v18590_v16 = vrot.slane %v1644_v38, %v18252_v7  ;;  %v1538_v59 = vmax.f32 %v1308_v42, 0.0 }
 0x1e5   :  { %v5988_v18 = vcombine.low %v1905_v36, %v1907_v19  ;;  %v2351_v27 = vrot.slane %v2337_v28, %v18252_v7  ;;  %v18593_v20 = vrot.slane %v1908_v24, %v18252_v7  ;;  %v2853_v48 = vrot.slane %v2839_v31, %v18252_v7 }
 0x1e6   :  { %v2344_v40 = vrot.slane %v2336_v26, %v18252_v7  ;;  %v2846_v23 = vrot.slane %v2838_v35, %v18252_v7  ;;  %v18603_v36 = vrot.slane %v1645_v2, %v18252_v7  ;;  %v18614_v19 = vcombine.low %v18387_v41, %v1805_v60 }
 0x1e7   :  { %v18585_v12 = vpop.f32.mrb[132].mxu0  ;;  %v5995_v61 = vrot.slane %v5988_v18, %v18252_v7  ;;  %v18607_v18 = vcombine.high %v18590_v16, %v18590_v16  ;;  %v18611_v24 = vcombine.high %v18593_v20, %v18593_v20  ;;  %v1787_v28 = vcombine.high %v18394_v29, %v18394_v29 }
 0x1e8   :  { %v18595_v37 = vpop.f32.mrb[133].mxu0  ;;  %21523 = vst [vmem:[#allocation6_spill] sm:$0xff] %v18603_v36  ;;  %v18618_v38 = vcombine.low %v2344_v40, %v2351_v27  ;;  %v18620_v31 = vcombine.low %v2846_v23, %v2853_v48  ;;  %v18627_v42 = vrot.slane %v1925_v43, %v18252_v7  ;;  %v18644_v43 = vld [vmem:[%s21304_s2] ss:$0 sm:$0xff]  ;;  %v3007_v35 = vrot.slane %v18579_v63, %v18252_v7 }
 0x1e9   :  { %v18600_v9 = vcombine.low %v2351_v27, %v5995_v61  ;;  %v2855_v26 = vcombine.low %v18607_v18, %v18593_v20  ;;  %v2856_v41 = vcombine.low %v18611_v24, %v18603_v36  ;;  %v21526_v61 = vmax.f32 %v18307_v58, 0.0 }
 0x1ea   :  { %21524 = vst [vmem:[#allocation7_spill] sm:$0xff] %v18618_v38  ;;  %21525 = vst [vmem:[#allocation54_spill] sm:$0xff] %v18620_v31  ;;  %v1323_v40 = vadd.f32 %v18644_v43, %v18476_v10  ;;  %v18655_v58 = vrot.slane %v2537_v6, %v18252_v7  ;;  %v21527_v10 = vld [vmem:[#allocation8_spill] sm:$0xff]  ;;  %v18667_v63 = vcombine.high %v18627_v42, %v18627_v42 }
 0x1eb   :  { %21522 = vst [vmem:[#allocation31_spill] sm:$0xff] %v18600_v9  ;;  %v18622_v2 = vpop.f32.mrb[134].mxu0  ;;  %v1610_v48 = vmax.f32 %v21526_v61, %v1538_v59  ;;  %v2863_v50 = vrot.slane %v2855_v26, %v18252_v7  ;;  %v2870_v27 = vrot.slane %v2856_v41, %v18252_v7  ;;  %v3025_v59 = vrot.slane %v18614_v19, %v18252_v7 }
 0x1ec   :  { %v18633_v60 = vpop.f32.mrb[135].mxu0  ;;  %v18660_v61 = vcombine.low %v18394_v29, %v1787_v28  ;;  %v1541_v41 = vmax.f32 %v1323_v40, 0.0  ;;  %v1318_v6 = vadd.f32 %v18644_v43, %v18487_v45  ;;  %v1823_v29 = vcombine.high %v18430_v53, %v18430_v53 }
 0x1ed   :  { %v1646_v9 = vmax.f32 %v21527_v10, %v1610_v48  ;;  %v18669_v26 = vcombine.low %v2863_v50, %v2870_v27  ;;  %v1806_v19 = vcombine.high %v18433_v0, %v18433_v0  ;;  %v1857_v28 = vcombine.high %v18497_v34, %v18497_v34  ;;  %v21529_v50 = vld [vmem:[#allocation32_spill] sm:$0xff] }
 0x1ee   :  { %v21530_v27 = vmax.f32 %v21529_v50, 0.0  ;;  %v1540_v30 = vmax.f32 %v1318_v6, 0.0  ;;  %v1333_v45 = vadd.f32 %v18644_v43, %v18504_v25  ;;  %v1864_v31 = vrot.slane %v18497_v34, %v18252_v7  ;;  %v21534_v50 = vld [vmem:[#allocation9_spill] sm:$0xff] }
 0x1ef   :  { %v18663_v36 = vpop.f32.mrb[136].mxu0  ;;  %21528 = vst [vmem:[#allocation8_spill] sm:$0xff] %v18669_v26  ;;  %v1942_v48 = vcombine.high %v1646_v9, %v1646_v9  ;;  %v1949_v10 = vrot.slane %v1646_v9, %v18252_v7  ;;  %v18688_v26 = vrot.slane %v18433_v0, %v18252_v7  ;;  %v1328_v9 = vadd.f32 %v18644_v43, %v18511_v4 }
 0x1f0   :  { %v18673_v23 = vpop.f32.mrb[137].mxu0  ;;  %v1613_v40 = vmax.f32 %v21530_v27, %v1541_v41  ;;  %v21535_v27 = vld [vmem:[#allocation33_spill] sm:$0xff]  ;;  %v18709_v34 = vrot.slane %v18430_v53, %v18252_v7  ;;  %v1543_v4 = vmax.f32 %v1333_v45, 0.0  ;;  %v21540_v45 = vld [vmem:[#allocation10_spill] sm:$0xff] }
 0x1f1   :  { %21531 = vst [vmem:[#allocation32_spill] sm:$0xff] %v18688_v26  ;;  %v18693_v1 = vrot.slane %v1942_v48, %v18252_v7  ;;  %v1957_v41 = vcombine.high %v1949_v10, %v1949_v10  ;;  %v2872_v6 = vcombine.low %v18667_v63, %v1949_v10  ;;  %v21536_v0 = vmax.f32 %v21535_v27, 0.0  ;;  %v21542_v27 = vld [vmem:[#allocation34_spill] sm:$0xff] }
 0x1f2   :  { %v18701_v25 = vmax.f32 %v21534_v50, %v1613_v40  ;;  %v18712_v48 = vrot.slane %v1857_v28, %v18252_v7  ;;  %v18717_v40 = vrot.slane %v1823_v29, %v18252_v7  ;;  %v18720_v50 = vrot.slane %v1806_v19, %v18252_v7 }
 0x1f3   :  { %21532 = vst [vmem:[#allocation55_spill] sm:$0xff] %v18693_v1  ;;  %v18697_v49 = vpop.f32.mrb[138].mxu0  ;;  %v1612_v3 = vmax.f32 %v21536_v0, %v1540_v30  ;;  %v2873_v30 = vcombine.low %v1957_v41, %v18693_v1  ;;  %v18725_v53 = vcombine.high %v18688_v26, %v18688_v26  ;;  %v2354_v28 = vcombine.low %v18593_v20, %v18611_v24  ;;  %v21546_v24 = vld [vmem:[#allocation11_spill] sm:$0xff] }
 0x1f4   :  { %21533 = vst [vmem:[#allocation56_spill] sm:$0xff] %v18697_v49  ;;  %v18705_v54 = vpop.f32.mrb[139].mxu0  ;;  %v1542_v49 = vmax.f32 %v1328_v9, 0.0  ;;  %21538 = vst [vmem:[#allocation33_spill] sm:$0xff] %v18717_v40  ;;  %v21543_v13 = vmax.f32 %v21542_v27, 0.0  ;;  %v2880_v19 = vrot.slane %v2872_v6, %v18252_v7  ;;  %v21544_v1 = vmax.f32 %v18341_v5, 0.0 }
 0x1f5   :  { %21537 = vst [vmem:[#allocation9_spill] sm:$0xff] %v18705_v54  ;;  %21539 = vst [vmem:[#allocation57_spill] sm:$0xff] %v18725_v53  ;;  %v18730_v9 = vmax.f32 %v21540_v45, %v1612_v3  ;;  %v2887_v0 = vrot.slane %v2873_v30, %v18252_v7  ;;  %v18740_v26 = vcombine.high %v1864_v31, %v1864_v31  ;;  %v21548_v30 = vld [vmem:[#allocation12_spill] sm:$0xff] }
 0x1f6   :  { %v1615_v44 = vmax.f32 %v21543_v13, %v1543_v4  ;;  %v1614_v54 = vmax.f32 %v21544_v1, %v1542_v49  ;;  %v1838_v3 = vcombine.high %v18709_v34, %v18709_v34  ;;  %v18748_v20 = vrot.slane %v18537_v15, %v18252_v7 }
 0x1f7   :  { %21541 = vst [vmem:[#allocation10_spill] sm:$0xff] %v18730_v9  ;;  %v18734_v29 = vpop.f32.mrb[140].mxu0  ;;  %v18755_v6 = vcombine.high %v18712_v48, %v18712_v48  ;;  %v18759_v5 = vcombine.high %v18717_v40, %v18717_v40  ;;  %v2353_v49 = vcombine.low %v18590_v16, %v18607_v18  ;;  %v18763_v1 = vcombine.low %v2880_v19, %v2887_v0 }
 0x1f8   :  { %v18742_v55 = vpop.f32.mrb[141].mxu0  ;;  %v18751_v4 = vmax.f32 %v21546_v24, %v1615_v44  ;;  %v18766_v45 = vmax.f32 %v21548_v30, %v1614_v54  ;;  %v21549_v15 = vcombine.low %v18328_v47, %v18352_v22  ;;  %v18775_v13 = vcombine.low %v18365_v32, %v3007_v35 }
 0x1f9   :  { %21545 = vst [vmem:[#allocation34_spill] sm:$0xff] %v18742_v55  ;;  %21547 = vst [vmem:[#allocation11_spill] sm:$0xff] %v18759_v5  ;;  %v4173_v44 = vcombine.low %v18725_v53, %v18720_v50  ;;  %v2371_v24 = vcombine.low %v1949_v10, %v1957_v41  ;;  %v18782_v16 = vcombine.low %v18655_v58, %v3025_v59 }
 0x1fa   :  { %v18772_v27 = vrot.slane %v21549_v15, %v18252_v7  ;;  %v2370_v54 = vcombine.low %v18627_v42, %v18667_v63  ;;  %v18787_v18 = vrot.slane %v2354_v28, %v18252_v7  ;;  %v2319_v47 = vcombine.low %v1864_v31, %v18740_v26 }
 0x1fb   :  { %v18779_v55 = vpop.f32.mrb[142].mxu0  ;;  %v2027_v35 = vcombine.high %v18751_v4, %v18751_v4  ;;  %v1889_v59 = vcombine.high %v18748_v20, %v18748_v20  ;;  %v2320_v10 = vcombine.low %v18712_v48, %v18755_v6  ;;  %v18801_v42 = vrot.slane %v2536_v46, %v18252_v7 }
 0x1fc   :  { %21550 = vst [vmem:[#allocation12_spill] sm:$0xff] %v18787_v18  ;;  %v18790_v22 = vpop.f32.mrb[143].mxu0  ;;  %v18804_v63 = vcombine.low %v18709_v34, %v1838_v3  ;;  %v2361_v41 = vrot.slane %v2353_v49, %v18252_v7  ;;  %v18810_v28 = vrot.slane %v4173_v44, %v18252_v7  ;;  %v18813_v19 = vrot.slane %v2371_v24, %v18252_v7 }
 0x1fd   :  { %v2327_v0 = vrot.slane %v2319_v47, %v18252_v7  ;;  %v2334_v30 = vrot.slane %v2320_v10, %v18252_v7  ;;  %v2378_v3 = vrot.slane %v2370_v54, %v18252_v7  ;;  %v2041_v44 = vrot.slane %v2027_v35, %v18252_v7 }
 0x1fe   :  { %21551 = vst [vmem:[#allocation58_spill] sm:$0xff] %v18810_v28  ;;  %21552 = vst [vmem:[#allocation59_spill] sm:$0xff] %v18813_v19  ;;  %v18821_v15 = vcombine.low %v2361_v41, %v18787_v18  ;;  %v5979_v24 = vcombine.low %v18748_v20, %v1889_v59  ;;  %v1343_v47 = vadd.f32 %v18644_v43, %v18541_v39  ;;  %v21559_v18 = vld [vmem:[#allocation29_spill] sm:$0xff] }
 0x1ff   :  { %v18826_v31 = vcombine.low %v2327_v0, %v2334_v30  ;;  %v1338_v10 = vadd.f32 %v18644_v43, %v18544_v57  ;;  %v1353_v54 = vadd.f32 %v18644_v43, %v18564_v56  ;;  %v1348_v41 = vadd.f32 %v18644_v43, %v18571_v51  ;;  %v18850_v56 = vld [vmem:[%s21305_s3 + $0x10] sm:$0x3f] }
 0x200   :  { %21553 = vst [vmem:[#allocation60_spill] sm:$0xff] %v18821_v15  ;;  %v1363_v49 = vadd.f32 %v18644_v43, %v18585_v12  ;;  %v18840_v35 = vcombine.low %v2378_v3, %v18813_v19  ;;  %v5986_v39 = vrot.slane %v5979_v24, %v18252_v7  ;;  %v1545_v59 = vmax.f32 %v1343_v47, 0.0  ;;  %v21557_v24 = vld [vmem:[#allocation35_spill] sm:$0xff] }
 0x201   :  { %21554 = vst [vmem:[#allocation61_spill] sm:$0xff] %v18826_v31  ;;  %15772 = vmatprep.mubr.msk.f32.mxu1 %vm2387_vm5, %v18826_v31  ;;  %v1358_v57 = vadd.f32 %v18644_v43, %v18595_v37  ;;  %v1544_v51 = vmax.f32 %v1338_v10, 0.0  ;;  %v1547_v12 = vmax.f32 %v1353_v54, 0.0  ;;  %v1546_v0 = vmax.f32 %v1348_v41, 0.0  ;;  %v21560_v10 = vld [vmem:[#allocation36_spill] sm:$0xff] }
 0x202   :  { %21555 = vst [vmem:[#allocation62_spill] sm:$0xff] %v18840_v35  ;;  %15773 = vmatmul.mubr.msk.f32.vlgmr.msra.gmra.mrb[0].mxu1 %vm2387_vm5, %v18618_v38  ;;  %v1549_v3 = vmax.f32 %v1363_v49, 0.0  ;;  %v2043_v32 = vcombine.high %v2041_v44, %v2041_v44  ;;  %v18854_v46 = vcombine.low %v2334_v30, %v5986_v39  ;;  %v21558_v47 = vmax.f32 %v21557_v24, 0.0  ;;  %v21562_v38 = vld [vmem:[#allocation37_spill] sm:$0xff] }
 0x203   :  { %15779 = vmatpush3.msk.msra.mxu1 %vm2396_vm4, %v21559_v18  ;;  %15775 = vmatprep.mubr.msk.f32.mxu1 %vm2387_vm5, %v18821_v15  ;;  %v1548_v37 = vmax.f32 %v1358_v57, 0.0  ;;  %v21561_v31 = vmax.f32 %v21560_v10, 0.0  ;;  %v21563_v54 = vmax.f32 %v21562_v38, 0.0  ;;  %v21564_v49 = vmax.f32 %v18401_v52, 0.0  ;;  %v21568_v38 = vld [vmem:[#allocation40_spill] sm:$0xff]  ;;  %v21570_v52 = vld [vmem:[#allocation14_spill] sm:$0xff] }
 0x204   :  { %21556 = vst [vmem:[#allocation63_spill] sm:$0xff] %v18854_v46  ;;  %v1617_v19 = vmax.f32 %v21558_v47, %v1545_v59  ;;  %v21565_v39 = vmax.f32 %v18405_v8, 0.0  ;;  %15786 = vmatprep.subr.msk.mxu1 %vm2396_vm4, %v18850_v56  ;;  %v18874_v18 = vrot.slane %v18501_v62, %v18252_v7  ;;  %v1976_v59 = vcombine.high %v18730_v9, %v18730_v9  ;;  %v21571_v47 = vld [vmem:[#allocation15_spill] sm:$0xff] }
 0x205   :  { %v1616_v53 = vmax.f32 %v21561_v31, %v1544_v51  ;;  %v1619_v41 = vmax.f32 %v21563_v54, %v1547_v12  ;;  %v1618_v30 = vmax.f32 %v21564_v49, %v1546_v0  ;;  %v21567_v31 = vld [vmem:[#allocation13_spill] sm:$0xff]  ;;  %v21569_v51 = vmax.f32 %v21568_v38, 0.0 }
 0x206   :  { %v1621_v24 = vmax.f32 %v21565_v39, %v1549_v3  ;;  %21566 = vst [vmem:[#allocation35_spill] sm:$0xff] %v18874_v18  ;;  %v1653_v57 = vmax.f32 %v21567_v31, %v1617_v19  ;;  %v21572_v3 = vld [vmem:[#allocation16_spill] sm:$0xff]  ;;  %v21573_v54 = vld [vmem:[#allocation17_spill] sm:$0xff]  ;;  %15776 = vmatmul.mubr.msk.f32.gmra.mrb[2].mxu1 %vm2387_vm5, %v18840_v35  ;;  %v1993_v39 = vcombine.high %v18701_v25, %v18701_v25 }
 0x207   :  { %v1620_v12 = vmax.f32 %v21569_v51, %v1548_v37  ;;  %v1652_v0 = vmax.f32 %v21570_v52, %v1616_v53  ;;  %v1655_v8 = vmax.f32 %v21571_v47, %v1619_v41  ;;  %v1654_v10 = vmax.f32 %v21572_v3, %v1618_v30  ;;  %v21574_v37 = vld [vmem:[#allocation18_spill] sm:$0xff] }
 0x208   :  { %v18885_v49 = vmax.f32 %v21573_v54, %v1621_v24  ;;  %v2061_v46 = vcombine.high %v1653_v57, %v1653_v57  ;;  %v18892_v19 = vrot.slane %v1653_v57, %v18252_v7  ;;  %v18899_v53 = vrot.slane %v18701_v25, %v18252_v7 }
 0x209   :  { %v18895_v31 = vmax.f32 %v21574_v37, %v1620_v12  ;;  %v3146_v41 = vcombine.low %v2041_v44, %v2043_v32  ;;  %v2044_v30 = vcombine.high %v1652_v0, %v1652_v0  ;;  %v2051_v24 = vrot.slane %v1652_v0, %v18252_v7 }
 0x20a   :  { %21575 = vst [vmem:[#allocation29_spill] sm:$0xff] %v18899_v53  ;;  %v18903_v38 = vrot.slane %v1976_v59, %v18252_v7  ;;  %v18906_v51 = vrot.slane %v2061_v46, %v18252_v7  ;;  %v2095_v52 = vcombine.high %v1655_v8, %v1655_v8  ;;  %v18909_v57 = vrot.slane %v1655_v8, %v18252_v7 }
 0x20b   :  { %v18912_v12 = vrot.slane %v2044_v30, %v18252_v7  ;;  %v2059_v47 = vcombine.high %v2051_v24, %v2051_v24  ;;  %v3486_v25 = vcombine.low %v2043_v32, %v2051_v24  ;;  %v18916_v44 = vcombine.high %v18561_v11, %v18561_v11 }
 0x20c   :  { %21576 = vst [vmem:[#allocation36_spill] sm:$0xff] %v18903_v38  ;;  %v18920_v59 = vrot.slane %v18751_v4, %v18252_v7  ;;  %v2010_v46 = vcombine.high %v18766_v45, %v18766_v45  ;;  %v2076_v0 = vcombine.high %v18892_v19, %v18892_v19  ;;  %v2078_v8 = vcombine.high %v1654_v10, %v1654_v10 }
 0x20d   :  { %21577 = vst [vmem:[#allocation37_spill] sm:$0xff] %v18912_v12  ;;  %v3154_v3 = vrot.slane %v3146_v41, %v18252_v7  ;;  %v18929_v32 = vrot.slane %v18766_v45, %v18252_v7  ;;  %v3147_v54 = vcombine.low %v2051_v24, %v2059_v47  ;;  %v3487_v37 = vcombine.low %v2059_v47, %v18912_v12  ;;  %v21621_v12 = vld [vmem:[#allocation47_spill] sm:$0xff] }
 0x20e   :  { %v18934_v4 = vcombine.high %v18906_v51, %v18906_v51  ;;  %v18937_v30 = vrot.slane %v2095_v52, %v18252_v7  ;;  %v2110_v9 = vcombine.high %v18909_v57, %v18909_v57  ;;  %v2085_v35 = vrot.slane %v1654_v10, %v18252_v7 }
 0x20f   :  { %v18943_v41 = vrot.slane %v3147_v54, %v18252_v7  ;;  %v3494_v45 = vrot.slane %v3486_v25, %v18252_v7  ;;  %v3501_v24 = vrot.slane %v3487_v37, %v18252_v7  ;;  %v2486_v47 = vcombine.low %v18561_v11, %v18916_v44 }
 0x210   :  { %21578 = vst [vmem:[#allocation13_spill] sm:$0xff] %v18937_v30  ;;  %v21580_v52 = vcombine.high %v18501_v62, %v18501_v62  ;;  %v18957_v5 = vcombine.high %v18903_v38, %v18903_v38  ;;  %v3503_v10 = vcombine.low %v2076_v0, %v18906_v51  ;;  %v18961_v54 = vrot.slane %v2078_v8, %v18252_v7 }
 0x211   :  { %21579 = vst [vmem:[#allocation40_spill] sm:$0xff] %v18943_v41  ;;  %v18965_v25 = vcombine.high %v18874_v18, %v18874_v18  ;;  %v18969_v37 = vcombine.high %v18929_v32, %v18929_v32  ;;  %v18972_v62 = vcombine.low %v3154_v3, %v18943_v41  ;;  %v3521_v40 = vcombine.low %v2110_v9, %v18937_v30 }
 0x212   :  { %v18953_v15 = vrot.slane %v21580_v52, %v18252_v7  ;;  %21582 = vst [vmem:[#allocation15_spill] sm:$0xff] %v18957_v5  ;;  %v18974_v52 = vcombine.low %v3494_v45, %v3501_v24  ;;  %v18982_v8 = vcombine.high %v18961_v54, %v18961_v54  ;;  %v3504_v28 = vcombine.low %v18934_v4, %v2085_v35 }
 0x213   :  { %21583 = vst [vmem:[#allocation16_spill] sm:$0xff] %v18965_v25  ;;  %v18987_v18 = vcombine.high %v18899_v53, %v18899_v53  ;;  %v18992_v45 = vrot.slane %v2010_v46, %v18252_v7  ;;  %v3511_v41 = vrot.slane %v3503_v10, %v18252_v7  ;;  %v3163_v3 = vcombine.low %v18892_v19, %v2076_v0  ;;  %v21612_v19 = vld [vmem:[#allocation9_spill] sm:$0xff]  ;;  %v21628_v25 = vld [vmem:[#allocation34_spill] sm:$0xff] }
 0x214   :  { %21581 = vst [vmem:[#allocation14_spill] sm:$0xff] %v18953_v15  ;;  %21584 = vst [vmem:[#allocation17_spill] sm:$0xff] %v18974_v52  ;;  %v18977_v15 = vrot.slane %v1993_v39, %v18252_v7  ;;  %v18995_v39 = vrot.slane %v2486_v47, %v18252_v7  ;;  %v3518_v30 = vrot.slane %v3504_v28, %v18252_v7 }
 0x215   :  { %21586 = vst [vmem:[#allocation64_spill] sm:$0xff] %v18987_v18  ;;  %v3520_v52 = vcombine.low %v18982_v8, %v18909_v57  ;;  %v3181_v46 = vcombine.low %v18909_v57, %v2110_v9  ;;  %v21587_v47 = vcombine.low %v18534_v14, %v18568_v17  ;;  %v3535_v24 = vrot.slane %v3521_v40, %v18252_v7 }
 0x216   :  { %21585 = vst [vmem:[#allocation18_spill] sm:$0xff] %v18977_v15  ;;  %v2093_v10 = vcombine.high %v2085_v35, %v2085_v35  ;;  %v19012_v5 = vcombine.low %v3511_v41, %v3518_v30  ;;  %v1373_v0 = vadd.f32 %v18644_v43, %v18622_v2  ;;  %v1368_v30 = vadd.f32 %v18644_v43, %v18633_v60  ;;  %v19047_v2 = vld [vmem:[%s21305_s3 + $0x18] sm:$0x3f] }
 0x217   :  { %v2493_v53 = vrot.slane %v21587_v47, %v18252_v7  ;;  %v3528_v28 = vrot.slane %v3520_v52, %v18252_v7  ;;  %v19031_v41 = vrot.slane %v3163_v3, %v18252_v7  ;;  %v19042_v47 = vcombine.low %v18801_v42, %v18655_v58  ;;  %21592 = vst [vmem:[#allocation68_spill] sm:$0xff] %v19047_v2 }
 0x218   :  { %21588 = vst [vmem:[#allocation65_spill] sm:$0xff] %v19012_v5  ;;  %v19050_v60 = vrot.slane %v3181_v46, %v18252_v7  ;;  %v19052_v3 = vcombine.low %v2085_v35, %v2093_v10  ;;  %v21595_v58 = vrot.slane %v18660_v61, %v18252_v7  ;;  %v1378_v35 = vadd.f32 %v18644_v43, %v18673_v23  ;;  %v21601_v23 = vld [vmem:[#allocation44_spill] sm:$0xff] }
 0x219   :  { %v2501_v57 = vcombine.low %v2493_v53, %v18995_v39  ;;  %v19024_v40 = vcombine.low %v3528_v28, %v3535_v24  ;;  %v21590_v53 = vcombine.low %v18344_v33, %v18374_v21  ;;  %v1383_v24 = vadd.f32 %v18644_v43, %v18663_v36  ;;  %21591 = vst [vmem:[#allocation67_spill] sm:$0xff] %v19042_v47  ;;  %v21593_v33 = vld [vmem:[#allocation38_spill] sm:$0xff] }
 0x21a   :  { %v1551_v28 = vmax.f32 %v1373_v0, 0.0  ;;  %v1550_v21 = vmax.f32 %v1368_v30, 0.0  ;;  %v2129_v10 = vcombine.high %v18885_v49, %v18885_v49  ;;  %v2112_v61 = vcombine.high %v18895_v31, %v18895_v31 }
 0x21b   :  { %21589 = vst [vmem:[#allocation66_spill] sm:$0xff] %v19024_v40  ;;  %15780 = vmatprep.mubr.msk.f32.mxu1 %vm2387_vm5, %v2501_v57  ;;  %v2534_v52 = vrot.slane %v21590_v53, %v18252_v7  ;;  %v1553_v46 = vmax.f32 %v1383_v24, 0.0  ;;  %v21596_v57 = vld [vmem:[#allocation42_spill] sm:$0xff]  ;;  %v21598_v53 = vld [vmem:[#allocation43_spill] sm:$0xff] }
 0x21c   :  { %15781 = vmatmul.mubr.msk.f32.vlgmr.msra.gmra.mrb[0].mxu1 %vm2387_vm5, %v21593_v33  ;;  %v21597_v0 = vmax.f32 %v21596_v57, 0.0  ;;  %v21599_v9 = vmax.f32 %v21598_v53, 0.0  ;;  %v21627_v40 = vld [vmem:[#allocation50_spill] sm:$0xff] }
 0x21d   :  { %15787 = vmatpush3.msk.msra.mxu1 %vm2396_vm4, %v18850_v56  ;;  %v19059_v36 = vcombine.low %v18772_v27, %v2534_v52  ;;  %v19064_v42 = vcombine.low %v2534_v52, %v21595_v58  ;;  %v21600_v27 = vld [vmem:[#allocation53_spill] sm:$0xff]  ;;  %v21602_v52 = vmax.f32 %v21601_v23, 0.0  ;;  %v1552_v58 = vmax.f32 %v1378_v35, 0.0 }
 0x21e   :  { %v1623_v30 = vmax.f32 %v21597_v0, %v1551_v28  ;;  %v1622_v38 = vmax.f32 %v21599_v9, %v1550_v21  ;;  %v2652_v14 = vcombine.low %v18916_v44, %v21600_v27  ;;  %15794 = vmatprep.subr.msk.mxu1 %vm2396_vm4, %v19047_v2  ;;  %v21603_v28 = vld [vmem:[#allocation56_spill] sm:$0xff]  ;;  %v19088_v9 = vrot.slane %v18895_v31, %v18252_v7  ;;  %v21605_v44 = vld [vmem:[#allocation19_spill] sm:$0xff]  ;;  %v21607_v35 = vld [vmem:[#allocation21_spill] sm:$0xff] }
 0x21f   :  { %21594 = vst [vmem:[#allocation69_spill] sm:$0xff] %v19059_v36  ;;  %15783 = vmatprep.mubr.msk.f32.mxu1 %vm2387_vm5, %v19059_v36  ;;  %v1625_v24 = vmax.f32 %v21602_v52, %v1553_v46  ;;  %v1393_v57 = vadd.f32 %v18644_v43, %v21603_v28  ;;  %v21606_v0 = vld [vmem:[#allocation20_spill] sm:$0xff]  ;;  %v19101_v46 = vrot.slane %v18885_v49, %v18252_v7  ;;  %v21608_v28 = vld [vmem:[#allocation45_spill] sm:$0xff]  ;;  %v21620_v36 = vld [vmem:[#allocation23_spill] sm:$0xff] }
 0x220   :  { %21604 = vst [vmem:[#allocation42_spill] sm:$0xff] %v19088_v9  ;;  %v19091_v21 = vmax.f32 %v21605_v44, %v1623_v30  ;;  %v19094_v53 = vmax.f32 %v21606_v0, %v1622_v38  ;;  %15784 = vmatmul.mubr.msk.f32.gmra.mrb[2].mxu1 %vm2387_vm5, %v19042_v47  ;;  %v2666_v23 = vrot.slane %v2652_v14, %v18252_v7  ;;  %v21609_v31 = vmax.f32 %v21608_v28, 0.0 }
 0x221   :  { %v1661_v52 = vmax.f32 %v21607_v35, %v1625_v24  ;;  %v21610_v30 = vcombine.low %v18568_v17, %v18561_v11  ;;  %v3180_v44 = vcombine.low %v18961_v54, %v18982_v8  ;;  %v19113_v0 = vrot.slane %v2129_v10, %v18252_v7  ;;  %v21613_v35 = vld [vmem:[#allocation22_spill] sm:$0xff] }
 0x222   :  { %v1624_v15 = vmax.f32 %v21609_v31, %v1552_v58  ;;  %v1555_v14 = vmax.f32 %v1393_v57, 0.0  ;;  %v1388_v49 = vadd.f32 %v18644_v43, %v21612_v19  ;;  %v19126_v17 = vrot.slane %v2112_v61, %v18252_v7  ;;  %v19144_v61 = vld [vmem:[%s21305_s3 + $0x20] sm:$0x3f] }
 0x223   :  { %v2659_v38 = vrot.slane %v21610_v30, %v18252_v7  ;;  %21611 = vst [vmem:[#allocation43_spill] sm:$0xff] %v19113_v0  ;;  %v2197_v47 = vcombine.high %v1661_v52, %v1661_v52  ;;  %v2204_v24 = vrot.slane %v1661_v52, %v18252_v7  ;;  %v19130_v54 = vcombine.high %v19088_v9, %v19088_v9  ;;  %v21619_v30 = vld [vmem:[#allocation39_spill] sm:$0xff] }
 0x224   :  { %v19119_v58 = vmax.f32 %v21613_v35, %v1624_v15  ;;  %v1403_v8 = vadd.f32 %v18644_v43, %v18734_v29  ;;  %v2144_v19 = vcombine.high %v19101_v46, %v19101_v46  ;;  %v19151_v29 = vcombine.high %v19113_v0, %v19113_v0 }
 0x225   :  { %v19121_v28 = vcombine.low %v2659_v38, %v2666_v23  ;;  %21615 = vst [vmem:[#allocation44_spill] sm:$0xff] %v19130_v54  ;;  %v2211_v15 = vrot.slane %v2197_v47, %v18252_v7  ;;  %v2212_v10 = vcombine.high %v2204_v24, %v2204_v24  ;;  %v19147_v23 = vrot.slane %v3180_v44, %v18252_v7  ;;  %v21617_v47 = vld [vmem:[#allocation46_spill] sm:$0xff] }
 0x226   :  { %v2180_v57 = vcombine.high %v19119_v58, %v19119_v58  ;;  %21616 = vst [vmem:[#allocation56_spill] sm:$0xff] %v19151_v29  ;;  %v21618_v52 = vmax.f32 %v21617_v47, 0.0  ;;  %v1554_v38 = vmax.f32 %v1388_v49, 0.0  ;;  %v4730_v44 = vcombine.low %v19130_v54, %v19126_v17 }
 0x227   :  { %21614 = vst [vmem:[#allocation53_spill] sm:$0xff] %v19121_v28  ;;  %15788 = vmatprep.mubr.msk.f32.mxu1 %vm2387_vm5, %v19121_v28  ;;  %v2213_v35 = vcombine.high %v2211_v15, %v2211_v15  ;;  %v3317_v11 = vcombine.low %v2204_v24, %v2212_v10  ;;  %v3657_v28 = vcombine.low %v2212_v10, %v2211_v15  ;;  %v21622_v47 = vmax.f32 %v21621_v12, 0.0 }
 0x228   :  { %v1627_v31 = vmax.f32 %v21618_v52, %v1555_v14  ;;  %15789 = vmatmul.mubr.msk.f32.vlgmr.msra.gmra.mrb[0].mxu1 %vm2387_vm5, %v21619_v30  ;;  %v2194_v9 = vrot.slane %v2180_v57, %v18252_v7  ;;  %v21623_v52 = vld [vmem:[#allocation41_spill] sm:$0xff]  ;;  %v1557_v49 = vmax.f32 %v1403_v8, 0.0  ;;  %v2163_v10 = vcombine.high %v19091_v21, %v19091_v21 }
 0x229   :  { %15795 = vmatpush3.msk.msra.mxu1 %vm2396_vm4, %v19047_v2  ;;  %v1626_v14 = vmax.f32 %v21622_v47, %v1554_v38  ;;  %15791 = vmatprep.mubr.msk.f32.mxu1 %vm2387_vm5, %v21623_v52  ;;  %v19173_v57 = vrot.slane %v19091_v21, %v18252_v7  ;;  %v6477_v54 = vcombine.low %v2211_v15, %v2213_v35  ;;  %v21625_v47 = vld [vmem:[#allocation48_spill] sm:$0xff] }
 0x22a   :  { %v1663_v33 = vmax.f32 %v21620_v36, %v1627_v31  ;;  %15802 = vmatprep.subr.msk.mxu1 %vm2396_vm4, %v19144_v61  ;;  %v2196_v30 = vcombine.high %v2194_v9, %v2194_v9  ;;  %v3331_v36 = vrot.slane %v3317_v11, %v18252_v7  ;;  %v21624_v31 = vld [vmem:[#allocation24_spill] sm:$0xff]  ;;  %v21626_v52 = vmax.f32 %v21625_v47, 0.0 }
 0x22b   :  { %v1662_v38 = vmax.f32 %v21624_v31, %v1626_v14  ;;  %v3671_v5 = vrot.slane %v3657_v28, %v18252_v7  ;;  %v6484_v18 = vrot.slane %v6477_v54, %v18252_v7  ;;  %v1398_v14 = vadd.f32 %v18644_v43, %v21628_v25  ;;  %v21630_v28 = vld [vmem:[#allocation25_spill] sm:$0xff] }
 0x22c   :  { %v2231_v12 = vcombine.high %v1663_v33, %v1663_v33  ;;  %v1629_v8 = vmax.f32 %v21626_v52, %v1557_v49  ;;  %15792 = vmatmul.mubr.msk.f32.gmra.mrb[2].mxu1 %vm2387_vm5, %v21627_v40  ;;  %v3316_v2 = vcombine.low %v2194_v9, %v2196_v30  ;;  %v3656_v21 = vcombine.low %v2196_v30, %v2204_v24  ;;  %v21634_v40 = vld [vmem:[#allocation49_spill] sm:$0xff] }
 0x22d   :  { %v2214_v35 = vcombine.high %v1662_v38, %v1662_v38  ;;  %v19185_v11 = vrot.slane %v1662_v38, %v18252_v7  ;;  %v19189_v31 = vcombine.low %v3331_v36, %v6484_v18  ;;  %v2146_v9 = vcombine.high %v19094_v53, %v19094_v53 }
 0x22e   :  { %v2245_v15 = vrot.slane %v2231_v12, %v18252_v7  ;;  %v3324_v52 = vrot.slane %v3316_v2, %v18252_v7  ;;  %v3664_v49 = vrot.slane %v3656_v21, %v18252_v7  ;;  %v1665_v47 = vmax.f32 %v21630_v28, %v1629_v8 }
 0x22f   :  { %21629 = vst [vmem:[#allocation19_spill] sm:$0xff] %v19189_v31  ;;  %v19198_v24 = vrot.slane %v19094_v53, %v18252_v7  ;;  %v2228_v54 = vrot.slane %v2214_v35, %v18252_v7  ;;  %v19203_v25 = vcombine.high %v19185_v11, %v19185_v11  ;;  %v19207_v18 = vcombine.high %v19173_v57, %v19173_v57 }
 0x230   :  { %v19209_v2 = vcombine.low %v3324_v52, %v3331_v36  ;;  %v19211_v30 = vcombine.low %v3664_v49, %v3671_v5  ;;  %v19214_v12 = vrot.slane %v1663_v33, %v18252_v7  ;;  %v19217_v53 = vcombine.low %v19101_v46, %v2144_v19 }
 0x231   :  { %v2247_v8 = vcombine.high %v2245_v15, %v2245_v15  ;;  %v2230_v21 = vcombine.high %v2228_v54, %v2228_v54  ;;  %v19222_v35 = vrot.slane %v4730_v44, %v18252_v7  ;;  %v3673_v28 = vcombine.low %v19203_v25, %v2228_v54 }
 0x232   :  { %21631 = vst [vmem:[#allocation20_spill] sm:$0xff] %v19211_v30  ;;  %v2265_v36 = vcombine.high %v1665_v47, %v1665_v47  ;;  %v1556_v52 = vmax.f32 %v1398_v14, 0.0  ;;  %v19226_v5 = vrot.slane %v2163_v10, %v18252_v7  ;;  %v19229_v33 = vrot.slane %v2146_v9, %v18252_v7 }
 0x233   :  { %v3674_v19 = vcombine.low %v2230_v21, %v19214_v12  ;;  %v19233_v49 = vrot.slane %v1665_v47, %v18252_v7  ;;  %v3299_v38 = vcombine.low %v19173_v57, %v19207_v18  ;;  %v19239_v44 = vcombine.high %v19198_v24, %v19198_v24 }
 0x234   :  { %21632 = vst [vmem:[#allocation21_spill] sm:$0xff] %v19229_v33  ;;  %v19243_v14 = vrot.slane %v19119_v58, %v18252_v7  ;;  %v2246_v10 = vcombine.high %v19214_v12, %v19214_v12  ;;  %v3350_v9 = vcombine.low %v2245_v15, %v2247_v8  ;;  %v3681_v31 = vrot.slane %v3673_v28, %v18252_v7 }
 0x235   :  { %21633 = vst [vmem:[#allocation45_spill] sm:$0xff] %v19233_v49  ;;  %v3688_v47 = vrot.slane %v3674_v19, %v18252_v7  ;;  %v21635_v30 = vmax.f32 %v21634_v40, 0.0  ;;  %v3333_v57 = vcombine.low %v19185_v11, %v19203_v25  ;;  %v19254_v29 = vrot.slane %v2265_v36, %v18252_v7  ;;  %v21639_v11 = vld [vmem:[#allocation26_spill] sm:$0xff] }
 0x236   :  { %v21636_v58 = vcombine.low %v18740_v26, %v18712_v48  ;;  %v21637_v15 = vcombine.low %v18755_v6, %v18748_v20  ;;  %v19268_v40 = vcombine.high %v19233_v49, %v19233_v49  ;;  %v3334_v36 = vcombine.low %v2228_v54, %v2230_v21 }
 0x237   :  { %v1628_v33 = vmax.f32 %v21635_v30, %v1556_v52  ;;  %v19264_v19 = vcombine.low %v3681_v31, %v3688_v47  ;;  %v1413_v30 = vadd.f32 %v18644_v43, %v18779_v55  ;;  %v1408_v26 = vadd.f32 %v18644_v43, %v18790_v22 }
 0x238   :  { %v2829_v0 = vrot.slane %v21636_v58, %v18252_v7  ;;  %v2836_v28 = vrot.slane %v21637_v15, %v18252_v7  ;;  %21638 = vst [vmem:[#allocation9_spill] sm:$0xff] %v19268_v40  ;;  %v21641_v48 = vcombine.high %v21600_v27, %v21600_v27  ;;  %v3358_v55 = vrot.slane %v3350_v9, %v18252_v7  ;;  %v21642_v58 = vld [vmem:[#allocation51_spill] sm:$0xff] }
 0x239   :  { %v1664_v25 = vmax.f32 %v21639_v11, %v1628_v33  ;;  %v1559_v47 = vmax.f32 %v1413_v30, 0.0  ;;  %v19284_v33 = vcombine.high %v19226_v5, %v19226_v5  ;;  %v1558_v43 = vmax.f32 %v1408_v26, 0.0  ;;  %v21644_v11 = vld [vmem:[#allocation54_spill] sm:$0xff] }
 0x23a   :  { %v19273_v52 = vcombine.low %v2829_v0, %v2836_v28  ;;  %v2991_v20 = vcombine.low %v21600_v27, %v21641_v48  ;;  %v19289_v0 = vcombine.high %v19254_v29, %v19254_v29  ;;  %v19297_v27 = vld [vmem:[%s21305_s3 + $0x28] sm:$0x3f]  ;;  %v21643_v15 = vmax.f32 %v21642_v58, 0.0  ;;  %v21647_v48 = vld [vmem:[#allocation8_spill] sm:$0xff] }
 0x23b   :  { %v2248_v6 = vcombine.high %v1664_v25, %v1664_v25  ;;  %v2255_v31 = vrot.slane %v1664_v25, %v18252_v7  ;;  %v21645_v25 = vld [vmem:[#allocation52_spill] sm:$0xff] }
 0x23c   :  { %21640 = vst [vmem:[#allocation22_spill] sm:$0xff] %v19273_v52  ;;  %15796 = vmatprep.mubr.msk.f32.mxu1 %vm2387_vm5, %v19273_v52  ;;  %v2998_v22 = vrot.slane %v2991_v20, %v18252_v7  ;;  %v1631_v28 = vmax.f32 %v21643_v15, %v1559_v47  ;;  %v21646_v30 = vmax.f32 %v21645_v25, 0.0  ;;  %v4843_v47 = vcombine.low %v19268_v40, %v19254_v29 }
 0x23d   :  { %v19300_v54 = vrot.slane %v2248_v6, %v18252_v7  ;;  %v2263_v21 = vcombine.high %v2255_v31, %v2255_v31  ;;  %v3690_v9 = vcombine.low %v2247_v8, %v2255_v31  ;;  %15797 = vmatmul.mubr.msk.f32.vlgmr.msra.gmra.mrb[0].mxu1 %vm2387_vm5, %v21644_v11  ;;  %v3300_v8 = vcombine.low %v19226_v5, %v19284_v33 }
 0x23e   :  { %15803 = vmatpush3.msk.msra.mxu1 %vm2396_vm4, %v19144_v61  ;;  %v1630_v26 = vmax.f32 %v21646_v30, %v1558_v43  ;;  %15799 = vmatprep.mubr.msk.f32.mxu1 %vm2387_vm5, %v21647_v48  ;;  %v19313_v20 = vcombine.low %v18995_v39, %v2998_v22  ;;  %v19318_v6 = vrot.slane %v3334_v36, %v18252_v7  ;;  %v21649_v43 = vld [vmem:[#allocation27_spill] sm:$0xff]  ;;  %v21650_v39 = vld [vmem:[#allocation28_spill] sm:$0xff] }
 0x23f   :  { %v3351_v58 = vcombine.low %v2255_v31, %v2263_v21  ;;  %v3691_v15 = vcombine.low %v2263_v21, %v19300_v54  ;;  %15810 = vmatprep.subr.msk.mxu1 %vm2396_vm4, %v19297_v27  ;;  %v19326_v25 = vmax.f32 %v21649_v43, %v1631_v28  ;;  %v19330_v30 = vrot.slane %v3300_v8, %v18252_v7 }
 0x240   :  { %21648 = vst [vmem:[#allocation46_spill] sm:$0xff] %v19313_v20  ;;  %v1666_v22 = vmax.f32 %v21650_v39, %v1630_v26  ;;  %v2026_v36 = vcombine.high %v18992_v45, %v18992_v45  ;;  %v3698_v31 = vrot.slane %v3690_v9, %v18252_v7  ;;  %v3307_v28 = vrot.slane %v3299_v38, %v18252_v7  ;;  %v19375_v39 = vld [vmem:[%s21305_s3 + $0x30] sm:$0x3f] }
 0x241   :  { %v19335_v52 = vrot.slane %v3351_v58, %v18252_v7  ;;  %v3705_v21 = vrot.slane %v3691_v15, %v18252_v7  ;;  %15800 = vmatmul.mubr.msk.f32.gmra.mrb[2].mxu1 %vm2387_vm5, %v18763_v1  ;;  %v3639_v26 = vcombine.low %v19207_v18, %v19226_v5  ;;  %v19345_v8 = vcombine.low %v19214_v12, %v2246_v10 }
 0x242   :  { %v3341_v43 = vrot.slane %v3333_v57, %v18252_v7  ;;  %v19349_v58 = vrot.slane %v1666_v22, %v18252_v7  ;;  %15804 = vmatprep.mubr.msk.f32.mxu1 %vm2387_vm5, %v19313_v20  ;;  %v19359_v38 = vcombine.low %v3307_v28, %v19330_v30  ;;  %v3130_v18 = vcombine.low %v18992_v45, %v2026_v36  ;;  %v21670_v20 = vld [vmem:[#allocation64_spill] sm:$0xff] }
 0x243   :  { %v19354_v9 = vcombine.low %v3358_v55, %v19335_v52  ;;  %v19356_v15 = vcombine.low %v3698_v31, %v3705_v21  ;;  %v4851_v5 = vrot.slane %v4843_v47, %v18252_v7  ;;  %v21652_v57 = vcombine.low %v18929_v32, %v18969_v37 }
 0x244   :  { %21651 = vst [vmem:[#allocation23_spill] sm:$0xff] %v19359_v38  ;;  %v19363_v12 = vcombine.low %v3341_v43, %v19318_v6  ;;  %v2282_v31 = vcombine.high %v1666_v22, %v1666_v22  ;;  %v4844_v21 = vcombine.low %v19289_v0, %v19349_v58  ;;  %16172 = vmatprep.mubr.msk.f32.mxu0 %vm2387_vm5, %v19359_v38 }
 0x245   :  { %v3137_v55 = vrot.slane %v21652_v57, %v18252_v7  ;;  %15805 = vmatmul.mubr.msk.f32.vlgmr.msra.gmra.mrb[0].mxu1 %vm2387_vm5, %v18775_v13  ;;  %v3144_v47 = vrot.slane %v3130_v18, %v18252_v7  ;;  %v21653_v32 = vcombine.low %v18906_v51, %v18934_v4  ;;  %v19394_v28 = vcombine.low %v19147_v23, %v19050_v60 }
 0x246   :  { %15811 = vmatpush3.msk.msra.mxu1 %vm2396_vm4, %v19297_v27  ;;  %15807 = vmatprep.mubr.msk.f32.mxu1 %vm2387_vm5, %v19064_v42  ;;  %v3470_v43 = vcombine.low %v2026_v36, %v18920_v59  ;;  %v19401_v57 = vrot.slane %v19326_v25, %v18252_v7  ;;  %v4858_v10 = vrot.slane %v4844_v21, %v18252_v7  ;;  %v19418_v36 = vld [vmem:[%s21305_s3] sm:$0x3f] }
 0x247   :  { %v3178_v22 = vrot.slane %v21653_v32, %v18252_v7  ;;  %16173 = vmatmul.mubr.msk.f32.vlgmr.msra.gmra.mrb[144].mxu0 %vm2387_vm5, %v19209_v2  ;;  %15818 = vmatprep.subr.msk.mxu1 %vm2396_vm4, %v19375_v39  ;;  %v3145_v51 = vcombine.low %v3137_v55, %v3144_v47  ;;  %v21654_v4 = vrot.slane %v19052_v3, %v18252_v7 }
 0x248   :  { %16175 = vmatprep.mubr.msk.f32.mxu0 %vm2387_vm5, %v19363_v12  ;;  %21655 = vst [vmem:[#allocation47_spill] sm:$0xff] %v19418_v36  ;;  %16179 = vmatpush3.msk.msra.mxu0 %vm2396_vm4, %v19418_v36  ;;  %v21656_v55 = vcombine.low %v18969_v37, %v18992_v45  ;;  %v19426_v32 = vcombine.low %v4851_v5, %v4858_v10  ;;  %v21671_v36 = vld [vmem:[#allocation29_spill] sm:$0xff] }
 0x249   :  { %v19413_v23 = vcombine.low %v3178_v22, %v21654_v4  ;;  %15808 = vmatmul.mubr.msk.f32.gmra.mrb[2].mxu1 %vm2387_vm5, %v18782_v16  ;;  %v3484_v3 = vrot.slane %v3470_v43, %v18252_v7  ;;  %16186 = vmatprep.subr.msk.mxu0 %vm2396_vm4, %v18850_v56  ;;  %v3640_v4 = vcombine.low %v19284_v33, %v19243_v14 }
 0x24a   :  { %v3477_v21 = vrot.slane %v21656_v55, %v18252_v7  ;;  %21657 = vst [vmem:[#allocation24_spill] sm:$0xff] %v19426_v32  ;;  %v19436_v18 = vrot.slane %v2282_v31, %v18252_v7  ;;  %15812 = vmatprep.mubr.msk.f32.mxu1 %vm2387_vm5, %v3145_v51  ;;  %v19440_v37 = vcombine.low %v19031_v41, %v3178_v22 }
 0x24b   :  { %v21658_v45 = vcombine.high %v18920_v59, %v18920_v59  ;;  %v1822_v10 = vcombine.high %v18720_v50, %v18720_v50  ;;  %16176 = vmatmul.mubr.msk.f32.gmra.mrb[146].mxu0 %vm2387_vm5, %v19354_v9  ;;  %v3647_v31 = vrot.slane %v3639_v26, %v18252_v7  ;;  %v3654_v43 = vrot.slane %v3640_v4, %v18252_v7 }
 0x24c   :  { %v19450_v33 = vcombine.low %v3477_v21, %v3484_v3  ;;  %v2128_v41 = vcombine.high %v19126_v17, %v19126_v17  ;;  %16180 = vmatprep.mubr.msk.f32.mxu0 %vm2387_vm5, %v3145_v51  ;;  %v4406_v26 = vrot.slane %v18804_v63, %v18252_v7  ;;  %v5175_v32 = vcombine.low %v21671_v36, %v21670_v20 }
 0x24d   :  { %v3809_v5 = vcombine.low %v18920_v59, %v21658_v45  ;;  %v19460_v59 = vld [vmem:[%s21305_s3 + $0x38] sm:$0x3f]  ;;  %v3948_v55 = vcombine.low %v18720_v50, %v1822_v10  ;;  %v4174_v21 = vcombine.low %v1822_v10, %v18709_v34  ;;  %15813 = vmatmul.mubr.msk.f32.vlgmr.msra.gmra.mrb[0].mxu1 %vm2387_vm5, %v18972_v62  ;;  %v19469_v3 = vcombine.low %v3647_v31, %v3654_v43  ;;  %v21662_v31 = vld [vmem:[#allocation58_spill] sm:$0xff] }
 0x24e   :  { %21659 = vst [vmem:[#allocation48_spill] sm:$0xff] %v19450_v33  ;;  %v4505_v51 = vcombine.low %v19126_v17, %v2128_v41  ;;  %v4731_v4 = vcombine.low %v2128_v41, %v19101_v46  ;;  %v4963_v45 = vrot.slane %v19217_v53, %v18252_v7  ;;  %15819 = vmatpush3.msk.msra.mxu1 %vm2396_vm4, %v19375_v39  ;;  %v21660_v53 = vld [vmem:[#allocation16_spill] sm:$0xff] }
 0x24f   :  { %v3816_v22 = vrot.slane %v3809_v5, %v18252_v7  ;;  %15815 = vmatprep.mubr.msk.f32.mxu1 %vm2387_vm5, %v19440_v37  ;;  %v19482_v50 = vrot.slane %v3948_v55, %v18252_v7  ;;  %v4188_v63 = vrot.slane %v4174_v21, %v18252_v7  ;;  %16181 = vmatmul.mubr.msk.f32.vlgmr.msra.gmra.mrb[144].mxu0 %vm2387_vm5, %v18972_v62  ;;  %v21661_v5 = vld [vmem:[#allocation35_spill] sm:$0xff]  ;;  %v21663_v55 = vld [vmem:[#allocation68_spill] sm:$0xff] }
 0x250   :  { %15826 = vmatprep.subr.msk.mxu1 %vm2396_vm4, %v19460_v59  ;;  %v19490_v46 = vrot.slane %v4505_v51, %v18252_v7  ;;  %v4745_v17 = vrot.slane %v4731_v4, %v18252_v7  ;;  %v19497_v10 = vcombine.high %v19436_v18, %v19436_v18  ;;  %16183 = vmatprep.mubr.msk.f32.mxu0 %vm2387_vm5, %v19440_v37  ;;  %v21667_v51 = vld [vmem:[#allocation11_spill] sm:$0xff] }
 0x251   :  { %v19479_v34 = vcombine.low %v3144_v47, %v3816_v22  ;;  %v5062_v47 = vcombine.low %v21661_v5, %v21660_v53  ;;  %16187 = vmatpush3.msk.msra.mxu0 %vm2396_vm4, %v18850_v56  ;;  %v19504_v43 = vcombine.low %v21662_v31, %v4188_v63  ;;  %v19507_v41 = vcombine.low %v19482_v50, %v4406_v26  ;;  %v21666_v26 = vld [vmem:[#allocation33_spill] sm:$0xff] }
 0x252   :  { %v2314_v22 = vcombine.high %v19401_v57, %v19401_v57  ;;  %15816 = vmatmul.mubr.msk.f32.gmra.mrb[2].mxu1 %vm2387_vm5, %v19394_v28  ;;  %16194 = vmatprep.subr.msk.mxu0 %vm2396_vm4, %v21663_v55  ;;  %v19516_v21 = vcombine.low %v19490_v46, %v4963_v45  ;;  %v19519_v56 = vcombine.low %v19222_v35, %v4745_v17  ;;  %v21672_v45 = vld [vmem:[#allocation36_spill] sm:$0xff] }
 0x253   :  { %15820 = vmatprep.mubr.msk.f32.mxu1 %vm2387_vm5, %v19359_v38  ;;  %v21668_v4 = vcombine.low %v21666_v26, %v21667_v51  ;;  %v19528_v31 = vrot.slane %v5062_v47, %v18252_v7  ;;  %16184 = vmatmul.mubr.msk.f32.gmra.mrb[146].mxu0 %vm2387_vm5, %v19394_v28  ;;  %v5287_v17 = vcombine.low %v21667_v51, %v21661_v5  ;;  %v21675_v38 = vld [vmem:[#allocation14_spill] sm:$0xff] }
 0x254   :  { %21664 = vst [vmem:[#allocation34_spill] sm:$0xff] %v19516_v21  ;;  %21665 = vst [vmem:[#allocation25_spill] sm:$0xff] %v19519_v56  ;;  %v21673_v21 = vld [vmem:[#allocation15_spill] sm:$0xff]  ;;  %v5288_v26 = vcombine.low %v21660_v53, %v21675_v38  ;;  %v9857_v40 = vcombine.low %v19436_v18, %v19497_v10  ;;  %16188 = vmatprep.mubr.msk.f32.mxu0 %vm2387_vm5, %v19450_v33  ;;  %v19559_v53 = vrot.slane %v5175_v32, %v18252_v7 }
 0x255   :  { %v5069_v63 = vrot.slane %v21668_v4, %v18252_v7  ;;  %21669 = vst [vmem:[#allocation49_spill] sm:$0xff] %v19528_v31  ;;  %v21674_v49 = vcombine.low %v21672_v45, %v21673_v21  ;;  %v5400_v47 = vcombine.low %v21673_v21, %v21671_v36  ;;  %v21676_v4 = vld [vmem:[#allocation18_spill] sm:$0xff]  ;;  %v5295_v18 = vrot.slane %v5287_v17, %v18252_v7  ;;  %v21679_v17 = vld [vmem:[#allocation43_spill] sm:$0xff] }
 0x256   :  { %v5401_v56 = vcombine.low %v21670_v20, %v21676_v4  ;;  %v9750_v20 = vcombine.low %v19198_v24, %v19239_v44  ;;  %15821 = vmatmul.mubr.msk.f32.vlgmr.msra.gmra.mrb[0].mxu1 %vm2387_vm5, %v19209_v2  ;;  %v5302_v36 = vrot.slane %v5288_v26, %v18252_v7  ;;  %v21680_v26 = vld [vmem:[#allocation56_spill] sm:$0xff] }
 0x257   :  { %v5182_v35 = vrot.slane %v21674_v49, %v18252_v7  ;;  %v19553_v49 = vld [vmem:[%s21305_s3 + $0x40] sm:$0x3f]  ;;  %v19556_v5 = vcombine.low %v5069_v63, %v19528_v31  ;;  %v5408_v21 = vrot.slane %v5400_v47, %v18252_v7  ;;  %v21677_v63 = vcombine.high %v19326_v25, %v19326_v25  ;;  %15827 = vmatpush3.msk.msra.mxu1 %vm2396_vm4, %v19460_v59 }
 0x258   :  { %v5415_v51 = vrot.slane %v5401_v56, %v18252_v7  ;;  %15823 = vmatprep.mubr.msk.f32.mxu1 %vm2387_vm5, %v19363_v12  ;;  %v21681_v47 = vcombine.low %v21679_v17, %v21680_v26  ;;  %v21683_v31 = vld [vmem:[#allocation17_spill] sm:$0xff]  ;;  %15834 = vmatprep.subr.msk.mxu1 %vm2396_vm4, %v19553_v49  ;;  %v19592_v25 = vcombine.low %v5295_v18, %v5302_v36 }
 0x259   :  { %v19573_v32 = vrot.slane %v21677_v63, %v18252_v7  ;;  %v19580_v45 = vcombine.low %v5182_v35, %v19559_v53  ;;  %16189 = vmatmul.mubr.msk.f32.vlgmr.msra.gmra.mrb[144].mxu0 %vm2387_vm5, %v21683_v31  ;;  %v19597_v38 = vrot.slane %v9750_v20, %v18252_v7  ;;  %v2195_v35 = vcombine.high %v19243_v14, %v19243_v14  ;;  %v21688_v36 = vld [vmem:[#allocation21_spill] sm:$0xff] }
 0x25a   :  { %v19586_v56 = vrot.slane %v21681_v47, %v18252_v7  ;;  %21684 = vst [vmem:[#allocation54_spill] sm:$0xff] %v19592_v25  ;;  %v19594_v63 = vcombine.low %v5408_v21, %v5415_v51  ;;  %16195 = vmatpush3.msk.msra.mxu0 %vm2396_vm4, %v21663_v55  ;;  %v9858_v17 = vcombine.low %v19401_v57, %v2314_v22 }
 0x25b   :  { %21678 = vst [vmem:[#allocation26_spill] sm:$0xff] %v19580_v45  ;;  %21686 = vst [vmem:[#allocation8_spill] sm:$0xff] %v19597_v38  ;;  %v21687_v45 = vld [vmem:[#allocation65_spill] sm:$0xff]  ;;  %v9865_v47 = vrot.slane %v9857_v40, %v18252_v7  ;;  %15824 = vmatmul.mubr.msk.f32.gmra.mrb[2].mxu1 %vm2387_vm5, %v19354_v9  ;;  %16202 = vmatprep.subr.msk.mxu0 %vm2396_vm4, %v19144_v61  ;;  %v9965_v18 = vcombine.low %v21680_v26, %v19198_v24  ;;  %v21691_v26 = vld [vmem:[#allocation66_spill] sm:$0xff] }
 0x25c   :  { %21682 = vst [vmem:[#allocation51_spill] sm:$0xff] %v19586_v56  ;;  %21685 = vst [vmem:[#allocation52_spill] sm:$0xff] %v19594_v63  ;;  %16191 = vmatprep.mubr.msk.f32.mxu0 %vm2387_vm5, %v21687_v45  ;;  %v9966_v21 = vcombine.low %v19239_v44, %v21688_v36  ;;  %v21689_v55 = vcombine.high %v19300_v54, %v19300_v54  ;;  %15828 = vmatprep.mubr.msk.f32.mxu1 %vm2387_vm5, %v19450_v33  ;;  %v21690_v38 = vld [vmem:[#allocation13_spill] sm:$0xff] }
 0x25d   :  { %v9872_v51 = vrot.slane %v9858_v17, %v18252_v7  ;;  %v10073_v63 = vcombine.low %v19497_v10, %v19401_v57  ;;  %v10074_v20 = vcombine.low %v2314_v22, %v19573_v32  ;;  %v2111_v24 = vcombine.high %v21690_v38, %v21690_v38  ;;  %16192 = vmatmul.mubr.msk.f32.gmra.mrb[146].mxu0 %vm2387_vm5, %v21691_v26  ;;  %v19642_v57 = vld [vmem:[%s21305_s3 + $0x48] sm:$0x3f] }
 0x25e   :  { %v6495_v40 = vcombine.low %v19300_v54, %v21689_v55  ;;  %v6493_v44 = vrot.slane %v19345_v8, %v18252_v7  ;;  %v9973_v54 = vrot.slane %v9965_v18, %v18252_v7  ;;  %v9980_v55 = vrot.slane %v9966_v21, %v18252_v7  ;;  %16196 = vmatprep.mubr.msk.f32.mxu0 %vm2387_vm5, %v19469_v3  ;;  %v21693_v18 = vld [vmem:[#allocation37_spill] sm:$0xff] }
 0x25f   :  { %v2297_v17 = vcombine.high %v19349_v58, %v19349_v58  ;;  %v19644_v10 = vcombine.low %v9865_v47, %v9872_v51  ;;  %v10081_v8 = vrot.slane %v10073_v63, %v18252_v7  ;;  %v10088_v22 = vrot.slane %v10074_v20, %v18252_v7  ;;  %15829 = vmatmul.mubr.msk.f32.vlgmr.msra.gmra.mrb[0].mxu1 %vm2387_vm5, %v21683_v31 }
 0x260   :  { %v21694_v21 = vcombine.high %v21693_v18, %v21693_v18  ;;  %v19654_v36 = vcombine.low %v9973_v54, %v9980_v55  ;;  %v6468_v56 = vcombine.low %v19243_v14, %v2195_v35  ;;  %v19658_v25 = vcombine.low %v19318_v6, %v6493_v44  ;;  %15835 = vmatpush3.msk.msra.mxu1 %vm2396_vm4, %v19553_v49  ;;  %v21697_v54 = vld [vmem:[#allocation20_spill] sm:$0xff]  ;;  %v21699_v44 = vld [vmem:[#allocation5_spill] sm:$0xff] }
 0x261   :  { %21692 = vst [vmem:[#allocation27_spill] sm:$0xff] %v19644_v10  ;;  %v4618_v63 = vcombine.low %v19254_v29, %v19289_v0  ;;  %15831 = vmatprep.mubr.msk.f32.mxu1 %vm2387_vm5, %v21687_v45  ;;  %v19666_v47 = vcombine.low %v10081_v8, %v10088_v22  ;;  %v6502_v20 = vrot.slane %v6495_v40, %v18252_v7 }
 0x262   :  { %v3818_v33 = vcombine.low %v21693_v18, %v21694_v21  ;;  %21695 = vst [vmem:[#allocation28_spill] sm:$0xff] %v19654_v36  ;;  %16197 = vmatmul.mubr.msk.f32.vlgmr.msra.gmra.mrb[144].mxu0 %vm2387_vm5, %v21697_v54  ;;  %15842 = vmatprep.subr.msk.mxu1 %vm2396_vm4, %v19642_v57  ;;  %v6475_v14 = vrot.slane %v6468_v56, %v18252_v7 }
 0x263   :  { %21696 = vst [vmem:[#allocation16_spill] sm:$0xff] %v19666_v47  ;;  %16199 = vmatprep.mubr.msk.f32.mxu0 %vm2387_vm5, %v19264_v19  ;;  %16203 = vmatpush3.msk.msra.mxu0 %vm2396_vm4, %v19144_v61  ;;  %v19679_v29 = vcombine.low %v19335_v52, %v6502_v20  ;;  %v7413_v0 = vcombine.low %v19349_v58, %v2297_v17  ;;  %v21700_v17 = vld [vmem:[#allocation40_spill] sm:$0xff]  ;;  %v21703_v20 = vld [vmem:[#allocation57_spill] sm:$0xff] }
 0x264   :  { %v2009_v6 = vcombine.high %v21676_v4, %v21676_v4  ;;  %v3825_v35 = vrot.slane %v3818_v33, %v18252_v7  ;;  %v3836_v40 = vcombine.low %v21690_v38, %v2111_v24  ;;  %15832 = vmatmul.mubr.msk.f32.gmra.mrb[2].mxu1 %vm2387_vm5, %v21691_v26  ;;  %16210 = vmatprep.subr.msk.mxu0 %vm2396_vm4, %v19297_v27 }
 0x265   :  { %v19691_v61 = vcombine.low %v19330_v30, %v6475_v14  ;;  %v19694_v52 = vrot.slane %v4618_v63, %v18252_v7  ;;  %15836 = vmatprep.mubr.msk.f32.mxu1 %vm2387_vm5, %v19469_v3  ;;  %v7420_v58 = vrot.slane %v7413_v0, %v18252_v7  ;;  %v2315_v38 = vcombine.high %v19573_v32, %v19573_v32  ;;  %v19709_v30 = vld [vmem:[%s21305_s3 + $0x50] sm:$0x3f]  ;;  %v21704_v14 = vld [vmem:[#allocation32_spill] sm:$0xff] }
 0x266   :  { %v7869_v33 = vcombine.low %v21676_v4, %v2009_v6  ;;  %16200 = vmatmul.mubr.msk.f32.gmra.mrb[146].mxu0 %vm2387_vm5, %v19356_v15  ;;  %v1959_v55 = vcombine.high %v21699_v44, %v21699_v44  ;;  %v19719_v8 = vcombine.low %v21700_v17, %v3825_v35  ;;  %v3843_v22 = vrot.slane %v3836_v40, %v18252_v7  ;;  %v19765_v6 = vld [vmem:[%s21305_s3 + $0x58] sm:$0x3f]  ;;  %v19801_v17 = vld [vmem:[%s21305_s3 + $0x60] sm:$0x3f] }
 0x267   :  { %16204 = vmatprep.mubr.msk.f32.mxu0 %vm2387_vm5, %v19479_v34  ;;  %v19712_v56 = vcombine.low %v19694_v52, %v7420_v58  ;;  %v12417_v4 = vcombine.low %v19573_v32, %v2315_v38  ;;  %v3947_v0 = vcombine.low %v21704_v14, %v21703_v20  ;;  %v21706_v58 = vld [vmem:[#allocation69_spill] sm:$0xff]  ;;  %v21707_v38 = vld [vmem:[#allocation67_spill] sm:$0xff]  ;;  %v21711_v20 = vld [vmem:[#allocation62_spill] sm:$0xff] }
 0x268   :  { %v7876_v24 = vrot.slane %v7869_v33, %v18252_v7  ;;  %15837 = vmatmul.mubr.msk.f32.vlgmr.msra.gmra.mrb[0].mxu1 %vm2387_vm5, %v21697_v54  ;;  %v19743_v63 = vrot.slane %v1959_v55, %v18252_v7  ;;  %v21708_v55 = vld [vmem:[#allocation7_spill] sm:$0xff] }
 0x269   :  { %21698 = vst [vmem:[#allocation35_spill] sm:$0xff] %v19712_v56  ;;  %15843 = vmatpush3.msk.msra.mxu1 %vm2396_vm4, %v19642_v57  ;;  %15839 = vmatprep.mubr.msk.f32.mxu1 %vm2387_vm5, %v19264_v19  ;;  %v12424_v32 = vrot.slane %v12417_v4, %v18252_v7  ;;  %v3955_v33 = vrot.slane %v3947_v0, %v18252_v7  ;;  %v21712_v0 = vld [vmem:[#allocation39_spill] sm:$0xff]  ;;  %v21722_v56 = vld [vmem:[#allocation9_spill] sm:$0xff] }
 0x26a   :  { %v19729_v18 = vcombine.low %v19559_v53, %v7876_v24  ;;  %16205 = vmatmul.mubr.msk.f32.vlgmr.msra.gmra.mrb[144].mxu0 %vm2387_vm5, %v19719_v8  ;;  %15850 = vmatprep.subr.msk.mxu1 %vm2396_vm4, %v19709_v30  ;;  %v19746_v53 = vcombine.low %v19050_v60, %v3843_v22  ;;  %v21705_v60 = vld [vmem:[#allocation38_spill] sm:$0xff]  ;;  %v1975_v35 = vcombine.high %v19743_v63, %v19743_v63 }
 0x26b   :  { %16207 = vmatprep.mubr.msk.f32.mxu0 %vm2387_vm5, %v19413_v23  ;;  %16211 = vmatpush3.msk.msra.mxu0 %vm2396_vm4, %v19297_v27  ;;  %v19740_v21 = vcombine.low %v9872_v51, %v12424_v32  ;;  %v1966_v51 = vrot.slane %v21699_v44, %v18252_v7  ;;  %v19788_v4 = vcombine.low %v3955_v33, %v19482_v50  ;;  %v21710_v32 = vld [vmem:[#allocation60_spill] sm:$0xff] }
 0x26c   :  { %21701 = vst [vmem:[#allocation58_spill] sm:$0xff] %v19729_v18  ;;  %15840 = vmatmul.mubr.msk.f32.gmra.mrb[2].mxu1 %vm2387_vm5, %v19356_v15  ;;  %16218 = vmatprep.subr.msk.mxu0 %vm2396_vm4, %v19375_v39  ;;  %v4061_v24 = vcombine.low %v19743_v63, %v1975_v35  ;;  %v19936_v18 = vld [vmem:[%s21305_s3 + $0x80] sm:$0x3f] }
 0x26d   :  { %21702 = vst [vmem:[#allocation68_spill] sm:$0xff] %v19740_v21  ;;  %15844 = vmatprep.mubr.msk.f32.mxu1 %vm2387_vm5, %v19479_v34  ;;  %v1974_v40 = vcombine.high %v1966_v51, %v1966_v51  ;;  %21721 = vst [vmem:[#allocation36_spill] sm:$0xff] %v19936_v18 }
 0x26e   :  { %16208 = vmatmul.mubr.msk.f32.gmra.mrb[146].mxu0 %vm2387_vm5, %v19746_v53  ;;  %v19804_v50 = vrot.slane %v4061_v24, %v18252_v7  ;;  %v21715_v24 = vld [vmem:[#allocation41_spill] sm:$0xff] }
 0x26f   :  { %16212 = vmatprep.mubr.msk.f32.mxu0 %vm2387_vm5, %v21705_v60  ;;  %v4060_v44 = vcombine.low %v1966_v51, %v1974_v40  ;;  %v19837_v51 = vld [vmem:[%s21305_s3 + $0x68] sm:$0x3f] }
 0x270   :  { %15845 = vmatmul.mubr.msk.f32.vlgmr.msra.gmra.mrb[0].mxu1 %vm2387_vm5, %v19719_v8  ;;  %21709 = vst [vmem:[#allocation33_spill] sm:$0xff] %v19804_v50 }
 0x271   :  { %15851 = vmatpush3.msk.msra.mxu1 %vm2396_vm4, %v19709_v30  ;;  %15847 = vmatprep.mubr.msk.f32.mxu1 %vm2387_vm5, %v19413_v23  ;;  %v4068_v22 = vrot.slane %v4060_v44, %v18252_v7  ;;  %v21716_v44 = vld [vmem:[#allocation50_spill] sm:$0xff] }
 0x272   :  { %16213 = vmatmul.mubr.msk.f32.vlgmr.msra.gmra.mrb[144].mxu0 %vm2387_vm5, %v21706_v58  ;;  %15858 = vmatprep.subr.msk.mxu1 %vm2396_vm4, %v19765_v6 }
 0x273   :  { %16215 = vmatprep.mubr.msk.f32.mxu0 %vm2387_vm5, %v21707_v38  ;;  %16219 = vmatpush3.msk.msra.mxu0 %vm2396_vm4, %v19375_v39  ;;  %v19822_v14 = vcombine.low %v4068_v22, %v19804_v50 }
 0x274   :  { %15848 = vmatmul.mubr.msk.f32.gmra.mrb[2].mxu1 %vm2387_vm5, %v19746_v53  ;;  %16226 = vmatprep.subr.msk.mxu0 %vm2396_vm4, %v19460_v59 }
 0x275   :  { %15852 = vmatprep.mubr.msk.f32.mxu1 %vm2387_vm5, %v21705_v60  ;;  %v21713_v60 = vld [vmem:[#allocation10_spill] sm:$0xff] }
 0x276   :  { %16216 = vmatmul.mubr.msk.f32.gmra.mrb[146].mxu0 %vm2387_vm5, %v19788_v4  ;;  %v19841_v33 = vrot.slane %v21713_v60, %v18252_v7  ;;  %v4286_v60 = vcombine.low %v1974_v40, %v19743_v63 }
 0x277   :  { %16220 = vmatprep.mubr.msk.f32.mxu0 %vm2387_vm5, %v21708_v55 }
 0x278   :  { %15853 = vmatmul.mubr.msk.f32.vlgmr.msra.gmra.mrb[0].mxu1 %vm2387_vm5, %v21706_v58  ;;  %21714 = vst [vmem:[#allocation11_spill] sm:$0xff] %v19841_v33  ;;  %v4287_v22 = vcombine.low %v1975_v35, %v19841_v33  ;;  %v19872_v35 = vld [vmem:[%s21305_s3 + $0x70] sm:$0x3f]  ;;  %v4294_v63 = vrot.slane %v4286_v60, %v18252_v7 }
 0x279   :  { %15859 = vmatpush3.msk.msra.mxu1 %vm2396_vm4, %v19765_v6  ;;  %15855 = vmatprep.mubr.msk.f32.mxu1 %vm2387_vm5, %v21707_v38  ;;  %21717 = vst [vmem:[#allocation64_spill] sm:$0xff] %v19872_v35  ;;  %v21720_v60 = vld [vmem:[#allocation42_spill] sm:$0xff] }
 0x27a   :  { %16221 = vmatmul.mubr.msk.f32.vlgmr.msra.gmra.mrb[144].mxu0 %vm2387_vm5, %v21710_v32  ;;  %15866 = vmatprep.subr.msk.mxu1 %vm2396_vm4, %v19801_v17  ;;  %v4301_v21 = vrot.slane %v4287_v22, %v18252_v7  ;;  %v21719_v22 = vld [vmem:[#allocation44_spill] sm:$0xff]  ;;  %v21729_v33 = vld [vmem:[#allocation34_spill] sm:$0xff] }
 0x27b   :  { %16223 = vmatprep.mubr.msk.f32.mxu0 %vm2387_vm5, %v21711_v20  ;;  %16227 = vmatpush3.msk.msra.mxu0 %vm2396_vm4, %v19460_v59 }
 0x27c   :  { %15856 = vmatmul.mubr.msk.f32.gmra.mrb[2].mxu1 %vm2387_vm5, %v19788_v4  ;;  %16234 = vmatprep.subr.msk.mxu0 %vm2396_vm4, %v19553_v49  ;;  %v19890_v40 = vcombine.low %v4294_v63, %v4301_v21  ;;  %v19905_v21 = vld [vmem:[%s21305_s3 + $0x78] sm:$0x3f]  ;;  %v4504_v63 = vcombine.low %v21720_v60, %v21719_v22 }
 0x27d   :  { %15860 = vmatprep.mubr.msk.f32.mxu1 %vm2387_vm5, %v21708_v55  ;;  %21718 = vst [vmem:[#allocation29_spill] sm:$0xff] %v19905_v21 }
 0x27e   :  { %16224 = vmatmul.mubr.msk.f32.gmra.mrb[146].mxu0 %vm2387_vm5, %v19822_v14  ;;  %v4512_v22 = vrot.slane %v4504_v63, %v18252_v7  ;;  %v21723_v63 = vld [vmem:[#allocation45_spill] sm:$0xff] }
 0x27f   :  { %16228 = vmatprep.mubr.msk.f32.mxu0 %vm2387_vm5, %v21712_v0  ;;  %v4617_v50 = vcombine.low %v21723_v63, %v21722_v56  ;;  %v21728_v63 = vld [vmem:[#allocation24_spill] sm:$0xff] }
 0x280   :  { %15861 = vmatmul.mubr.msk.f32.vlgmr.msra.gmra.mrb[0].mxu1 %vm2387_vm5, %v21710_v32  ;;  %v19956_v60 = vcombine.low %v4512_v22, %v19490_v46  ;;  %v19971_v46 = vld [vmem:[%s21305_s3 + $0x88] sm:$0x3f]  ;;  %v20033_v22 = vld [vmem:[%s21305_s3 + $0x98] sm:$0x3f] }
 0x281   :  { %15867 = vmatpush3.msk.msra.mxu1 %vm2396_vm4, %v19801_v17  ;;  %15863 = vmatprep.mubr.msk.f32.mxu1 %vm2387_vm5, %v21711_v20  ;;  %21724 = vst [vmem:[#allocation15_spill] sm:$0xff] %v19971_v46  ;;  %21727 = vst [vmem:[#allocation43_spill] sm:$0xff] %v20033_v22 }
 0x282   :  { %16229 = vmatmul.mubr.msk.f32.vlgmr.msra.gmra.mrb[144].mxu0 %vm2387_vm5, %v21715_v24  ;;  %15874 = vmatprep.subr.msk.mxu1 %vm2396_vm4, %v19837_v51 }
 0x283   :  { %16231 = vmatprep.mubr.msk.f32.mxu0 %vm2387_vm5, %v21716_v44  ;;  %16235 = vmatpush3.msk.msra.mxu0 %vm2396_vm4, %v19553_v49 }
 0x284   :  { %15864 = vmatmul.mubr.msk.f32.gmra.mrb[2].mxu1 %vm2387_vm5, %v19822_v14  ;;  %16242 = vmatprep.subr.msk.mxu0 %vm2396_vm4, %v19642_v57 }
 0x285   :  { %15868 = vmatprep.mubr.msk.f32.mxu1 %vm2387_vm5, %v21712_v0 }
 0x286   :  { %16232 = vmatmul.mubr.msk.f32.gmra.mrb[146].mxu0 %vm2387_vm5, %v19504_v43 }
 0x287   :  { %16236 = vmatprep.mubr.msk.f32.mxu0 %vm2387_vm5, %v21644_v11 }
 0x288   :  { %15869 = vmatmul.mubr.msk.f32.vlgmr.msra.gmra.mrb[0].mxu1 %vm2387_vm5, %v21715_v24 }
 0x289   :  { %15875 = vmatpush3.msk.msra.mxu1 %vm2396_vm4, %v19837_v51  ;;  %15871 = vmatprep.mubr.msk.f32.mxu1 %vm2387_vm5, %v21716_v44 }
 0x28a   :  { %16237 = vmatmul.mubr.msk.f32.vlgmr.msra.gmra.mrb[144].mxu0 %vm2387_vm5, %v21647_v48  ;;  %15882 = vmatprep.subr.msk.mxu1 %vm2396_vm4, %v19872_v35 }
 0x28b   :  { %16239 = vmatprep.mubr.msk.f32.mxu0 %vm2387_vm5, %v18763_v1  ;;  %16243 = vmatpush3.msk.msra.mxu0 %vm2396_vm4, %v19642_v57 }
 0x28c   :  { %15872 = vmatmul.mubr.msk.f32.gmra.mrb[2].mxu1 %vm2387_vm5, %v19504_v43  ;;  %16250 = vmatprep.subr.msk.mxu0 %vm2396_vm4, %v19709_v30 }
 0x28d   :  { %15876 = vmatprep.mubr.msk.f32.mxu1 %vm2387_vm5, %v21644_v11 }
 0x28e   :  { %16240 = vmatmul.mubr.msk.f32.gmra.mrb[146].mxu0 %vm2387_vm5, %v19890_v40 }
 0x28f   :  { %16244 = vmatprep.mubr.msk.f32.mxu0 %vm2387_vm5, %v18775_v13 }
 0x290   :  { %15877 = vmatmul.mubr.msk.f32.vlgmr.msra.gmra.mrb[0].mxu1 %vm2387_vm5, %v21647_v48 }
 0x291   :  { %15883 = vmatpush3.msk.msra.mxu1 %vm2396_vm4, %v19872_v35  ;;  %15879 = vmatprep.mubr.msk.f32.mxu1 %vm2387_vm5, %v18763_v1 }
 0x292   :  { %16245 = vmatmul.mubr.msk.f32.vlgmr.msra.gmra.mrb[144].mxu0 %vm2387_vm5, %v19064_v42  ;;  %15890 = vmatprep.subr.msk.mxu1 %vm2396_vm4, %v19905_v21 }
 0x293   :  { %16247 = vmatprep.mubr.msk.f32.mxu0 %vm2387_vm5, %v18782_v16  ;;  %16251 = vmatpush3.msk.msra.mxu0 %vm2396_vm4, %v19709_v30 }
 0x294   :  { %15880 = vmatmul.mubr.msk.f32.gmra.mrb[2].mxu1 %vm2387_vm5, %v19890_v40  ;;  %16258 = vmatprep.subr.msk.mxu0 %vm2396_vm4, %v19765_v6 }
 0x295   :  { %15884 = vmatprep.mubr.msk.f32.mxu1 %vm2387_vm5, %v18775_v13 }
 0x296   :  { %16248 = vmatmul.mubr.msk.f32.gmra.mrb[146].mxu0 %vm2387_vm5, %v19507_v41 }
 0x297   :  { %16252 = vmatprep.mubr.msk.f32.mxu0 %vm2387_vm5, %v18972_v62 }
 0x298   :  { %15885 = vmatmul.mubr.msk.f32.vlgmr.msra.gmra.mrb[0].mxu1 %vm2387_vm5, %v19064_v42 }
 0x299   :  { %15891 = vmatpush3.msk.msra.mxu1 %vm2396_vm4, %v19905_v21  ;;  %15887 = vmatprep.mubr.msk.f32.mxu1 %vm2387_vm5, %v18782_v16 }
 0x29a   :  { %16253 = vmatmul.mubr.msk.f32.vlgmr.msra.gmra.mrb[144].mxu0 %vm2387_vm5, %v19440_v37  ;;  %15898 = vmatprep.subr.msk.mxu1 %vm2396_vm4, %v19936_v18 }
 0x29b   :  { %16255 = vmatprep.mubr.msk.f32.mxu0 %vm2387_vm5, %v19394_v28  ;;  %16259 = vmatpush3.msk.msra.mxu0 %vm2396_vm4, %v19765_v6 }
 0x29c   :  { %15888 = vmatmul.mubr.msk.f32.gmra.mrb[2].mxu1 %vm2387_vm5, %v19507_v41  ;;  %16266 = vmatprep.subr.msk.mxu0 %vm2396_vm4, %v19801_v17 }
 0x29d   :  { %15892 = vmatprep.mubr.msk.f32.mxu1 %vm2387_vm5, %v18972_v62  ;;  %v4625_v62 = vrot.slane %v4617_v50, %v18252_v7  ;;  %v21726_v50 = vld [vmem:[#allocation25_spill] sm:$0xff] }
 0x29e   :  { %16256 = vmatmul.mubr.msk.f32.gmra.mrb[146].mxu0 %vm2387_vm5, %v19956_v60 }
 0x29f   :  { %16260 = vmatprep.mubr.msk.f32.mxu0 %vm2387_vm5, %v19209_v2  ;;  %v19989_v56 = vcombine.low %v4625_v62, %v19694_v52  ;;  %v20004_v52 = vld [vmem:[%s21305_s3 + $0x90] sm:$0x3f]  ;;  %v20062_v62 = vld [vmem:[%s21305_s3 + $0xa0] sm:$0x3f] }
 0x2a0   :  { %15893 = vmatmul.mubr.msk.f32.vlgmr.msra.gmra.mrb[0].mxu1 %vm2387_vm5, %v19440_v37  ;;  %21725 = vst [vmem:[#allocation18_spill] sm:$0xff] %v20004_v52 }
 0x2a1   :  { %15899 = vmatpush3.msk.msra.mxu1 %vm2396_vm4, %v19936_v18  ;;  %15895 = vmatprep.mubr.msk.f32.mxu1 %vm2387_vm5, %v19394_v28 }
 0x2a2   :  { %16261 = vmatmul.mubr.msk.f32.vlgmr.msra.gmra.mrb[144].mxu0 %vm2387_vm5, %v19363_v12  ;;  %15906 = vmatprep.subr.msk.mxu1 %vm2396_vm4, %v19971_v46 }
 0x2a3   :  { %16263 = vmatprep.mubr.msk.f32.mxu0 %vm2387_vm5, %v19354_v9  ;;  %16267 = vmatpush3.msk.msra.mxu0 %vm2396_vm4, %v19801_v17 }
 0x2a4   :  { %15896 = vmatmul.mubr.msk.f32.gmra.mrb[2].mxu1 %vm2387_vm5, %v19956_v60  ;;  %16274 = vmatprep.subr.msk.mxu0 %vm2396_vm4, %v19837_v51 }
 0x2a5   :  { %15900 = vmatprep.mubr.msk.f32.mxu1 %vm2387_vm5, %v19209_v2 }
 0x2a6   :  { %16264 = vmatmul.mubr.msk.f32.gmra.mrb[146].mxu0 %vm2387_vm5, %v19989_v56 }
 0x2a7   :  { %16268 = vmatprep.mubr.msk.f32.mxu0 %vm2387_vm5, %v21683_v31 }
 0x2a8   :  { %15901 = vmatmul.mubr.msk.f32.vlgmr.msra.gmra.mrb[0].mxu1 %vm2387_vm5, %v19363_v12 }
 0x2a9   :  { %15907 = vmatpush3.msk.msra.mxu1 %vm2396_vm4, %v19971_v46  ;;  %15903 = vmatprep.mubr.msk.f32.mxu1 %vm2387_vm5, %v19354_v9 }
 0x2aa   :  { %16269 = vmatmul.mubr.msk.f32.vlgmr.msra.gmra.mrb[144].mxu0 %vm2387_vm5, %v21687_v45  ;;  %15914 = vmatprep.subr.msk.mxu1 %vm2396_vm4, %v20004_v52 }
 0x2ab   :  { %16271 = vmatprep.mubr.msk.f32.mxu0 %vm2387_vm5, %v21691_v26  ;;  %16275 = vmatpush3.msk.msra.mxu0 %vm2396_vm4, %v19837_v51 }
 0x2ac   :  { %15904 = vmatmul.mubr.msk.f32.gmra.mrb[2].mxu1 %vm2387_vm5, %v19989_v56  ;;  %16282 = vmatprep.subr.msk.mxu0 %vm2396_vm4, %v19872_v35 }
 0x2ad   :  { %15908 = vmatprep.mubr.msk.f32.mxu1 %vm2387_vm5, %v21683_v31 }
 0x2ae   :  { %16272 = vmatmul.mubr.msk.f32.gmra.mrb[146].mxu0 %vm2387_vm5, %v21726_v50 }
 0x2af   :  { %16276 = vmatprep.mubr.msk.f32.mxu0 %vm2387_vm5, %v21697_v54 }
 0x2b0   :  { %15909 = vmatmul.mubr.msk.f32.vlgmr.msra.gmra.mrb[0].mxu1 %vm2387_vm5, %v21687_v45 }
 0x2b1   :  { %15915 = vmatpush3.msk.msra.mxu1 %vm2396_vm4, %v20004_v52  ;;  %15911 = vmatprep.mubr.msk.f32.mxu1 %vm2387_vm5, %v21691_v26 }
 0x2b2   :  { %16277 = vmatmul.mubr.msk.f32.vlgmr.msra.gmra.mrb[144].mxu0 %vm2387_vm5, %v19264_v19  ;;  %15922 = vmatprep.subr.msk.mxu1 %vm2396_vm4, %v20033_v22 }
 0x2b3   :  { %16279 = vmatprep.mubr.msk.f32.mxu0 %vm2387_vm5, %v19356_v15  ;;  %16283 = vmatpush3.msk.msra.mxu0 %vm2396_vm4, %v19872_v35  ;;  %v20091_v35 = vld [vmem:[%s21305_s3 + $0xa8] sm:$0x3f] }
 0x2b4   :  { %15912 = vmatmul.mubr.msk.f32.gmra.mrb[2].mxu1 %vm2387_vm5, %v21726_v50  ;;  %16290 = vmatprep.subr.msk.mxu0 %vm2396_vm4, %v19905_v21  ;;  %21730 = vst [vmem:[#allocation56_spill] sm:$0xff] %v20091_v35 }
 0x2b5   :  { %15916 = vmatprep.mubr.msk.f32.mxu1 %vm2387_vm5, %v21697_v54 }
 0x2b6   :  { %16280 = vmatmul.mubr.msk.f32.gmra.mrb[146].mxu0 %vm2387_vm5, %v21728_v63 }
 0x2b7   :  { %16284 = vmatprep.mubr.msk.f32.mxu0 %vm2387_vm5, %v19719_v8 }
 0x2b8   :  { %15917 = vmatmul.mubr.msk.f32.vlgmr.msra.gmra.mrb[0].mxu1 %vm2387_vm5, %v19264_v19 }
 0x2b9   :  { %15923 = vmatpush3.msk.msra.mxu1 %vm2396_vm4, %v20033_v22  ;;  %15919 = vmatprep.mubr.msk.f32.mxu1 %vm2387_vm5, %v19356_v15 }
 0x2ba   :  { %16285 = vmatmul.mubr.msk.f32.vlgmr.msra.gmra.mrb[144].mxu0 %vm2387_vm5, %v19413_v23  ;;  %15930 = vmatprep.subr.msk.mxu1 %vm2396_vm4, %v20062_v62 }
 0x2bb   :  { %16287 = vmatprep.mubr.msk.f32.mxu0 %vm2387_vm5, %v19746_v53  ;;  %16291 = vmatpush3.msk.msra.mxu0 %vm2396_vm4, %v19905_v21  ;;  %v20120_v21 = vld [vmem:[%s21305_s3 + $0xb0] sm:$0x3f] }
 0x2bc   :  { %15920 = vmatmul.mubr.msk.f32.gmra.mrb[2].mxu1 %vm2387_vm5, %v21728_v63  ;;  %16298 = vmatprep.subr.msk.mxu0 %vm2396_vm4, %v19936_v18  ;;  %21731 = vst [vmem:[#allocation17_spill] sm:$0xff] %v20120_v21 }
 0x2bd   :  { %15924 = vmatprep.mubr.msk.f32.mxu1 %vm2387_vm5, %v19719_v8 }
 0x2be   :  { %16288 = vmatmul.mubr.msk.f32.gmra.mrb[146].mxu0 %vm2387_vm5, %v21729_v33 }
 0x2bf   :  { %16292 = vmatprep.mubr.msk.f32.mxu0 %vm2387_vm5, %v21706_v58 }
 0x2c0   :  { %15925 = vmatmul.mubr.msk.f32.vlgmr.msra.gmra.mrb[0].mxu1 %vm2387_vm5, %v19413_v23 }
 0x2c1   :  { %15931 = vmatpush3.msk.msra.mxu1 %vm2396_vm4, %v20062_v62  ;;  %15927 = vmatprep.mubr.msk.f32.mxu1 %vm2387_vm5, %v19746_v53 }
 0x2c2   :  { %16293 = vmatmul.mubr.msk.f32.vlgmr.msra.gmra.mrb[144].mxu0 %vm2387_vm5, %v21707_v38  ;;  %15938 = vmatprep.subr.msk.mxu1 %vm2396_vm4, %v20091_v35 }
 0x2c3   :  { %16295 = vmatprep.mubr.msk.f32.mxu0 %vm2387_vm5, %v19788_v4  ;;  %16299 = vmatpush3.msk.msra.mxu0 %vm2396_vm4, %v19936_v18  ;;  %v21737_v18 = vld [vmem:[#allocation52_spill] sm:$0xff] }
 0x2c4   :  { %15928 = vmatmul.mubr.msk.f32.gmra.mrb[2].mxu1 %vm2387_vm5, %v21729_v33  ;;  %16306 = vmatprep.subr.msk.mxu0 %vm2396_vm4, %v19971_v46 }
 0x2c5   :  { %15932 = vmatprep.mubr.msk.f32.mxu1 %vm2387_vm5, %v21706_v58  ;;  %v21732_v58 = vld [vmem:[#allocation26_spill] sm:$0xff] }
 0x2c6   :  { %16296 = vmatmul.mubr.msk.f32.gmra.mrb[146].mxu0 %vm2387_vm5, %v19556_v5 }
 0x2c7   :  { %16300 = vmatprep.mubr.msk.f32.mxu0 %vm2387_vm5, %v21710_v32 }
 0x2c8   :  { %15933 = vmatmul.mubr.msk.f32.vlgmr.msra.gmra.mrb[0].mxu1 %vm2387_vm5, %v21707_v38  ;;  %v20149_v38 = vld [vmem:[%s21305_s3 + $0xb8] sm:$0x3f] }
 0x2c9   :  { %15939 = vmatpush3.msk.msra.mxu1 %vm2396_vm4, %v20091_v35  ;;  %15935 = vmatprep.mubr.msk.f32.mxu1 %vm2387_vm5, %v19788_v4  ;;  %21733 = vst [vmem:[#allocation65_spill] sm:$0xff] %v20149_v38  ;;  %v20178_v4 = vld [vmem:[%s21305_s3 + $0xc0] sm:$0x3f] }
 0x2ca   :  { %16301 = vmatmul.mubr.msk.f32.vlgmr.msra.gmra.mrb[144].mxu0 %vm2387_vm5, %v21711_v20  ;;  %15946 = vmatprep.subr.msk.mxu1 %vm2396_vm4, %v20120_v21  ;;  %21735 = vst [vmem:[#allocation13_spill] sm:$0xff] %v20178_v4 }
 0x2cb   :  { %16303 = vmatprep.mubr.msk.f32.mxu0 %vm2387_vm5, %v19822_v14  ;;  %16307 = vmatpush3.msk.msra.mxu0 %vm2396_vm4, %v19971_v46 }
 0x2cc   :  { %15936 = vmatmul.mubr.msk.f32.gmra.mrb[2].mxu1 %vm2387_vm5, %v19556_v5  ;;  %16314 = vmatprep.subr.msk.mxu0 %vm2396_vm4, %v20004_v52  ;;  %v21734_v5 = vld [vmem:[#allocation54_spill] sm:$0xff] }
 0x2cd   :  { %15940 = vmatprep.mubr.msk.f32.mxu1 %vm2387_vm5, %v21710_v32 }
 0x2ce   :  { %16304 = vmatmul.mubr.msk.f32.gmra.mrb[146].mxu0 %vm2387_vm5, %v21732_v58 }
 0x2cf   :  { %16308 = vmatprep.mubr.msk.f32.mxu0 %vm2387_vm5, %v21715_v24 }
 0x2d0   :  { %15941 = vmatmul.mubr.msk.f32.vlgmr.msra.gmra.mrb[0].mxu1 %vm2387_vm5, %v21711_v20 }
 0x2d1   :  { %15947 = vmatpush3.msk.msra.mxu1 %vm2396_vm4, %v20120_v21  ;;  %15943 = vmatprep.mubr.msk.f32.mxu1 %vm2387_vm5, %v19822_v14 }
 0x2d2   :  { %16309 = vmatmul.mubr.msk.f32.vlgmr.msra.gmra.mrb[144].mxu0 %vm2387_vm5, %v21716_v44  ;;  %15954 = vmatprep.subr.msk.mxu1 %vm2396_vm4, %v20149_v38 }
 0x2d3   :  { %16311 = vmatprep.mubr.msk.f32.mxu0 %vm2387_vm5, %v19504_v43  ;;  %16315 = vmatpush3.msk.msra.mxu0 %vm2396_vm4, %v20004_v52 }
 0x2d4   :  { %15944 = vmatmul.mubr.msk.f32.gmra.mrb[2].mxu1 %vm2387_vm5, %v21732_v58  ;;  %16322 = vmatprep.subr.msk.mxu0 %vm2396_vm4, %v20033_v22  ;;  %v21736_v58 = vld [vmem:[#allocation14_spill] sm:$0xff] }
 0x2d5   :  { %15948 = vmatprep.mubr.msk.f32.mxu1 %vm2387_vm5, %v21715_v24  ;;  %v1856_v52 = vcombine.high %v21736_v58, %v21736_v58 }
 0x2d6   :  { %16312 = vmatmul.mubr.msk.f32.gmra.mrb[146].mxu0 %vm2387_vm5, %v21734_v5 }
 0x2d7   :  { %16316 = vmatprep.mubr.msk.f32.mxu0 %vm2387_vm5, %v21647_v48  ;;  %v5513_v46 = vcombine.low %v21736_v58, %v1856_v52  ;;  %v20219_v52 = vld [vmem:[%s21305_s3 + $0x8] sm:$0x3f] }
 0x2d8   :  { %15949 = vmatmul.mubr.msk.f32.vlgmr.msra.gmra.mrb[0].mxu1 %vm2387_vm5, %v21716_v44  ;;  %21738 = vst [vmem:[#allocation66_spill] sm:$0xff] %v20219_v52 }
 0x2d9   :  { %15955 = vmatpush3.msk.msra.mxu1 %vm2396_vm4, %v20149_v38  ;;  %15951 = vmatprep.mubr.msk.f32.mxu1 %vm2387_vm5, %v19504_v43 }
 0x2da   :  { %16317 = vmatmul.mubr.msk.f32.vlgmr.msra.gmra.mrb[144].mxu0 %vm2387_vm5, %v18763_v1  ;;  %15962 = vmatprep.subr.msk.mxu1 %vm2396_vm4, %v20178_v4 }
 0x2db   :  { %16319 = vmatprep.mubr.msk.f32.mxu0 %vm2387_vm5, %v19890_v40  ;;  %16323 = vmatpush3.msk.msra.mxu0 %vm2396_vm4, %v20033_v22  ;;  %v5520_v22 = vrot.slane %v5513_v46, %v18252_v7  ;;  %v21739_v46 = vld [vmem:[#allocation49_spill] sm:$0xff] }
 0x2dc   :  { %15952 = vmatmul.mubr.msk.f32.gmra.mrb[2].mxu1 %vm2387_vm5, %v21734_v5  ;;  %16330 = vmatprep.subr.msk.mxu0 %vm2396_vm4, %v20062_v62 }
 0x2dd   :  { %15956 = vmatprep.mubr.msk.f32.mxu1 %vm2387_vm5, %v21647_v48  ;;  %v20230_v58 = vcombine.low %v21739_v46, %v5520_v22  ;;  %v21741_v22 = vld [vmem:[#allocation47_spill] sm:$0xff] }
 0x2de   :  { %16320 = vmatmul.mubr.msk.f32.gmra.mrb[146].mxu0 %vm2387_vm5, %v21737_v18  ;;  %v21743_v46 = vld [vmem:[#allocation51_spill] sm:$0xff] }
 0x2df   :  { %16324 = vmatprep.mubr.msk.f32.mxu0 %vm2387_vm5, %v19064_v42  ;;  %21740 = vst [vmem:[#allocation37_spill] sm:$0xff] %v20230_v58 }
 0x2e0   :  { %15957 = vmatmul.mubr.msk.f32.vlgmr.msra.gmra.mrb[0].mxu1 %vm2387_vm5, %v18763_v1 }
 0x2e1   :  { %15963 = vmatpush3.msk.msra.mxu1 %vm2396_vm4, %v20178_v4  ;;  %15959 = vmatprep.mubr.msk.f32.mxu1 %vm2387_vm5, %v19890_v40 }
 0x2e2   :  { %16325 = vmatmul.mubr.msk.f32.vlgmr.msra.gmra.mrb[144].mxu0 %vm2387_vm5, %v18782_v16  ;;  %15970 = vmatprep.subr.msk.mxu1 %vm2396_vm4, %v20219_v52 }
 0x2e3   :  { %16327 = vmatprep.mubr.msk.f32.mxu0 %vm2387_vm5, %v19507_v41  ;;  %16331 = vmatpush3.msk.msra.mxu0 %vm2396_vm4, %v20062_v62 }
 0x2e4   :  { %15960 = vmatmul.mubr.msk.f32.gmra.mrb[2].mxu1 %vm2387_vm5, %v21737_v18  ;;  %16338 = vmatprep.subr.msk.mxu0 %vm2396_vm4, %v20091_v35 }
 0x2e5   :  { %15964 = vmatprep.mubr.msk.f32.mxu1 %vm2387_vm5, %v19064_v42 }
 0x2e6   :  { %16328 = vmatmul.mubr.msk.f32.gmra.mrb[146].mxu0 %vm2387_vm5, %v20230_v58 }
 0x2e7   :  { %16332 = vmatprep.mubr.msk.f32.mxu0 %vm2387_vm5, %v19440_v37  ;;  %v21742_v37 = vld [vmem:[#allocation53_spill] sm:$0xff] }
 0x2e8   :  { %15965 = vmatmul.mubr.msk.f32.vlgmr.msra.gmra.mrb[0].mxu1 %vm2387_vm5, %v18782_v16 }
 0x2e9   :  { %15971 = vmatpush3.msk.msra.mxu1 %vm2396_vm4, %v20219_v52  ;;  %15967 = vmatprep.mubr.msk.f32.mxu1 %vm2387_vm5, %v19507_v41 }
 0x2ea   :  { %16333 = vmatmul.mubr.msk.f32.vlgmr.msra.gmra.mrb[144].mxu0 %vm2387_vm5, %v19394_v28  ;;  %15978 = vmatprep.subr.msk.mxu1 %vm2396_vm4, %v21741_v22  ;;  %v21744_v28 = vld [vmem:[#allocation8_spill] sm:$0xff] }
 0x2eb   :  { %16335 = vmatprep.mubr.msk.f32.mxu0 %vm2387_vm5, %v19956_v60  ;;  %16339 = vmatpush3.msk.msra.mxu0 %vm2396_vm4, %v20091_v35  ;;  %v21745_v52 = vcombine.low %v21743_v46, %v21744_v28  ;;  %v20277_v60 = vld [vmem:[%s21305_s3 + $0x10] sm:$0x3f]  ;;  %v21750_v46 = vld [vmem:[#allocation21_spill] sm:$0xff] }
 0x2ec   :  { %15968 = vmatmul.mubr.msk.f32.gmra.mrb[2].mxu1 %vm2387_vm5, %v20230_v58  ;;  %16346 = vmatprep.subr.msk.mxu0 %vm2396_vm4, %v20120_v21  ;;  %21746 = vst [vmem:[#allocation20_spill] sm:$0xff] %v20277_v60  ;;  %v21754_v58 = vld [vmem:[#allocation55_spill] sm:$0xff] }
 0x2ed   :  { %15972 = vmatprep.mubr.msk.f32.mxu1 %vm2387_vm5, %v21742_v37  ;;  %v21749_v37 = vld [vmem:[#allocation22_spill] sm:$0xff]  ;;  %v1958_v18 = vcombine.high %v21754_v58, %v21754_v58 }
 0x2ee   :  { %16336 = vmatmul.mubr.msk.f32.gmra.mrb[146].mxu0 %vm2387_vm5, %v21745_v52  ;;  %v21747_v52 = vld [vmem:[#allocation61_spill] sm:$0xff] }
 0x2ef   :  { %16340 = vmatprep.mubr.msk.f32.mxu0 %vm2387_vm5, %v19363_v12 }
 0x2f0   :  { %15973 = vmatmul.mubr.msk.f32.vlgmr.msra.gmra.mrb[4].mxu1 %vm2387_vm5, %v21712_v0 }
 0x2f1   :  { %15979 = vmatpush3.msk.msra.mxu1 %vm2396_vm4, %v21741_v22  ;;  %15975 = vmatprep.mubr.msk.f32.mxu1 %vm2387_vm5, %v21715_v24  ;;  %v20306_v22 = vld [vmem:[%s21305_s3 + $0x18] sm:$0x3f] }
 0x2f2   :  { %16341 = vmatmul.mubr.msk.f32.vlgmr.msra.gmra.mrb[144].mxu0 %vm2387_vm5, %v19354_v9  ;;  %15986 = vmatprep.subr.msk.mxu1 %vm2396_vm4, %v20277_v60  ;;  %21748 = vst [vmem:[#allocation5_spill] sm:$0xff] %v20306_v22 }
 0x2f3   :  { %16343 = vmatprep.mubr.msk.f32.mxu0 %vm2387_vm5, %v19989_v56  ;;  %16347 = vmatpush3.msk.msra.mxu0 %vm2396_vm4, %v20120_v21 }
 0x2f4   :  { %15976 = vmatmul.mubr.msk.f32.gmra.mrb[6].mxu1 %vm2387_vm5, %v21716_v44  ;;  %16354 = vmatprep.subr.msk.mxu0 %vm2396_vm4, %v20149_v38 }
 0x2f5   :  { %15980 = vmatprep.mubr.msk.f32.mxu1 %vm2387_vm5, %v21747_v52  ;;  %v2162_v52 = vcombine.high %v21750_v46, %v21750_v46 }
 0x2f6   :  { %16344 = vmatmul.mubr.msk.f32.gmra.mrb[146].mxu0 %vm2387_vm5, %v19644_v10  ;;  %v21752_v10 = vld [vmem:[#allocation6_spill] sm:$0xff] }
 0x2f7   :  { %16348 = vmatprep.mubr.msk.f32.mxu0 %vm2387_vm5, %v21687_v45 }
 0x2f8   :  { %15981 = vmatmul.mubr.msk.f32.vlgmr.msra.gmra.mrb[4].mxu1 %vm2387_vm5, %v21708_v55 }
 0x2f9   :  { %15987 = vmatpush3.msk.msra.mxu1 %vm2396_vm4, %v20277_v60  ;;  %15983 = vmatprep.mubr.msk.f32.mxu1 %vm2387_vm5, %v21710_v32  ;;  %v21753_v60 = vld [vmem:[#allocation46_spill] sm:$0xff] }
 0x2fa   :  { %16349 = vmatmul.mubr.msk.f32.vlgmr.msra.gmra.mrb[144].mxu0 %vm2387_vm5, %v21691_v26  ;;  %15994 = vmatprep.subr.msk.mxu1 %vm2396_vm4, %v20306_v22 }
 0x2fb   :  { %16351 = vmatprep.mubr.msk.f32.mxu0 %vm2387_vm5, %v21726_v50  ;;  %16355 = vmatpush3.msk.msra.mxu0 %vm2396_vm4, %v20149_v38 }
 0x2fc   :  { %15984 = vmatmul.mubr.msk.f32.gmra.mrb[6].mxu1 %vm2387_vm5, %v21711_v20  ;;  %16362 = vmatprep.subr.msk.mxu0 %vm2396_vm4, %v20178_v4 }
 0x2fd   :  { %15988 = vmatprep.mubr.msk.f32.mxu1 %vm2387_vm5, %v21749_v37  ;;  %v20337_v37 = vld [vmem:[%s21305_s3 + $0x20] sm:$0x3f] }
 0x2fe   :  { %16352 = vmatmul.mubr.msk.f32.gmra.mrb[146].mxu0 %vm2387_vm5, %v19654_v36  ;;  %21751 = vst [vmem:[#allocation40_spill] sm:$0xff] %v20337_v37  ;;  %v10181_v36 = vcombine.low %v21750_v46, %v2162_v52 }
 0x2ff   :  { %16356 = vmatprep.mubr.msk.f32.mxu0 %vm2387_vm5, %v19264_v19 }
 0x300   :  { %15989 = vmatmul.mubr.msk.f32.vlgmr.msra.gmra.mrb[4].mxu1 %vm2387_vm5, %v21644_v11  ;;  %v10188_v46 = vrot.slane %v10181_v36, %v18252_v7 }
 0x301   :  { %15995 = vmatpush3.msk.msra.mxu1 %vm2396_vm4, %v20306_v22  ;;  %15991 = vmatprep.mubr.msk.f32.mxu1 %vm2387_vm5, %v21647_v48  ;;  %v1940_v22 = vcombine.high %v21752_v10, %v21752_v10 }
 0x302   :  { %16357 = vmatmul.mubr.msk.f32.vlgmr.msra.gmra.mrb[144].mxu0 %vm2387_vm5, %v19356_v15  ;;  %16002 = vmatprep.subr.msk.mxu1 %vm2396_vm4, %v20337_v37  ;;  %v20376_v36 = vcombine.low %v21744_v28, %v10188_v46  ;;  %v21759_v28 = vld [vmem:[#allocation59_spill] sm:$0xff] }
 0x303   :  { %16359 = vmatprep.mubr.msk.f32.mxu0 %vm2387_vm5, %v21728_v63  ;;  %16363 = vmatpush3.msk.msra.mxu0 %vm2396_vm4, %v20178_v4  ;;  %v5997_v52 = vcombine.low %v21752_v10, %v1940_v22  ;;  %v21756_v22 = vld [vmem:[#allocation63_spill] sm:$0xff] }
 0x304   :  { %15992 = vmatmul.mubr.msk.f32.gmra.mrb[6].mxu1 %vm2387_vm5, %v18763_v1  ;;  %21755 = vst [vmem:[#allocation57_spill] sm:$0xff] %v20376_v36 }
 0x305   :  { %15996 = vmatprep.mubr.msk.f32.mxu1 %vm2387_vm5, %v21753_v60  ;;  %v6006_v60 = vcombine.low %v21754_v58, %v1958_v18  ;;  %v6004_v10 = vrot.slane %v5997_v52, %v18252_v7  ;;  %v21757_v58 = vld [vmem:[#allocation12_spill] sm:$0xff]  ;;  %v21760_v52 = vld [vmem:[#allocation23_spill] sm:$0xff] }
 0x306   :  { %16360 = vmatmul.mubr.msk.f32.gmra.mrb[146].mxu0 %vm2387_vm5, %v19666_v47 }
 0x307   :  { %16364 = vmatprep.mubr.msk.f32.mxu0 %vm2387_vm5, %v19413_v23  ;;  %v6013_v18 = vrot.slane %v6006_v60, %v18252_v7  ;;  %v20385_v47 = vcombine.low %v21757_v58, %v6004_v10  ;;  %v21765_v60 = vld [vmem:[#allocation29_spill] sm:$0xff] }
 0x308   :  { %15997 = vmatmul.mubr.msk.f32.vlgmr.msra.gmra.mrb[4].mxu1 %vm2387_vm5, %v18775_v13 }
 0x309   :  { %16003 = vmatpush3.msk.msra.mxu1 %vm2396_vm4, %v20337_v37  ;;  %15999 = vmatprep.mubr.msk.f32.mxu1 %vm2387_vm5, %v19064_v42  ;;  %v21758_v37 = vld [vmem:[#allocation31_spill] sm:$0xff]  ;;  %v20394_v46 = vcombine.low %v21759_v28, %v6013_v18  ;;  %v21766_v18 = vld [vmem:[#allocation33_spill] sm:$0xff]  ;;  %v21767_v28 = vld [vmem:[#allocation36_spill] sm:$0xff] }
 0x30a   :  { %16365 = vmatmul.mubr.msk.f32.vlgmr.msra.gmra.mrb[144].mxu0 %vm2387_vm5, %v19746_v53  ;;  %16010 = vmatprep.subr.msk.mxu1 %vm2396_vm4, %v19297_v27 }
 0x30b   :  { %16367 = vmatprep.mubr.msk.f32.mxu0 %vm2387_vm5, %v21729_v33 }
 0x30c   :  { %16000 = vmatmul.mubr.msk.f32.gmra.mrb[6].mxu1 %vm2387_vm5, %v18782_v16 }
 0x30d   :  { %16004 = vmatprep.mubr.msk.f32.mxu1 %vm2387_vm5, %v21756_v22 }
 0x30e   :  { %16368 = vmatmul.mubr.msk.f32.gmra.mrb[146].mxu0 %vm2387_vm5, %v20376_v36  ;;  %v21774_v36 = vld [vmem:[#allocation66_spill] sm:$0xff] }
 0x310   :  { %16005 = vmatmul.mubr.msk.f32.vlgmr.msra.gmra.mrb[4].mxu1 %vm2387_vm5, %v21758_v37 }
 0x311   :  { %16011 = vmatpush3.msk.msra.mxu1 %vm2396_vm4, %v19297_v27  ;;  %16007 = vmatprep.mubr.msk.f32.mxu1 %vm2387_vm5, %v20385_v47  ;;  %v21761_v27 = vld [vmem:[#allocation48_spill] sm:$0xff] }
 0x312   :  { %16018 = vmatprep.subr.msk.mxu1 %vm2396_vm4, %v19375_v39 }
 0x314   :  { %16008 = vmatmul.mubr.msk.f32.gmra.mrb[6].mxu1 %vm2387_vm5, %v20394_v46 }
 0x315   :  { %16012 = vmatprep.mubr.msk.f32.mxu1 %vm2387_vm5, %v21760_v52 }
 0x318   :  { %16013 = vmatmul.mubr.msk.f32.vlgmr.msra.gmra.mrb[4].mxu1 %vm2387_vm5, %v19209_v2 }
 0x319   :  { %16019 = vmatpush3.msk.msra.mxu1 %vm2396_vm4, %v19375_v39  ;;  %16015 = vmatprep.mubr.msk.f32.mxu1 %vm2387_vm5, %v19363_v12  ;;  %v21762_v39 = vld [vmem:[#allocation19_spill] sm:$0xff] }
 0x31a   :  { %16026 = vmatprep.subr.msk.mxu1 %vm2396_vm4, %v19460_v59 }
 0x31c   :  { %16016 = vmatmul.mubr.msk.f32.gmra.mrb[6].mxu1 %vm2387_vm5, %v19354_v9 }
 0x31d   :  { %16020 = vmatprep.mubr.msk.f32.mxu1 %vm2387_vm5, %v21761_v27 }
 0x320   :  { %16021 = vmatmul.mubr.msk.f32.vlgmr.msra.gmra.mrb[4].mxu1 %vm2387_vm5, %v21683_v31 }
 0x321   :  { %16027 = vmatpush3.msk.msra.mxu1 %vm2396_vm4, %v19460_v59  ;;  %16023 = vmatprep.mubr.msk.f32.mxu1 %vm2387_vm5, %v21687_v45  ;;  %v21763_v59 = vld [vmem:[#allocation64_spill] sm:$0xff] }
 0x322   :  { %16034 = vmatprep.subr.msk.mxu1 %vm2396_vm4, %v19553_v49 }
 0x324   :  { %16024 = vmatmul.mubr.msk.f32.gmra.mrb[6].mxu1 %vm2387_vm5, %v21691_v26 }
 0x325   :  { %16028 = vmatprep.mubr.msk.f32.mxu1 %vm2387_vm5, %v19469_v3 }
 0x328   :  { %16029 = vmatmul.mubr.msk.f32.vlgmr.msra.gmra.mrb[4].mxu1 %vm2387_vm5, %v21697_v54 }
 0x329   :  { %16035 = vmatpush3.msk.msra.mxu1 %vm2396_vm4, %v19553_v49  ;;  %16031 = vmatprep.mubr.msk.f32.mxu1 %vm2387_vm5, %v19264_v19  ;;  %v21764_v49 = vld [vmem:[#allocation11_spill] sm:$0xff] }
 0x32a   :  { %16042 = vmatprep.subr.msk.mxu1 %vm2396_vm4, %v19642_v57 }
 0x32c   :  { %16032 = vmatmul.mubr.msk.f32.gmra.mrb[6].mxu1 %vm2387_vm5, %v19356_v15 }
 0x32d   :  { %16036 = vmatprep.mubr.msk.f32.mxu1 %vm2387_vm5, %v19479_v34 }
 0x330   :  { %16037 = vmatmul.mubr.msk.f32.vlgmr.msra.gmra.mrb[4].mxu1 %vm2387_vm5, %v19719_v8 }
 0x331   :  { %16043 = vmatpush3.msk.msra.mxu1 %vm2396_vm4, %v19642_v57  ;;  %16039 = vmatprep.mubr.msk.f32.mxu1 %vm2387_vm5, %v19413_v23  ;;  %v1991_v57 = vcombine.high %v21764_v49, %v21764_v49 }
 0x332   :  { %16050 = vmatprep.subr.msk.mxu1 %vm2396_vm4, %v19709_v30 }
 0x333   :  { %v6957_v10 = vcombine.low %v21764_v49, %v1991_v57  ;;  %v21768_v49 = vld [vmem:[#allocation15_spill] sm:$0xff]  ;;  %v21769_v57 = vld [vmem:[#allocation18_spill] sm:$0xff] }
 0x334   :  { %16040 = vmatmul.mubr.msk.f32.gmra.mrb[6].mxu1 %vm2387_vm5, %v19746_v53 }
 0x335   :  { %16044 = vmatprep.mubr.msk.f32.mxu1 %vm2387_vm5, %v19691_v61  ;;  %v6964_v22 = vrot.slane %v6957_v10, %v18252_v7  ;;  %v21770_v10 = vld [vmem:[#allocation43_spill] sm:$0xff]  ;;  %v21773_v7 = vld [vmem:[#allocation52_spill] sm:$0xff] }
 0x337   :  { %v20521_v58 = vcombine.low %v21766_v18, %v6964_v22  ;;  %v21771_v22 = vld [vmem:[#allocation35_spill] sm:$0xff]  ;;  %v21772_v18 = vld [vmem:[#allocation26_spill] sm:$0xff] }
 0x338   :  { %16045 = vmatmul.mubr.msk.f32.vlgmr.msra.gmra.mrb[4].mxu1 %vm2387_vm5, %v21762_v39 }
 0x339   :  { %16051 = vmatpush3.msk.msra.mxu1 %vm2396_vm4, %v19709_v30  ;;  %16047 = vmatprep.mubr.msk.f32.mxu1 %vm2387_vm5, %v19658_v25 }
 0x33a   :  { %16058 = vmatprep.subr.msk.mxu1 %vm2396_vm4, %v19765_v6 }
 0x33c   :  { %16048 = vmatmul.mubr.msk.f32.gmra.mrb[6].mxu1 %vm2387_vm5, %v19679_v29 }
 0x33d   :  { %16052 = vmatprep.mubr.msk.f32.mxu1 %vm2387_vm5, %v21708_v55 }
 0x340   :  { %16053 = vmatmul.mubr.msk.f32.vlgmr.msra.gmra.mrb[4].mxu1 %vm2387_vm5, %v21710_v32 }
 0x341   :  { %16059 = vmatpush3.msk.msra.mxu1 %vm2396_vm4, %v19765_v6  ;;  %16055 = vmatprep.mubr.msk.f32.mxu1 %vm2387_vm5, %v21711_v20 }
 0x342   :  { %16066 = vmatprep.subr.msk.mxu1 %vm2396_vm4, %v19801_v17 }
 0x344   :  { %16056 = vmatmul.mubr.msk.f32.gmra.mrb[6].mxu1 %vm2387_vm5, %v19822_v14 }
 0x345   :  { %16060 = vmatprep.mubr.msk.f32.mxu1 %vm2387_vm5, %v21712_v0 }
 0x348   :  { %16061 = vmatmul.mubr.msk.f32.vlgmr.msra.gmra.mrb[4].mxu1 %vm2387_vm5, %v21715_v24 }
 0x349   :  { %16067 = vmatpush3.msk.msra.mxu1 %vm2396_vm4, %v19801_v17  ;;  %16063 = vmatprep.mubr.msk.f32.mxu1 %vm2387_vm5, %v21716_v44 }
 0x34a   :  { %16074 = vmatprep.subr.msk.mxu1 %vm2396_vm4, %v19837_v51 }
 0x34c   :  { %16064 = vmatmul.mubr.msk.f32.gmra.mrb[6].mxu1 %vm2387_vm5, %v19504_v43 }
 0x34d   :  { %16068 = vmatprep.mubr.msk.f32.mxu1 %vm2387_vm5, %v21644_v11 }
 0x350   :  { %16069 = vmatmul.mubr.msk.f32.vlgmr.msra.gmra.mrb[4].mxu1 %vm2387_vm5, %v21647_v48 }
 0x351   :  { %16075 = vmatpush3.msk.msra.mxu1 %vm2396_vm4, %v19837_v51  ;;  %16071 = vmatprep.mubr.msk.f32.mxu1 %vm2387_vm5, %v18763_v1 }
 0x352   :  { %16082 = vmatprep.subr.msk.mxu1 %vm2396_vm4, %v21763_v59 }
 0x354   :  { %16072 = vmatmul.mubr.msk.f32.gmra.mrb[6].mxu1 %vm2387_vm5, %v19890_v40 }
 0x355   :  { %16076 = vmatprep.mubr.msk.f32.mxu1 %vm2387_vm5, %v18775_v13 }
 0x358   :  { %16077 = vmatmul.mubr.msk.f32.vlgmr.msra.gmra.mrb[4].mxu1 %vm2387_vm5, %v19064_v42 }
 0x359   :  { %16083 = vmatpush3.msk.msra.mxu1 %vm2396_vm4, %v21763_v59  ;;  %16079 = vmatprep.mubr.msk.f32.mxu1 %vm2387_vm5, %v18782_v16 }
 0x35a   :  { %16090 = vmatprep.subr.msk.mxu1 %vm2396_vm4, %v21765_v60 }
 0x35c   :  { %16080 = vmatmul.mubr.msk.f32.gmra.mrb[6].mxu1 %vm2387_vm5, %v19507_v41 }
 0x35d   :  { %16084 = vmatprep.mubr.msk.f32.mxu1 %vm2387_vm5, %v21758_v37 }
 0x360   :  { %16085 = vmatmul.mubr.msk.f32.vlgmr.msra.gmra.mrb[4].mxu1 %vm2387_vm5, %v20385_v47 }
 0x361   :  { %16091 = vmatpush3.msk.msra.mxu1 %vm2396_vm4, %v21765_v60  ;;  %16087 = vmatprep.mubr.msk.f32.mxu1 %vm2387_vm5, %v20394_v46 }
 0x362   :  { %16098 = vmatprep.subr.msk.mxu1 %vm2396_vm4, %v21767_v28 }
 0x364   :  { %16088 = vmatmul.mubr.msk.f32.gmra.mrb[6].mxu1 %vm2387_vm5, %v20521_v58 }
 0x365   :  { %16092 = vmatprep.mubr.msk.f32.mxu1 %vm2387_vm5, %v19209_v2 }
 0x368   :  { %16093 = vmatmul.mubr.msk.f32.vlgmr.msra.gmra.mrb[4].mxu1 %vm2387_vm5, %v19363_v12 }
 0x369   :  { %16099 = vmatpush3.msk.msra.mxu1 %vm2396_vm4, %v21767_v28  ;;  %16095 = vmatprep.mubr.msk.f32.mxu1 %vm2387_vm5, %v19354_v9 }
 0x36a   :  { %16106 = vmatprep.subr.msk.mxu1 %vm2396_vm4, %v21768_v49 }
 0x36c   :  { %16096 = vmatmul.mubr.msk.f32.gmra.mrb[6].mxu1 %vm2387_vm5, %v19989_v56 }
 0x36d   :  { %16100 = vmatprep.mubr.msk.f32.mxu1 %vm2387_vm5, %v21683_v31 }
 0x370   :  { %16101 = vmatmul.mubr.msk.f32.vlgmr.msra.gmra.mrb[4].mxu1 %vm2387_vm5, %v21687_v45 }
 0x371   :  { %16107 = vmatpush3.msk.msra.mxu1 %vm2396_vm4, %v21768_v49  ;;  %16103 = vmatprep.mubr.msk.f32.mxu1 %vm2387_vm5, %v21691_v26 }
 0x372   :  { %16114 = vmatprep.subr.msk.mxu1 %vm2396_vm4, %v21769_v57 }
 0x374   :  { %16104 = vmatmul.mubr.msk.f32.gmra.mrb[6].mxu1 %vm2387_vm5, %v21726_v50 }
 0x375   :  { %16108 = vmatprep.mubr.msk.f32.mxu1 %vm2387_vm5, %v21697_v54 }
 0x378   :  { %16109 = vmatmul.mubr.msk.f32.vlgmr.msra.gmra.mrb[4].mxu1 %vm2387_vm5, %v19264_v19 }
 0x379   :  { %16115 = vmatpush3.msk.msra.mxu1 %vm2396_vm4, %v21769_v57  ;;  %16111 = vmatprep.mubr.msk.f32.mxu1 %vm2387_vm5, %v19356_v15 }
 0x37a   :  { %16122 = vmatprep.subr.msk.mxu1 %vm2396_vm4, %v21770_v10 }
 0x37c   :  { %16112 = vmatmul.mubr.msk.f32.gmra.mrb[6].mxu1 %vm2387_vm5, %v21728_v63 }
 0x37d   :  { %16116 = vmatprep.mubr.msk.f32.mxu1 %vm2387_vm5, %v19719_v8 }
 0x380   :  { %16117 = vmatmul.mubr.msk.f32.vlgmr.msra.gmra.mrb[4].mxu1 %vm2387_vm5, %v19413_v23 }
 0x381   :  { %16123 = vmatpush3.msk.msra.mxu1 %vm2396_vm4, %v21770_v10  ;;  %16119 = vmatprep.mubr.msk.f32.mxu1 %vm2387_vm5, %v19746_v53 }
 0x382   :  { %16130 = vmatprep.subr.msk.mxu1 %vm2396_vm4, %v20062_v62 }
 0x384   :  { %16120 = vmatmul.mubr.msk.f32.gmra.mrb[6].mxu1 %vm2387_vm5, %v21729_v33 }
 0x385   :  { %16124 = vmatprep.mubr.msk.f32.mxu1 %vm2387_vm5, %v21762_v39 }
 0x388   :  { %16125 = vmatmul.mubr.msk.f32.vlgmr.msra.gmra.mrb[4].mxu1 %vm2387_vm5, %v19658_v25 }
 0x389   :  { %16131 = vmatpush3.msk.msra.mxu1 %vm2396_vm4, %v20062_v62  ;;  %16127 = vmatprep.mubr.msk.f32.mxu1 %vm2387_vm5, %v19679_v29 }
 0x38a   :  { %16138 = vmatprep.subr.msk.mxu1 %vm2396_vm4, %v20091_v35 }
 0x38c   :  { %16128 = vmatmul.mubr.msk.f32.gmra.mrb[6].mxu1 %vm2387_vm5, %v21771_v22 }
 0x38d   :  { %16132 = vmatprep.mubr.msk.f32.mxu1 %vm2387_vm5, %v21710_v32 }
 0x390   :  { %16133 = vmatmul.mubr.msk.f32.vlgmr.msra.gmra.mrb[4].mxu1 %vm2387_vm5, %v21711_v20 }
 0x391   :  { %16139 = vmatpush3.msk.msra.mxu1 %vm2396_vm4, %v20091_v35  ;;  %16135 = vmatprep.mubr.msk.f32.mxu1 %vm2387_vm5, %v19822_v14 }
 0x392   :  { %16146 = vmatprep.subr.msk.mxu1 %vm2396_vm4, %v20120_v21 }
 0x394   :  { %16136 = vmatmul.mubr.msk.f32.gmra.mrb[6].mxu1 %vm2387_vm5, %v21772_v18 }
 0x395   :  { %16140 = vmatprep.mubr.msk.f32.mxu1 %vm2387_vm5, %v21715_v24 }
 0x398   :  { %16141 = vmatmul.mubr.msk.f32.vlgmr.msra.gmra.mrb[4].mxu1 %vm2387_vm5, %v21716_v44 }
 0x399   :  { %16147 = vmatpush3.msk.msra.mxu1 %vm2396_vm4, %v20120_v21  ;;  %16143 = vmatprep.mubr.msk.f32.mxu1 %vm2387_vm5, %v19504_v43  ;;  %v21776_v21 = vld [vmem:[#allocation58_spill] sm:$0xff] }
 0x39a   :  { %16154 = vmatprep.subr.msk.mxu1 %vm2396_vm4, %v20149_v38 }
 0x39c   :  { %16144 = vmatmul.mubr.msk.f32.gmra.mrb[6].mxu1 %vm2387_vm5, %v21734_v5 }
 0x39d   :  { %16148 = vmatprep.mubr.msk.f32.mxu1 %vm2387_vm5, %v21647_v48 }
 0x3a0   :  { %16149 = vmatmul.mubr.msk.f32.vlgmr.msra.gmra.mrb[4].mxu1 %vm2387_vm5, %v18763_v1 }
 0x3a1   :  { %16155 = vmatpush3.msk.msra.mxu1 %vm2396_vm4, %v20149_v38  ;;  %16151 = vmatprep.mubr.msk.f32.mxu1 %vm2387_vm5, %v19890_v40  ;;  %v21775_v38 = vld [vmem:[#allocation37_spill] sm:$0xff] }
 0x3a2   :  { %16162 = vmatprep.subr.msk.mxu1 %vm2396_vm4, %v20178_v4 }
 0x3a4   :  { %16152 = vmatmul.mubr.msk.f32.gmra.mrb[6].mxu1 %vm2387_vm5, %v21773_v7 }
 0x3a5   :  { %16156 = vmatprep.mubr.msk.f32.mxu1 %vm2387_vm5, %v19064_v42 }
 0x3a8   :  { %16157 = vmatmul.mubr.msk.f32.vlgmr.msra.gmra.mrb[4].mxu1 %vm2387_vm5, %v18782_v16 }
 0x3a9   :  { %16163 = vmatpush3.msk.msra.mxu1 %vm2396_vm4, %v20178_v4  ;;  %16159 = vmatprep.mubr.msk.f32.mxu1 %vm2387_vm5, %v19507_v41  ;;  %v17238_v4 = vld [vmem:[%s21305_s3] sm:$0x3f] }
 0x3aa   :  { %16370 = vmatprep.subr.msk.mxu1 %vm2396_vm4, %v21774_v36 }
 0x3ac   :  { %16160 = vmatmul.mubr.msk.f32.gmra.mrb[6].mxu1 %vm2387_vm5, %v21775_v38 }
 0x3ad   :  { %16164 = vmatprep.mubr.msk.f32.mxu1 %vm2387_vm5, %v20385_v47 }
 0x3b0   :  { %16165 = vmatmul.mubr.msk.f32.vlgmr.msra.gmra.mrb[4].mxu1 %vm2387_vm5, %v20394_v46 }
 0x3b1   :  { %16371 = vmatpush3.msk.msra.mxu1 %vm2396_vm4, %v21774_v36  ;;  %16167 = vmatprep.mubr.msk.f32.mxu1 %vm2387_vm5, %v20521_v58  ;;  %v21777_v36 = vld [vmem:[#allocation20_spill] sm:$0xff] }
 0x3b2   :  { %16378 = vmatprep.subr.msk.mxu1 %vm2396_vm4, %v17238_v4 }
 0x3b4   :  { %16168 = vmatmul.mubr.msk.f32.gmra.mrb[6].mxu1 %vm2387_vm5, %v21776_v21 }
 0x3b5   :  { %16372 = vmatprep.mubr.msk.f32.mxu1 %vm2387_vm5, %v21761_v27 }
 0x3b8   :  { %16373 = vmatmul.mubr.msk.f32.vlgmr.msra.gmra.mrb[8].mxu1 %vm2387_vm5, %v21683_v31 }
 0x3b9   :  { %16379 = vmatpush3.msk.msra.mxu1 %vm2396_vm4, %v17238_v4  ;;  %16375 = vmatprep.mubr.msk.f32.mxu1 %vm2387_vm5, %v21687_v45  ;;  %v21778_v4 = vld [vmem:[#allocation5_spill] sm:$0xff] }
 0x3ba   :  { %16386 = vmatprep.subr.msk.mxu1 %vm2396_vm4, %v21777_v36 }
 0x3bb   :  { %v20658_v35 = vpop.f32.mrb[0].mxu1 }
 0x3bc   :  { %v20660_v38 = vpop.f32.mrb[1].mxu1  ;;  %16376 = vmatmul.mubr.msk.f32.gmra.mrb[10].mxu1 %vm2387_vm5, %v21691_v26 }
 0x3bd   :  { %16380 = vmatprep.mubr.msk.f32.mxu1 %vm2387_vm5, %v21760_v52  ;;  %v21779_v52 = vld [vmem:[#allocation40_spill] sm:$0xff] }
 0x3bf   :  { %v20666_v27 = vpop.f32.mrb[2].mxu1 }
 0x3c0   :  { %v20668_v21 = vpop.f32.mrb[3].mxu1  ;;  %16381 = vmatmul.mubr.msk.f32.vlgmr.msra.gmra.mrb[8].mxu1 %vm2387_vm5, %v19209_v2 }
 0x3c1   :  { %16387 = vmatpush3.msk.msra.mxu1 %vm2396_vm4, %v21777_v36  ;;  %16383 = vmatprep.mubr.msk.f32.mxu1 %vm2387_vm5, %v19363_v12 }
 0x3c2   :  { %16394 = vmatprep.subr.msk.mxu1 %vm2396_vm4, %v21778_v4 }
 0x3c4   :  { %16384 = vmatmul.mubr.msk.f32.gmra.mrb[10].mxu1 %vm2387_vm5, %v19354_v9 }
 0x3c5   :  { %16388 = vmatprep.mubr.msk.f32.mxu1 %vm2387_vm5, %v19469_v3  ;;  %v17239_v3 = vld [vmem:[%s21305_s3 + $0x28] sm:$0x3f] }
 0x3c8   :  { %16389 = vmatmul.mubr.msk.f32.vlgmr.msra.gmra.mrb[8].mxu1 %vm2387_vm5, %v21697_v54 }
 0x3c9   :  { %16395 = vmatpush3.msk.msra.mxu1 %vm2396_vm4, %v21778_v4  ;;  %16391 = vmatprep.mubr.msk.f32.mxu1 %vm2387_vm5, %v19264_v19 }
 0x3ca   :  { %16402 = vmatprep.subr.msk.mxu1 %vm2396_vm4, %v21779_v52 }
 0x3cc   :  { %16392 = vmatmul.mubr.msk.f32.gmra.mrb[10].mxu1 %vm2387_vm5, %v19356_v15 }
 0x3cd   :  { %16396 = vmatprep.mubr.msk.f32.mxu1 %vm2387_vm5, %v19479_v34  ;;  %v17240_v34 = vld [vmem:[%s21305_s3 + $0x30] sm:$0x3f] }
 0x3d0   :  { %16397 = vmatmul.mubr.msk.f32.vlgmr.msra.gmra.mrb[8].mxu1 %vm2387_vm5, %v19719_v8 }
 0x3d1   :  { %16403 = vmatpush3.msk.msra.mxu1 %vm2396_vm4, %v21779_v52  ;;  %16399 = vmatprep.mubr.msk.f32.mxu1 %vm2387_vm5, %v19413_v23 }
 0x3d2   :  { %16410 = vmatprep.subr.msk.mxu1 %vm2396_vm4, %v17239_v3 }
 0x3d4   :  { %16400 = vmatmul.mubr.msk.f32.gmra.mrb[10].mxu1 %vm2387_vm5, %v19746_v53 }
 0x3d5   :  { %16404 = vmatprep.mubr.msk.f32.mxu1 %vm2387_vm5, %v19691_v61 }
 0x3d8   :  { %16405 = vmatmul.mubr.msk.f32.vlgmr.msra.gmra.mrb[8].mxu1 %vm2387_vm5, %v21762_v39 }
 0x3d9   :  { %16411 = vmatpush3.msk.msra.mxu1 %vm2396_vm4, %v17239_v3  ;;  %16407 = vmatprep.mubr.msk.f32.mxu1 %vm2387_vm5, %v19658_v25  ;;  %v17242_v3 = vld [vmem:[%s21305_s3 + $0x40] sm:$0x3f] }
 0x3da   :  { %16418 = vmatprep.subr.msk.mxu1 %vm2396_vm4, %v17240_v34 }
 0x3dc   :  { %16408 = vmatmul.mubr.msk.f32.gmra.mrb[10].mxu1 %vm2387_vm5, %v19679_v29 }
 0x3dd   :  { %16412 = vmatprep.mubr.msk.f32.mxu1 %vm2387_vm5, %v21708_v55  ;;  %v20721_v61 = vpop.f32.mrb[144].mxu0  ;;  %v17241_v55 = vld [vmem:[%s21305_s3 + $0x38] sm:$0x3f] }
 0x3de   :  { %v20723_v36 = vpop.f32.mrb[145].mxu0 }
 0x3e0   :  { %16413 = vmatmul.mubr.msk.f32.vlgmr.msra.gmra.mrb[8].mxu1 %vm2387_vm5, %v21710_v32 }
 0x3e1   :  { %16419 = vmatpush3.msk.msra.mxu1 %vm2396_vm4, %v17240_v34  ;;  %16415 = vmatprep.mubr.msk.f32.mxu1 %vm2387_vm5, %v21711_v20  ;;  %v20730_v4 = vpop.f32.mrb[146].mxu0 }
 0x3e2   :  { %v20732_v52 = vpop.f32.mrb[147].mxu0  ;;  %16426 = vmatprep.subr.msk.mxu1 %vm2396_vm4, %v17241_v55 }
 0x3e4   :  { %16416 = vmatmul.mubr.msk.f32.gmra.mrb[10].mxu1 %vm2387_vm5, %v19822_v14 }
 0x3e5   :  { %16420 = vmatprep.mubr.msk.f32.mxu1 %vm2387_vm5, %v21712_v0  ;;  %v17243_v0 = vld [vmem:[%s21305_s3 + $0x48] sm:$0x3f] }
 0x3e8   :  { %16421 = vmatmul.mubr.msk.f32.vlgmr.msra.gmra.mrb[8].mxu1 %vm2387_vm5, %v21715_v24 }
 0x3e9   :  { %16427 = vmatpush3.msk.msra.mxu1 %vm2396_vm4, %v17241_v55  ;;  %16423 = vmatprep.mubr.msk.f32.mxu1 %vm2387_vm5, %v21716_v44 }
 0x3ea   :  { %16434 = vmatprep.subr.msk.mxu1 %vm2396_vm4, %v17242_v3 }
 0x3ec   :  { %16424 = vmatmul.mubr.msk.f32.gmra.mrb[10].mxu1 %vm2387_vm5, %v19504_v43 }
 0x3ed   :  { %16428 = vmatprep.mubr.msk.f32.mxu1 %vm2387_vm5, %v21644_v11  ;;  %v21786_v11 = vld [vmem:[#allocation28_spill] sm:$0xff] }
 0x3f0   :  { %16429 = vmatmul.mubr.msk.f32.vlgmr.msra.gmra.mrb[8].mxu1 %vm2387_vm5, %v21647_v48 }
 0x3f1   :  { %16435 = vmatpush3.msk.msra.mxu1 %vm2396_vm4, %v17242_v3  ;;  %16431 = vmatprep.mubr.msk.f32.mxu1 %vm2387_vm5, %v18763_v1 }
 0x3f2   :  { %16442 = vmatprep.subr.msk.mxu1 %vm2396_vm4, %v17243_v0 }
 0x3f4   :  { %16432 = vmatmul.mubr.msk.f32.gmra.mrb[10].mxu1 %vm2387_vm5, %v19890_v40 }
 0x3f5   :  { %16436 = vmatprep.mubr.msk.f32.mxu1 %vm2387_vm5, %v18775_v13  ;;  %v21782_v13 = vld [vmem:[#allocation58_spill] sm:$0xff] }
 0x3f8   :  { %16437 = vmatmul.mubr.msk.f32.vlgmr.msra.gmra.mrb[8].mxu1 %vm2387_vm5, %v19064_v42 }
 0x3f9   :  { %16443 = vmatpush3.msk.msra.mxu1 %vm2396_vm4, %v17243_v0  ;;  %16439 = vmatprep.mubr.msk.f32.mxu1 %vm2387_vm5, %v18782_v16 }
 0x3fa   :  { %16450 = vmatprep.subr.msk.mxu1 %vm2396_vm4, %v19709_v30 }
 0x3fc   :  { %16440 = vmatmul.mubr.msk.f32.gmra.mrb[10].mxu1 %vm2387_vm5, %v19507_v41 }
 0x3fd   :  { %16444 = vmatprep.mubr.msk.f32.mxu1 %vm2387_vm5, %v21758_v37 }
 0x400   :  { %16445 = vmatmul.mubr.msk.f32.vlgmr.msra.gmra.mrb[8].mxu1 %vm2387_vm5, %v20385_v47 }
 0x401   :  { %16451 = vmatpush3.msk.msra.mxu1 %vm2396_vm4, %v19709_v30  ;;  %16447 = vmatprep.mubr.msk.f32.mxu1 %vm2387_vm5, %v20394_v46 }
 0x402   :  { %16458 = vmatprep.subr.msk.mxu1 %vm2396_vm4, %v19765_v6 }
 0x404   :  { %16448 = vmatmul.mubr.msk.f32.gmra.mrb[10].mxu1 %vm2387_vm5, %v20521_v58 }
 0x405   :  { %16452 = vmatprep.mubr.msk.f32.mxu1 %vm2387_vm5, %v19209_v2  ;;  %v21785_v2 = vld [vmem:[#allocation65_spill] sm:$0xff] }
 0x408   :  { %16453 = vmatmul.mubr.msk.f32.vlgmr.msra.gmra.mrb[8].mxu1 %vm2387_vm5, %v19363_v12 }
 0x409   :  { %16459 = vmatpush3.msk.msra.mxu1 %vm2396_vm4, %v19765_v6  ;;  %16455 = vmatprep.mubr.msk.f32.mxu1 %vm2387_vm5, %v19354_v9 }
 0x40a   :  { %16466 = vmatprep.subr.msk.mxu1 %vm2396_vm4, %v19801_v17 }
 0x40c   :  { %16456 = vmatmul.mubr.msk.f32.gmra.mrb[10].mxu1 %vm2387_vm5, %v19989_v56 }
 0x40d   :  { %16460 = vmatprep.mubr.msk.f32.mxu1 %vm2387_vm5, %v21683_v31 }
 0x410   :  { %16461 = vmatmul.mubr.msk.f32.vlgmr.msra.gmra.mrb[8].mxu1 %vm2387_vm5, %v21687_v45 }
 0x411   :  { %16467 = vmatpush3.msk.msra.mxu1 %vm2396_vm4, %v19801_v17  ;;  %16463 = vmatprep.mubr.msk.f32.mxu1 %vm2387_vm5, %v21691_v26 }
 0x412   :  { %16474 = vmatprep.subr.msk.mxu1 %vm2396_vm4, %v19837_v51 }
 0x414   :  { %16464 = vmatmul.mubr.msk.f32.gmra.mrb[10].mxu1 %vm2387_vm5, %v21726_v50 }
 0x415   :  { %16468 = vmatprep.mubr.msk.f32.mxu1 %vm2387_vm5, %v21697_v54 }
 0x418   :  { %16469 = vmatmul.mubr.msk.f32.vlgmr.msra.gmra.mrb[8].mxu1 %vm2387_vm5, %v19264_v19 }
 0x419   :  { %16475 = vmatpush3.msk.msra.mxu1 %vm2396_vm4, %v19837_v51  ;;  %16471 = vmatprep.mubr.msk.f32.mxu1 %vm2387_vm5, %v19356_v15 }
 0x41a   :  { %16482 = vmatprep.subr.msk.mxu1 %vm2396_vm4, %v21763_v59 }
 0x41c   :  { %16472 = vmatmul.mubr.msk.f32.gmra.mrb[10].mxu1 %vm2387_vm5, %v21728_v63 }
 0x41d   :  { %16476 = vmatprep.mubr.msk.f32.mxu1 %vm2387_vm5, %v19719_v8 }
 0x420   :  { %16477 = vmatmul.mubr.msk.f32.vlgmr.msra.gmra.mrb[8].mxu1 %vm2387_vm5, %v19413_v23 }
 0x421   :  { %16483 = vmatpush3.msk.msra.mxu1 %vm2396_vm4, %v21763_v59  ;;  %16479 = vmatprep.mubr.msk.f32.mxu1 %vm2387_vm5, %v19746_v53 }
 0x422   :  { %16490 = vmatprep.subr.msk.mxu1 %vm2396_vm4, %v21765_v60 }
 0x424   :  { %16480 = vmatmul.mubr.msk.f32.gmra.mrb[10].mxu1 %vm2387_vm5, %v21729_v33 }
 0x425   :  { %16484 = vmatprep.mubr.msk.f32.mxu1 %vm2387_vm5, %v21762_v39 }
 0x428   :  { %16485 = vmatmul.mubr.msk.f32.vlgmr.msra.gmra.mrb[8].mxu1 %vm2387_vm5, %v19658_v25 }
 0x429   :  { %16491 = vmatpush3.msk.msra.mxu1 %vm2396_vm4, %v21765_v60  ;;  %16487 = vmatprep.mubr.msk.f32.mxu1 %vm2387_vm5, %v19679_v29 }
 0x42a   :  { %16498 = vmatprep.subr.msk.mxu1 %vm2396_vm4, %v21767_v28 }
 0x42c   :  { %16488 = vmatmul.mubr.msk.f32.gmra.mrb[10].mxu1 %vm2387_vm5, %v21771_v22 }
 0x42d   :  { %16492 = vmatprep.mubr.msk.f32.mxu1 %vm2387_vm5, %v21710_v32 }
 0x430   :  { %16493 = vmatmul.mubr.msk.f32.vlgmr.msra.gmra.mrb[8].mxu1 %vm2387_vm5, %v21711_v20 }
 0x431   :  { %16499 = vmatpush3.msk.msra.mxu1 %vm2396_vm4, %v21767_v28  ;;  %16495 = vmatprep.mubr.msk.f32.mxu1 %vm2387_vm5, %v19822_v14 }
 0x432   :  { %16506 = vmatprep.subr.msk.mxu1 %vm2396_vm4, %v21768_v49 }
 0x434   :  { %16496 = vmatmul.mubr.msk.f32.gmra.mrb[10].mxu1 %vm2387_vm5, %v21772_v18 }
 0x435   :  { %16500 = vmatprep.mubr.msk.f32.mxu1 %vm2387_vm5, %v21715_v24 }
 0x438   :  { %16501 = vmatmul.mubr.msk.f32.vlgmr.msra.gmra.mrb[8].mxu1 %vm2387_vm5, %v21716_v44 }
 0x439   :  { %16507 = vmatpush3.msk.msra.mxu1 %vm2396_vm4, %v21768_v49  ;;  %16503 = vmatprep.mubr.msk.f32.mxu1 %vm2387_vm5, %v19504_v43 }
 0x43a   :  { %16514 = vmatprep.subr.msk.mxu1 %vm2396_vm4, %v21769_v57 }
 0x43c   :  { %16504 = vmatmul.mubr.msk.f32.gmra.mrb[10].mxu1 %vm2387_vm5, %v21734_v5 }
 0x43d   :  { %16508 = vmatprep.mubr.msk.f32.mxu1 %vm2387_vm5, %v21647_v48  ;;  %v21787_v48 = vld [vmem:[#allocation13_spill] sm:$0xff] }
 0x440   :  { %16509 = vmatmul.mubr.msk.f32.vlgmr.msra.gmra.mrb[8].mxu1 %vm2387_vm5, %v18763_v1  ;;  %v21780_v1 = vld [vmem:[#allocation37_spill] sm:$0xff] }
 0x441   :  { %16515 = vmatpush3.msk.msra.mxu1 %vm2396_vm4, %v21769_v57  ;;  %16511 = vmatprep.mubr.msk.f32.mxu1 %vm2387_vm5, %v19890_v40 }
 0x442   :  { %16522 = vmatprep.subr.msk.mxu1 %vm2396_vm4, %v21770_v10 }
 0x444   :  { %16512 = vmatmul.mubr.msk.f32.gmra.mrb[10].mxu1 %vm2387_vm5, %v21773_v7  ;;  %v21781_v7 = vld [vmem:[#allocation56_spill] sm:$0xff] }
 0x445   :  { %16516 = vmatprep.mubr.msk.f32.mxu1 %vm2387_vm5, %v19064_v42  ;;  %v21784_v42 = vld [vmem:[#allocation27_spill] sm:$0xff] }
 0x448   :  { %16517 = vmatmul.mubr.msk.f32.vlgmr.msra.gmra.mrb[8].mxu1 %vm2387_vm5, %v18782_v16  ;;  %v21783_v16 = vld [vmem:[#allocation17_spill] sm:$0xff] }
 0x449   :  { %16523 = vmatpush3.msk.msra.mxu1 %vm2396_vm4, %v21770_v10  ;;  %16519 = vmatprep.mubr.msk.f32.mxu1 %vm2387_vm5, %v19507_v41 }
 0x44a   :  { %16530 = vmatprep.subr.msk.mxu1 %vm2396_vm4, %v20062_v62 }
 0x44c   :  { %16520 = vmatmul.mubr.msk.f32.gmra.mrb[10].mxu1 %vm2387_vm5, %v21780_v1 }
 0x44d   :  { %16524 = vmatprep.mubr.msk.f32.mxu1 %vm2387_vm5, %v20385_v47 }
 0x450   :  { %16525 = vmatmul.mubr.msk.f32.vlgmr.msra.gmra.mrb[8].mxu1 %vm2387_vm5, %v20394_v46 }
 0x451   :  { %16531 = vmatpush3.msk.msra.mxu1 %vm2396_vm4, %v20062_v62  ;;  %16527 = vmatprep.mubr.msk.f32.mxu1 %vm2387_vm5, %v20521_v58 }
 0x452   :  { %16538 = vmatprep.subr.msk.mxu1 %vm2396_vm4, %v21781_v7 }
 0x454   :  { %16528 = vmatmul.mubr.msk.f32.gmra.mrb[10].mxu1 %vm2387_vm5, %v21782_v13 }
 0x455   :  { %16532 = vmatprep.mubr.msk.f32.mxu1 %vm2387_vm5, %v19363_v12  ;;  %v14381_v12 = vld [vmem:[%s21306_s4] ss:$0 sm:$0xff] }
 0x456   :  { %v5623_v43 = vadd.f32 %v14381_v12, %v20660_v38  ;;  %v5626_v47 = vadd.f32 %v20666_v27, %v14381_v12  ;;  %v5625_v30 = vadd.f32 %v14381_v12, %v20668_v21  ;;  %v14757_v21 = vld [vmem:[%s21307_s5 + $0x10] sm:$0xff]  ;;  %v17272_v38 = vmov 0.0  }
 0x457   :  { %16574 = vmatprep.mubr.msk.f32.mxu0 %vm17271_vm8, %v17272_v38  ;;  %v10282_v5 = vadd.f32 %v20721_v61, %v14381_v12  ;;  %v10281_v37 = vadd.f32 %v14381_v12, %v20723_v36  ;;  %v10284_v28 = vadd.f32 %v20730_v4, %v14381_v12  ;;  %v10283_v10 = vadd.f32 %v14381_v12, %v20732_v52  ;;  %v12609_v4 = vld [vmem:[%s21307_s5] sm:$0xff]  ;;  %v12610_v52 = vld [vmem:[%s21307_s5 + $0x8] sm:$0xf] }
 0x458   :  { %16533 = vmatmul.mubr.msk.f32.vlgmr.msra.gmra.mrb[8].mxu1 %vm2387_vm5, %v19354_v9  ;;  %v21788_v9 = vld [vmem:[#allocation16_spill] sm:$0xff]  ;;  %v5630_v51 = vmax.f32 %v5626_v47, 0.0  ;;  %v5629_v24 = vmax.f32 %v5625_v30, 0.0 }
 0x459   :  { %16539 = vmatpush3.msk.msra.mxu1 %vm2396_vm4, %v21781_v7  ;;  %16535 = vmatprep.mubr.msk.f32.mxu1 %vm2387_vm5, %v19989_v56  ;;  %v10286_v58 = vmax.f32 %v10282_v5, 0.0  ;;  %v10285_v57 = vmax.f32 %v10281_v37, 0.0  ;;  %v10288_v0 = vmax.f32 %v10284_v28, 0.0  ;;  %v10287_v7 = vmax.f32 %v10283_v10, 0.0  ;;  %v14796_v28 = vld [vmem:[%s21307_s5 + $0xa8] sm:$0xf] }
 0x45a   :  { %16546 = vmatprep.subr.msk.mxu1 %vm2396_vm4, %v21783_v16 }
 0x45c   :  { %16536 = vmatmul.mubr.msk.f32.gmra.mrb[10].mxu1 %vm2387_vm5, %v21784_v42 }
 0x45d   :  { %16540 = vmatprep.mubr.msk.f32.mxu1 %vm2387_vm5, %v21687_v45 }
 0x460   :  { %16541 = vmatmul.mubr.msk.f32.vlgmr.msra.gmra.mrb[8].mxu1 %vm2387_vm5, %v21691_v26 }
 0x461   :  { %16547 = vmatpush3.msk.msra.mxu1 %vm2396_vm4, %v21783_v16  ;;  %16543 = vmatprep.mubr.msk.f32.mxu1 %vm2387_vm5, %v21726_v50  ;;  %v14758_v50 = vld [vmem:[%s21307_s5 + $0x18] sm:$0xf] }
 0x462   :  { %16554 = vmatprep.subr.msk.mxu1 %vm2396_vm4, %v21785_v2  ;;  %v16745_v62 = vpack.c.bf16 %v14758_v50, %v14757_v21  ;;  %v14787_v50 = vld [vmem:[%s21307_s5 + $0x80] sm:$0xff] }
 0x464   :  { %16544 = vmatmul.mubr.msk.f32.gmra.mrb[10].mxu1 %vm2387_vm5, %v21786_v11 }
 0x465   :  { %16548 = vmatprep.mubr.msk.f32.mxu1 %vm2387_vm5, %v19264_v19  ;;  %v21789_v19 = vld [vmem:[#allocation57_spill] sm:$0xff] }
 0x468   :  { %16549 = vmatmul.mubr.msk.f32.vlgmr.msra.gmra.mrb[8].mxu1 %vm2387_vm5, %v19356_v15  ;;  %v21790_v15 = vld [vmem:[#allocation68_spill] sm:$0xff] }
 0x469   :  { %16555 = vmatpush3.msk.msra.mxu1 %vm2396_vm4, %v21785_v2  ;;  %16551 = vmatprep.mubr.msk.f32.mxu1 %vm2387_vm5, %v21728_v63  ;;  %v17270_v63 = vmov 0.0|0.0   ;;  %v21793_v2 = vld [vmem:[#allocation30_spill] sm:$0xff] }
 0x46a   :  { %16562 = vmatprep.subr.msk.mxu1 %vm2396_vm4, %v21787_v48  ;;  %16744 = vmatprep.subr.bf16.mxu0 %v17270_v63 }
 0x46b   :  { %16747 = vmatpush3.bf16.msk.msra.mxu0 %vm20971_vm7, %v16745_v62  ;;  %v14788_v62 = vld [vmem:[%s21307_s5 + $0x88] sm:$0xf] }
 0x46c   :  { %16552 = vmatmul.mubr.msk.f32.gmra.mrb[10].mxu1 %vm2387_vm5, %v21788_v9  ;;  %16748 = vmatprep.subr.bf16.mxu0 %v17270_v63  ;;  %v16777_v5 = vpack.c.bf16 %v14788_v62, %v14787_v50 }
 0x46d   :  { %16556 = vmatprep.mubr.msk.f32.mxu1 %vm2387_vm5, %v19413_v23  ;;  %v5624_v23 = vadd.f32 %v20658_v35, %v14381_v12 }
 0x46f   :  { %v5628_v26 = vmax.f32 %v5624_v23, 0.0  ;;  %v14763_v23 = vld [vmem:[%s21307_s5 + $0x20] sm:$0xff] }
 0x470   :  { %16557 = vmatmul.mubr.msk.f32.vlgmr.msra.gmra.mrb[8].mxu1 %vm2387_vm5, %v19746_v53 }
 0x471   :  { %16563 = vmatpush3.msk.msra.mxu1 %vm2396_vm4, %v21787_v48  ;;  %16559 = vmatprep.mubr.msk.f32.mxu1 %vm2387_vm5, %v21729_v33 }
 0x474   :  { %16560 = vmatmul.mubr.msk.f32.gmra.mrb[10].mxu1 %vm2387_vm5, %v21789_v19  ;;  %v16749_v19 = vpack.c.bf16 %v12610_v52, %v12609_v4  ;;  %v14812_v4 = vld [vmem:[%s21307_s5 + $0xe8] sm:$0xf] }
 0x475   :  { %16564 = vmatprep.mubr.msk.f32.mxu1 %vm2387_vm5, %v19658_v25 }
 0x478   :  { %16565 = vmatmul.mubr.msk.f32.vlgmr.msra.gmra.mrb[8].mxu1 %vm2387_vm5, %v19679_v29  ;;  %v5627_v29 = vmax.f32 %v5623_v43, 0.0  ;;  %v14764_v43 = vld [vmem:[%s21307_s5 + $0x28] sm:$0xf] }
 0x479   :  { %16567 = vmatprep.mubr.msk.f32.mxu1 %vm2387_vm5, %v21771_v22 }
 0x47c   :  { %16568 = vmatmul.mubr.msk.f32.gmra.mrb[10].mxu1 %vm2387_vm5, %v21790_v15 }
 0x483   :  { %v16166_v41 = vpop.f32.mrb[4].mxu1 }
 0x484   :  { %v7970_v31 = vadd.f32 %v16166_v41, %v14381_v12  ;;  %v7946_v45 = vpop.f32.mrb[5].mxu1  ;;  %v16753_v41 = vpack.c.bf16 %v14764_v43, %v14763_v23  ;;  %v13882_v23 = vld [vmem:[%s21309_s7 + $0x8] sm:$0xff] }
 0x485   :  { %v7969_v25 = vadd.f32 %v14381_v12, %v7946_v45  ;;  %v14767_v45 = vld [vmem:[%s21307_s5 + $0x30] sm:$0xff] }
 0x486   :  { %v7974_v54 = vmax.f32 %v7970_v31, 0.0 }
 0x487   :  { %v7973_v8 = vmax.f32 %v7969_v25, 0.0  ;;  %v16169_v53 = vpop.f32.mrb[6].mxu1  ;;  %v14768_v25 = vld [vmem:[%s21307_s5 + $0x38] sm:$0xf] }
 0x488   :  { %v12526_v6 = vmax.f32 %v5628_v26, %v7974_v54  ;;  %v7972_v17 = vadd.f32 %v16169_v53, %v14381_v12  ;;  %v7956_v32 = vpop.f32.mrb[7].mxu1  ;;  %v16757_v26 = vpack.c.bf16 %v14768_v25, %v14767_v45  ;;  %v14771_v54 = vld [vmem:[%s21307_s5 + $0x40] sm:$0xff]  ;;  %v14775_v53 = vld [vmem:[%s21307_s5 + $0x50] sm:$0xff] }
 0x489   :  { %v12525_v20 = vmax.f32 %v5627_v29, %v7973_v8  ;;  %v7971_v14 = vadd.f32 %v14381_v12, %v7956_v32  ;;  %v14772_v29 = vld [vmem:[%s21307_s5 + $0x48] sm:$0xf]  ;;  %v13885_v25 = vld [vmem:[%s21309_s7 + $0x20] sm:$0xff] }
 0x48a   :  { %v7976_v33 = vmax.f32 %v7972_v17, 0.0  ;;  %v16761_v30 = vpack.c.bf16 %v14772_v29, %v14771_v54  ;;  %v13887_v54 = vld [vmem:[%s21309_s7 + $0x30] sm:$0xff]  ;;  %v13888_v29 = vld [vmem:[%s21309_s7 + $0x38] sm:$0xff] }
 0x48b   :  { %v7975_v44 = vmax.f32 %v7971_v14, 0.0  ;;  %v14780_v14 = vld [vmem:[%s21307_s5 + $0x68] sm:$0xf] }
 0x48c   :  { %v12528_v35 = vmax.f32 %v5630_v51, %v7976_v33 }
 0x48d   :  { %v12527_v40 = vmax.f32 %v5629_v24, %v7975_v44  ;;  %v14783_v44 = vld [vmem:[%s21307_s5 + $0x70] sm:$0xff] }
 0x54b   :  { %v16566_v46 = vpop.f32.mrb[8].mxu1 }
 0x54c   :  { %v12518_v39 = vadd.f32 %v16566_v46, %v14381_v12  ;;  %v12494_v59 = vpop.f32.mrb[9].mxu1  ;;  %v14791_v46 = vld [vmem:[%s21307_s5 + $0x90] sm:$0xff] }
 0x54d   :  { %v12517_v60 = vadd.f32 %v14381_v12, %v12494_v59 }
 0x54e   :  { %v12522_v49 = vmax.f32 %v12518_v39, 0.0  ;;  %v14792_v39 = vld [vmem:[%s21307_s5 + $0x98] sm:$0xf] }
 0x54f   :  { %v12521_v22 = vmax.f32 %v12517_v60, 0.0  ;;  %v16569_v18 = vpop.f32.mrb[10].mxu1  ;;  %v16781_v59 = vpack.c.bf16 %v14792_v39, %v14791_v46 }
 0x550   :  { %v12530_v27 = vmax.f32 %v10286_v58, %v12522_v49  ;;  %v12520_v34 = vadd.f32 %v16569_v18, %v14381_v12  ;;  %v12504_v55 = vpop.f32.mrb[11].mxu1  ;;  %v14795_v58 = vld [vmem:[%s21307_s5 + $0xa0] sm:$0xff]  ;;  %v14800_v18 = vld [vmem:[%s21307_s5 + $0xb8] sm:$0xf] }
 0x551   :  { %v12529_v3 = vmax.f32 %v10285_v57, %v12521_v22  ;;  %v12519_v61 = vadd.f32 %v14381_v12, %v12504_v55  ;;  %v16785_v49 = vpack.c.bf16 %v14796_v28, %v14795_v58  ;;  %v14799_v22 = vld [vmem:[%s21307_s5 + $0xb0] sm:$0xff]  ;;  %v14803_v55 = vld [vmem:[%s21307_s5 + $0xc0] sm:$0xff] }
 0x552   :  { %v20991_v36 = vmax.f32 %v12526_v6, %v12530_v27  ;;  %v12524_v1 = vmax.f32 %v12520_v34, 0.0  ;;  %v14776_v6 = vld [vmem:[%s21307_s5 + $0x58] sm:$0xf]  ;;  %v16789_v27 = vpack.c.bf16 %v14800_v18, %v14799_v22 }
 0x553   :  { %v12533_v13 = vmax.f32 %v12525_v20, %v12529_v3  ;;  %v12523_v16 = vmax.f32 %v12519_v61, 0.0  ;;  %v16765_v17 = vpack.c.bf16 %v14776_v6, %v14775_v53  ;;  %v14779_v20 = vld [vmem:[%s21307_s5 + $0x60] sm:$0xff]  ;;  %v14804_v3 = vld [vmem:[%s21307_s5 + $0xc8] sm:$0xf] }
 0x554   :  { %v12532_v42 = vmax.f32 %v10288_v0, %v12524_v1  ;;  %v12565_v32 = vrot.slane %v20991_v36, %v21793_v2  ;;  %v16769_v51 = vpack.c.bf16 %v14780_v14, %v14779_v20  ;;  %v12558_v33 = vcombine.high %v20991_v36, %v20991_v36  ;;  %v14807_v36 = vld [vmem:[%s21307_s5 + $0xd0] sm:$0xff]  ;;  %v14808_v1 = vld [vmem:[%s21307_s5 + $0xd8] sm:$0xf]  ;;  %v13890_v53 = vld [vmem:[%s21309_s7 + $0x48] sm:$0xff] }
 0x555   :  { %v12548_v11 = vrot.slane %v12533_v13, %v21793_v2  ;;  %v12531_v48 = vmax.f32 %v10287_v7, %v12523_v16  ;;  %v12541_v31 = vcombine.high %v12533_v13, %v12533_v13  ;;  %v16793_v61 = vpack.c.bf16 %v14804_v3, %v14803_v55  ;;  %v14811_v16 = vld [vmem:[%s21307_s5 + $0xe0] sm:$0xff] }
 0x556   :  { %v21000_v9 = vmax.f32 %v12528_v35, %v12532_v42  ;;  %v12573_v24 = vcombine.high %v12565_v32, %v12565_v32  ;;  %v14784_v35 = vld [vmem:[%s21307_s5 + $0x78] sm:$0xf]  ;;  %v12572_v21 = vrot.slane %v12558_v33, %v21793_v2  ;;  %v16797_v7 = vpack.c.bf16 %v14808_v1, %v14807_v36  ;;  %v13893_v14 = vld [vmem:[%s21309_s7 + $0x60] sm:$0xff] }
 0x557   :  { %v12556_v15 = vcombine.high %v12548_v11, %v12548_v11  ;;  %v21002_v12 = vmax.f32 %v12527_v40, %v12531_v48  ;;  %v12555_v47 = vrot.slane %v12541_v31, %v21793_v2  ;;  %v16773_v40 = vpack.c.bf16 %v14784_v35, %v14783_v44  ;;  %v14815_v48 = vld [vmem:[%s21307_s5 + $0xf0] sm:$0xff]  ;;  %v13884_v31 = vld [vmem:[%s21309_s7 + $0x18] sm:$0xff] }
 0x558   :  { %v12574_v37 = vcombine.high %v12572_v21, %v12572_v21  ;;  %v12599_v13 = vrot.slane %v21000_v9, %v21793_v2  ;;  %v16801_v52 = vpack.c.bf16 %v14812_v4, %v14811_v16  ;;  %v12592_v42 = vcombine.high %v21000_v9, %v21000_v9 }
 0x559   :  { %16575 = vmatmul.mubr.msk.f32.vlgmr.msra.gmra.mrb[148].mxu0 %vm12614_vm9, %v12556_v15  ;;  %v12557_v8 = vcombine.high %v12555_v47, %v12555_v47  ;;  %v12582_v60 = vrot.slane %v21002_v12, %v21793_v2  ;;  %v12575_v57 = vcombine.high %v21002_v12, %v21002_v12 }
 0x55a   :  { %16751 = vmatpush3.bf16.msk.msra.mxu0 %vm20971_vm7, %v16749_v19  ;;  %16581 = vmatprep.mubr.msk.f32.mxu0 %vm17271_vm8, %v17272_v38  ;;  %v14816_v19 = vld [vmem:[%s21307_s5 + $0xf8] sm:$0xf]  ;;  %v12606_v15 = vrot.slane %v12592_v42, %v21793_v2  ;;  %s17273_s5 = smov [#allocation2]  }
 0x55b   :  { %16752 = vmatprep.subr.bf16.mxu0 %v17270_v63  ;;  %v12590_v10 = vcombine.high %v12582_v60, %v12582_v60  ;;  %v12589_v34 = vrot.slane %v12575_v57, %v21793_v2  ;;  %v16805_v9 = vpack.c.bf16 %v14816_v19, %v14815_v48  ;;  %v13881_v2 = vld [vmem:[%s21309_s7] sm:$0xff] }
 0x55c   :  { %v12608_v12 = vcombine.high %v12606_v15, %v12606_v15  ;;  %v16809_v43 = vpack.c.bf16 %v13882_v23, %v13881_v2 }
 0x55d   :  { %16582 = vmatmul.mubr.msk.f32.vlgmr.msra.gmra.mrb[150].mxu0 %vm12614_vm9, %v12548_v11  ;;  %v12591_v0 = vcombine.high %v12589_v34, %v12589_v34  ;;  %v12607_v11 = vcombine.high %v12599_v13, %v12599_v13 }
 0x55e   :  { %16755 = vmatpush3.bf16.msk.msra.mxu0 %vm20971_vm7, %v16753_v41  ;;  %16588 = vmatprep.mubr.msk.f32.mxu0 %vm17271_vm8, %v17272_v38  ;;  %v13883_v41 = vld [vmem:[%s21309_s7 + $0x10] sm:$0xff] }
 0x55f   :  { %16756 = vmatprep.subr.bf16.mxu0 %v17270_v63  ;;  %v16812_v45 = vpack.c.bf16 %v13884_v31, %v13883_v41 }
 0x561   :  { %16589 = vmatmul.mubr.msk.f32.vlgmr.msra.gmra.mrb[152].mxu0 %vm12614_vm9, %v12555_v47 }
 0x562   :  { %16759 = vmatpush3.bf16.msk.msra.mxu0 %vm20971_vm7, %v16757_v26  ;;  %16595 = vmatprep.mubr.msk.f32.mxu0 %vm17271_vm8, %v17272_v38  ;;  %v13886_v26 = vld [vmem:[%s21309_s7 + $0x28] sm:$0xff] }
 0x563   :  { %16760 = vmatprep.subr.bf16.mxu0 %v17270_v63  ;;  %v16815_v47 = vpack.c.bf16 %v13886_v26, %v13885_v25  ;;  %v14819_v25 = vld [vmem:[%s21308_s6] ss:$0 sm:$0xff] }
 0x565   :  { %16596 = vmatmul.mubr.msk.f32.vlgmr.msra.gmra.mrb[154].mxu0 %vm12614_vm9, %v12557_v8  ;;  %v13889_v8 = vld [vmem:[%s21309_s7 + $0x40] sm:$0xff] }
 0x566   :  { %16763 = vmatpush3.bf16.msk.msra.mxu0 %vm20971_vm7, %v16761_v30  ;;  %16602 = vmatprep.mubr.msk.f32.mxu0 %vm17271_vm8, %v17272_v38  ;;  %v16818_v30 = vpack.c.bf16 %v13888_v29, %v13887_v54  ;;  %v16821_v6 = vpack.c.bf16 %v13890_v53, %v13889_v8  ;;  %v13978_v54 = vld [vmem:[%s21311_s9] sm:$0xff]  ;;  %v13979_v29 = vld [vmem:[%s21311_s9 + $0x8] sm:$0xff] }
 0x567   :  { %16764 = vmatprep.subr.bf16.mxu0 %v17270_v63  ;;  %v16830_v8 = vpack.c.bf16 %v13979_v29, %v13978_v54 }
 0x569   :  { %16603 = vmatmul.mubr.msk.f32.vlgmr.msra.gmra.mrb[156].mxu0 %vm12614_vm9, %v12565_v32  ;;  %v13892_v32 = vld [vmem:[%s21309_s7 + $0x58] sm:$0xff] }
 0x56a   :  { %16767 = vmatpush3.bf16.msk.msra.mxu0 %vm20971_vm7, %v16765_v17  ;;  %16609 = vmatprep.mubr.msk.f32.mxu0 %vm17271_vm8, %v17272_v38  ;;  %v13891_v17 = vld [vmem:[%s21309_s7 + $0x50] sm:$0xff] }
 0x56b   :  { %16768 = vmatprep.subr.bf16.mxu0 %v17270_v63  ;;  %v16824_v20 = vpack.c.bf16 %v13892_v32, %v13891_v17  ;;  %v13981_v17 = vld [vmem:[%s21311_s9 + $0x18] sm:$0xff] }
 0x56d   :  { %16610 = vmatmul.mubr.msk.f32.vlgmr.msra.gmra.mrb[158].mxu0 %vm12614_vm9, %v12573_v24  ;;  %v13895_v24 = vld [vmem:[%s21309_s7 + $0x70] sm:$0xff] }
 0x56e   :  { %16771 = vmatpush3.bf16.msk.msra.mxu0 %vm20971_vm7, %v16769_v51  ;;  %16616 = vmatprep.mubr.msk.f32.mxu0 %vm17271_vm8, %v17272_v38  ;;  %v13894_v51 = vld [vmem:[%s21309_s7 + $0x68] sm:$0xff] }
 0x56f   :  { %16772 = vmatprep.subr.bf16.mxu0 %v17270_v63  ;;  %v16827_v33 = vpack.c.bf16 %v13894_v51, %v13893_v14  ;;  %v13983_v14 = vld [vmem:[%s21311_s9 + $0x28] sm:$0xff] }
 0x571   :  { %16617 = vmatmul.mubr.msk.f32.vlgmr.msra.gmra.mrb[160].mxu0 %vm12614_vm9, %v12572_v21 }
 0x572   :  { %16775 = vmatpush3.bf16.msk.msra.mxu0 %vm20971_vm7, %v16773_v40  ;;  %16623 = vmatprep.mubr.msk.f32.mxu0 %vm17271_vm8, %v17272_v38 }
 0x573   :  { %16776 = vmatprep.subr.bf16.mxu0 %v17270_v63 }
 0x575   :  { %16624 = vmatmul.mubr.msk.f32.vlgmr.msra.gmra.mrb[162].mxu0 %vm12614_vm9, %v12574_v37 }
 0x576   :  { %16779 = vmatpush3.bf16.msk.msra.mxu0 %vm20971_vm7, %v16777_v5  ;;  %16630 = vmatprep.mubr.msk.f32.mxu0 %vm17271_vm8, %v17272_v38 }
 0x577   :  { %16780 = vmatprep.subr.bf16.mxu0 %v17270_v63 }
 0x579   :  { %16631 = vmatmul.mubr.msk.f32.vlgmr.msra.gmra.mrb[164].mxu0 %vm12614_vm9, %v12582_v60 }
 0x57a   :  { %16783 = vmatpush3.bf16.msk.msra.mxu0 %vm20971_vm7, %v16781_v59  ;;  %16637 = vmatprep.mubr.msk.f32.mxu0 %vm17271_vm8, %v17272_v38 }
 0x57b   :  { %16784 = vmatprep.subr.bf16.mxu0 %v17270_v63 }
 0x57d   :  { %16638 = vmatmul.mubr.msk.f32.vlgmr.msra.gmra.mrb[166].mxu0 %vm12614_vm9, %v12590_v10 }
 0x57e   :  { %16787 = vmatpush3.bf16.msk.msra.mxu0 %vm20971_vm7, %v16785_v49  ;;  %16644 = vmatprep.mubr.msk.f32.mxu0 %vm17271_vm8, %v17272_v38 }
 0x57f   :  { %16788 = vmatprep.subr.bf16.mxu0 %v17270_v63 }
 0x581   :  { %16645 = vmatmul.mubr.msk.f32.vlgmr.msra.gmra.mrb[168].mxu0 %vm12614_vm9, %v12589_v34 }
 0x582   :  { %16791 = vmatpush3.bf16.msk.msra.mxu0 %vm20971_vm7, %v16789_v27  ;;  %16651 = vmatprep.mubr.msk.f32.mxu0 %vm17271_vm8, %v17272_v38 }
 0x583   :  { %16792 = vmatprep.subr.bf16.mxu0 %v17270_v63 }
 0x585   :  { %16652 = vmatmul.mubr.msk.f32.vlgmr.msra.gmra.mrb[170].mxu0 %vm12614_vm9, %v12591_v0 }
 0x586   :  { %16795 = vmatpush3.bf16.msk.msra.mxu0 %vm20971_vm7, %v16793_v61  ;;  %16658 = vmatprep.mubr.msk.f32.mxu0 %vm17271_vm8, %v17272_v38 }
 0x587   :  { %16796 = vmatprep.subr.bf16.mxu0 %v17270_v63 }
 0x589   :  { %16659 = vmatmul.mubr.msk.f32.vlgmr.msra.gmra.mrb[172].mxu0 %vm12614_vm9, %v12599_v13 }
 0x58a   :  { %16799 = vmatpush3.bf16.msk.msra.mxu0 %vm20971_vm7, %v16797_v7  ;;  %16665 = vmatprep.mubr.msk.f32.mxu0 %vm17271_vm8, %v17272_v38 }
 0x58b   :  { %16800 = vmatprep.subr.bf16.mxu0 %v17270_v63 }
 0x58d   :  { %16666 = vmatmul.mubr.msk.f32.vlgmr.msra.gmra.mrb[174].mxu0 %vm12614_vm9, %v12607_v11 }
 0x58e   :  { %16803 = vmatpush3.bf16.msk.msra.mxu0 %vm20971_vm7, %v16801_v52  ;;  %16672 = vmatprep.mubr.msk.f32.mxu0 %vm17271_vm8, %v17272_v38 }
 0x58f   :  { %16804 = vmatprep.subr.bf16.mxu0 %v17270_v63 }
 0x591   :  { %16673 = vmatmul.mubr.msk.f32.vlgmr.msra.gmra.mrb[176].mxu0 %vm12614_vm9, %v12606_v15 }
 0x592   :  { %16807 = vmatpush3.bf16.msk.msra.mxu0 %vm20971_vm7, %v16805_v9  ;;  %16679 = vmatprep.mubr.msk.f32.mxu0 %vm17271_vm8, %v17272_v38 }
 0x593   :  { %16808 = vmatprep.subr.bf16.mxu0 %v17270_v63 }
 0x595   :  { %16680 = vmatmul.mubr.msk.f32.vlgmr.msra.gmra.mrb[178].mxu0 %vm12614_vm9, %v12608_v12 }
 0x596   :  { %16712 = vmatprep.mubr.msk.f32.mxu0 %vm17271_vm8, %v17272_v38  ;;  %16810 = vmatpush3.bf16.msra.mxu0 %v16809_v43 }
 0x597   :  { %16811 = vmatprep.subr.bf16.mxu0 %v17270_v63 }
 0x59a   :  { %16813 = vmatpush3.bf16.msra.mxu0 %v16812_v45 }
 0x59b   :  { %16814 = vmatprep.subr.bf16.mxu0 %v17270_v63 }
 0x59e   :  { %16816 = vmatpush3.bf16.msra.mxu0 %v16815_v47 }
 0x59f   :  { %16817 = vmatprep.subr.bf16.mxu0 %v17270_v63 }
 0x5a2   :  { %16819 = vmatpush3.bf16.msra.mxu0 %v16818_v30 }
 0x5a3   :  { %16820 = vmatprep.subr.bf16.mxu0 %v17270_v63 }
 0x5a6   :  { %16822 = vmatpush3.bf16.msra.mxu0 %v16821_v6  ;;  %v13980_v6 = vld [vmem:[%s21311_s9 + $0x10] sm:$0xff] }
 0x5a7   :  { %16823 = vmatprep.subr.bf16.mxu0 %v17270_v63  ;;  %v16833_v32 = vpack.c.bf16 %v13981_v17, %v13980_v6 }
 0x5aa   :  { %16825 = vmatpush3.bf16.msra.mxu0 %v16824_v20  ;;  %v13982_v20 = vld [vmem:[%s21311_s9 + $0x20] sm:$0xff] }
 0x5ab   :  { %16826 = vmatprep.subr.bf16.mxu0 %v17270_v63  ;;  %v16836_v51 = vpack.c.bf16 %v13983_v14, %v13982_v20 }
 0x5ae   :  { %16828 = vmatpush3.bf16.msra.mxu0 %v16827_v33  ;;  %v13985_v33 = vld [vmem:[%s21311_s9 + $0x38] sm:$0xf] }
 0x5af   :  { %16710 = vmatprep.subr.mxu0 %v17272_v38 }
 0x5b2   :  { %16711 = vmatpush3.msra.mxu0 %v13895_v24 }
 0x5b3   :  { %16829 = vmatprep.subr.bf16.mxu0 %v17270_v63 }
 0x62c   :  { %v12687_v44 = vpop.f32.mrb[148].mxu0 }
 0x62d   :  { %v16576_v35 = vpop.f32.mrb[149].mxu0 }
 0x630   :  { %v12762_v40 = vpop.f32.mrb[150].mxu0 }
 0x631   :  { %v12763_v21 = vadd.f32 %v12762_v40, %v12687_v44  ;;  %v16583_v50 = vpop.f32.mrb[151].mxu0  ;;  %v14820_v44 = vld [vmem:[%s21310_s8] ss:$0 sm:$0xff] }
 0x632   :  { %v14822_v50 = vld [vmem:[%s21312_s10] ss:$0 sm:$0xff] }
 0x634   :  { %v12840_v62 = vpop.f32.mrb[152].mxu0 }
 0x635   :  { %v12844_v5 = vadd.f32 %v12840_v62, %v12763_v21  ;;  %v16590_v37 = vpop.f32.mrb[153].mxu0 }
 0x638   :  { %v12919_v46 = vpop.f32.mrb[154].mxu0 }
 0x639   :  { %v12923_v39 = vadd.f32 %v12919_v46, %v12844_v5  ;;  %v16597_v59 = vpop.f32.mrb[155].mxu0 }
 0x63c   :  { %v12998_v60 = vpop.f32.mrb[156].mxu0 }
 0x63d   :  { %v13002_v58 = vadd.f32 %v12998_v60, %v12923_v39  ;;  %v16604_v28 = vpop.f32.mrb[157].mxu0 }
 0x640   :  { %v13077_v49 = vpop.f32.mrb[158].mxu0 }
 0x641   :  { %v13081_v57 = vadd.f32 %v13077_v49, %v13002_v58  ;;  %v16611_v10 = vpop.f32.mrb[159].mxu0 }
 0x644   :  { %v13156_v22 = vpop.f32.mrb[160].mxu0 }
 0x645   :  { %v13160_v18 = vadd.f32 %v13156_v22, %v13081_v57  ;;  %v16618_v27 = vpop.f32.mrb[161].mxu0 }
 0x648   :  { %v13235_v34 = vpop.f32.mrb[162].mxu0 }
 0x649   :  { %v13239_v55 = vadd.f32 %v13235_v34, %v13160_v18  ;;  %v16625_v3 = vpop.f32.mrb[163].mxu0 }
 0x64c   :  { %v13314_v61 = vpop.f32.mrb[164].mxu0 }
 0x64d   :  { %v13318_v0 = vadd.f32 %v13314_v61, %v13239_v55  ;;  %v16632_v36 = vpop.f32.mrb[165].mxu0 }
 0x650   :  { %v13393_v1 = vpop.f32.mrb[166].mxu0 }
 0x651   :  { %v13397_v7 = vadd.f32 %v13393_v1, %v13318_v0  ;;  %v16639_v13 = vpop.f32.mrb[167].mxu0 }
 0x654   :  { %v13472_v16 = vpop.f32.mrb[168].mxu0 }
 0x655   :  { %v13476_v4 = vadd.f32 %v13472_v16, %v13397_v7  ;;  %v16646_v52 = vpop.f32.mrb[169].mxu0 }
 0x658   :  { %v13551_v42 = vpop.f32.mrb[170].mxu0 }
 0x659   :  { %v13555_v11 = vadd.f32 %v13551_v42, %v13476_v4  ;;  %v16653_v48 = vpop.f32.mrb[171].mxu0 }
 0x65c   :  { %v13630_v19 = vpop.f32.mrb[172].mxu0 }
 0x65d   :  { %v13634_v9 = vadd.f32 %v13630_v19, %v13555_v11  ;;  %v16660_v15 = vpop.f32.mrb[173].mxu0 }
 0x660   :  { %v13709_v12 = vpop.f32.mrb[174].mxu0 }
 0x661   :  { %v13713_v2 = vadd.f32 %v13709_v12, %v13634_v9  ;;  %v16667_v23 = vpop.f32.mrb[175].mxu0 }
 0x664   :  { %v13788_v43 = vpop.f32.mrb[176].mxu0 }
 0x665   :  { %v13792_v41 = vadd.f32 %v13788_v43, %v13713_v2  ;;  %v16674_v31 = vpop.f32.mrb[177].mxu0 }
 0x668   :  { %v13867_v45 = vpop.f32.mrb[178].mxu0 }
 0x669   :  { %v13871_v26 = vadd.f32 %v13867_v45, %v13792_v41  ;;  %v16681_v47 = vpop.f32.mrb[179].mxu0 }
 0x66b   :  { %v13879_v30 = vadd.f32 %v14819_v25, %v13871_v26 }
 0x66d   :  { %v13880_v53 = vmax.f32 %v13879_v30, 0.0 }
 0x66f   :  { %16713 = vmatmul.mubr.msk.f32.vlgmr.msra.gmra.mrb[180].mxu0 %vm13903_vm10, %v13880_v53 }
 0x670   :  { %16831 = vmatpush3.bf16.msra.mxu0 %v16830_v8  ;;  %16731 = vmatprep.mubr.msk.f32.mxu0 %vm17271_vm8, %v17272_v38  ;;  %v13984_v38 = vld [vmem:[%s21311_s9 + $0x30] sm:$0xff]  ;;  %s14078_s9 = sshll.u32 %s17273_s5, 4  ;;  %s14079_s9 = int_to_ptr.vmem [resolvable:$true] %s14078_s9 }
 0x671   :  { %16832 = vmatprep.subr.bf16.mxu0 %v17270_v63  ;;  %v16839_v24 = vpack.c.bf16 %v13985_v33, %v13984_v38  ;;  %s17244_s16 = scalar_lea.vmem %s14079_s9, 32  ;;  %p17249_p1 = scmp.lt.s32.totalorder %s14079_s9, %s14079_s9 }
 0x672   :  { %p17245_p0 = scmp.ne.s32.totalorder %s14079_s9, %s17244_s16  ;;  %p17250_p2 = scmp.lt.s32.totalorder %s17244_s16, %s17244_s16 }
 0x674   :  { %16834 = vmatpush3.bf16.msra.mxu0 %v16833_v32  ;;  %p17251_p3 = por %p17250_p2, %p17249_p1 }
 0x675   :  { %16835 = vmatprep.subr.bf16.mxu0 %v17270_v63 }
 0x676   :  { %p17252_p4 = pnand %p17251_p3, %p17245_p0 }
 0x678   :  { %16837 = vmatpush3.bf16.msra.mxu0 %v16836_v51 }
 0x679   :  { %16838 = vmatprep.subr.bf16.mxu0 %v17270_v63 }
 0x67c   :  { %16841 = vmatpush3.bf16.msk.msra.mxu0 %vm20971_vm7, %v16839_v24 }
 0x742   :  { %v13973_v35 = vpop.f32.mrb[180].mxu0 }
 0x743   :  { %v13974_v40 = vadd.f32 %v14820_v44, %v13973_v35  ;;  %v16714_v21 = vpop.f32.mrb[181].mxu0 }
 0x745   :  { %v13977_v63 = vmax.f32 %v13974_v40, 0.0 }
 0x747   :  { %16732 = vmatmul.mubr.msk.f32.vlgmr.msra.gmra.mrb[182].mxu0 %vm13993_vm11, %v13977_v63 }
 0x81a   :  { %v14066_v62 = vpop.f32.mrb[182].mxu0 }
 0x81b   :  { %v14067_v56 = vadd.f32 %v14822_v50, %v14066_v62  ;;  %v16733_v5 = vpop.f32.mrb[183].mxu0 }
 0x81d   :  { %14071 = vst.msk [vmem:[#allocation2] sm:$0x3] %vm14070_vm12, %v14067_v56 }
 0x81e   :  { %17255 = shalt.err (!%p17252_p4)
}
 0x81f   :  { %s17256_s18 = scalar_lea.hbm %s21313_s11, 32 }
 0x820   :  { %p17257_p5 = scmp.ne.s32.totalorder %s21313_s11, %s17256_s18  ;;  %p17260_p6 = scmp.lt.u32.totalorder %s17256_s18, %s21313_s11 }
 0x822   :  { %p17262_p7 = pnand %p17260_p6, %p17257_p5 }
 0x824   :  { %17265 = shalt.err (!%p17262_p7)
}
 0x825   :  { %14081 = dma.vmem_to_hbm [thread:$0]  %s14079_s9, 32, %s21313_s11, [#allocation3]  }
 0x826   :  { %17266 = dma.done.wait [#allocation3], 32  }
 0x827   :  { %17267 = vsyncadd [#allocation3], 4294967264 }
 0x828   :  { %14085 = vsyncpa [#allocation3], 1 }

</bundles_post_ra>
